<compile_context>
chip_gen: v7x
topology: tpu7x:2x2x1
jax: 0.10.0
libtpu: 0.0.40
codegen_flags: <defaults>
</compile_context>

<pallas_src>
import functools
import math

import jax
import jax.numpy as jnp
from jax.experimental import pallas as pl
from jax.experimental.pallas import tpu as pltpu

HIDDEN = 160                           # hidden_size / n_embd
N_HEAD = 2
HEAD_DIM = HIDDEN // N_HEAD            # 80
HEAD_PAD = 128                         # per-head lanes padded to 128 (aligned slices)
LEG_SIZE = 27
PATCH_SIZE = 64
PATCH_NUM = 12
N_LEG_TOKENS = 6
N_TOKENS = N_LEG_TOKENS + PATCH_NUM    # 18
NUM_ACTIONS = 18                       # means[:, :6] -> (B,6,3) -> (B,18)
OBS_DIM = 66 + PATCH_NUM * PATCH_SIZE  # 834
TOKEN_IN = LEG_SIZE + PATCH_SIZE + 2   # 93 = [leg feat | patch | is_leg | is_patch]
TOKEN_IN_PAD = 128                     # lane-dense token rows
OUT_LANES = 128                        # lane-dense output block
LN_EPS = 1e-5
INIT_NOISE_STD = 1.0
NEG_INF = -1e30
BF16 = jnp.bfloat16


# ---------------------------------------------------------------------------
# math helpers
# ---------------------------------------------------------------------------
def _gelu(x):
    # exact (erf) GELU — matches torch.nn.GELU() default (kept in f32)
    return 0.5 * x * (1.0 + jax.lax.erf(x * (1.0 / math.sqrt(2.0))))


def _batch_index(shape, dim, b_tile):
    """iota along `dim`, reduced mod b_tile (rows are token-major: row = t*b_tile+b)."""
    idx = jax.lax.broadcasted_iota(jnp.int32, shape, dim)
    if (b_tile & (b_tile - 1)) == 0:
        return idx & (b_tile - 1)
    return idx % b_tile


# ---------------------------------------------------------------------------
# Pallas kernel (operates on B_TILE batch elements stacked along sublanes,
# token-major ordering: row = t * B_TILE + b_local)
# ---------------------------------------------------------------------------
def _fused_encode_block(x, w_qkv, b_qkv, w_proj, b_proj, w_mlp, b_mlp, b_tile):
    """EncodeBlock on stacked rows; attention is block-diagonal via an iota mask."""
    M = x.shape[0]
    scale = 1.0 / math.sqrt(HEAD_DIM)

    qkv = jnp.dot(x.astype(BF16), w_qkv,
                  preferred_element_type=jnp.float32) + b_qkv              # (M, 768) f32
    same = _batch_index((M, M), 0, b_tile) == _batch_index((M, M), 1, b_tile)

    ys = []
    for h in range(N_HEAD):                       # static loop; 128-aligned slices
        q = qkv[:, h * HEAD_PAD:(h + 1) * HEAD_PAD].astype(BF16)
        k = qkv[:, (N_HEAD + h) * HEAD_PAD:(N_HEAD + h + 1) * HEAD_PAD].astype(BF16)
        v = qkv[:, (2 * N_HEAD + h) * HEAD_PAD:(2 * N_HEAD + h + 1) * HEAD_PAD].astype(BF16)
        att = jax.lax.dot_general(q, k, (((1,), (1,)), ((), ())),
                                  preferred_element_type=jnp.float32) * scale
        att = jnp.where(same, att, NEG_INF)       # off the batch block-diagonal
        att = jnp.exp(att - jnp.max(att, axis=-1, keepdims=True))
        inv = pl.reciprocal(jnp.sum(att, axis=-1, keepdims=True), approx=True)
        att = att * inv
        ys.append(jnp.dot(att.astype(BF16), v,
                          preferred_element_type=jnp.float32))             # (M, 128)
    y = jnp.concatenate(ys, axis=-1).astype(BF16)                          # (M, 256)
    x = x + jnp.dot(y, w_proj, preferred_element_type=jnp.float32) + b_proj
    x = x + _gelu(jnp.dot(x.astype(BF16), w_mlp,
                          preferred_element_type=jnp.float32) + b_mlp)
    return x


def _actor_critic_kernel(tok_ref, w_emb_ref,
                         w_qkv1_ref, b_qkv1_ref, w_proj1_ref, w_mlp1_ref,
                         w_qkv2_ref, b_qkv2_ref, w_proj2_ref, w_mlp2_ref,
                         w_h1_ref, w_h2_ref, w_out_ref, small_ref,
                         out_ref):
    b_tile = out_ref.shape[0] // (N_LEG_TOKENS + 1)
    M = tok_ref.shape[0]                          # N_TOKENS * b_tile

    small = small_ref[...]                        # (16, 160) packed small params (f32)
    ln_g, ln_b = small[0:1, :], small[1:2, :]
    b_proj1, b_mlp1 = small[2:3, :], small[3:4, :]
    b_proj2, b_mlp2 = small[4:5, :], small[5:6, :]
    b_h1 = small[6:7, :]
    b_out = small[7:8, 0:OUT_LANES]               # (1, 128) [b_out | zeros]
    b_h2 = small[8:9, 0:OUT_LANES]                # (1, 128) [b_h2  | zeros]

    # token embeddings: leg/patch weights AND biases folded into one bf16 matmul
    x = jnp.dot(tok_ref[...], w_emb_ref[...],
                preferred_element_type=jnp.float32)                        # (M, 160) f32

    # obs_encoder = LayerNorm(160) + GELU  (f32, rsqrt on the (M,1) column)
    mu = jnp.mean(x, axis=-1, keepdims=True)
    var = jnp.mean(jnp.square(x - mu), axis=-1, keepdims=True)
    x = (x - mu) * jax.lax.rsqrt(var + LN_EPS) * ln_g + ln_b
    x = _gelu(x)

    # blocks1
    x = _fused_encode_block(x, w_qkv1_ref[...], b_qkv1_ref[...], w_proj1_ref[...],
                            b_proj1, w_mlp1_ref[...], b_mlp1, b_tile)

    # head -> per-token value, reduced in-kernel (mean over 18 tokens, by linearity):
    #   value[b] = (mean_t h[t,b]) @ wh2 + bh2
    h = _gelu(jnp.dot(x.astype(BF16), w_h1_ref[...],
                      preferred_element_type=jnp.float32) + b_h1)          # (M, 160) f32
    pool_mask = (_batch_index((b_tile, M), 0, b_tile)
                 == _batch_index((b_tile, M), 1, b_tile))
    pool = jnp.where(pool_mask, 1.0, 0.0).astype(BF16)                     # (b_tile, M)
    pooled = jnp.dot(pool, h.astype(BF16),
                     preferred_element_type=jnp.float32) * (1.0 / N_TOKENS)
    value_blk = jnp.dot(pooled.astype(BF16), w_h2_ref[...],
                        preferred_element_type=jnp.float32) + b_h2         # (b_tile,128)

    # blocks2
    x = _fused_encode_block(x, w_qkv2_ref[...], b_qkv2_ref[...], w_proj2_ref[...],
                            b_proj2, w_mlp2_ref[...], b_mlp2, b_tile)

    # action means: ONE matmul on the contiguous leg-token slab, then a single
    # lane-dense store of [means(48,128) ; value(b_tile,128)].  Pad lanes are zero.
    means = jnp.dot(x[:N_LEG_TOKENS * b_tile, :].astype(BF16), w_out_ref[...],
                    preferred_element_type=jnp.float32) + b_out            # (48, 128)
    out_ref[...] = jnp.concatenate([means, value_blk], axis=0)             # (56, 128)


# ---------------------------------------------------------------------------
# host-side glue: token-input construction + pallas_call wrapper
# ---------------------------------------------------------------------------
def _build_token_inputs(obs, b_tile):
    """(B, 834) -> (B*18, 128) bf16 token features, token-major within each tile."""
    B = obs.shape[0]
    f32 = jnp.float32
    obs66 = obs[:, :66]
    torso = obs66[:, :12]
    leg_feats = []
    for i in range(N_LEG_TOKENS):
        pos = jnp.broadcast_to(
            jnp.array([float(i), 0.0, float(i), 1.0, float(i), 2.0], f32), (B, 6))
        leg_feats.append(jnp.concatenate([
            obs66[:, 12 + 3 * i:15 + 3 * i],
            obs66[:, 30 + 3 * i:33 + 3 * i],
            obs66[:, 48 + 3 * i:51 + 3 * i],
            torso,
            pos,
        ], axis=-1))                                                  # (B, 27)
    legs = jnp.stack(leg_feats, axis=1)                               # (B, 6, 27)
    hm = obs[:, 66:].reshape(B, PATCH_NUM, PATCH_SIZE)                # (B, 12, 64)

    pad = TOKEN_IN_PAD - TOKEN_IN                                     # 35 zero lanes
    leg_rows = jnp.concatenate(
        [legs,
         jnp.zeros((B, N_LEG_TOKENS, PATCH_SIZE), f32),
         jnp.ones((B, N_LEG_TOKENS, 1), f32),
         jnp.zeros((B, N_LEG_TOKENS, 1 + pad), f32)], axis=-1)        # (B, 6, 128)
    patch_rows = jnp.concatenate(
        [jnp.zeros((B, PATCH_NUM, LEG_SIZE), f32),
         hm,
         jnp.zeros((B, PATCH_NUM, 1), f32),
         jnp.ones((B, PATCH_NUM, 1), f32),
         jnp.zeros((B, PATCH_NUM, pad), f32)], axis=-1)               # (B, 12, 128)
    tok = jnp.concatenate([leg_rows, patch_rows], axis=1)             # (B, 18, 128)

    nt = B // b_tile
    tok = tok.reshape(nt, b_tile, N_TOKENS, TOKEN_IN_PAD)
    tok = tok.transpose(0, 2, 1, 3)               # token-major inside each tile
    return tok.reshape(nt * N_TOKENS * b_tile, TOKEN_IN_PAD).astype(BF16)


def actor_critic_forward(obs, packed, *, b_tile=8):
    """Returns (action_mean [B,18], action_std [B,18], value [B,1])."""
    B = obs.shape[0]
    nt = -(-B // b_tile)
    b_pad = nt * b_tile
    if b_pad != B:
        obs = jnp.concatenate(
            [obs, jnp.zeros((b_pad - B, obs.shape[1]), obs.dtype)], axis=0)

    tok = _build_token_inputs(obs, b_tile)        # (b_pad*18, 128) bf16
    m_rows = N_TOKENS * b_tile                    # 144 stacked rows per step
    out_rows = (N_LEG_TOKENS + 1) * b_tile        # 48 mean rows + b_tile value rows

    weight_names = ["w_emb", "w_qkv1", "b_qkv1", "w_proj1", "w_mlp1",
                    "w_qkv2", "b_qkv2", "w_proj2", "w_mlp2",
                    "w_h1", "w_h2", "w_out", "small"]
    weights = [packed[n] for n in weight_names]

    def const_spec(arr):                          # grid-invariant -> fetched once
        return pl.BlockSpec(arr.shape, lambda i: (0, 0))

    in_specs = ([pl.BlockSpec((m_rows, TOKEN_IN_PAD), lambda i: (i, 0))]
                + [const_spec(w) for w in weights])

    out = pl.pallas_call(
        _actor_critic_kernel,
        grid=(nt,),
        in_specs=in_specs,
        out_specs=pl.BlockSpec((out_rows, OUT_LANES), lambda i: (i, 0)),
        out_shape=jax.ShapeDtypeStruct((nt * out_rows, OUT_LANES), jnp.float32),
        compiler_params=pltpu.CompilerParams(dimension_semantics=("parallel",)),
    )(tok, *weights)

    # host repack of the lane-dense output block
    out = out.reshape(nt, out_rows, OUT_LANES)
    means = out[:, :N_LEG_TOKENS * b_tile, :3]                        # (nt, 48, 3)
    means = means.reshape(nt, N_LEG_TOKENS, b_tile, 3).transpose(0, 2, 1, 3)
    action_mean = means.reshape(b_pad, NUM_ACTIONS)[:B]
    value = out[:, N_LEG_TOKENS * b_tile:, 0].reshape(b_pad, 1)[:B]
    action_std = jnp.broadcast_to(packed["std"], (B, NUM_ACTIONS))
    # TODO(synk): Normal(mean, std).sample() / log_prob / entropy are stochastic
    # distribution ops with no Pallas equivalent; we return the distribution params.
    return action_mean, action_std, value


# ---------------------------------------------------------------------------
# weight packing (host side, once): fold embeds+biases, pad heads to 128 lanes,
# cast all matmul weights to bf16 (biases / LN params stay f32)
# ---------------------------------------------------------------------------
def pack_params(params, b_tile=8):
    assert b_tile % 8 == 0, "b_tile must be a multiple of 8 (sublane tile)"
    w = params["weights"]
    w_leg, b_leg, w_patch, b_patch, ln_g, ln_b = w[0:6]
    blk1 = w[6:16]
    wh1, bh1, wh2, bh2 = w[16:20]
    blk2 = w[20:30]
    w_out, b_out = w[30:32]
    f32 = jnp.float32

    def pack_block(blk):
        wk, bk, wq, bq, wv, bv, wp, bp, wm, bm = blk
        pad_w = jnp.zeros((HIDDEN, HEAD_PAD - HEAD_DIM), f32)
        pad_b = jnp.zeros((1, HEAD_PAD - HEAD_DIM), f32)
        w_cols, b_cols = [], []
        for mat, bias in ((wq, bq), (wk, bk), (wv, bv)):
            for h in range(N_HEAD):
                w_cols += [mat[:, h * HEAD_DIM:(h + 1) * HEAD_DIM], pad_w]
                b_cols += [bias[:, h * HEAD_DIM:(h + 1) * HEAD_DIM], pad_b]
        w_qkv = jnp.concatenate(w_cols, axis=1).astype(BF16)        # (160, 768)
        b_qkv = jnp.concatenate(b_cols, axis=1)                     # (1, 768) f32
        pad_rows = jnp.zeros((HEAD_PAD - HEAD_DIM, HIDDEN), f32)
        w_proj = jnp.concatenate(
            [wp[0:HEAD_DIM, :], pad_rows,
             wp[HEAD_DIM:2 * HEAD_DIM, :], pad_rows], axis=0).astype(BF16)  # (256,160)
        return w_qkv, b_qkv, w_proj, bp, wm.astype(BF16), bm

    w_qkv1, b_qkv1, w_proj1, bp1, wm1, bm1 = pack_block(blk1)
    w_qkv2, b_qkv2, w_proj2, bp2, wm2, bm2 = pack_block(blk2)

    # embedding: [w_leg; w_patch; b_leg; b_patch; zero pad] driven by padded tokens
    w_emb = jnp.concatenate(
        [w_leg, w_patch, b_leg, b_patch,
         jnp.zeros((TOKEN_IN_PAD - TOKEN_IN, HIDDEN), f32)], axis=0).astype(BF16)

    # value / action-mean weights padded to 128 output lanes (pad lanes = 0)
    w_h2_pad = jnp.concatenate(
        [wh2, jnp.zeros((HIDDEN, OUT_LANES - 1), f32)], axis=1).astype(BF16)
    w_out_pad = jnp.concatenate(
        [w_out, jnp.zeros((HIDDEN, OUT_LANES - 3), f32)], axis=1).astype(BF16)

    b_out_row = jnp.concatenate(
        [b_out.reshape(1, 3), jnp.zeros((1, HIDDEN - 3), f32)], axis=1)
    b_h2_row = jnp.concatenate(
        [bh2.reshape(1, 1), jnp.zeros((1, HIDDEN - 1), f32)], axis=1)
    small = jnp.concatenate(
        [ln_g, ln_b, bp1, bm1, bp2, bm2, bh1, b_out_row, b_h2_row,
         jnp.zeros((7, HIDDEN), f32)], axis=0)                      # (16, 160) f32

    return {
        "w_emb": w_emb,
        "w_qkv1": w_qkv1, "b_qkv1": b_qkv1, "w_proj1": w_proj1, "w_mlp1": wm1,
        "w_qkv2": w_qkv2, "b_qkv2": b_qkv2, "w_proj2": w_proj2, "w_mlp2": wm2,
        "w_h1": wh1.astype(BF16), "w_h2": w_h2_pad, "w_out": w_out_pad,
        "small": small,
        "std": params["std"],
    }


# ---------------------------------------------------------------------------
# pure-JAX f32 reference (unpacked weights, per-element math) for correctness
# ---------------------------------------------------------------------------
def _ref_attn(x, wk, bk, wq, bq, wv, bv, wp, bp):
    L, D = x.shape
    hd = D // N_HEAD
    k = jnp.dot(x, wk) + bk
    q = jnp.dot(x, wq) + bq
    v = jnp.dot(x, wv) + bv
    scale = 1.0 / math.sqrt(hd)
    yproj = jnp.zeros((L, D), jnp.float32)
    for h in range(N_HEAD):
        lo, hi = h * hd, (h + 1) * hd
        qh, kh, vh = q[:, lo:hi], k[:, lo:hi], v[:, lo:hi]
        att = jax.lax.dot_general(qh, kh, (((1,), (1,)), ((), ()))) * scale
        att = att - jnp.max(att, axis=-1, keepdims=True)
        att = jnp.exp(att)
        att = att / jnp.sum(att, axis=-1, keepdims=True)
        yproj = yproj + jnp.dot(jnp.dot(att, vh), wp[lo:hi, :])
    return yproj + bp


def _ref_encode_block(x, wk, bk, wq, bq, wv, bv, wp, bp, wm, bm):
    x = x + _ref_attn(x, wk, bk, wq, bq, wv, bv, wp, bp)
    x = x + _gelu(jnp.dot(x, wm) + bm)
    return x


def _ref_transformer_single(legs, hm,
                            w_leg, b_leg, w_patch, b_patch, ln_g, ln_b,
                            wk1, bk1, wq1, bq1, wv1, bv1, wp1, bp1, wm1, bm1,
                            wh1, bh1, wh2, bh2,
                            wk2, bk2, wq2, bq2, wv2, bv2, wp2, bp2, wm2, bm2,
                            w_out, b_out):
    leg_tok = jnp.dot(legs, w_leg) + b_leg
    patch_tok = jnp.dot(hm, w_patch) + b_patch
    tokens = jnp.concatenate([leg_tok, patch_tok], axis=0)
    mu = jnp.mean(tokens, axis=-1, keepdims=True)
    var = jnp.mean((tokens - mu) ** 2, axis=-1, keepdims=True)
    x = (tokens - mu) / jnp.sqrt(var + LN_EPS) * ln_g + ln_b
    x = _gelu(x)
    x = _ref_encode_block(x, wk1, bk1, wq1, bq1, wv1, bv1, wp1, bp1, wm1, bm1)
    h = _gelu(jnp.dot(x, wh1) + bh1)
    v_loc = jnp.dot(h, wh2) + bh2
    x = _ref_encode_block(x, wk2, bk2, wq2, bq2, wv2, bv2, wp2, bp2, wm2, bm2)
    means = jnp.dot(x, w_out) + b_out
    return means[:N_LEG_TOKENS, :], v_loc


def _ref_build_tokens(obs):
    B = obs.shape[0]
    obs66 = obs[:, :66]
    torso = obs66[:, :12]
    leg_rows = []
    for i in range(6):
        pos = jnp.tile(jnp.array([[float(i), 0.0, float(i), 1.0, float(i), 2.0]],
                                 jnp.float32), (B, 1))
        leg_rows.append(jnp.concatenate([
            obs66[:, 12 + 3 * i:15 + 3 * i],
            obs66[:, 30 + 3 * i:33 + 3 * i],
            obs66[:, 48 + 3 * i:51 + 3 * i],
            torso, pos], axis=-1))
    legs = jnp.stack(leg_rows, axis=1)
    hm = obs[:, 66:].reshape(B, PATCH_NUM, PATCH_SIZE)
    return legs, hm


def reference_forward(obs, params):
    legs, hm = _ref_build_tokens(obs)
    fn = lambda l, h: _ref_transformer_single(l, h, *params["weights"])
    means6, vloc = jax.vmap(fn)(legs, hm)
    return means6.reshape(obs.shape[0], NUM_ACTIONS), jnp.mean(vloc, axis=1)


# ---------------------------------------------------------------------------
# deterministic parameter initialization (synthetic, not a checkpoint load)
# ---------------------------------------------------------------------------
def init_params(key):
    keys = iter(jax.random.split(key, 64))

    def linear(in_f, out_f):
        wm = jax.random.normal(next(keys), (in_f, out_f), jnp.float32) / math.sqrt(in_f)
        bm = 0.01 * jax.random.normal(next(keys), (1, out_f), jnp.float32)
        return wm, bm

    w_leg, b_leg = linear(LEG_SIZE, HIDDEN)
    w_patch, b_patch = linear(PATCH_SIZE, HIDDEN)
    ln_g = jnp.ones((1, HIDDEN), jnp.float32)
    ln_b = jnp.zeros((1, HIDDEN), jnp.float32)

    def encode_block_params():
        wk, bk = linear(HIDDEN, HIDDEN)
        wq, bq = linear(HIDDEN, HIDDEN)
        wv, bv = linear(HIDDEN, HIDDEN)
        wp, bp = linear(HIDDEN, HIDDEN)
        wm, bm = linear(HIDDEN, HIDDEN)
        return [wk, bk, wq, bq, wv, bv, wp, bp, wm, bm]

    blk1 = encode_block_params()
    wh1, bh1 = linear(HIDDEN, HIDDEN)
    wh2, bh2 = linear(HIDDEN, 1)
    blk2 = encode_block_params()
    w_out, b_out = linear(HIDDEN, 3)

    weights = [w_leg, b_leg, w_patch, b_patch, ln_g, ln_b] + blk1 + \
              [wh1, bh1, wh2, bh2] + blk2 + [w_out, b_out]
    std = INIT_NOISE_STD * jnp.ones((NUM_ACTIONS,), jnp.float32)
    return {"weights": weights, "std": std}


if __name__ == "__main__":
    key = jax.random.PRNGKey(0)
    pkey, okey = jax.random.split(key)
    params = init_params(pkey)

    B_TILE = 8          # 144 stacked token rows per grid step
    B = 64              # grid of 8 steps -> >=4 pipelined steps per v7x TensorCore
    packed = pack_params(params, b_tile=B_TILE)
    obs = jax.random.normal(okey, (B, OBS_DIM), jnp.float32)

    fwd = jax.jit(functools.partial(actor_critic_forward, b_tile=B_TILE))
    mean, std, value = fwd(obs, packed)
    jax.block_until_ready((mean, std, value))

    ref_mean, ref_value = reference_forward(obs, params)
    assert mean.shape == (B, NUM_ACTIONS) and value.shape == (B, 1)
    # bf16 MXU inputs (f32 accumulation) vs. the pure-f32 reference: ~1e-2-level error
    assert jnp.allclose(mean, ref_mean, atol=5e-2, rtol=5e-2), \
        float(jnp.max(jnp.abs(mean - ref_mean)))
    assert jnp.allclose(value, ref_value, atol=5e-2, rtol=5e-2), \
        float(jnp.max(jnp.abs(value - ref_value)))

    print("KERNEL_OK")
</pallas_src>

<mosaic_0001>
module attributes {stable_mosaic.version = 11 : i64} {
  func.func @_actor_critic_kernel(%arg0: i32, %arg1: memref<144x128xbf16, #tpu.memory_space<vmem>>, %arg2: memref<128x160xbf16, #tpu.memory_space<vmem>>, %arg3: memref<160x768xbf16, #tpu.memory_space<vmem>>, %arg4: memref<1x768xf32, #tpu.memory_space<vmem>>, %arg5: memref<256x160xbf16, #tpu.memory_space<vmem>>, %arg6: memref<160x160xbf16, #tpu.memory_space<vmem>>, %arg7: memref<160x768xbf16, #tpu.memory_space<vmem>>, %arg8: memref<1x768xf32, #tpu.memory_space<vmem>>, %arg9: memref<256x160xbf16, #tpu.memory_space<vmem>>, %arg10: memref<160x160xbf16, #tpu.memory_space<vmem>>, %arg11: memref<160x160xbf16, #tpu.memory_space<vmem>>, %arg12: memref<160x128xbf16, #tpu.memory_space<vmem>>, %arg13: memref<160x128xbf16, #tpu.memory_space<vmem>>, %arg14: memref<16x160xf32, #tpu.memory_space<vmem>>, %arg15: memref<56x128xf32, #tpu.memory_space<vmem>>) attributes {dimension_semantics = [#tpu.dimension_semantics<parallel>], iteration_bounds = array<i64: 8>, scalar_prefetch = 0 : i64, scratch_operands = 0 : i64, tpu.core_type = #tpu.core_type<tc>, window_params = [{transform_indices = @transform_0, window_bounds = array<i64: 144, 128>}, {pipeline_mode = #tpu.pipeline_mode<synchronous>, transform_indices = @transform_1, window_bounds = array<i64: 128, 160>}, {pipeline_mode = #tpu.pipeline_mode<synchronous>, transform_indices = @transform_2, window_bounds = array<i64: 160, 768>}, {pipeline_mode = #tpu.pipeline_mode<synchronous>, transform_indices = @transform_3, window_bounds = array<i64: 1, 768>}, {pipeline_mode = #tpu.pipeline_mode<synchronous>, transform_indices = @transform_4, window_bounds = array<i64: 256, 160>}, {pipeline_mode = #tpu.pipeline_mode<synchronous>, transform_indices = @transform_5, window_bounds = array<i64: 160, 160>}, {pipeline_mode = #tpu.pipeline_mode<synchronous>, transform_indices = @transform_6, window_bounds = array<i64: 160, 768>}, {pipeline_mode = #tpu.pipeline_mode<synchronous>, transform_indices = @transform_7, window_bounds = array<i64: 1, 768>}, {pipeline_mode = #tpu.pipeline_mode<synchronous>, transform_indices = @transform_8, window_bounds = array<i64: 256, 160>}, {pipeline_mode = #tpu.pipeline_mode<synchronous>, transform_indices = @transform_9, window_bounds = array<i64: 160, 160>}, {pipeline_mode = #tpu.pipeline_mode<synchronous>, transform_indices = @transform_10, window_bounds = array<i64: 160, 160>}, {pipeline_mode = #tpu.pipeline_mode<synchronous>, transform_indices = @transform_11, window_bounds = array<i64: 160, 128>}, {pipeline_mode = #tpu.pipeline_mode<synchronous>, transform_indices = @transform_12, window_bounds = array<i64: 160, 128>}, {pipeline_mode = #tpu.pipeline_mode<synchronous>, transform_indices = @transform_13, window_bounds = array<i64: 16, 160>}, {transform_indices = @transform_14, window_bounds = array<i64: 56, 128>}]} {
    %c0 = arith.constant 0 : index
    %c0_0 = arith.constant 0 : index
    %0 = vector.load %arg14[%c0, %c0_0] : memref<16x160xf32, #tpu.memory_space<vmem>>, vector<16x160xf32>
    %1 = vector.extract_strided_slice %0 {offsets = [0, 0], sizes = [1, 160], strides = [1, 1]} : vector<16x160xf32> to vector<1x160xf32>
    %2 = vector.extract_strided_slice %0 {offsets = [1, 0], sizes = [1, 160], strides = [1, 1]} : vector<16x160xf32> to vector<1x160xf32>
    %3 = vector.extract_strided_slice %0 {offsets = [2, 0], sizes = [1, 160], strides = [1, 1]} : vector<16x160xf32> to vector<1x160xf32>
    %4 = vector.extract_strided_slice %0 {offsets = [3, 0], sizes = [1, 160], strides = [1, 1]} : vector<16x160xf32> to vector<1x160xf32>
    %5 = vector.extract_strided_slice %0 {offsets = [4, 0], sizes = [1, 160], strides = [1, 1]} : vector<16x160xf32> to vector<1x160xf32>
    %6 = vector.extract_strided_slice %0 {offsets = [5, 0], sizes = [1, 160], strides = [1, 1]} : vector<16x160xf32> to vector<1x160xf32>
    %7 = vector.extract_strided_slice %0 {offsets = [6, 0], sizes = [1, 160], strides = [1, 1]} : vector<16x160xf32> to vector<1x160xf32>
    %8 = vector.extract_strided_slice %0 {offsets = [7, 0], sizes = [1, 128], strides = [1, 1]} : vector<16x160xf32> to vector<1x128xf32>
    %9 = vector.extract_strided_slice %0 {offsets = [8, 0], sizes = [1, 128], strides = [1, 1]} : vector<16x160xf32> to vector<1x128xf32>
    %c0_1 = arith.constant 0 : index
    %c0_2 = arith.constant 0 : index
    %10 = vector.load %arg1[%c0_1, %c0_2] : memref<144x128xbf16, #tpu.memory_space<vmem>>, vector<144x128xbf16>
    %c0_3 = arith.constant 0 : index
    %c0_4 = arith.constant 0 : index
    %11 = vector.load %arg2[%c0_3, %c0_4] : memref<128x160xbf16, #tpu.memory_space<vmem>>, vector<128x160xbf16>
    %cst = arith.constant dense<0.000000e+00> : vector<144x160xf32>
    %12 = tpu.matmul %10, %11, %cst {dimension_numbers = #tpu.dot_dimension_numbers<[1], [0], [0], [1], [0, 0, 1, 1], [], []>} : vector<144x128xbf16>, vector<128x160xbf16>, vector<144x160xf32> -> vector<144x160xf32>
    %cst_5 = arith.constant dense<0.000000e+00> : vector<144xf32>
    %13 = vector.multi_reduction <add>, %12, %cst_5 [1] : vector<144x160xf32> to vector<144xf32>
    %14 = vector.shape_cast %13 : vector<144xf32> to vector<144x1xf32>
    %cst_6 = arith.constant 1.600000e+02 : f32
    %15 = vector.broadcast %cst_6 : f32 to vector<144x1xf32>
    %16 = arith.divf %14, %15 : vector<144x1xf32>
    %17 = vector.broadcast %16 : vector<144x1xf32> to vector<144x160xf32>
    %18 = arith.subf %12, %17 : vector<144x160xf32>
    %19 = arith.mulf %18, %18 : vector<144x160xf32>
    %cst_7 = arith.constant dense<0.000000e+00> : vector<144xf32>
    %20 = vector.multi_reduction <add>, %19, %cst_7 [1] : vector<144x160xf32> to vector<144xf32>
    %21 = vector.shape_cast %20 : vector<144xf32> to vector<144x1xf32>
    %cst_8 = arith.constant 1.600000e+02 : f32
    %22 = vector.broadcast %cst_8 : f32 to vector<144x1xf32>
    %23 = arith.divf %21, %22 : vector<144x1xf32>
    %24 = vector.broadcast %16 : vector<144x1xf32> to vector<144x160xf32>
    %25 = arith.subf %12, %24 : vector<144x160xf32>
    %cst_9 = arith.constant 9.99999974E-6 : f32
    %26 = vector.broadcast %cst_9 : f32 to vector<144x1xf32>
    %27 = arith.addf %23, %26 : vector<144x1xf32>
    %28 = math.rsqrt %27 : vector<144x1xf32>
    %29 = vector.broadcast %28 : vector<144x1xf32> to vector<144x160xf32>
    %30 = arith.mulf %25, %29 : vector<144x160xf32>
    %31 = vector.broadcast %1 : vector<1x160xf32> to vector<144x160xf32>
    %32 = arith.mulf %30, %31 : vector<144x160xf32>
    %33 = vector.broadcast %2 : vector<1x160xf32> to vector<144x160xf32>
    %34 = arith.addf %32, %33 : vector<144x160xf32>
    %cst_10 = arith.constant 5.000000e-01 : f32
    %35 = vector.broadcast %cst_10 : f32 to vector<144x160xf32>
    %36 = arith.mulf %35, %34 : vector<144x160xf32>
    %cst_11 = arith.constant 0.707106769 : f32
    %37 = vector.broadcast %cst_11 : f32 to vector<144x160xf32>
    %38 = arith.mulf %34, %37 : vector<144x160xf32>
    %39 = math.erf %38 : vector<144x160xf32>
    %cst_12 = arith.constant 1.000000e+00 : f32
    %40 = vector.broadcast %cst_12 : f32 to vector<144x160xf32>
    %41 = arith.addf %40, %39 : vector<144x160xf32>
    %42 = arith.mulf %36, %41 : vector<144x160xf32>
    %c0_13 = arith.constant 0 : index
    %c0_14 = arith.constant 0 : index
    %43 = vector.load %arg3[%c0_13, %c0_14] : memref<160x768xbf16, #tpu.memory_space<vmem>>, vector<160x768xbf16>
    %c0_15 = arith.constant 0 : index
    %c0_16 = arith.constant 0 : index
    %44 = vector.load %arg4[%c0_15, %c0_16] : memref<1x768xf32, #tpu.memory_space<vmem>>, vector<1x768xf32>
    %c0_17 = arith.constant 0 : index
    %c0_18 = arith.constant 0 : index
    %45 = vector.load %arg5[%c0_17, %c0_18] : memref<256x160xbf16, #tpu.memory_space<vmem>>, vector<256x160xbf16>
    %c0_19 = arith.constant 0 : index
    %c0_20 = arith.constant 0 : index
    %46 = vector.load %arg6[%c0_19, %c0_20] : memref<160x160xbf16, #tpu.memory_space<vmem>>, vector<160x160xbf16>
    %47 = arith.truncf %42 : vector<144x160xf32> to vector<144x160xbf16>
    %cst_21 = arith.constant dense<0.000000e+00> : vector<144x768xf32>
    %48 = tpu.matmul %47, %43, %cst_21 {dimension_numbers = #tpu.dot_dimension_numbers<[1], [0], [0], [1], [0, 0, 1, 1], [], []>} : vector<144x160xbf16>, vector<160x768xbf16>, vector<144x768xf32> -> vector<144x768xf32>
    %49 = vector.broadcast %44 : vector<1x768xf32> to vector<144x768xf32>
    %50 = arith.addf %48, %49 : vector<144x768xf32>
    %51 = tpu.iota {dimensions = array<i32: 0>} : vector<144x144xi32>
    %c7_i32 = arith.constant 7 : i32
    %52 = vector.broadcast %c7_i32 : i32 to vector<144x144xi32>
    %53 = arith.andi %51, %52 : vector<144x144xi32>
    %54 = tpu.iota {dimensions = array<i32: 1>} : vector<144x144xi32>
    %c7_i32_22 = arith.constant 7 : i32
    %55 = vector.broadcast %c7_i32_22 : i32 to vector<144x144xi32>
    %56 = arith.andi %54, %55 : vector<144x144xi32>
    %57 = arith.cmpi eq, %53, %56 : vector<144x144xi32>
    %58 = vector.extract_strided_slice %50 {offsets = [0, 0], sizes = [144, 128], strides = [1, 1]} : vector<144x768xf32> to vector<144x128xf32>
    %59 = arith.truncf %58 : vector<144x128xf32> to vector<144x128xbf16>
    %60 = vector.extract_strided_slice %50 {offsets = [0, 256], sizes = [144, 128], strides = [1, 1]} : vector<144x768xf32> to vector<144x128xf32>
    %61 = arith.truncf %60 : vector<144x128xf32> to vector<144x128xbf16>
    %62 = vector.extract_strided_slice %50 {offsets = [0, 512], sizes = [144, 128], strides = [1, 1]} : vector<144x768xf32> to vector<144x128xf32>
    %63 = arith.truncf %62 : vector<144x128xf32> to vector<144x128xbf16>
    %cst_23 = arith.constant dense<0.000000e+00> : vector<144x144xf32>
    %64 = tpu.matmul %59, %61, %cst_23 {dimension_numbers = #tpu.dot_dimension_numbers<[1], [1], [0], [0], [0, 0, 1, 0], [], []>} : vector<144x128xbf16>, vector<144x128xbf16>, vector<144x144xf32> -> vector<144x144xf32>
    %cst_24 = arith.constant 0.111803398 : f32
    %65 = vector.broadcast %cst_24 : f32 to vector<144x144xf32>
    %66 = arith.mulf %64, %65 : vector<144x144xf32>
    %cst_25 = arith.constant -1.000000e+30 : f32
    %67 = vector.broadcast %cst_25 : f32 to vector<144x144xf32>
    %68 = arith.select %57, %66, %67 : vector<144x144xi1>, vector<144x144xf32>
    %cst_26 = arith.constant dense<0xFF800000> : vector<144xf32>
    %69 = vector.multi_reduction <maximumf>, %68, %cst_26 [1] : vector<144x144xf32> to vector<144xf32>
    %70 = vector.shape_cast %69 : vector<144xf32> to vector<144x1xf32>
    %71 = vector.broadcast %70 : vector<144x1xf32> to vector<144x144xf32>
    %72 = arith.subf %68, %71 : vector<144x144xf32>
    %73 = math.exp %72 : vector<144x144xf32>
    %cst_27 = arith.constant dense<0.000000e+00> : vector<144xf32>
    %74 = vector.multi_reduction <add>, %73, %cst_27 [1] : vector<144x144xf32> to vector<144xf32>
    %75 = vector.shape_cast %74 : vector<144xf32> to vector<144x1xf32>
    %76 = tpu.reciprocal %75 {approx = true} : vector<144x1xf32> -> vector<144x1xf32>
    %77 = vector.broadcast %76 : vector<144x1xf32> to vector<144x144xf32>
    %78 = arith.mulf %73, %77 : vector<144x144xf32>
    %79 = arith.truncf %78 : vector<144x144xf32> to vector<144x144xbf16>
    %cst_28 = arith.constant dense<0.000000e+00> : vector<144x128xf32>
    %80 = tpu.matmul %79, %63, %cst_28 {dimension_numbers = #tpu.dot_dimension_numbers<[1], [0], [0], [1], [0, 0, 1, 1], [], []>} : vector<144x144xbf16>, vector<144x128xbf16>, vector<144x128xf32> -> vector<144x128xf32>
    %81 = vector.extract_strided_slice %50 {offsets = [0, 128], sizes = [144, 128], strides = [1, 1]} : vector<144x768xf32> to vector<144x128xf32>
    %82 = arith.truncf %81 : vector<144x128xf32> to vector<144x128xbf16>
    %83 = vector.extract_strided_slice %50 {offsets = [0, 384], sizes = [144, 128], strides = [1, 1]} : vector<144x768xf32> to vector<144x128xf32>
    %84 = arith.truncf %83 : vector<144x128xf32> to vector<144x128xbf16>
    %85 = vector.extract_strided_slice %50 {offsets = [0, 640], sizes = [144, 128], strides = [1, 1]} : vector<144x768xf32> to vector<144x128xf32>
    %86 = arith.truncf %85 : vector<144x128xf32> to vector<144x128xbf16>
    %cst_29 = arith.constant dense<0.000000e+00> : vector<144x144xf32>
    %87 = tpu.matmul %82, %84, %cst_29 {dimension_numbers = #tpu.dot_dimension_numbers<[1], [1], [0], [0], [0, 0, 1, 0], [], []>} : vector<144x128xbf16>, vector<144x128xbf16>, vector<144x144xf32> -> vector<144x144xf32>
    %cst_30 = arith.constant 0.111803398 : f32
    %88 = vector.broadcast %cst_30 : f32 to vector<144x144xf32>
    %89 = arith.mulf %87, %88 : vector<144x144xf32>
    %cst_31 = arith.constant -1.000000e+30 : f32
    %90 = vector.broadcast %cst_31 : f32 to vector<144x144xf32>
    %91 = arith.select %57, %89, %90 : vector<144x144xi1>, vector<144x144xf32>
    %cst_32 = arith.constant dense<0xFF800000> : vector<144xf32>
    %92 = vector.multi_reduction <maximumf>, %91, %cst_32 [1] : vector<144x144xf32> to vector<144xf32>
    %93 = vector.shape_cast %92 : vector<144xf32> to vector<144x1xf32>
    %94 = vector.broadcast %93 : vector<144x1xf32> to vector<144x144xf32>
    %95 = arith.subf %91, %94 : vector<144x144xf32>
    %96 = math.exp %95 : vector<144x144xf32>
    %cst_33 = arith.constant dense<0.000000e+00> : vector<144xf32>
    %97 = vector.multi_reduction <add>, %96, %cst_33 [1] : vector<144x144xf32> to vector<144xf32>
    %98 = vector.shape_cast %97 : vector<144xf32> to vector<144x1xf32>
    %99 = tpu.reciprocal %98 {approx = true} : vector<144x1xf32> -> vector<144x1xf32>
    %100 = vector.broadcast %99 : vector<144x1xf32> to vector<144x144xf32>
    %101 = arith.mulf %96, %100 : vector<144x144xf32>
    %102 = arith.truncf %101 : vector<144x144xf32> to vector<144x144xbf16>
    %cst_34 = arith.constant dense<0.000000e+00> : vector<144x128xf32>
    %103 = tpu.matmul %102, %86, %cst_34 {dimension_numbers = #tpu.dot_dimension_numbers<[1], [0], [0], [1], [0, 0, 1, 1], [], []>} : vector<144x144xbf16>, vector<144x128xbf16>, vector<144x128xf32> -> vector<144x128xf32>
    %104 = tpu.concatenate %80, %103 in 1 : vector<144x128xf32>, vector<144x128xf32> -> vector<144x256xf32>
    %105 = arith.truncf %104 : vector<144x256xf32> to vector<144x256xbf16>
    %cst_35 = arith.constant dense<0.000000e+00> : vector<144x160xf32>
    %106 = tpu.matmul %105, %45, %cst_35 {dimension_numbers = #tpu.dot_dimension_numbers<[1], [0], [0], [1], [0, 0, 1, 1], [], []>} : vector<144x256xbf16>, vector<256x160xbf16>, vector<144x160xf32> -> vector<144x160xf32>
    %107 = arith.addf %42, %106 : vector<144x160xf32>
    %108 = vector.broadcast %3 : vector<1x160xf32> to vector<144x160xf32>
    %109 = arith.addf %107, %108 : vector<144x160xf32>
    %110 = arith.truncf %109 : vector<144x160xf32> to vector<144x160xbf16>
    %cst_36 = arith.constant dense<0.000000e+00> : vector<144x160xf32>
    %111 = tpu.matmul %110, %46, %cst_36 {dimension_numbers = #tpu.dot_dimension_numbers<[1], [0], [0], [1], [0, 0, 1, 1], [], []>} : vector<144x160xbf16>, vector<160x160xbf16>, vector<144x160xf32> -> vector<144x160xf32>
    %112 = vector.broadcast %4 : vector<1x160xf32> to vector<144x160xf32>
    %113 = arith.addf %111, %112 : vector<144x160xf32>
    %cst_37 = arith.constant 5.000000e-01 : f32
    %114 = vector.broadcast %cst_37 : f32 to vector<144x160xf32>
    %115 = arith.mulf %114, %113 : vector<144x160xf32>
    %cst_38 = arith.constant 0.707106769 : f32
    %116 = vector.broadcast %cst_38 : f32 to vector<144x160xf32>
    %117 = arith.mulf %113, %116 : vector<144x160xf32>
    %118 = math.erf %117 : vector<144x160xf32>
    %cst_39 = arith.constant 1.000000e+00 : f32
    %119 = vector.broadcast %cst_39 : f32 to vector<144x160xf32>
    %120 = arith.addf %119, %118 : vector<144x160xf32>
    %121 = arith.mulf %115, %120 : vector<144x160xf32>
    %122 = arith.addf %109, %121 : vector<144x160xf32>
    %123 = arith.truncf %122 : vector<144x160xf32> to vector<144x160xbf16>
    %c0_40 = arith.constant 0 : index
    %c0_41 = arith.constant 0 : index
    %124 = vector.load %arg11[%c0_40, %c0_41] : memref<160x160xbf16, #tpu.memory_space<vmem>>, vector<160x160xbf16>
    %cst_42 = arith.constant dense<0.000000e+00> : vector<144x160xf32>
    %125 = tpu.matmul %123, %124, %cst_42 {dimension_numbers = #tpu.dot_dimension_numbers<[1], [0], [0], [1], [0, 0, 1, 1], [], []>} : vector<144x160xbf16>, vector<160x160xbf16>, vector<144x160xf32> -> vector<144x160xf32>
    %126 = vector.broadcast %7 : vector<1x160xf32> to vector<144x160xf32>
    %127 = arith.addf %125, %126 : vector<144x160xf32>
    %cst_43 = arith.constant 5.000000e-01 : f32
    %128 = vector.broadcast %cst_43 : f32 to vector<144x160xf32>
    %129 = arith.mulf %128, %127 : vector<144x160xf32>
    %cst_44 = arith.constant 0.707106769 : f32
    %130 = vector.broadcast %cst_44 : f32 to vector<144x160xf32>
    %131 = arith.mulf %127, %130 : vector<144x160xf32>
    %132 = math.erf %131 : vector<144x160xf32>
    %cst_45 = arith.constant 1.000000e+00 : f32
    %133 = vector.broadcast %cst_45 : f32 to vector<144x160xf32>
    %134 = arith.addf %133, %132 : vector<144x160xf32>
    %135 = arith.mulf %129, %134 : vector<144x160xf32>
    %136 = tpu.iota {dimensions = array<i32: 0>} : vector<8x144xi32>
    %c7_i32_46 = arith.constant 7 : i32
    %137 = vector.broadcast %c7_i32_46 : i32 to vector<8x144xi32>
    %138 = arith.andi %136, %137 : vector<8x144xi32>
    %139 = tpu.iota {dimensions = array<i32: 1>} : vector<8x144xi32>
    %c7_i32_47 = arith.constant 7 : i32
    %140 = vector.broadcast %c7_i32_47 : i32 to vector<8x144xi32>
    %141 = arith.andi %139, %140 : vector<8x144xi32>
    %142 = arith.cmpi eq, %138, %141 : vector<8x144xi32>
    %cst_48 = arith.constant 1.000000e+00 : f32
    %cst_49 = arith.constant 0.000000e+00 : f32
    %143 = vector.broadcast %cst_48 : f32 to vector<8x144xf32>
    %144 = vector.broadcast %cst_49 : f32 to vector<8x144xf32>
    %145 = arith.select %142, %143, %144 : vector<8x144xi1>, vector<8x144xf32>
    %146 = arith.truncf %145 : vector<8x144xf32> to vector<8x144xbf16>
    %147 = arith.truncf %135 : vector<144x160xf32> to vector<144x160xbf16>
    %cst_50 = arith.constant dense<0.000000e+00> : vector<8x160xf32>
    %148 = tpu.matmul %146, %147, %cst_50 {dimension_numbers = #tpu.dot_dimension_numbers<[1], [0], [0], [1], [0, 0, 1, 1], [], []>} : vector<8x144xbf16>, vector<144x160xbf16>, vector<8x160xf32> -> vector<8x160xf32>
    %cst_51 = arith.constant 0.055555556 : f32
    %149 = vector.broadcast %cst_51 : f32 to vector<8x160xf32>
    %150 = arith.mulf %148, %149 : vector<8x160xf32>
    %151 = arith.truncf %150 : vector<8x160xf32> to vector<8x160xbf16>
    %c0_52 = arith.constant 0 : index
    %c0_53 = arith.constant 0 : index
    %152 = vector.load %arg12[%c0_52, %c0_53] : memref<160x128xbf16, #tpu.memory_space<vmem>>, vector<160x128xbf16>
    %cst_54 = arith.constant dense<0.000000e+00> : vector<8x128xf32>
    %153 = tpu.matmul %151, %152, %cst_54 {dimension_numbers = #tpu.dot_dimension_numbers<[1], [0], [0], [1], [0, 0, 1, 1], [], []>} : vector<8x160xbf16>, vector<160x128xbf16>, vector<8x128xf32> -> vector<8x128xf32>
    %154 = vector.broadcast %9 : vector<1x128xf32> to vector<8x128xf32>
    %155 = arith.addf %153, %154 : vector<8x128xf32>
    %c0_55 = arith.constant 0 : index
    %c0_56 = arith.constant 0 : index
    %156 = vector.load %arg7[%c0_55, %c0_56] : memref<160x768xbf16, #tpu.memory_space<vmem>>, vector<160x768xbf16>
    %c0_57 = arith.constant 0 : index
    %c0_58 = arith.constant 0 : index
    %157 = vector.load %arg8[%c0_57, %c0_58] : memref<1x768xf32, #tpu.memory_space<vmem>>, vector<1x768xf32>
    %c0_59 = arith.constant 0 : index
    %c0_60 = arith.constant 0 : index
    %158 = vector.load %arg9[%c0_59, %c0_60] : memref<256x160xbf16, #tpu.memory_space<vmem>>, vector<256x160xbf16>
    %c0_61 = arith.constant 0 : index
    %c0_62 = arith.constant 0 : index
    %159 = vector.load %arg10[%c0_61, %c0_62] : memref<160x160xbf16, #tpu.memory_space<vmem>>, vector<160x160xbf16>
    %160 = arith.truncf %122 : vector<144x160xf32> to vector<144x160xbf16>
    %cst_63 = arith.constant dense<0.000000e+00> : vector<144x768xf32>
    %161 = tpu.matmul %160, %156, %cst_63 {dimension_numbers = #tpu.dot_dimension_numbers<[1], [0], [0], [1], [0, 0, 1, 1], [], []>} : vector<144x160xbf16>, vector<160x768xbf16>, vector<144x768xf32> -> vector<144x768xf32>
    %162 = vector.broadcast %157 : vector<1x768xf32> to vector<144x768xf32>
    %163 = arith.addf %161, %162 : vector<144x768xf32>
    %164 = tpu.iota {dimensions = array<i32: 0>} : vector<144x144xi32>
    %c7_i32_64 = arith.constant 7 : i32
    %165 = vector.broadcast %c7_i32_64 : i32 to vector<144x144xi32>
    %166 = arith.andi %164, %165 : vector<144x144xi32>
    %167 = tpu.iota {dimensions = array<i32: 1>} : vector<144x144xi32>
    %c7_i32_65 = arith.constant 7 : i32
    %168 = vector.broadcast %c7_i32_65 : i32 to vector<144x144xi32>
    %169 = arith.andi %167, %168 : vector<144x144xi32>
    %170 = arith.cmpi eq, %166, %169 : vector<144x144xi32>
    %171 = vector.extract_strided_slice %163 {offsets = [0, 0], sizes = [144, 128], strides = [1, 1]} : vector<144x768xf32> to vector<144x128xf32>
    %172 = arith.truncf %171 : vector<144x128xf32> to vector<144x128xbf16>
    %173 = vector.extract_strided_slice %163 {offsets = [0, 256], sizes = [144, 128], strides = [1, 1]} : vector<144x768xf32> to vector<144x128xf32>
    %174 = arith.truncf %173 : vector<144x128xf32> to vector<144x128xbf16>
    %175 = vector.extract_strided_slice %163 {offsets = [0, 512], sizes = [144, 128], strides = [1, 1]} : vector<144x768xf32> to vector<144x128xf32>
    %176 = arith.truncf %175 : vector<144x128xf32> to vector<144x128xbf16>
    %cst_66 = arith.constant dense<0.000000e+00> : vector<144x144xf32>
    %177 = tpu.matmul %172, %174, %cst_66 {dimension_numbers = #tpu.dot_dimension_numbers<[1], [1], [0], [0], [0, 0, 1, 0], [], []>} : vector<144x128xbf16>, vector<144x128xbf16>, vector<144x144xf32> -> vector<144x144xf32>
    %cst_67 = arith.constant 0.111803398 : f32
    %178 = vector.broadcast %cst_67 : f32 to vector<144x144xf32>
    %179 = arith.mulf %177, %178 : vector<144x144xf32>
    %cst_68 = arith.constant -1.000000e+30 : f32
    %180 = vector.broadcast %cst_68 : f32 to vector<144x144xf32>
    %181 = arith.select %170, %179, %180 : vector<144x144xi1>, vector<144x144xf32>
    %cst_69 = arith.constant dense<0xFF800000> : vector<144xf32>
    %182 = vector.multi_reduction <maximumf>, %181, %cst_69 [1] : vector<144x144xf32> to vector<144xf32>
    %183 = vector.shape_cast %182 : vector<144xf32> to vector<144x1xf32>
    %184 = vector.broadcast %183 : vector<144x1xf32> to vector<144x144xf32>
    %185 = arith.subf %181, %184 : vector<144x144xf32>
    %186 = math.exp %185 : vector<144x144xf32>
    %cst_70 = arith.constant dense<0.000000e+00> : vector<144xf32>
    %187 = vector.multi_reduction <add>, %186, %cst_70 [1] : vector<144x144xf32> to vector<144xf32>
    %188 = vector.shape_cast %187 : vector<144xf32> to vector<144x1xf32>
    %189 = tpu.reciprocal %188 {approx = true} : vector<144x1xf32> -> vector<144x1xf32>
    %190 = vector.broadcast %189 : vector<144x1xf32> to vector<144x144xf32>
    %191 = arith.mulf %186, %190 : vector<144x144xf32>
    %192 = arith.truncf %191 : vector<144x144xf32> to vector<144x144xbf16>
    %cst_71 = arith.constant dense<0.000000e+00> : vector<144x128xf32>
    %193 = tpu.matmul %192, %176, %cst_71 {dimension_numbers = #tpu.dot_dimension_numbers<[1], [0], [0], [1], [0, 0, 1, 1], [], []>} : vector<144x144xbf16>, vector<144x128xbf16>, vector<144x128xf32> -> vector<144x128xf32>
    %194 = vector.extract_strided_slice %163 {offsets = [0, 128], sizes = [144, 128], strides = [1, 1]} : vector<144x768xf32> to vector<144x128xf32>
    %195 = arith.truncf %194 : vector<144x128xf32> to vector<144x128xbf16>
    %196 = vector.extract_strided_slice %163 {offsets = [0, 384], sizes = [144, 128], strides = [1, 1]} : vector<144x768xf32> to vector<144x128xf32>
    %197 = arith.truncf %196 : vector<144x128xf32> to vector<144x128xbf16>
    %198 = vector.extract_strided_slice %163 {offsets = [0, 640], sizes = [144, 128], strides = [1, 1]} : vector<144x768xf32> to vector<144x128xf32>
    %199 = arith.truncf %198 : vector<144x128xf32> to vector<144x128xbf16>
    %cst_72 = arith.constant dense<0.000000e+00> : vector<144x144xf32>
    %200 = tpu.matmul %195, %197, %cst_72 {dimension_numbers = #tpu.dot_dimension_numbers<[1], [1], [0], [0], [0, 0, 1, 0], [], []>} : vector<144x128xbf16>, vector<144x128xbf16>, vector<144x144xf32> -> vector<144x144xf32>
    %cst_73 = arith.constant 0.111803398 : f32
    %201 = vector.broadcast %cst_73 : f32 to vector<144x144xf32>
    %202 = arith.mulf %200, %201 : vector<144x144xf32>
    %cst_74 = arith.constant -1.000000e+30 : f32
    %203 = vector.broadcast %cst_74 : f32 to vector<144x144xf32>
    %204 = arith.select %170, %202, %203 : vector<144x144xi1>, vector<144x144xf32>
    %cst_75 = arith.constant dense<0xFF800000> : vector<144xf32>
    %205 = vector.multi_reduction <maximumf>, %204, %cst_75 [1] : vector<144x144xf32> to vector<144xf32>
    %206 = vector.shape_cast %205 : vector<144xf32> to vector<144x1xf32>
    %207 = vector.broadcast %206 : vector<144x1xf32> to vector<144x144xf32>
    %208 = arith.subf %204, %207 : vector<144x144xf32>
    %209 = math.exp %208 : vector<144x144xf32>
    %cst_76 = arith.constant dense<0.000000e+00> : vector<144xf32>
    %210 = vector.multi_reduction <add>, %209, %cst_76 [1] : vector<144x144xf32> to vector<144xf32>
    %211 = vector.shape_cast %210 : vector<144xf32> to vector<144x1xf32>
    %212 = tpu.reciprocal %211 {approx = true} : vector<144x1xf32> -> vector<144x1xf32>
    %213 = vector.broadcast %212 : vector<144x1xf32> to vector<144x144xf32>
    %214 = arith.mulf %209, %213 : vector<144x144xf32>
    %215 = arith.truncf %214 : vector<144x144xf32> to vector<144x144xbf16>
    %cst_77 = arith.constant dense<0.000000e+00> : vector<144x128xf32>
    %216 = tpu.matmul %215, %199, %cst_77 {dimension_numbers = #tpu.dot_dimension_numbers<[1], [0], [0], [1], [0, 0, 1, 1], [], []>} : vector<144x144xbf16>, vector<144x128xbf16>, vector<144x128xf32> -> vector<144x128xf32>
    %217 = tpu.concatenate %193, %216 in 1 : vector<144x128xf32>, vector<144x128xf32> -> vector<144x256xf32>
    %218 = arith.truncf %217 : vector<144x256xf32> to vector<144x256xbf16>
    %cst_78 = arith.constant dense<0.000000e+00> : vector<144x160xf32>
    %219 = tpu.matmul %218, %158, %cst_78 {dimension_numbers = #tpu.dot_dimension_numbers<[1], [0], [0], [1], [0, 0, 1, 1], [], []>} : vector<144x256xbf16>, vector<256x160xbf16>, vector<144x160xf32> -> vector<144x160xf32>
    %220 = arith.addf %122, %219 : vector<144x160xf32>
    %221 = vector.broadcast %5 : vector<1x160xf32> to vector<144x160xf32>
    %222 = arith.addf %220, %221 : vector<144x160xf32>
    %223 = arith.truncf %222 : vector<144x160xf32> to vector<144x160xbf16>
    %cst_79 = arith.constant dense<0.000000e+00> : vector<144x160xf32>
    %224 = tpu.matmul %223, %159, %cst_79 {dimension_numbers = #tpu.dot_dimension_numbers<[1], [0], [0], [1], [0, 0, 1, 1], [], []>} : vector<144x160xbf16>, vector<160x160xbf16>, vector<144x160xf32> -> vector<144x160xf32>
    %225 = vector.broadcast %6 : vector<1x160xf32> to vector<144x160xf32>
    %226 = arith.addf %224, %225 : vector<144x160xf32>
    %cst_80 = arith.constant 5.000000e-01 : f32
    %227 = vector.broadcast %cst_80 : f32 to vector<144x160xf32>
    %228 = arith.mulf %227, %226 : vector<144x160xf32>
    %cst_81 = arith.constant 0.707106769 : f32
    %229 = vector.broadcast %cst_81 : f32 to vector<144x160xf32>
    %230 = arith.mulf %226, %229 : vector<144x160xf32>
    %231 = math.erf %230 : vector<144x160xf32>
    %cst_82 = arith.constant 1.000000e+00 : f32
    %232 = vector.broadcast %cst_82 : f32 to vector<144x160xf32>
    %233 = arith.addf %232, %231 : vector<144x160xf32>
    %234 = arith.mulf %228, %233 : vector<144x160xf32>
    %235 = arith.addf %222, %234 : vector<144x160xf32>
    %236 = vector.extract_strided_slice %235 {offsets = [0, 0], sizes = [48, 160], strides = [1, 1]} : vector<144x160xf32> to vector<48x160xf32>
    %237 = arith.truncf %236 : vector<48x160xf32> to vector<48x160xbf16>
    %c0_83 = arith.constant 0 : index
    %c0_84 = arith.constant 0 : index
    %238 = vector.load %arg13[%c0_83, %c0_84] : memref<160x128xbf16, #tpu.memory_space<vmem>>, vector<160x128xbf16>
    %cst_85 = arith.constant dense<0.000000e+00> : vector<48x128xf32>
    %239 = tpu.matmul %237, %238, %cst_85 {dimension_numbers = #tpu.dot_dimension_numbers<[1], [0], [0], [1], [0, 0, 1, 1], [], []>} : vector<48x160xbf16>, vector<160x128xbf16>, vector<48x128xf32> -> vector<48x128xf32>
    %240 = vector.broadcast %8 : vector<1x128xf32> to vector<48x128xf32>
    %241 = arith.addf %239, %240 : vector<48x128xf32>
    %242 = tpu.concatenate %241, %155 in 0 : vector<48x128xf32>, vector<8x128xf32> -> vector<56x128xf32>
    %c0_86 = arith.constant 0 : index
    %c0_87 = arith.constant 0 : index
    %243 = vector.load %arg15[%c0_86, %c0_87] : memref<56x128xf32, #tpu.memory_space<vmem>>, vector<56x128xf32>
    tpu.vector_store %arg15[%c0_86, %c0_87], %242 {strides = array<i32>} : memref<56x128xf32, #tpu.memory_space<vmem>>, vector<56x128xf32>,
    return
  }
  func.func @transform_0(%arg0: i32) -> (i32, i32) {
    %c0_i32 = arith.constant 0 : i32
    %c0_i32_0 = arith.constant 0 : i32
    return %arg0, %c0_i32 : i32, i32
  }
  func.func @transform_1(%arg0: i32) -> (i32, i32) {
    %c0_i32 = arith.constant 0 : i32
    %c0_i32_0 = arith.constant 0 : i32
    %c0_i32_1 = arith.constant 0 : i32
    return %c0_i32, %c0_i32_0 : i32, i32
  }
  func.func @transform_2(%arg0: i32) -> (i32, i32) {
    %c0_i32 = arith.constant 0 : i32
    %c0_i32_0 = arith.constant 0 : i32
    %c0_i32_1 = arith.constant 0 : i32
    return %c0_i32, %c0_i32_0 : i32, i32
  }
  func.func @transform_3(%arg0: i32) -> (i32, i32) {
    %c0_i32 = arith.constant 0 : i32
    %c0_i32_0 = arith.constant 0 : i32
    %c0_i32_1 = arith.constant 0 : i32
    return %c0_i32, %c0_i32_0 : i32, i32
  }
  func.func @transform_4(%arg0: i32) -> (i32, i32) {
    %c0_i32 = arith.constant 0 : i32
    %c0_i32_0 = arith.constant 0 : i32
    %c0_i32_1 = arith.constant 0 : i32
    return %c0_i32, %c0_i32_0 : i32, i32
  }
  func.func @transform_5(%arg0: i32) -> (i32, i32) {
    %c0_i32 = arith.constant 0 : i32
    %c0_i32_0 = arith.constant 0 : i32
    %c0_i32_1 = arith.constant 0 : i32
    return %c0_i32, %c0_i32_0 : i32, i32
  }
  func.func @transform_6(%arg0: i32) -> (i32, i32) {
    %c0_i32 = arith.constant 0 : i32
    %c0_i32_0 = arith.constant 0 : i32
    %c0_i32_1 = arith.constant 0 : i32
    return %c0_i32, %c0_i32_0 : i32, i32
  }
  func.func @transform_7(%arg0: i32) -> (i32, i32) {
    %c0_i32 = arith.constant 0 : i32
    %c0_i32_0 = arith.constant 0 : i32
    %c0_i32_1 = arith.constant 0 : i32
    return %c0_i32, %c0_i32_0 : i32, i32
  }
  func.func @transform_8(%arg0: i32) -> (i32, i32) {
    %c0_i32 = arith.constant 0 : i32
    %c0_i32_0 = arith.constant 0 : i32
    %c0_i32_1 = arith.constant 0 : i32
    return %c0_i32, %c0_i32_0 : i32, i32
  }
  func.func @transform_9(%arg0: i32) -> (i32, i32) {
    %c0_i32 = arith.constant 0 : i32
    %c0_i32_0 = arith.constant 0 : i32
    %c0_i32_1 = arith.constant 0 : i32
    return %c0_i32, %c0_i32_0 : i32, i32
  }
  func.func @transform_10(%arg0: i32) -> (i32, i32) {
    %c0_i32 = arith.constant 0 : i32
    %c0_i32_0 = arith.constant 0 : i32
    %c0_i32_1 = arith.constant 0 : i32
    return %c0_i32, %c0_i32_0 : i32, i32
  }
  func.func @transform_11(%arg0: i32) -> (i32, i32) {
    %c0_i32 = arith.constant 0 : i32
    %c0_i32_0 = arith.constant 0 : i32
    %c0_i32_1 = arith.constant 0 : i32
    return %c0_i32, %c0_i32_0 : i32, i32
  }
  func.func @transform_12(%arg0: i32) -> (i32, i32) {
    %c0_i32 = arith.constant 0 : i32
    %c0_i32_0 = arith.constant 0 : i32
    %c0_i32_1 = arith.constant 0 : i32
    return %c0_i32, %c0_i32_0 : i32, i32
  }
  func.func @transform_13(%arg0: i32) -> (i32, i32) {
    %c0_i32 = arith.constant 0 : i32
    %c0_i32_0 = arith.constant 0 : i32
    %c0_i32_1 = arith.constant 0 : i32
    return %c0_i32, %c0_i32_0 : i32, i32
  }
  func.func @transform_14(%arg0: i32) -> (i32, i32) {
    %c0_i32 = arith.constant 0 : i32
    %c0_i32_0 = arith.constant 0 : i32
    return %arg0, %c0_i32 : i32, i32
  }
}

</mosaic_0001>

<bundles_post_ra>
// kernel: squeeze.1
= control target key start
LH: loop header
LB: loop body
LE: loop exit
PB: predicated region body
PF: predicated region fallthrough
CT: control target
= control target key end

     0   :  { %s103_s10 = smov 56   ;;  %s104_s11 = smov 40   ;;  %vm4_vm0 = vcmask 64512   ;;  %s157_s0 = inlined_call_operand.vmem [shape: f32[8,8], index: 0, kind: input, shape index: {}]   ;;  %s158_s1 = inlined_call_operand.hbm [shape: f32[64,1], index: 1, kind: output, shape index: {}]  }
   0x1   :  { %v64_v0 = vld [vmem:[%s157_s0 + $0x7] sm:$0x1]   ;;  %v66_v1 = vld [vmem:[%s157_s0 + $0x5] sm:$0x1]   ;;  %v65_v2 = vld [vmem:[%s157_s0 + $0x6] sm:$0x1]  }
   0x2   :  { %8 = vrot.lane.b32.xlu0 %v64_v0, %s103_s10  ;;  %20 = vrot.lane.b32.xlu1 %v66_v1, %s104_s11  ;;  %v67_v3 = vld [vmem:[%s157_s0 + $0x4] sm:$0x1]   ;;  %v3_v4 = vld [vmem:[%s157_s0] sm:$0x1]  }
   0x3   :  { %2 = vsyncpa [#allocation1], 0  ;;  %s105_s18 = smov 48   ;;  %s106_s19 = smov 32   ;;  %5 = vst.msk [vmem:[#allocation2] sm:$0x1] %vm4_vm0, %v3_v4  }
   0x4   :  { %v68_v5 = vld [vmem:[%s157_s0 + $0x3] sm:$0x1]   ;;  %v69_v6 = vld [vmem:[%s157_s0 + $0x2] sm:$0x1]   ;;  %s107_s24 = smov 24   ;;  %s108_s25 = smov 16  }
   0x5   :  { %v70_v7 = vld [vmem:[%s157_s0 + $0x1] sm:$0x1]   ;;  %s109_s0 = smov 8   ;;  %vm10_vm1 = vcmask 523712   ;;  %vm16_vm2 = vcmask 458112   ;;  %vm22_vm3 = vcmask 392512  }
   0x6   :  { %14 = vrot.lane.b32.xlu0 %v65_v2, %s105_s18  ;;  %26 = vrot.lane.b32.xlu1 %v67_v3, %s106_s19  ;;  %vm28_vm4 = vcmask 326912   ;;  %vm34_vm5 = vcmask 261312   ;;  %vm40_vm6 = vcmask 195712   ;;  %vm46_vm7 = vcmask 130112   ;;  %s110_s28 = smov [#allocation0]  }
   0x7   :  { %s58_s29 = sshll.u32 %s110_s28, 4  ;;  %s59_s29 = int_to_ptr.vmem [resolvable:$true] %s58_s29 }
   0x8   :  { %s79_s30 = scalar_lea.vmem %s59_s29, 16  ;;  %s83_s2 = scalar_lea.vmem %s59_s29, 32 }
   0x9   :  { %p80_p0 = scmp.ne.s32.totalorder %s59_s29, %s79_s30  ;;  %p84_p1 = scmp.lt.s32.totalorder %s59_s29, %s59_s29 }
   0xa   :  { %32 = vrot.lane.b32.xlu0 %v68_v5, %s107_s24  ;;  %38 = vrot.lane.b32.xlu1 %v69_v6, %s108_s25  ;;  %p85_p2 = scmp.lt.s32.totalorder %s83_s2, %s79_s30 }
   0xc   :  { %p86_p3 = por %p85_p2, %p84_p1 }
   0xe   :  { %44 = vrot.lane.b32.xlu0 %v70_v7, %s109_s0  ;;  %p87_p4 = pnand %p86_p3, %p80_p0 }
  0x74   :  { %v9_v8 = vpop.permute.xlu0 %8   ;;  %v21_v9 = vpop.permute.xlu1 %20  }
  0x75   :  { %11 = vst.msk [vmem:[#allocation2] sm:$0x1] %vm10_vm1, %v9_v8  }
  0x78   :  { %v15_v10 = vpop.permute.xlu0 %14   ;;  %v27_v11 = vpop.permute.xlu1 %26  }
  0x79   :  { %17 = vst.msk [vmem:[#allocation2] sm:$0x1] %vm16_vm2, %v15_v10  }
  0x7a   :  { %23 = vst.msk [vmem:[#allocation2] sm:$0x1] %vm22_vm3, %v21_v9  }
  0x7b   :  { %29 = vst.msk [vmem:[#allocation2] sm:$0x1] %vm28_vm4, %v27_v11  }
  0x7c   :  { %v33_v12 = vpop.permute.xlu0 %32   ;;  %v39_v13 = vpop.permute.xlu1 %38  }
  0x7d   :  { %35 = vst.msk [vmem:[#allocation2] sm:$0x1] %vm34_vm5, %v33_v12  }
  0x7e   :  { %41 = vst.msk [vmem:[#allocation2] sm:$0x1] %vm40_vm6, %v39_v13  }
  0x80   :  { %v45_v14 = vpop.permute.xlu0 %44  }
  0x81   :  { %47 = vst.msk [vmem:[#allocation2] sm:$0x1] %vm46_vm7, %v45_v14  }
  0x88   :  { %v51_v15 = vld [vmem:[#allocation2] sm:$0x1] }
  0x89   :  { %53 = vst [vmem:[#allocation0] sm:$0x1] %v51_v15 }
  0x8a   :  { %90 = shalt.err (!%p87_p4)
}
  0x8b   :  { %s91_s5 = scalar_lea.hbm %s158_s1, 16 }
  0x8c   :  { %p92_p5 = scmp.ne.s32.totalorder %s158_s1, %s91_s5  ;;  %p95_p6 = scmp.lt.u32.totalorder %s91_s5, %s158_s1 }
  0x8e   :  { %p97_p7 = pnand %p95_p6, %p92_p5 }
  0x90   :  { %100 = shalt.err (!%p97_p7)
}
  0x91   :  { %61 = dma.vmem_to_hbm [thread:$0]  %s59_s29, 16, %s158_s1, [#allocation1]  }
  0x92   :  { %101 = dma.done.wait [#allocation1], 16  }
  0x93   :  { %102 = vsyncadd [#allocation1], 4294967280 }
  0x94   :  { %63 = vsyncpa [#allocation1], 1 }

// kernel: actor_critic_forward.1
= control target key start
LH: loop header
LB: loop body
LE: loop exit
PB: predicated region body
PF: predicated region fallthrough
CT: control target
= control target key end

     0   :  { %s9944_s29 = smov 0   ;;  %s15570_s0 = inlined_call_operand.vmem [shape: bf16[1152,128], index: 0, kind: input, shape index: {}]   ;;  %s15571_s1 = inlined_call_operand.vmem [shape: bf16[128,160], index: 1, kind: input, shape index: {}]   ;;  %s15572_s2 = inlined_call_operand.vmem [shape: bf16[160,768], index: 2, kind: input, shape index: {}]   ;;  %s15573_s3 = inlined_call_operand.vmem [shape: f32[1,768], index: 3, kind: input, shape index: {}]   ;;  %s15574_s4 = inlined_call_operand.vmem [shape: bf16[256,160], index: 4, kind: input, shape index: {}]   ;;  %s15575_s5 = inlined_call_operand.vmem [shape: bf16[160,160], index: 5, kind: input, shape index: {}]   ;;  %s15576_s6 = inlined_call_operand.vmem [shape: bf16[160,768], index: 6, kind: input, shape index: {}]   ;;  %s15577_s7 = inlined_call_operand.vmem [shape: f32[1,768], index: 7, kind: input, shape index: {}]   ;;  %s15578_s8 = inlined_call_operand.vmem [shape: bf16[256,160], index: 8, kind: input, shape index: {}]   ;;  %s15579_s9 = inlined_call_operand.vmem [shape: bf16[160,160], index: 9, kind: input, shape index: {}]   ;;  %s15580_s10 = inlined_call_operand.vmem [shape: bf16[160,160], index: 10, kind: input, shape index: {}]   ;;  %s15581_s11 = inlined_call_operand.vmem [shape: bf16[160,128], index: 11, kind: input, shape index: {}]   ;;  %s15582_s12 = inlined_call_operand.vmem [shape: bf16[160,128], index: 12, kind: input, shape index: {}]   ;;  %s15583_s13 = inlined_call_operand.vmem [shape: f32[16,160], index: 13, kind: input, shape index: {}]   ;;  %s15584_s14 = inlined_call_operand.vmem [shape: f32[448,128], index: 14, kind: output, shape index: {}]  }
   0x1 LB: > { %s8292_s30 = sadd.s32 4294967295, %s9864_s29   ;;  %p8296_p0 = scmp.ge.s32.totalorder %s9864_s29, 1  ;;  %s9864_s29 = sphi %s9944_s29, %s24_s29  }
   0x2   : > { %p413_p1 = scmp.lt.s32.totalorder %s9864_s29, 9 }
   0x4   : > { %p414_p2 = pnand %p8296_p0, %p413_p1 }
   0x6   : > { %417 = sbr.rel (%p414_p2) target bundleno = 4638 (0x121e), region = 76 }
   0xd   : > { %v8725_v0 = vld [vmem:[%s15571_s1 + $0x4] ss:$8 sps:$4 sm:$0xff]   ;;  %s459_s17 = smul.u32 18, %s8292_s30  ;;  %v8727_v1 = vld [vmem:[%s15571_s1] ss:$8 sps:$4 sm:$0xff]   ;;  %v15586_v2 = vmov 0  }
   0xe   : > { %675 = vmatprep.mubr.bf16.mxu0 %v15586_v2  ;;  %643 = vmatprep.subr.bf16.mxu0 %v8725_v0  ;;  %v8728_v3 = vld [vmem:[%s15571_s1 + $0x14] ss:$8 sps:$4 sm:$0xff]   ;;  %v8730_v4 = vld [vmem:[%s15571_s1 + $0x10] ss:$8 sps:$4 sm:$0xff]   ;;  %v8731_v5 = vld [vmem:[%s15571_s1 + $0x24] ss:$8 sps:$4 sm:$0xff]  }
   0xf   : > { %p460_p3 = scmp.lt.s32.totalorder %s459_s17, 143  ;;  %644 = vmatpush1.bf16.msra.mxu0 %v8727_v1  ;;  %v8733_v6 = vld [vmem:[%s15571_s1 + $0x20] ss:$8 sps:$4 sm:$0xff]   ;;  %v8734_v7 = vld [vmem:[%s15571_s1 + $0x34] ss:$8 sps:$4 sm:$0xff]   ;;  %vm15639_vm0 = vcmask 261120  }
  0x10   : > { %645 = vmatprep.subr.bf16.mxu0 %v8728_v3  ;;  %v8736_v8 = vld [vmem:[%s15571_s1 + $0x30] ss:$8 sps:$4 sm:$0xff]   ;;  %v8737_v9 = vld [vmem:[%s15571_s1 + $0x44] ss:$8 sps:$4 sm:$0xff]   ;;  %v8739_v10 = vld [vmem:[%s15571_s1 + $0x40] ss:$8 sps:$4 sm:$0xff]  }
  0x11   : > { %s16901_s17 = smov (!%p460_p3, %s459_s17), 143  ;;  %v8740_v11 = vld [vmem:[%s15571_s1 + $0x54] ss:$8 sps:$4 sm:$0xff]   ;;  %v8742_v12 = vld [vmem:[%s15571_s1 + $0x50] ss:$8 sps:$4 sm:$0xff]   ;;  %vm15640_vm3 = vcmask 130048  }
  0x12   : > { %s8297_s26 = sshll.u32 %s16901_s17, 2  ;;  %v8743_v13 = vld [vmem:[%s15571_s1 + $0x64] ss:$8 sps:$4 sm:$0xff]   ;;  %v8745_v14 = vld [vmem:[%s15571_s1 + $0x60] ss:$8 sps:$4 sm:$0xff]  }
  0x13   : > { %646 = vmatpush1.bf16.msra.mxu0 %v8730_v4  ;;  %s9979_s20 = scalar_lea.vmem %s15570_s0, %s8297_s26  ;;  %v8746_v15 = vld [vmem:[%s15571_s1 + $0x74] ss:$8 sps:$4 sm:$0xff]   ;;  %v8748_v16 = vld [vmem:[%s15571_s1 + $0x70] ss:$8 sps:$4 sm:$0xff]  }
  0x14   : > { %647 = vmatprep.subr.bf16.mxu0 %v8731_v5  ;;  %v8749_v17 = vld [vmem:[%s9979_s20] sm:$0xff]   ;;  %v8750_v18 = vld [vmem:[%s9979_s20 + $0x8] sm:$0xff]   ;;  %v8751_v19 = vld [vmem:[%s9979_s20 + $0x10] sm:$0xff]  }
  0x15   : > { %v8752_v20 = vld [vmem:[%s9979_s20 + $0x18] sm:$0xff]   ;;  %v8753_v21 = vld [vmem:[%s9979_s20 + $0x20] sm:$0xff]   ;;  %v8754_v22 = vld [vmem:[%s9979_s20 + $0x28] sm:$0xff]  }
  0x16   : > { %v8755_v23 = vld [vmem:[%s9979_s20 + $0x30] sm:$0xff]   ;;  %v8756_v24 = vld [vmem:[%s9979_s20 + $0x38] sm:$0xff]   ;;  %v8757_v25 = vld [vmem:[%s9979_s20 + $0x40] sm:$0xff]   ;;  %s465_s20 = smul.u32 7, %s8292_s30 }
  0x17   : > { %648 = vmatpush1.bf16.msra.mxu0 %v8733_v6 }
  0x18   : > { %649 = vmatprep.subr.bf16.mxu0 %v8734_v7  ;;  %p466_p4 = scmp.lt.s32.totalorder %s465_s20, 55 }
  0x1a   : > { %s16903_s20 = smov (!%p466_p4, %s465_s20), 55 }
  0x1b   : > { %650 = vmatpush1.bf16.msra.mxu0 %v8736_v8  ;;  %s8298_s26 = sshll.u32 %s16903_s20, 3 }
  0x1c   : > { %651 = vmatprep.subr.bf16.mxu0 %v8737_v9  ;;  %s14008_s16 = scalar_lea.vmem %s15584_s14, %s8298_s26 }
  0x1f   : > { %652 = vmatpush1.bf16.msra.mxu0 %v8739_v10 }
  0x20   : > { %653 = vmatprep.subr.bf16.mxu0 %v8740_v11 }
  0x23   : > { %654 = vmatpush1.bf16.msra.mxu0 %v8742_v12 }
  0x24   : > { %655 = vmatprep.subr.bf16.mxu0 %v8743_v13 }
  0x27   : > { %656 = vmatpush1.bf16.msra.mxu0 %v8745_v14 }
  0x28   : > { %657 = vmatprep.subr.bf16.mxu0 %v8746_v15 }
  0x2b   : > { %658 = vmatpush1.bf16.msra.mxu0 %v8748_v16 }
  0x2e   : > { %676 = vmatmul.mubr.bf16.vlgmr.msra.gmra.mrb[0].mxu0 %v8749_v17 }
  0x2f   : > { %685 = vmatprep.mubr.bf16.mxu0 %v15586_v2 }
  0x36   : > { %686 = vmatmul.mubr.bf16.gmra.mrb[4].mxu0 %v8750_v18 }
  0x37   : > { %695 = vmatprep.mubr.bf16.mxu0 %v15586_v2 }
  0x3e   : > { %696 = vmatmul.mubr.bf16.gmra.mrb[8].mxu0 %v8751_v19 }
  0x3f   : > { %705 = vmatprep.mubr.bf16.mxu0 %v15586_v2 }
  0x46   : > { %706 = vmatmul.mubr.bf16.gmra.mrb[12].mxu0 %v8752_v20 }
  0x47   : > { %715 = vmatprep.mubr.bf16.mxu0 %v15586_v2 }
  0x4e   : > { %716 = vmatmul.mubr.bf16.gmra.mrb[16].mxu0 %v8753_v21 }
  0x4f   : > { %725 = vmatprep.mubr.bf16.mxu0 %v15586_v2 }
  0x56   : > { %726 = vmatmul.mubr.bf16.gmra.mrb[20].mxu0 %v8754_v22 }
  0x57   : > { %735 = vmatprep.mubr.bf16.mxu0 %v15586_v2 }
  0x5e   : > { %736 = vmatmul.mubr.bf16.gmra.mrb[24].mxu0 %v8755_v23 }
  0x5f   : > { %745 = vmatprep.mubr.bf16.mxu0 %v15586_v2 }
  0x66   : > { %746 = vmatmul.mubr.bf16.gmra.mrb[28].mxu0 %v8756_v24 }
  0x67   : > { %755 = vmatprep.mubr.bf16.mxu0 %v15586_v2 }
  0x6e   : > { %756 = vmatmul.mubr.bf16.gmra.mrb[32].mxu0 %v8757_v25 }
 0x101   : > { %v10025_v26 = vpop.f32.mrb[0].mxu0 }
 0x102   : > { %v10027_v27 = vpop.f32.mrb[1].mxu0 }
 0x103   : > { %v10029_v28 = vpop.f32.mrb[2].mxu0  ;;  %v767_v29 = vsel %vm15639_vm0, %v10027_v27, 0.0 }
 0x104   : > { %v10033_v30 = vpop.f32.mrb[3].mxu0  ;;  %v768_v31 = vadd.f32 %v767_v29, %v10025_v26 }
 0x105   : > { %v771_v32 = vsel %vm15639_vm0, %v10033_v30, 0.0 }
 0x106   : > { %769 = vadd.xlane.f32.xlu0 %v768_v31  ;;  %v772_v33 = vadd.f32 %v771_v32, %v10029_v28 }
 0x109   : > { %v10039_v34 = vpop.f32.mrb[4].mxu0 }
 0x10a   : > { %773 = vadd.xlane.f32.xlu0 %v772_v33  ;;  %v10041_v35 = vpop.f32.mrb[5].mxu0 }
 0x10b   : > { %v10043_v36 = vpop.f32.mrb[6].mxu0  ;;  %v775_v37 = vsel %vm15639_vm0, %v10041_v35, 0.0 }
 0x10c   : > { %v10047_v38 = vpop.f32.mrb[7].mxu0  ;;  %v776_v39 = vadd.f32 %v775_v37, %v10039_v34 }
 0x10d   : > { %v779_v40 = vsel %vm15639_vm0, %v10047_v38, 0.0 }
 0x10e   : > { %777 = vadd.xlane.f32.xlu1 %v776_v39  ;;  %v780_v41 = vadd.f32 %v779_v40, %v10043_v36 }
 0x111   : > { %v10053_v42 = vpop.f32.mrb[8].mxu0 }
 0x112   : > { %781 = vadd.xlane.f32.xlu1 %v780_v41  ;;  %v10055_v43 = vpop.f32.mrb[9].mxu0 }
 0x113   : > { %v10057_v44 = vpop.f32.mrb[10].mxu0  ;;  %v783_v45 = vsel %vm15639_vm0, %v10055_v43, 0.0 }
 0x114   : > { %v10061_v46 = vpop.f32.mrb[11].mxu0  ;;  %v784_v47 = vadd.f32 %v783_v45, %v10053_v42 }
 0x115   : > { %v787_v48 = vsel %vm15639_vm0, %v10061_v46, 0.0 }
 0x116   : > { %785 = vadd.xlane.f32.xlu0 %v784_v47  ;;  %v788_v49 = vadd.f32 %v787_v48, %v10057_v44  ;;  %v8758_v47 = vld [vmem:[%s15572_s2 + $0x8] ss:$24 sps:$4 sm:$0xff]   ;;  %v8760_v48 = vld [vmem:[%s15572_s2 + $0xc] ss:$24 sps:$4 sm:$0xff]  }
 0x117   : > { %1972 = vmatprep.subr.bf16.mxu0 %v8760_v48 }
 0x118   : > { %789 = vadd.xlane.f32.xlu1 %v788_v49  ;;  %v8763_v49 = vld [vmem:[%s15572_s2 + $0x3c] ss:$24 sps:$4 sm:$0xff]   ;;  %1973 = vmatpush1.bf16.msra.mxu0 %v8758_v47 }
 0x119   : > { %v10067_v50 = vpop.f32.mrb[12].mxu0  ;;  %1974 = vmatprep.subr.bf16.mxu0 %v8763_v49 }
 0x11a   : > { %v10069_v51 = vpop.f32.mrb[13].mxu0 }
 0x11b   : > { %v10071_v52 = vpop.f32.mrb[14].mxu0  ;;  %v791_v53 = vsel %vm15639_vm0, %v10069_v51, 0.0 }
 0x11c   : > { %v10075_v54 = vpop.f32.mrb[15].mxu0  ;;  %v792_v55 = vadd.f32 %v791_v53, %v10067_v50  ;;  %v8761_v53 = vld [vmem:[%s15572_s2 + $0x38] ss:$24 sps:$4 sm:$0xff]  }
 0x11d   : > { %v795_v56 = vsel %vm15639_vm0, %v10075_v54, 0.0  ;;  %1975 = vmatpush1.bf16.msra.mxu0 %v8761_v53 }
 0x11e   : > { %793 = vadd.xlane.f32.xlu0 %v792_v55  ;;  %v796_v57 = vadd.f32 %v795_v56, %v10071_v52  ;;  %v8766_v55 = vld [vmem:[%s15572_s2 + $0x6c] ss:$24 sps:$4 sm:$0xff]   ;;  %v8764_v56 = vld [vmem:[%s15572_s2 + $0x68] ss:$24 sps:$4 sm:$0xff]  }
 0x11f   : > { %1976 = vmatprep.subr.bf16.mxu0 %v8766_v55 }
 0x120   : > { %797 = vadd.xlane.f32.xlu1 %v796_v57  ;;  %v8769_v57 = vld [vmem:[%s15572_s2 + $0x9c] ss:$24 sps:$4 sm:$0xff]  }
 0x121   : > { %v10081_v58 = vpop.f32.mrb[16].mxu0  ;;  %1977 = vmatpush1.bf16.msra.mxu0 %v8764_v56 }
 0x122   : > { %v10083_v59 = vpop.f32.mrb[17].mxu0  ;;  %1978 = vmatprep.subr.bf16.mxu0 %v8769_v57 }
 0x123   : > { %v10085_v60 = vpop.f32.mrb[18].mxu0  ;;  %v799_v61 = vsel %vm15639_vm0, %v10083_v59, 0.0 }
 0x124   : > { %v10089_v62 = vpop.f32.mrb[19].mxu0  ;;  %v800_v63 = vadd.f32 %v799_v61, %v10081_v58  ;;  %v8767_v61 = vld [vmem:[%s15572_s2 + $0x98] ss:$24 sps:$4 sm:$0xff]  }
 0x125   : > { %v803_v0 = vsel %vm15639_vm0, %v10089_v62, 0.0  ;;  %1979 = vmatpush1.bf16.msra.mxu0 %v8767_v61 }
 0x126   : > { %801 = vadd.xlane.f32.xlu0 %v800_v63  ;;  %v804_v1 = vadd.f32 %v803_v0, %v10085_v60 }
 0x128   : > { %805 = vadd.xlane.f32.xlu1 %v804_v1 }
 0x129   : > { %v10095_v3 = vpop.f32.mrb[20].mxu0 }
 0x12a   : > { %v10097_v4 = vpop.f32.mrb[21].mxu0 }
 0x12b   : > { %v10099_v5 = vpop.f32.mrb[22].mxu0  ;;  %v807_v6 = vsel %vm15639_vm0, %v10097_v4, 0.0 }
 0x12c   : > { %v10103_v7 = vpop.f32.mrb[23].mxu0  ;;  %v808_v8 = vadd.f32 %v807_v6, %v10095_v3 }
 0x12d   : > { %v811_v9 = vsel %vm15639_vm0, %v10103_v7, 0.0 }
 0x12e   : > { %809 = vadd.xlane.f32.xlu0 %v808_v8  ;;  %v812_v10 = vadd.f32 %v811_v9, %v10099_v5 }
 0x130   : > { %813 = vadd.xlane.f32.xlu1 %v812_v10 }
 0x131   : > { %v10109_v11 = vpop.f32.mrb[24].mxu0 }
 0x132   : > { %v10111_v12 = vpop.f32.mrb[25].mxu0 }
 0x133   : > { %v10113_v13 = vpop.f32.mrb[26].mxu0  ;;  %v815_v14 = vsel %vm15639_vm0, %v10111_v12, 0.0 }
 0x134   : > { %v10117_v15 = vpop.f32.mrb[27].mxu0  ;;  %v816_v16 = vadd.f32 %v815_v14, %v10109_v11 }
 0x135   : > { %v819_v17 = vsel %vm15639_vm0, %v10117_v15, 0.0 }
 0x136   : > { %817 = vadd.xlane.f32.xlu0 %v816_v16  ;;  %v820_v18 = vadd.f32 %v819_v17, %v10113_v13 }
 0x138   : > { %821 = vadd.xlane.f32.xlu1 %v820_v18 }
 0x139   : > { %v10123_v19 = vpop.f32.mrb[28].mxu0 }
 0x13a   : > { %v10125_v20 = vpop.f32.mrb[29].mxu0 }
 0x13b   : > { %v10127_v21 = vpop.f32.mrb[30].mxu0  ;;  %v823_v22 = vsel %vm15639_vm0, %v10125_v20, 0.0 }
 0x13c   : > { %v10131_v23 = vpop.f32.mrb[31].mxu0  ;;  %v824_v24 = vadd.f32 %v823_v22, %v10123_v19 }
 0x13d   : > { %v827_v25 = vsel %vm15639_vm0, %v10131_v23, 0.0 }
 0x13e   : > { %825 = vadd.xlane.f32.xlu0 %v824_v24  ;;  %v828_v29 = vadd.f32 %v827_v25, %v10127_v21 }
 0x140   : > { %829 = vadd.xlane.f32.xlu1 %v828_v29 }
 0x141   : > { %v10137_v31 = vpop.f32.mrb[32].mxu0 }
 0x142   : > { %v10139_v32 = vpop.f32.mrb[33].mxu0 }
 0x143   : > { %v10141_v33 = vpop.f32.mrb[34].mxu0  ;;  %v831_v37 = vsel %vm15639_vm0, %v10139_v32, 0.0 }
 0x144   : > { %v10145_v39 = vpop.f32.mrb[35].mxu0  ;;  %v832_v40 = vadd.f32 %v831_v37, %v10137_v31 }
 0x145   : > { %v835_v41 = vsel %vm15639_vm0, %v10145_v39, 0.0 }
 0x146   : > { %833 = vadd.xlane.f32.xlu0 %v832_v40  ;;  %v836_v45 = vadd.f32 %v835_v41, %v10141_v33 }
 0x148   : > { %837 = vadd.xlane.f32.xlu1 %v836_v45 }
 0x193   : > { %v770_v63 = vpop.xlane.xlu0 %769 }
 0x194   : > { %v840_v0 = vmul.f32 0.00625, %v770_v63 }
 0x196   : > { %v10176_v1 = vsub.f32 %v10025_v26, %v840_v0  ;;  %v10179_v6 = vsub.f32 %v10027_v27, %v840_v0 }
 0x197   : > { %v774_v8 = vpop.xlane.xlu0 %773 }
 0x198   : > { %v841_v9 = vmul.f32 0.00625, %v774_v8  ;;  %v894_v10 = vmul.f32 %v10176_v1, %v10176_v1  ;;  %v895_v14 = vmul.f32 %v10179_v6, %v10179_v6 }
 0x19a   : > { %v10186_v16 = vsub.f32 %v10029_v28, %v841_v9  ;;  %v10189_v17 = vsub.f32 %v10033_v30, %v841_v9  ;;  %v930_v26 = vsel %vm15639_vm0, %v895_v14, 0.0 }
 0x19b   : > { %v778_v18 = vpop.xlane.xlu1 %777  ;;  %v931_v22 = vadd.f32 %v930_v26, %v894_v10 }
 0x19c   : > { %v842_v27 = vmul.f32 0.00625, %v778_v18  ;;  %v896_v24 = vmul.f32 %v10186_v16, %v10186_v16  ;;  %v897_v25 = vmul.f32 %v10189_v17, %v10189_v17 }
 0x19d   : > { %932 = vadd.xlane.f32.xlu0 %v931_v22 }
 0x19e   : > { %v10197_v29 = vsub.f32 %v10039_v34, %v842_v27  ;;  %v10200_v28 = vsub.f32 %v10041_v35, %v842_v27  ;;  %v934_v30 = vsel %vm15639_vm0, %v897_v25, 0.0 }
 0x19f   : > { %v782_v37 = vpop.xlane.xlu1 %781  ;;  %v935_v40 = vadd.f32 %v934_v30, %v896_v24 }
 0x1a0   : > { %v843_v41 = vmul.f32 0.00625, %v782_v37  ;;  %v898_v45 = vmul.f32 %v10197_v29, %v10197_v29  ;;  %v899_v47 = vmul.f32 %v10200_v28, %v10200_v28 }
 0x1a1   : > { %936 = vadd.xlane.f32.xlu1 %v935_v40 }
 0x1a2   : > { %v10208_v48 = vsub.f32 %v10043_v36, %v843_v41  ;;  %v10211_v34 = vsub.f32 %v10047_v38, %v843_v41  ;;  %v938_v35 = vsel %vm15639_vm0, %v899_v47, 0.0  ;;  %v8770_v41 = vld [vmem:[%s15572_s2 + $0x4] ss:$24 sps:$4 sm:$0xff]  }
 0x1a3   : > { %v786_v49 = vpop.xlane.xlu0 %785  ;;  %v939_v53 = vadd.f32 %v938_v35, %v898_v45  ;;  %v8772_v45 = vld [vmem:[%s15572_s2] ss:$24 sps:$4 sm:$0xff]   ;;  %1849 = vmatprep.subr.bf16.mxu1 %v8770_v41 }
 0x1a4   : > { %v844_v55 = vmul.f32 0.00625, %v786_v49  ;;  %v900_v56 = vmul.f32 %v10208_v48, %v10208_v48  ;;  %v901_v57 = vmul.f32 %v10211_v34, %v10211_v34  ;;  %1850 = vmatpush1.bf16.msra.mxu1 %v8772_v45 }
 0x1a5   : > { %v790_v61 = vpop.xlane.xlu1 %789  ;;  %940 = vadd.xlane.f32.xlu0 %v939_v53 }
 0x1a6   : > { %v10219_v63 = vsub.f32 %v10053_v42, %v844_v55  ;;  %v10222_v36 = vsub.f32 %v10055_v43, %v844_v55  ;;  %v845_v38 = vmul.f32 0.00625, %v790_v61  ;;  %v942_v0 = vsel %vm15639_vm0, %v901_v57, 0.0  ;;  %v8778_v57 = vld [vmem:[%s15572_s2 + $0x30] ss:$24 sps:$4 sm:$0xff]  }
 0x1a7   : > { %v943_v8 = vadd.f32 %v942_v0, %v900_v56 }
 0x1a8   : > { %v10226_v9 = vsub.f32 %v10057_v44, %v845_v38  ;;  %v10229_v10 = vsub.f32 %v10061_v46, %v845_v38  ;;  %v902_v14 = vmul.f32 %v10219_v63, %v10219_v63  ;;  %v903_v42 = vmul.f32 %v10222_v36, %v10222_v36 }
 0x1a9   : > { %944 = vadd.xlane.f32.xlu1 %v943_v8 }
 0x1aa   : > { %v946_v43 = vsel %vm15639_vm0, %v903_v42, 0.0  ;;  %v904_v26 = vmul.f32 %v10226_v9, %v10226_v9  ;;  %v905_v18 = vmul.f32 %v10229_v10, %v10229_v10 }
 0x1ab   : > { %v794_v44 = vpop.xlane.xlu0 %793  ;;  %v947_v22 = vadd.f32 %v946_v43, %v902_v14 }
 0x1ac   : > { %v846_v27 = vmul.f32 0.00625, %v794_v44  ;;  %v950_v46 = vsel %vm15639_vm0, %v905_v18, 0.0  ;;  %v8784_v18 = vld [vmem:[%s15572_s2 + $0x60] ss:$24 sps:$4 sm:$0xff]  }
 0x1ad   : > { %v798_v24 = vpop.xlane.xlu1 %797  ;;  %948 = vadd.xlane.f32.xlu0 %v947_v22  ;;  %v951_v25 = vadd.f32 %v950_v46, %v904_v26  ;;  %v8779_v26 = vld [vmem:[%s15572_s2 + $0x64] ss:$24 sps:$4 sm:$0xff]  }
 0x1ae   : > { %v10242_v30 = vsub.f32 %v10067_v50, %v846_v27  ;;  %v10245_v37 = vsub.f32 %v10069_v51, %v846_v27  ;;  %v847_v40 = vmul.f32 0.00625, %v798_v24 }
 0x1af   : > { %952 = vadd.xlane.f32.xlu1 %v951_v25 }
 0x1b0   : > { %v10254_v47 = vsub.f32 %v10071_v52, %v847_v40  ;;  %v10257_v35 = vsub.f32 %v10075_v54, %v847_v40  ;;  %v906_v50 = vmul.f32 %v10242_v30, %v10242_v30  ;;  %v907_v51 = vmul.f32 %v10245_v37, %v10245_v37  ;;  %v8776_v54 = vld [vmem:[%s15572_s2 + $0x34] ss:$24 sps:$4 sm:$0xff]   ;;  %v8787_v40 = vld [vmem:[%s15572_s2 + $0x90] ss:$24 sps:$4 sm:$0xff]  }
 0x1b1   : > { %1851 = vmatprep.subr.bf16.mxu1 %v8776_v54  ;;  %v8773_v54 = vld [vmem:[%s15572_s2 + $0xc8] ss:$24 sps:$4 sm:$0xff]  }
 0x1b2   : > { %v954_v49 = vsel %vm15639_vm0, %v907_v51, 0.0  ;;  %v908_v53 = vmul.f32 %v10254_v47, %v10254_v47  ;;  %v909_v52 = vmul.f32 %v10257_v35, %v10257_v35  ;;  %1852 = vmatpush1.bf16.msra.mxu1 %v8778_v57 }
 0x1b3   : > { %v802_v55 = vpop.xlane.xlu0 %801  ;;  %v955_v56 = vadd.f32 %v954_v49, %v906_v50  ;;  %1853 = vmatprep.subr.bf16.mxu1 %v8779_v26 }
 0x1b4   : > { %v848_v61 = vmul.f32 0.00625, %v802_v55  ;;  %v958_v38 = vsel %vm15639_vm0, %v909_v52, 0.0  ;;  %v8775_v55 = vld [vmem:[%s15572_s2 + $0xcc] ss:$24 sps:$4 sm:$0xff]  }
 0x1b5   : > { %v806_v0 = vpop.xlane.xlu1 %805  ;;  %956 = vadd.xlane.f32.xlu0 %v955_v56  ;;  %v959_v8 = vadd.f32 %v958_v38, %v908_v53  ;;  %v8788_v56 = vld [vmem:[%s15572_s2 + $0xc4] ss:$24 sps:$4 sm:$0xff]   ;;  %1980 = vmatprep.subr.bf16.mxu0 %v8775_v55 }
 0x1b6   : > { %v10276_v14 = vsub.f32 %v10081_v58, %v848_v61  ;;  %v10279_v42 = vsub.f32 %v10083_v59, %v848_v61  ;;  %v849_v43 = vmul.f32 0.00625, %v806_v0  ;;  %1854 = vmatpush1.bf16.msra.mxu1 %v8784_v18  ;;  %1981 = vmatpush1.bf16.msra.mxu0 %v8773_v54 }
 0x1b7   : > { %960 = vadd.xlane.f32.xlu1 %v959_v8 }
 0x1b8   : > { %v10288_v44 = vsub.f32 %v10085_v60, %v849_v43  ;;  %v10291_v22 = vsub.f32 %v10089_v62, %v849_v43  ;;  %v910_v58 = vmul.f32 %v10276_v14, %v10276_v14  ;;  %v911_v59 = vmul.f32 %v10279_v42, %v10279_v42  ;;  %v8785_v62 = vld [vmem:[%s15572_s2 + $0x94] ss:$24 sps:$4 sm:$0xff]  }
 0x1b9   : > { %1855 = vmatprep.subr.bf16.mxu1 %v8785_v62  ;;  %v8794_v43 = vld [vmem:[%s15572_s2 + $0xf4] ss:$24 sps:$4 sm:$0xff]  }
 0x1ba   : > { %v962_v27 = vsel %vm15639_vm0, %v911_v59, 0.0  ;;  %v912_v46 = vmul.f32 %v10288_v44, %v10288_v44  ;;  %v913_v60 = vmul.f32 %v10291_v22, %v10291_v22  ;;  %1856 = vmatpush1.bf16.msra.mxu1 %v8787_v40  ;;  %v8796_v59 = vld [vmem:[%s15572_s2 + $0xf0] ss:$24 sps:$4 sm:$0xff]  }
 0x1bb   : > { %v810_v24 = vpop.xlane.xlu0 %809  ;;  %v963_v25 = vadd.f32 %v962_v27, %v910_v58  ;;  %1857 = vmatprep.subr.bf16.mxu1 %v8788_v56  ;;  %v8781_v58 = vld [vmem:[%s15572_s2 + $0xf8] ss:$24 sps:$4 sm:$0xff]  }
 0x1bc   : > { %v850_v41 = vmul.f32 0.00625, %v810_v24  ;;  %v966_v45 = vsel %vm15639_vm0, %v913_v60, 0.0 }
 0x1bd   : > { %v814_v50 = vpop.xlane.xlu1 %813  ;;  %964 = vadd.xlane.f32.xlu0 %v963_v25  ;;  %v967_v51 = vadd.f32 %v966_v45, %v912_v46  ;;  %v8800_v45 = vld [vmem:[%s15572_s2 + $0x124] ss:$24 sps:$4 sm:$0xff]  }
 0x1be   : > { %v10310_v49 = vsub.f32 %v10095_v3, %v850_v41  ;;  %v10313_v53 = vsub.f32 %v10097_v4, %v850_v41  ;;  %v851_v52 = vmul.f32 0.00625, %v814_v50  ;;  %v8793_v3 = vld [vmem:[%s15572_s2 + $0xc0] ss:$24 sps:$4 sm:$0xff]   ;;  %v8792_v41 = vld [vmem:[%s15572_s2 + $0x12c] ss:$24 sps:$4 sm:$0xff]  }
 0x1bf   : > { %968 = vadd.xlane.f32.xlu1 %v967_v51  ;;  %1858 = vmatpush1.bf16.msra.mxu1 %v8793_v3  ;;  %v8790_v50 = vld [vmem:[%s15572_s2 + $0x128] ss:$24 sps:$4 sm:$0xff]   ;;  %v8803_v3 = vld [vmem:[%s15572_s2 + $0x154] ss:$24 sps:$4 sm:$0xff]  }
 0x1c0   : > { %v10328_v4 = vsub.f32 %v10099_v5, %v851_v52  ;;  %v10331_v57 = vsub.f32 %v10103_v7, %v851_v52  ;;  %v914_v61 = vmul.f32 %v10310_v49, %v10310_v49  ;;  %v915_v38 = vmul.f32 %v10313_v53, %v10313_v53  ;;  %v8783_v7 = vld [vmem:[%s15572_s2 + $0xfc] ss:$24 sps:$4 sm:$0xff]   ;;  %1859 = vmatprep.subr.bf16.mxu1 %v8794_v43 }
 0x1c1   : > { %1982 = vmatprep.subr.bf16.mxu0 %v8783_v7 }
 0x1c2   : > { %v970_v0 = vsel %vm15639_vm0, %v915_v38, 0.0  ;;  %v916_v8 = vmul.f32 %v10328_v4, %v10328_v4  ;;  %v917_v5 = vmul.f32 %v10331_v57, %v10331_v57  ;;  %1983 = vmatpush1.bf16.msra.mxu0 %v8781_v58 }
 0x1c3   : > { %v818_v26 = vpop.xlane.xlu0 %817  ;;  %v971_v18 = vadd.f32 %v970_v0, %v914_v61  ;;  %1860 = vmatpush1.bf16.msra.mxu1 %v8796_v59  ;;  %1984 = vmatprep.subr.bf16.mxu0 %v8792_v41  ;;  %v8797_v0 = vld [vmem:[%s15572_s2 + $0x158] ss:$24 sps:$4 sm:$0xff]  }
 0x1c4   : > { %v852_v27 = vmul.f32 0.00625, %v818_v26  ;;  %v974_v46 = vsel %vm15639_vm0, %v917_v5, 0.0  ;;  %1861 = vmatprep.subr.bf16.mxu1 %v8800_v45 }
 0x1c5   : > { %v822_v60 = vpop.xlane.xlu1 %821  ;;  %972 = vadd.xlane.f32.xlu0 %v971_v18  ;;  %v975_v62 = vadd.f32 %v974_v46, %v916_v8  ;;  %v8805_v8 = vld [vmem:[%s15572_s2 + $0x150] ss:$24 sps:$4 sm:$0xff]   ;;  %v8809_v46 = vld [vmem:[%s15572_s2 + $0x184] ss:$24 sps:$4 sm:$0xff]  }
 0x1c6   : > { %v10356_v24 = vsub.f32 %v10109_v11, %v852_v27  ;;  %v10359_v25 = vsub.f32 %v10111_v12, %v852_v27  ;;  %v853_v40 = vmul.f32 0.00625, %v822_v60  ;;  %v8802_v11 = vld [vmem:[%s15572_s2 + $0x120] ss:$24 sps:$4 sm:$0xff]   ;;  %1985 = vmatpush1.bf16.msra.mxu0 %v8790_v50  ;;  %v8808_v27 = vld [vmem:[%s15572_s2 + $0x18c] ss:$24 sps:$4 sm:$0xff]  }
 0x1c7   : > { %976 = vadd.xlane.f32.xlu1 %v975_v62  ;;  %1862 = vmatpush1.bf16.msra.mxu1 %v8802_v11  ;;  %v8806_v60 = vld [vmem:[%s15572_s2 + $0x188] ss:$24 sps:$4 sm:$0xff]   ;;  %v8816_v11 = vld [vmem:[%s15572_s2 + $0x1bc] ss:$24 sps:$4 sm:$0xff]  }
 0x1c8   : > { %v10374_v12 = vsub.f32 %v10113_v13, %v853_v40  ;;  %v10377_v51 = vsub.f32 %v10117_v15, %v853_v40  ;;  %v918_v52 = vmul.f32 %v10356_v24, %v10356_v24  ;;  %v919_v54 = vmul.f32 %v10359_v25, %v10359_v25  ;;  %v8799_v15 = vld [vmem:[%s15572_s2 + $0x15c] ss:$24 sps:$4 sm:$0xff]   ;;  %1863 = vmatprep.subr.bf16.mxu1 %v8803_v3 }
 0x1c9   : > { %1986 = vmatprep.subr.bf16.mxu0 %v8799_v15 }
 0x1ca   : > { %v978_v55 = vsel %vm15639_vm0, %v919_v54, 0.0  ;;  %v920_v56 = vmul.f32 %v10374_v12, %v10374_v12  ;;  %v921_v13 = vmul.f32 %v10377_v51, %v10377_v51  ;;  %1987 = vmatpush1.bf16.msra.mxu0 %v8797_v0 }
 0x1cb   : > { %v826_v61 = vpop.xlane.xlu0 %825  ;;  %v979_v38 = vadd.f32 %v978_v55, %v918_v52  ;;  %1864 = vmatpush1.bf16.msra.mxu1 %v8805_v8  ;;  %1988 = vmatprep.subr.bf16.mxu0 %v8808_v27  ;;  %v8814_v55 = vld [vmem:[%s15572_s2 + $0x1b8] ss:$24 sps:$4 sm:$0xff]  }
 0x1cc   : > { %v854_v5 = vmul.f32 0.00625, %v826_v61  ;;  %v982_v7 = vsel %vm15639_vm0, %v921_v13, 0.0  ;;  %1865 = vmatprep.subr.bf16.mxu1 %v8809_v46  ;;  %v8820_v46 = vld [vmem:[%s15572_s2 + $0x14] ss:$24 sps:$4 sm:$0xff]  }
 0x1cd   : > { %v830_v43 = vpop.xlane.xlu1 %829  ;;  %980 = vadd.xlane.f32.xlu0 %v979_v38  ;;  %v983_v26 = vadd.f32 %v982_v7, %v920_v56  ;;  %v8817_v56 = vld [vmem:[%s15572_s2 + $0x1b0] ss:$24 sps:$4 sm:$0xff]  }
 0x1ce   : > { %v10402_v18 = vsub.f32 %v10123_v19, %v854_v5  ;;  %v10405_v58 = vsub.f32 %v10125_v20, %v854_v5  ;;  %v855_v59 = vmul.f32 0.00625, %v830_v43  ;;  %v8811_v19 = vld [vmem:[%s15572_s2 + $0x180] ss:$24 sps:$4 sm:$0xff]   ;;  %1989 = vmatpush1.bf16.msra.mxu0 %v8806_v60 }
 0x1cf   : > { %984 = vadd.xlane.f32.xlu1 %v983_v26  ;;  %1866 = vmatpush1.bf16.msra.mxu1 %v8811_v19 }
 0x1d0   : > { %v10420_v20 = vsub.f32 %v10127_v21, %v855_v59  ;;  %v10423_v62 = vsub.f32 %v10131_v23, %v855_v59  ;;  %v922_v40 = vmul.f32 %v10402_v18, %v10402_v18  ;;  %v923_v41 = vmul.f32 %v10405_v58, %v10405_v58  ;;  %v8812_v23 = vld [vmem:[%s15572_s2 + $0x1b4] ss:$24 sps:$4 sm:$0xff]   ;;  %1990 = vmatprep.subr.bf16.mxu0 %v8816_v11 }
 0x1d1   : > { %1867 = vmatprep.subr.bf16.mxu1 %v8812_v23 }
 0x1d2   : > { %v986_v45 = vsel %vm15639_vm0, %v923_v41, 0.0  ;;  %v924_v50 = vmul.f32 %v10420_v20, %v10420_v20  ;;  %v925_v21 = vmul.f32 %v10423_v62, %v10423_v62  ;;  %1991 = vmatpush1.bf16.msra.mxu0 %v8814_v55 }
 0x1d3   : > { %v834_v52 = vpop.xlane.xlu0 %833  ;;  %v987_v54 = vadd.f32 %v986_v45, %v922_v40  ;;  %1868 = vmatpush1.bf16.msra.mxu1 %v8817_v56  ;;  %2323 = vmatprep.subr.bf16.mxu0 %v15586_v2  ;;  %v15585_v40 = vlaneseq  ;;  %v473_v56 = vld [vmem:[%s15583_s13 + $0x8] sm:$0xff] }
 0x1d4   : > { %v856_v13 = vmul.f32 0.00625, %v834_v52  ;;  %v990_v15 = vsel %vm15639_vm0, %v925_v21, 0.0  ;;  %2095 = vmatprep.subr.bf16.mxu1 %v8820_v46 }
 0x1d5   : > { %988 = vadd.xlane.f32.xlu0 %v987_v54  ;;  %v838_v3 = vpop.xlane.xlu1 %837  ;;  %v991_v61 = vadd.f32 %v990_v15, %v924_v50  ;;  %v10474_v21 = vshrl.u32 %v15585_v40, 7 }
 0x1d6   : > { %v10448_v38 = vsub.f32 %v10137_v31, %v856_v13  ;;  %v10451_v0 = vsub.f32 %v10139_v32, %v856_v13  ;;  %v857_v8 = vmul.f32 0.00625, %v838_v3  ;;  %v472_v13 = vld [vmem:[%s15583_s13] sm:$0xff] }
 0x1d7   : > { %992 = vadd.xlane.f32.xlu1 %v991_v61  ;;  %15934 = vst [vmem:[#allocation2_spill] sm:$0xff] %v10474_v21  ;;  %v10477_v54 = vsub.s32 0, %v10474_v21  ;;  %v10486_v3 = vsub.s32 1, %v10474_v21 }
 0x1d8   : > { %v10455_v5 = vsub.f32 %v10141_v33, %v857_v8  ;;  %v10458_v7 = vsub.f32 %v10145_v39, %v857_v8  ;;  %v926_v43 = vmul.f32 %v10448_v38, %v10448_v38  ;;  %v927_v31 = vmul.f32 %v10451_v0, %v10451_v0 }
 0x1d9   : > { %15935 = vst [vmem:[#allocation3_spill] sm:$0xff] %v10477_v54  ;;  %15936 = vst [vmem:[#allocation4_spill] sm:$0xff] %v10486_v3  ;;  %v10489_v8 = vrot.slane %v473_v56, %v10477_v54 }
 0x1da   : > { %v994_v32 = vsel %vm15639_vm0, %v927_v31, 0.0  ;;  %v928_v26 = vmul.f32 %v10455_v5, %v10455_v5  ;;  %v929_v59 = vmul.f32 %v10458_v7, %v10458_v7 }
 0x1db   : > { %v995_v27 = vadd.f32 %v994_v32, %v926_v43  ;;  %v10492_v43 = vrot.slane %v472_v13, %v10477_v54 }
 0x1dc   : > { %v998_v33 = vsel %vm15639_vm0, %v929_v59, 0.0 }
 0x1dd   : > { %996 = vadd.xlane.f32.xlu0 %v995_v27  ;;  %v999_v39 = vadd.f32 %v998_v33, %v928_v26  ;;  %v10497_v33 = vrot.slane %v473_v56, %v10486_v3 }
 0x1df   : > { %1000 = vadd.xlane.f32.xlu1 %v999_v39  ;;  %v10500_v39 = vrot.slane %v472_v13, %v10486_v3 }
 0x22a   : > { %v933_v60 = vpop.xlane.xlu0 %932 }
 0x22b   : > { %v1002_v19 = vmul.f32 0.00625, %v933_v60 }
 0x22d   : > { %v1020_v41 = vadd.f32 1e-05, %v1002_v19 }
 0x22e   : > { %v937_v45 = vpop.xlane.xlu1 %936 }
 0x22f   : > { %9144 = vrsqrt.f32 %v1020_v41  ;;  %v1003_v50 = vmul.f32 0.00625, %v937_v45 }
 0x231   : > { %v1021_v23 = vadd.f32 1e-05, %v1003_v50 }
 0x232   : > { %v941_v11 = vpop.xlane.xlu0 %940 }
 0x233   : > { %9146 = vrsqrt.f32 %v1021_v23  ;;  %v1004_v52 = vmul.f32 0.00625, %v941_v11 }
 0x235   : > { %v1022_v55 = vadd.f32 1e-05, %v1004_v52 }
 0x236   : > { %v945_v15 = vpop.xlane.xlu1 %944 }
 0x237   : > { %9148 = vrsqrt.f32 %v1022_v55  ;;  %v1005_v61 = vmul.f32 0.00625, %v945_v15 }
 0x239   : > { %v9145_v31 = vpop.eup %9144  ;;  %v1023_v32 = vadd.f32 1e-05, %v1005_v61 }
 0x23a   : > { %v1056_v26 = vmul.f32 %v9145_v31, %v10176_v1  ;;  %v1057_v59 = vmul.f32 %v9145_v31, %v10179_v6  ;;  %v949_v27 = vpop.xlane.xlu0 %948 }
 0x23b   : > { %9150 = vrsqrt.f32 %v1023_v32  ;;  %v1006_v46 = vmul.f32 0.00625, %v949_v27 }
 0x23c   : > { %v953_v60 = vpop.xlane.xlu1 %952  ;;  %v1101_v19 = vmul.f32 %v10489_v8, %v1057_v59  ;;  %v1100_v41 = vmul.f32 %v10492_v43, %v1056_v26 }
 0x23d   : > { %v9147_v45 = vpop.eup %9146  ;;  %v1024_v50 = vadd.f32 1e-05, %v1006_v46  ;;  %v1007_v23 = vmul.f32 0.00625, %v953_v60 }
 0x23e   : > { %v1058_v1 = vmul.f32 %v9147_v45, %v10186_v16  ;;  %v1059_v6 = vmul.f32 %v9147_v45, %v10189_v17  ;;  %v1145_v11 = vadd.f32 %v10497_v33, %v1101_v19  ;;  %v1144_v52 = vadd.f32 %v10500_v39, %v1100_v41 }
 0x23f   : > { %9152 = vrsqrt.f32 %v1024_v50  ;;  %v1025_v55 = vadd.f32 1e-05, %v1007_v23 }
 0x240   : > { %v1103_v56 = vmul.f32 %v10489_v8, %v1059_v6  ;;  %v1217_v13 = vmul.f32 0.70710677, %v1145_v11  ;;  %v1102_v15 = vmul.f32 %v10492_v43, %v1058_v1  ;;  %v1216_v31 = vmul.f32 0.70710677, %v1144_v52 }
 0x241   : > { %v9149_v61 = vpop.eup %9148  ;;  %9154 = vrsqrt.f32 %v1025_v55 }
 0x242   : > { %v1060_v32 = vmul.f32 %v9149_v61, %v10197_v29  ;;  %v1061_v16 = vmul.f32 %v9149_v61, %v10200_v28  ;;  %v957_v26 = vpop.xlane.xlu0 %956  ;;  %v1147_v17 = vadd.f32 %v10497_v33, %v1103_v56  ;;  %9156 = verf.f32 %v1217_v13 }
 0x243   : > { %v1008_v59 = vmul.f32 0.00625, %v957_v26  ;;  %v1146_v27 = vadd.f32 %v10500_v39, %v1102_v15  ;;  %9158 = verf.f32 %v1216_v31 }
 0x244   : > { %v961_v46 = vpop.xlane.xlu1 %960  ;;  %v1219_v60 = vmul.f32 0.70710677, %v1147_v17  ;;  %v1105_v19 = vmul.f32 %v10489_v8, %v1061_v16  ;;  %v1104_v41 = vmul.f32 %v10492_v43, %v1060_v32  ;;  %v1183_v40 = vmul.f32 0.5, %v1147_v17 }
 0x245   : > { %v9151_v45 = vpop.eup %9150  ;;  %v1026_v50 = vadd.f32 1e-05, %v1008_v59  ;;  %v1009_v23 = vmul.f32 0.00625, %v961_v46  ;;  %v1218_v1 = vmul.f32 0.70710677, %v1146_v27 }
 0x246   : > { %v1062_v29 = vmul.f32 %v9151_v45, %v10208_v48  ;;  %v1063_v28 = vmul.f32 %v9151_v45, %v10211_v34  ;;  %9160 = verf.f32 %v1219_v60  ;;  %v10519_v55 = vadd.f32 %v10497_v33, %v1105_v19 }
 0x247   : > { %9162 = vrsqrt.f32 %v1026_v50  ;;  %v1027_v6 = vadd.f32 1e-05, %v1009_v23  ;;  %v10524_v15 = vadd.f32 %v10500_v39, %v1104_v41  ;;  %v1181_v41 = vmul.f32 0.5, %v1145_v11 }
 0x248   : > { %9164 = verf.f32 %v1218_v1  ;;  %v1107_v56 = vmul.f32 %v10489_v8, %v1063_v28  ;;  %v1106_v13 = vmul.f32 %v10492_v43, %v1062_v29  ;;  %v1221_v48 = vmul.f32 0.70710677, %v10519_v55 }
 0x249   : > { %v9153_v61 = vpop.eup %9152  ;;  %9166 = vrsqrt.f32 %v1027_v6  ;;  %v1220_v50 = vmul.f32 0.70710677, %v10524_v15  ;;  %v1180_v11 = vmul.f32 0.5, %v1144_v52 }
 0x24a   : > { %v1065_v34 = vmul.f32 %v9153_v61, %v10222_v36  ;;  %v965_v31 = vpop.xlane.xlu0 %964  ;;  %v10529_v32 = vadd.f32 %v10497_v33, %v1107_v56  ;;  %v10532_v16 = vadd.f32 %v10500_v39, %v1106_v13  ;;  %9168 = verf.f32 %v1221_v48 }
 0x24b   : > { %v9155_v26 = vpop.eup %9154  ;;  %v1010_v59 = vmul.f32 0.00625, %v965_v31  ;;  %v1064_v23 = vmul.f32 %v9153_v61, %v10219_v63 }
 0x24c   : > { %v9157_v46 = vpop.eup %9156  ;;  %v1067_v60 = vmul.f32 %v9155_v26, %v10229_v10  ;;  %v969_v19 = vpop.xlane.xlu1 %968  ;;  %v1223_v45 = vmul.f32 0.70710677, %v10529_v32  ;;  %v1066_v29 = vmul.f32 %v9155_v26, %v10226_v9  ;;  %v1222_v56 = vmul.f32 0.70710677, %v10532_v16 }
 0x24d   : > { %v9159_v36 = vpop.eup %9158  ;;  %v1028_v28 = vadd.f32 1e-05, %v1010_v59  ;;  %v1011_v1 = vmul.f32 0.00625, %v969_v19  ;;  %v1289_v6 = vadd.f32 1.0, %v9157_v46  ;;  %v1109_v13 = vmul.f32 %v10489_v8, %v1065_v34 }
 0x24e   : > { %9170 = verf.f32 %v1223_v45  ;;  %v1111_v48 = vmul.f32 %v10489_v8, %v1067_v60  ;;  %v1288_v2 = vadd.f32 1.0, %v9159_v36  ;;  %v1182_v26 = vmul.f32 0.5, %v1146_v27 }
 0x24f   : > { %9172 = vrsqrt.f32 %v1028_v28  ;;  %v1029_v10 = vadd.f32 1e-05, %v1011_v1  ;;  %v10543_v63 = vadd.f32 %v10497_v33, %v1109_v13  ;;  %v10548_v19 = vmul.f32 %v1289_v6, %v1181_v41 }
 0x250   : > { %v9161_v31 = vpop.eup %9160  ;;  %9174 = verf.f32 %v1220_v50  ;;  %v10546_v59 = vadd.f32 %v10497_v33, %v1111_v48  ;;  %v1108_v52 = vmul.f32 %v10492_v43, %v1064_v23  ;;  %v1110_v17 = vmul.f32 %v10492_v43, %v1066_v29 }
 0x251   : > { %v9163_v9 = vpop.eup %9162  ;;  %9176 = vrsqrt.f32 %v1029_v10  ;;  %v1291_v61 = vadd.f32 1.0, %v9161_v31  ;;  %15937 = vst [vmem:[#allocation5_spill] sm:$0xff] %v10548_v19  ;;  %v10556_v13 = vmul.f32 %v1288_v2, %v1180_v11  ;;  %v1225_v41 = vmul.f32 0.70710677, %v10543_v63  ;;  %v8818_v11 = vld [vmem:[%s15572_s2 + $0x10] ss:$24 sps:$4 sm:$0xff]  }
 0x252   : > { %v9165_v34 = vpop.eup %9164  ;;  %v973_v46 = vpop.xlane.xlu0 %972  ;;  %9178 = verf.f32 %v1222_v56  ;;  %v1069_v45 = vmul.f32 %v9163_v9, %v10245_v37  ;;  %v1227_v6 = vmul.f32 0.70710677, %v10546_v59  ;;  %v10570_v2 = vadd.f32 %v10500_v39, %v1110_v17 }
 0x253   : > { %v9167_v60 = vpop.eup %9166  ;;  %v1012_v50 = vmul.f32 0.00625, %v973_v46  ;;  %v10553_v36 = vmul.f32 %v1291_v61, %v1183_v40  ;;  %v1290_v28 = vadd.f32 1.0, %v9165_v34  ;;  %15939 = vst [vmem:[#allocation7_spill] sm:$0xff] %v10556_v13  ;;  %9180 = verf.f32 %v1225_v41  ;;  %v8823_v34 = vld [vmem:[%s15572_s2 + $0x44] ss:$24 sps:$4 sm:$0xff]  }
 0x254   : > { %v1071_v27 = vmul.f32 %v9167_v60, %v10257_v35  ;;  %v977_v1 = vpop.xlane.xlu1 %976  ;;  %v9169_v56 = vpop.eup %9168  ;;  %v10567_v35 = vadd.f32 %v10500_v39, %v1108_v52  ;;  %v1185_v31 = vmul.f32 0.5, %v10519_v55  ;;  %v1184_v61 = vmul.f32 0.5, %v10524_v15 }
 0x255   : > { %15938 = vst [vmem:[#allocation6_spill] sm:$0xff] %v10553_v36  ;;  %v1030_v23 = vadd.f32 1e-05, %v1012_v50  ;;  %v1013_v10 = vmul.f32 0.00625, %v977_v1  ;;  %v10562_v29 = vpack.c.bf16 %v10553_v36, %v10548_v19  ;;  %v10564_v37 = vmul.f32 %v1290_v28, %v1182_v26 }
 0x256   : > { %v1293_v40 = vadd.f32 1.0, %v9169_v56  ;;  %v1113_v26 = vmul.f32 %v10489_v8, %v1069_v45  ;;  %v1187_v17 = vmul.f32 0.5, %v10529_v32  ;;  %v1186_v50 = vmul.f32 0.5, %v10532_v16 }
 0x257   : > { %15940 = vst [vmem:[#allocation8_spill] sm:$0xff] %v10564_v37  ;;  %8384 = vmatprep.mubr.msk.bf16.mxu1 %vm15639_vm0, %v10562_v29  ;;  %8393 = vmatprep.mubr.msk.bf16.mxu0 %vm15639_vm0, %v10562_v29  ;;  %v10581_v48 = vpack.c.bf16 %v10564_v37, %v10556_v13  ;;  %v1031_v52 = vadd.f32 1e-05, %v1013_v10  ;;  %9182 = verf.f32 %v1227_v6  ;;  %v1068_v1 = vmul.f32 %v9163_v9, %v10242_v30  ;;  %v8821_v30 = vld [vmem:[%s15572_s2 + $0x40] ss:$24 sps:$4 sm:$0xff]  }
 0x258   : > { %v9171_v46 = vpop.eup %9170  ;;  %v1224_v15 = vmul.f32 0.70710677, %v10567_v35  ;;  %v1226_v45 = vmul.f32 0.70710677, %v10570_v2  ;;  %9184 = vrsqrt.f32 %v1030_v23  ;;  %v10596_v10 = vmul.f32 %v1293_v40, %v1185_v31 }
 0x259   : > { %v9173_v28 = vpop.eup %9172  ;;  %1882 = vmatmul.mubr.bf16.vlgmr.msra.gmra.mrb[0].mxu1 %v10581_v48  ;;  %2005 = vmatmul.mubr.bf16.vlgmr.msra.gmra.mrb[36].mxu0 %v10581_v48  ;;  %v1295_v55 = vadd.f32 1.0, %v9171_v46  ;;  %v1115_v32 = vmul.f32 %v10489_v8, %v1071_v27  ;;  %v10600_v16 = vadd.f32 %v10497_v33, %v1113_v26  ;;  %v1070_v40 = vmul.f32 %v9167_v60, %v10254_v47  ;;  %v8826_v26 = vld [vmem:[%s15572_s2 + $0x74] ss:$24 sps:$4 sm:$0xff]  }
 0x25a   : > { %v9175_v41 = vpop.eup %9174  ;;  %v981_v56 = vpop.xlane.xlu0 %980  ;;  %15941 = vst [vmem:[#allocation9_spill] sm:$0xff] %v10596_v10  ;;  %2096 = vmatpush1.bf16.msra.mxu1 %v8818_v11  ;;  %9186 = verf.f32 %v1224_v15  ;;  %v1189_v27 = vmul.f32 0.5, %v10543_v63  ;;  %v1073_v47 = vmul.f32 %v9173_v28, %v10279_v42  ;;  %v1191_v63 = vmul.f32 0.5, %v10546_v59 }
 0x25b   : > { %v9177_v9 = vpop.eup %9176  ;;  %v1014_v6 = vmul.f32 0.00625, %v981_v56  ;;  %v10605_v46 = vmul.f32 %v1295_v55, %v1187_v17  ;;  %v1292_v36 = vadd.f32 1.0, %v9175_v41  ;;  %2097 = vmatprep.subr.bf16.mxu1 %v8823_v34  ;;  %9188 = verf.f32 %v1226_v45  ;;  %v8824_v45 = vld [vmem:[%s15572_s2 + $0x70] ss:$24 sps:$4 sm:$0xff]  }
 0x25c   : > { %v9179_v23 = vpop.eup %9178  ;;  %v985_v31 = vpop.xlane.xlu1 %984  ;;  %v10610_v11 = vadd.f32 %v10497_v33, %v1115_v32  ;;  %9190 = vrsqrt.f32 %v1031_v52  ;;  %v1075_v60 = vmul.f32 %v9177_v9, %v10291_v22  ;;  %v1229_v15 = vmul.f32 0.70710677, %v10600_v16 }
 0x25d   : > { %15942 = vst [vmem:[#allocation10_spill] sm:$0xff] %v10605_v46  ;;  %v1015_v17 = vmul.f32 0.00625, %v985_v31  ;;  %v10617_v55 = vpack.c.bf16 %v10605_v46, %v10596_v10  ;;  %v1294_v34 = vadd.f32 1.0, %v9179_v23  ;;  %v1032_v52 = vadd.f32 1e-05, %v1014_v6  ;;  %v9181_v59 = vpop.eup %9180 }
 0x25e   : > { %2098 = vmatpush1.bf16.msra.mxu1 %v8821_v30  ;;  %v10630_v41 = vmul.f32 %v1292_v36, %v1184_v61  ;;  %v1231_v22 = vmul.f32 0.70710677, %v10610_v11  ;;  %9192 = verf.f32 %v1229_v15  ;;  %v1112_v32 = vmul.f32 %v10492_v43, %v1068_v1  ;;  %v8829_v6 = vld [vmem:[%s15572_s2 + $0xa4] ss:$24 sps:$4 sm:$0xff]  }
 0x25f   : > { %8385 = vmatprep.mubr.msk.bf16.mxu1 %vm15639_vm0, %v10617_v55  ;;  %8394 = vmatprep.mubr.msk.bf16.mxu0 %vm15639_vm0, %v10617_v55  ;;  %v10632_v42 = vmul.f32 %v1294_v34, %v1186_v50  ;;  %v1033_v56 = vadd.f32 1e-05, %v1015_v17  ;;  %v1114_v30 = vmul.f32 %v10492_v43, %v1070_v40  ;;  %v1297_v61 = vadd.f32 1.0, %v9181_v59  ;;  %v8827_v34 = vld [vmem:[%s15572_s2 + $0xa0] ss:$24 sps:$4 sm:$0xff]  }
 0x260   : > { %15943 = vst [vmem:[#allocation11_spill] sm:$0xff] %v10630_v41  ;;  %2099 = vmatprep.subr.bf16.mxu1 %v8826_v26  ;;  %v1188_v50 = vmul.f32 0.5, %v10567_v35  ;;  %v1190_v23 = vmul.f32 0.5, %v10570_v2  ;;  %v1072_v17 = vmul.f32 %v9173_v28, %v10276_v14  ;;  %9194 = verf.f32 %v1231_v22  ;;  %v8832_v28 = vld [vmem:[%s15572_s2 + $0xd4] ss:$24 sps:$4 sm:$0xff]  }
 0x261   : > { %15944 = vst [vmem:[#allocation12_spill] sm:$0xff] %v10632_v42  ;;  %v10642_v36 = vpack.c.bf16 %v10632_v42, %v10630_v41  ;;  %v9183_v31 = vpop.eup %9182  ;;  %v10648_v40 = vadd.f32 %v10500_v39, %v1112_v32  ;;  %v1117_v26 = vmul.f32 %v10489_v8, %v1073_v47  ;;  %9196 = vrsqrt.f32 %v1032_v52 }
 0x262   : > { %v989_v1 = vpop.xlane.xlu0 %988  ;;  %2100 = vmatpush1.bf16.msra.mxu1 %v8824_v45  ;;  %v1299_v2 = vadd.f32 1.0, %v9183_v31  ;;  %v10657_v14 = vadd.f32 %v10500_v39, %v1114_v30  ;;  %v9185_v47 = vpop.eup %9184  ;;  %v1074_v15 = vmul.f32 %v9177_v9, %v10288_v44  ;;  %9198 = vrsqrt.f32 %v1033_v56  ;;  %v8830_v9 = vld [vmem:[%s15572_s2 + $0xd0] ss:$24 sps:$4 sm:$0xff]  }
 0x263   : > { %1892 = vmatmul.mubr.bf16.gmra.mrb[4].mxu1 %v10642_v36  ;;  %2015 = vmatmul.mubr.bf16.gmra.mrb[40].mxu0 %v10642_v36  ;;  %v1016_v35 = vmul.f32 0.00625, %v989_v1  ;;  %v1228_v52 = vmul.f32 0.70710677, %v10648_v40  ;;  %v1119_v22 = vmul.f32 %v10489_v8, %v1075_v60  ;;  %v10665_v1 = vmul.f32 %v1297_v61, %v1189_v27  ;;  %v8835_v61 = vld [vmem:[%s15572_s2 + $0x104] ss:$24 sps:$4 sm:$0xff]  }
 0x264   : > { %v993_v45 = vpop.xlane.xlu1 %992  ;;  %2101 = vmatprep.subr.bf16.mxu1 %v8829_v6  ;;  %v9187_v59 = vpop.eup %9186  ;;  %v10667_v30 = vmul.f32 %v1299_v2, %v1191_v63  ;;  %v1230_v41 = vmul.f32 0.70710677, %v10657_v14  ;;  %v1161_v44 = vadd.f32 %v10497_v33, %v1117_v26  ;;  %v1193_v63 = vmul.f32 0.5, %v10600_v16 }
 0x265   : > { %v1034_v32 = vadd.f32 1e-05, %v1016_v35  ;;  %v1017_v31 = vmul.f32 0.00625, %v993_v45  ;;  %15945 = vst [vmem:[#allocation13_spill] sm:$0xff] %v10665_v1  ;;  %v9189_v46 = vpop.eup %9188  ;;  %v1296_v42 = vadd.f32 1.0, %v9187_v59  ;;  %9200 = verf.f32 %v1228_v52 }
 0x266   : > { %15946 = vst [vmem:[#allocation14_spill] sm:$0xff] %v10667_v30  ;;  %2102 = vmatpush1.bf16.msra.mxu1 %v8827_v34  ;;  %v9191_v60 = vpop.eup %9190  ;;  %v10676_v56 = vpack.c.bf16 %v10667_v30, %v10665_v1  ;;  %v1298_v27 = vadd.f32 1.0, %v9189_v46  ;;  %v1195_v6 = vmul.f32 0.5, %v10610_v11  ;;  %v1076_v26 = vmul.f32 %v9185_v47, %v10310_v49  ;;  %v8833_v45 = vld [vmem:[%s15572_s2 + $0x100] ss:$24 sps:$4 sm:$0xff]  }
 0x267   : > { %2103 = vmatprep.subr.bf16.mxu1 %v8832_v28  ;;  %v1077_v34 = vmul.f32 %v9185_v47, %v10313_v53  ;;  %9202 = verf.f32 %v1230_v41  ;;  %v10686_v35 = vadd.f32 %v10497_v33, %v1119_v22  ;;  %v1035_v2 = vadd.f32 1e-05, %v1017_v31 }
 0x268   : > { %8386 = vmatprep.mubr.msk.bf16.mxu1 %vm15639_vm0, %v10676_v56  ;;  %8395 = vmatprep.mubr.msk.bf16.mxu0 %vm15639_vm0, %v10676_v56  ;;  %v10692_v16 = vmul.f32 %v1296_v42, %v1188_v50  ;;  %v10694_v46 = vmul.f32 %v1298_v27, %v1190_v23  ;;  %v1233_v11 = vmul.f32 0.70710677, %v1161_v44  ;;  %v9193_v28 = vpop.eup %9192  ;;  %v1079_v49 = vmul.f32 %v9191_v60, %v10331_v57  ;;  %v8838_v57 = vld [vmem:[%s15572_s2 + $0x134] ss:$24 sps:$4 sm:$0xff]  }
 0x269   : > { %9204 = vrsqrt.f32 %v1034_v32  ;;  %v1235_v41 = vmul.f32 0.70710677, %v10686_v35  ;;  %v1116_v47 = vmul.f32 %v10492_v43, %v1072_v17  ;;  %v1301_v23 = vadd.f32 1.0, %v9193_v28 }
 0x26a   : > { %15947 = vst [vmem:[#allocation15_spill] sm:$0xff] %v10692_v16  ;;  %15948 = vst [vmem:[#allocation16_spill] sm:$0xff] %v10694_v46  ;;  %v997_v53 = vpop.xlane.xlu0 %996  ;;  %2104 = vmatpush1.bf16.msra.mxu1 %v8830_v9  ;;  %v10704_v42 = vpack.c.bf16 %v10694_v46, %v10692_v16  ;;  %9206 = verf.f32 %v1233_v11  ;;  %v9195_v52 = vpop.eup %9194  ;;  %v1078_v17 = vmul.f32 %v9191_v60, %v10328_v4  ;;  %v1192_v59 = vmul.f32 0.5, %v10648_v40 }
 0x26b   : > { %v1018_v50 = vmul.f32 0.00625, %v997_v53  ;;  %2105 = vmatprep.subr.bf16.mxu1 %v8835_v61  ;;  %9208 = verf.f32 %v1235_v41  ;;  %v1118_v32 = vmul.f32 %v10492_v43, %v1074_v15  ;;  %v9197_v31 = vpop.eup %9196  ;;  %v1303_v61 = vadd.f32 1.0, %v9195_v52  ;;  %v8836_v15 = vld [vmem:[%s15572_s2 + $0x130] ss:$24 sps:$4 sm:$0xff]  }
 0x26c   : > { %v1001_v22 = vpop.xlane.xlu1 %1000  ;;  %9210 = vrsqrt.f32 %v1035_v2  ;;  %1902 = vmatmul.mubr.bf16.gmra.mrb[8].mxu1 %v10704_v42  ;;  %2025 = vmatmul.mubr.bf16.gmra.mrb[44].mxu0 %v10704_v42  ;;  %v9199_v11 = vpop.eup %9198  ;;  %v1160_v28 = vadd.f32 %v10500_v39, %v1116_v47  ;;  %v1121_v40 = vmul.f32 %v10489_v8, %v1077_v34  ;;  %v1123_v60 = vmul.f32 %v10489_v8, %v1079_v49  ;;  %v8841_v47 = vld [vmem:[%s15572_s2 + $0x164] ss:$24 sps:$4 sm:$0xff]  }
 0x26d   : > { %v1036_v9 = vadd.f32 1e-05, %v1018_v50  ;;  %v1019_v27 = vmul.f32 0.00625, %v1001_v22  ;;  %v10716_v4 = vadd.f32 %v10500_v39, %v1118_v32  ;;  %v10723_v2 = vmul.f32 %v1301_v23, %v1193_v63 }
 0x26e   : > { %2106 = vmatpush1.bf16.msra.mxu1 %v8833_v45  ;;  %v10725_v53 = vmul.f32 %v1303_v61, %v1195_v6  ;;  %v1194_v41 = vmul.f32 0.5, %v10657_v14  ;;  %v1197_v50 = vmul.f32 0.5, %v1161_v44  ;;  %v1232_v45 = vmul.f32 0.70710677, %v1160_v28 }
 0x26f   : > { %15949 = vst [vmem:[#allocation17_spill] sm:$0xff] %v10723_v2  ;;  %2107 = vmatprep.subr.bf16.mxu1 %v8838_v57  ;;  %v9201_v34 = vpop.eup %9200  ;;  %9212 = vrsqrt.f32 %v1036_v9  ;;  %v1037_v49 = vadd.f32 1e-05, %v1019_v27  ;;  %v1234_v52 = vmul.f32 0.70710677, %v10716_v4  ;;  %v1165_v23 = vadd.f32 %v10497_v33, %v1121_v40 }
 0x270   : > { %15950 = vst [vmem:[#allocation18_spill] sm:$0xff] %v10725_v53  ;;  %v10734_v63 = vpack.c.bf16 %v10725_v53, %v10723_v2  ;;  %v1300_v6 = vadd.f32 1.0, %v9201_v34  ;;  %v1120_v14 = vmul.f32 %v10492_v43, %v1076_v26  ;;  %v1081_v57 = vmul.f32 %v9197_v31, %v10359_v25  ;;  %v8839_v9 = vld [vmem:[%s15572_s2 + $0x160] ss:$24 sps:$4 sm:$0xff]  }
 0x271   : > { %v9203_v44 = vpop.eup %9202  ;;  %v1083_v22 = vmul.f32 %v9199_v11, %v10377_v51  ;;  %9214 = verf.f32 %v1232_v45  ;;  %v1167_v32 = vadd.f32 %v10497_v33, %v1123_v60  ;;  %v1080_v27 = vmul.f32 %v9197_v31, %v10356_v24  ;;  %v8844_v51 = vld [vmem:[%s15572_s2 + $0x194] ss:$24 sps:$4 sm:$0xff]  }
 0x272   : > { %2108 = vmatpush1.bf16.msra.mxu1 %v8836_v15  ;;  %8387 = vmatprep.mubr.msk.bf16.mxu1 %vm15639_vm0, %v10734_v63  ;;  %v1302_v26 = vadd.f32 1.0, %v9203_v44  ;;  %v1199_v25 = vmul.f32 0.5, %v10686_v35  ;;  %9216 = verf.f32 %v1234_v52  ;;  %v1082_v40 = vmul.f32 %v9199_v11, %v10374_v12 }
 0x273   : > { %8396 = vmatprep.mubr.msk.bf16.mxu0 %vm15639_vm0, %v10734_v63  ;;  %v9205_v61 = vpop.eup %9204  ;;  %9218 = vrsqrt.f32 %v1037_v49  ;;  %v10754_v60 = vmul.f32 %v1300_v6, %v1192_v59  ;;  %v1237_v24 = vmul.f32 0.70710677, %v1165_v23  ;;  %2109 = vmatprep.subr.bf16.mxu1 %v8841_v47  ;;  %v1239_v34 = vmul.f32 0.70710677, %v1167_v32  ;;  %v8842_v59 = vld [vmem:[%s15572_s2 + $0x190] ss:$24 sps:$4 sm:$0xff]  }
 0x274   : > { %v9207_v31 = vpop.eup %9206  ;;  %v10756_v15 = vmul.f32 %v1302_v26, %v1194_v41  ;;  %v1122_v45 = vmul.f32 %v10492_v43, %v1078_v17  ;;  %v1164_v35 = vadd.f32 %v10500_v39, %v1120_v14  ;;  %v1125_v53 = vmul.f32 %v10489_v8, %v1081_v57  ;;  %v8847_v49 = vld [vmem:[%s15572_s2 + $0x1c4] ss:$24 sps:$4 sm:$0xff]  }
 0x275   : > { %15951 = vst [vmem:[#allocation19_spill] sm:$0xff] %v10754_v60  ;;  %v9209_v52 = vpop.eup %9208  ;;  %v1305_v44 = vadd.f32 1.0, %v9207_v31  ;;  %9220 = verf.f32 %v1237_v24  ;;  %v1127_v12 = vmul.f32 %v10489_v8, %v1083_v22  ;;  %v1085_v6 = vmul.f32 %v9205_v61, %v10405_v58 }
 0x276   : > { %15952 = vst [vmem:[#allocation20_spill] sm:$0xff] %v10756_v15  ;;  %2110 = vmatpush1.bf16.msra.mxu1 %v8839_v9  ;;  %v9211_v11 = vpop.eup %9210  ;;  %v10767_v41 = vpack.c.bf16 %v10756_v15, %v10754_v60  ;;  %v1307_v17 = vadd.f32 1.0, %v9209_v52  ;;  %9222 = verf.f32 %v1239_v34  ;;  %v10770_v47 = vadd.f32 %v10500_v39, %v1122_v45 }
 0x277   : > { %2111 = vmatprep.subr.bf16.mxu1 %v8844_v51  ;;  %v1196_v14 = vmul.f32 0.5, %v1160_v28  ;;  %v1236_v57 = vmul.f32 0.70710677, %v1164_v35  ;;  %v10777_v22 = vadd.f32 %v10497_v33, %v1125_v53  ;;  %v10781_v9 = vmul.f32 %v1305_v44, %v1197_v50  ;;  %v8845_v50 = vld [vmem:[%s15572_s2 + $0x1c0] ss:$24 sps:$4 sm:$0xff]  }
 0x278   : > { %1912 = vmatmul.mubr.bf16.gmra.mrb[12].mxu1 %v10767_v41  ;;  %2035 = vmatmul.mubr.bf16.gmra.mrb[48].mxu0 %v10767_v41  ;;  %v10783_v26 = vmul.f32 %v1307_v17, %v1199_v25  ;;  %v1238_v51 = vmul.f32 0.70710677, %v10770_v47  ;;  %v10787_v24 = vadd.f32 %v10497_v33, %v1127_v12  ;;  %v1084_v58 = vmul.f32 %v9205_v61, %v10402_v18 }
 0x279   : > { %15953 = vst [vmem:[#allocation21_spill] sm:$0xff] %v10781_v9  ;;  %v9213_v31 = vpop.eup %9212  ;;  %v1087_v28 = vmul.f32 %v9211_v11, %v10423_v62  ;;  %v1198_v53 = vmul.f32 0.5, %v10716_v4  ;;  %9224 = verf.f32 %v1236_v57  ;;  %v1201_v34 = vmul.f32 0.5, %v1165_v23 }
 0x27a   : > { %15954 = vst [vmem:[#allocation22_spill] sm:$0xff] %v10783_v26  ;;  %2112 = vmatpush1.bf16.msra.mxu1 %v8842_v59  ;;  %v10797_v25 = vpack.c.bf16 %v10783_v26, %v10781_v9  ;;  %9226 = verf.f32 %v1238_v51  ;;  %v1241_v45 = vmul.f32 0.70710677, %v10777_v22  ;;  %v1086_v62 = vmul.f32 %v9211_v11, %v10420_v20 }
 0x27b   : > { %2113 = vmatprep.subr.bf16.mxu1 %v8847_v49  ;;  %v9215_v18 = vpop.eup %9214  ;;  %v1203_v61 = vmul.f32 0.5, %v1167_v32  ;;  %v1243_v4 = vmul.f32 0.70710677, %v10787_v24  ;;  %v1124_v52 = vmul.f32 %v10492_v43, %v1080_v27  ;;  %v1126_v12 = vmul.f32 %v10492_v43, %v1082_v40 }
 0x27c   : > { %v9217_v44 = vpop.eup %9216  ;;  %8388 = vmatprep.mubr.msk.bf16.mxu1 %vm15639_vm0, %v10797_v25  ;;  %8397 = vmatprep.mubr.msk.bf16.mxu0 %vm15639_vm0, %v10797_v25  ;;  %v1304_v23 = vadd.f32 1.0, %v9215_v18  ;;  %9228 = verf.f32 %v1241_v45  ;;  %v1129_v59 = vmul.f32 %v10489_v8, %v1085_v6  ;;  %v1131_v27 = vmul.f32 %v10489_v8, %v1087_v28 }
 0x27d   : > { %v9219_v17 = vpop.eup %9218  ;;  %v1306_v20 = vadd.f32 1.0, %v9217_v44  ;;  %9230 = verf.f32 %v1243_v4  ;;  %v10810_v32 = vadd.f32 %v10500_v39, %v1124_v52  ;;  %v1200_v49 = vmul.f32 0.5, %v1164_v35 }
 0x27e   : > { %2114 = vmatpush1.bf16.msra.mxu1 %v8845_v50  ;;  %v10813_v11 = vmul.f32 %v1304_v23, %v1196_v14  ;;  %v10816_v57 = vadd.f32 %v10500_v39, %v1126_v12  ;;  %v10819_v51 = vadd.f32 %v10497_v33, %v1129_v59  ;;  %v15956_v40 = vmov 0  }
 0x27f   : > { %2870 = vmatprep.subr.bf16.mxu1 %v15956_v40  ;;  %v9221_v6 = vpop.eup %9220  ;;  %v10822_v45 = vmul.f32 %v1306_v20, %v1198_v53  ;;  %v1240_v18 = vmul.f32 0.70710677, %v10810_v32  ;;  %v10826_v4 = vadd.f32 %v10497_v33, %v1131_v27  ;;  %v1128_v14 = vmul.f32 %v10492_v43, %v1084_v58 }
 0x280   : > { %15955 = vst [vmem:[#allocation23_spill] sm:$0xff] %v10813_v11  ;;  %v9223_v28 = vpop.eup %9222  ;;  %v1089_v35 = vmul.f32 %v9213_v31, %v10451_v0  ;;  %v1091_v50 = vmul.f32 %v9219_v17, %v10458_v7  ;;  %v1309_v52 = vadd.f32 1.0, %v9221_v6  ;;  %v1242_v44 = vmul.f32 0.70710677, %v10816_v57 }
 0x281   : > { %15957 = vst [vmem:[#allocation24_spill] sm:$0xff] %v10822_v45  ;;  %v1088_v23 = vmul.f32 %v9213_v31, %v10448_v38  ;;  %v10835_v53 = vpack.c.bf16 %v10822_v45, %v10813_v11  ;;  %v1311_v12 = vadd.f32 1.0, %v9223_v28  ;;  %9232 = verf.f32 %v1240_v18 }
 0x282   : > { %v10837_v59 = vmul.f32 %v1309_v52, %v1201_v34  ;;  %9234 = verf.f32 %v1242_v44  ;;  %v1245_v58 = vmul.f32 0.70710677, %v10819_v51  ;;  %v1247_v0 = vmul.f32 0.70710677, %v10826_v4 }
 0x283   : > { %v9225_v20 = vpop.eup %9224  ;;  %1922 = vmatmul.mubr.bf16.gmra.mrb[16].mxu1 %v10835_v53  ;;  %2045 = vmatmul.mubr.bf16.gmra.mrb[52].mxu0 %v10835_v53  ;;  %v10843_v7 = vmul.f32 %v1311_v12, %v1203_v61  ;;  %v1202_v38 = vmul.f32 0.5, %v10770_v47  ;;  %v1130_v31 = vmul.f32 %v10492_v43, %v1086_v62  ;;  %v10848_v27 = vadd.f32 %v10500_v39, %v1128_v14 }
 0x284   : > { %15958 = vst [vmem:[#allocation25_spill] sm:$0xff] %v10837_v59  ;;  %v9227_v34 = vpop.eup %9226  ;;  %v1308_v6 = vadd.f32 1.0, %v9225_v20  ;;  %9236 = verf.f32 %v1245_v58  ;;  %v1133_v18 = vmul.f32 %v10489_v8, %v1089_v35  ;;  %v1135_v28 = vmul.f32 %v10489_v8, %v1091_v50 }
 0x285   : > { %15959 = vst [vmem:[#allocation26_spill] sm:$0xff] %v10843_v7  ;;  %v10854_v52 = vpack.c.bf16 %v10843_v7, %v10837_v59  ;;  %v1310_v61 = vadd.f32 1.0, %v9227_v34  ;;  %9238 = verf.f32 %v1247_v0  ;;  %v1174_v47 = vadd.f32 %v10500_v39, %v1130_v31 }
 0x286   : > { %v9229_v44 = vpop.eup %9228  ;;  %v1090_v62 = vmul.f32 %v9219_v17, %v10455_v5  ;;  %v1205_v14 = vmul.f32 0.5, %v10777_v22  ;;  %v1244_v12 = vmul.f32 0.70710677, %v10848_v27  ;;  %v10861_v58 = vadd.f32 %v10497_v33, %v1133_v18 }
 0x287   : > { %v9231_v35 = vpop.eup %9230  ;;  %8389 = vmatprep.mubr.msk.bf16.mxu1 %vm15639_vm0, %v10854_v52  ;;  %8398 = vmatprep.mubr.msk.bf16.mxu0 %vm15639_vm0, %v10854_v52  ;;  %v10867_v8 = vmul.f32 %v1308_v6, %v1200_v49  ;;  %v10869_v50 = vmul.f32 %v1310_v61, %v1202_v38  ;;  %v1313_v0 = vadd.f32 1.0, %v9229_v44  ;;  %v1246_v5 = vmul.f32 0.70710677, %v1174_v47 }
 0x288   : > { %v1207_v22 = vmul.f32 0.5, %v10787_v24  ;;  %v1315_v17 = vadd.f32 1.0, %v9231_v35  ;;  %9240 = verf.f32 %v1244_v12  ;;  %v1179_v20 = vadd.f32 %v10497_v33, %v1135_v28 }
 0x289   : > { %15960 = vst [vmem:[#allocation27_spill] sm:$0xff] %v10867_v8  ;;  %15961 = vst [vmem:[#allocation28_spill] sm:$0xff] %v10869_v50  ;;  %v10875_v31 = vpack.c.bf16 %v10869_v50, %v10867_v8  ;;  %9242 = verf.f32 %v1246_v5  ;;  %v1249_v34 = vmul.f32 0.70710677, %v10861_v58  ;;  %v10878_v18 = vmul.f32 %v1313_v0, %v1205_v14 }
 0x28a   : > { %v10880_v49 = vmul.f32 %v1315_v17, %v1207_v22  ;;  %v1251_v38 = vmul.f32 0.70710677, %v1179_v20  ;;  %v1132_v6 = vmul.f32 %v10492_v43, %v1088_v23  ;;  %v1134_v33 = vmul.f32 %v10492_v43, %v1090_v62 }
 0x28b   : > { %15962 = vst [vmem:[#allocation29_spill] sm:$0xff] %v10878_v18  ;;  %v9233_v61 = vpop.eup %9232  ;;  %1932 = vmatmul.mubr.bf16.gmra.mrb[20].mxu1 %v10875_v31  ;;  %2055 = vmatmul.mubr.bf16.gmra.mrb[56].mxu0 %v10875_v31  ;;  %9244 = verf.f32 %v1249_v34  ;;  %v1204_v12 = vmul.f32 0.5, %v10810_v32  ;;  %v1206_v23 = vmul.f32 0.5, %v10816_v57  ;;  %v1209_v57 = vmul.f32 0.5, %v10819_v51 }
 0x28c   : > { %15963 = vst [vmem:[#allocation30_spill] sm:$0xff] %v10880_v49  ;;  %v9235_v24 = vpop.eup %9234  ;;  %v10888_v28 = vpack.c.bf16 %v10880_v49, %v10878_v18  ;;  %v1312_v44 = vadd.f32 1.0, %v9233_v61  ;;  %9246 = verf.f32 %v1251_v38  ;;  %v1176_v14 = vadd.f32 %v10500_v39, %v1132_v6 }
 0x28d   : > { %v1314_v35 = vadd.f32 1.0, %v9235_v24  ;;  %v1178_v0 = vadd.f32 %v10500_v39, %v1134_v33  ;;  %v1211_v38 = vmul.f32 0.5, %v10826_v4 }
 0x28e   : > { %v9237_v5 = vpop.eup %9236  ;;  %8390 = vmatprep.mubr.msk.bf16.mxu1 %vm15639_vm0, %v10888_v28  ;;  %8399 = vmatprep.mubr.msk.bf16.mxu0 %vm15639_vm0, %v10888_v28  ;;  %v1248_v43 = vmul.f32 0.70710677, %v1176_v14  ;;  %v10898_v22 = vmul.f32 %v1312_v44, %v1204_v12 }
 0x28f   : > { %v9239_v62 = vpop.eup %9238  ;;  %v10900_v17 = vmul.f32 %v1314_v35, %v1206_v23  ;;  %v1317_v34 = vadd.f32 1.0, %v9237_v5  ;;  %v1250_v32 = vmul.f32 0.70710677, %v1178_v0  ;;  %v1210_v23 = vmul.f32 0.5, %v1174_v47 }
 0x290   : > { %15964 = vst [vmem:[#allocation31_spill] sm:$0xff] %v10898_v22  ;;  %v1319_v39 = vadd.f32 1.0, %v9239_v62  ;;  %9248 = verf.f32 %v1248_v43  ;;  %v1208_v5 = vmul.f32 0.5, %v10848_v27 }
 0x291   : > { %15965 = vst [vmem:[#allocation32_spill] sm:$0xff] %v10900_v17  ;;  %v1485_v6 = vpack.c.bf16 %v10900_v17, %v10898_v22  ;;  %9250 = verf.f32 %v1250_v32  ;;  %v10906_v33 = vmul.f32 %v1317_v34, %v1209_v57  ;;  %v1213_v57 = vmul.f32 0.5, %v10861_v58 }
 0x292   : > { %v9241_v61 = vpop.eup %9240  ;;  %v10908_v24 = vmul.f32 %v1319_v39, %v1211_v38  ;;  %v1215_v38 = vmul.f32 0.5, %v1179_v20  ;;  %v1212_v58 = vmul.f32 0.5, %v1176_v14 }
 0x293   : > { %15966 = vst [vmem:[#allocation33_spill] sm:$0xff] %v10906_v33  ;;  %v9243_v44 = vpop.eup %9242  ;;  %1942 = vmatmul.mubr.bf16.gmra.mrb[24].mxu1 %v1485_v6  ;;  %2065 = vmatmul.mubr.bf16.gmra.mrb[60].mxu0 %v1485_v6  ;;  %v1316_v12 = vadd.f32 1.0, %v9241_v61 }
 0x294   : > { %15967 = vst [vmem:[#allocation34_spill] sm:$0xff] %v10908_v24  ;;  %v1488_v51 = vpack.c.bf16 %v10908_v24, %v10906_v33  ;;  %v1318_v4 = vadd.f32 1.0, %v9243_v44 }
 0x295   : > { %v9245_v35 = vpop.eup %9244  ;;  %v10917_v32 = vmul.f32 %v1316_v12, %v1208_v5 }
 0x296   : > { %v9247_v43 = vpop.eup %9246  ;;  %8391 = vmatprep.mubr.msk.bf16.mxu1 %vm15639_vm0, %v1488_v51  ;;  %8400 = vmatprep.mubr.msk.bf16.mxu0 %vm15639_vm0, %v1488_v51  ;;  %v10915_v62 = vmul.f32 %v1318_v4, %v1210_v23  ;;  %v1321_v34 = vadd.f32 1.0, %v9245_v35  ;;  %v1214_v4 = vmul.f32 0.5, %v1178_v0 }
 0x297   : > { %15969 = vst [vmem:[#allocation36_spill] sm:$0xff] %v10917_v32  ;;  %v1323_v39 = vadd.f32 1.0, %v9247_v43 }
 0x298   : > { %15968 = vst [vmem:[#allocation35_spill] sm:$0xff] %v10915_v62  ;;  %v1487_v47 = vpack.c.bf16 %v10915_v62, %v10917_v32  ;;  %v10922_v61 = vmul.f32 %v1321_v34, %v1213_v57 }
 0x299   : > { %v10924_v27 = vmul.f32 %v1323_v39, %v1215_v38 }
 0x29a   : > { %15970 = vst [vmem:[#allocation37_spill] sm:$0xff] %v10922_v61  ;;  %v9249_v44 = vpop.eup %9248 }
 0x29b   : > { %15971 = vst [vmem:[#allocation38_spill] sm:$0xff] %v10924_v27  ;;  %v9251_v24 = vpop.eup %9250  ;;  %1952 = vmatmul.mubr.bf16.gmra.mrb[28].mxu1 %v1487_v47  ;;  %2075 = vmatmul.mubr.bf16.gmra.mrb[64].mxu0 %v1487_v47  ;;  %v1490_v23 = vpack.c.bf16 %v10924_v27, %v10922_v61  ;;  %v1320_v12 = vadd.f32 1.0, %v9249_v44 }
 0x29c   : > { %v1322_v35 = vadd.f32 1.0, %v9251_v24 }
 0x29d   : > { %8392 = vmatprep.mubr.msk.bf16.mxu1 %vm15639_vm0, %v1490_v23  ;;  %8401 = vmatprep.mubr.msk.bf16.mxu0 %vm15639_vm0, %v1490_v23  ;;  %v10932_v5 = vmul.f32 %v1320_v12, %v1212_v58 }
 0x29e   : > { %v10930_v20 = vmul.f32 %v1322_v35, %v1214_v4 }
 0x29f   : > { %15973 = vst [vmem:[#allocation40_spill] sm:$0xff] %v10932_v5 }
 0x2a0   : > { %15972 = vst [vmem:[#allocation39_spill] sm:$0xff] %v10930_v20  ;;  %v1489_v43 = vpack.c.bf16 %v10930_v20, %v10932_v5 }
 0x2a3   : > { %1962 = vmatmul.mubr.bf16.gmra.mrb[32].mxu1 %v1489_v43  ;;  %2085 = vmatmul.mubr.bf16.gmra.mrb[68].mxu0 %v1489_v43 }
 0x2a4   : > { %8402 = vmatprep.mubr.msk.bf16.mxu1 %vm15639_vm0, %v10562_v29  ;;  %2355 = vmatprep.mubr.bf16.mxu0 %v15956_v40  ;;  %v10960_v29 = vsub.s32 2, %v10474_v21 }
 0x2a6   : > { %15974 = vst [vmem:[#allocation41_spill] sm:$0xff] %v10960_v29 }
 0x2ab   : > { %2128 = vmatmul.mubr.bf16.vlgmr.msra.gmra.mrb[36].mxu1 %v10581_v48  ;;  %v10965_v48 = vld [vmem:[%s15573_s3] sm:$0x3f] }
 0x2ac   : > { %8403 = vmatprep.mubr.msk.bf16.mxu1 %vm15639_vm0, %v10617_v55  ;;  %v10968_v55 = vsub.s32 3, %v10474_v21 }
 0x2ae   : > { %15975 = vst [vmem:[#allocation42_spill] sm:$0xff] %v10968_v55 }
 0x2b3   : > { %2138 = vmatmul.mubr.bf16.gmra.mrb[40].mxu1 %v10642_v36  ;;  %v10972_v36 = vrot.slane %v10965_v48, %v10477_v54 }
 0x2b4   : > { %8404 = vmatprep.mubr.msk.bf16.mxu1 %vm15639_vm0, %v10676_v56  ;;  %v10976_v56 = vrot.slane %v10965_v48, %v10960_v29 }
 0x2bb   : > { %2148 = vmatmul.mubr.bf16.gmra.mrb[44].mxu1 %v10704_v42 }
 0x2bc   : > { %8405 = vmatprep.mubr.msk.bf16.mxu1 %vm15639_vm0, %v10734_v63 }
 0x2c3   : > { %2158 = vmatmul.mubr.bf16.gmra.mrb[48].mxu1 %v10767_v41  ;;  %v10980_v41 = vrot.slane %v10965_v48, %v10486_v3 }
 0x2c4   : > { %8406 = vmatprep.mubr.msk.bf16.mxu1 %vm15639_vm0, %v10797_v25  ;;  %v10984_v25 = vrot.slane %v10965_v48, %v10968_v55 }
 0x2cb   : > { %2168 = vmatmul.mubr.bf16.gmra.mrb[52].mxu1 %v10835_v53 }
 0x2cc   : > { %8407 = vmatprep.mubr.msk.bf16.mxu1 %vm15639_vm0, %v10854_v52 }
 0x2d3   : > { %2178 = vmatmul.mubr.bf16.gmra.mrb[56].mxu1 %v10875_v31 }
 0x2d4   : > { %8408 = vmatprep.mubr.msk.bf16.mxu1 %vm15639_vm0, %v10888_v28 }
 0x2db   : > { %2188 = vmatmul.mubr.bf16.gmra.mrb[60].mxu1 %v1485_v6 }
 0x2dc   : > { %8409 = vmatprep.mubr.msk.bf16.mxu1 %vm15639_vm0, %v1488_v51 }
 0x2e3   : > { %2198 = vmatmul.mubr.bf16.gmra.mrb[64].mxu1 %v1487_v47 }
 0x2e4   : > { %8410 = vmatprep.mubr.msk.bf16.mxu1 %vm15639_vm0, %v1490_v23 }
 0x2eb   : > { %2208 = vmatmul.mubr.bf16.gmra.mrb[68].mxu1 %v1489_v43 }
 0x32c   : > { %v1883_v42 = vpop.f32.mrb[0].mxu1  ;;  %v2006_v63 = vpop.f32.mrb[36].mxu0 }
 0x32d   : > { %v1885_v53 = vpop.f32.mrb[1].mxu1  ;;  %v2008_v52 = vpop.f32.mrb[37].mxu0  ;;  %v10987_v14 = vadd.f32 %v1883_v42, %v10972_v36  ;;  %v2007_v0 = vadd.f32 %v2006_v63, %v10976_v56 }
 0x32e   : > { %v1887_v31 = vpop.f32.mrb[2].mxu1  ;;  %v2010_v28 = vpop.f32.mrb[38].mxu0  ;;  %v10995_v57 = vadd.f32 %v1885_v53, %v10980_v41  ;;  %v10998_v38 = vadd.f32 %v2008_v52, %v10984_v25 }
 0x32f   : > { %v10991_v6 = vadd.f32 %v1887_v31, %v10972_v36  ;;  %v2011_v24 = vadd.f32 %v2010_v28, %v10976_v56  ;;  %v1889_v51 = vpop.f32.mrb[3].mxu1  ;;  %v2012_v34 = vpop.f32.mrb[39].mxu0 }
 0x330   : > { %v11001_v39 = vadd.f32 %v1889_v51, %v10980_v41  ;;  %v11004_v47 = vadd.f32 %v2012_v34, %v10984_v25 }
 0x331   : > { %v2305_v23 = vpack.c.bf16 %v2011_v24, %v2007_v0 }
 0x333   : > { %2324 = vmatpush1.bf16.xpose.msra.mxu0 %v2305_v23 }
 0x334   : > { %2325 = vmatprep.subr.bf16.mxu0 %v15956_v40 }
 0x336   : > { %v1893_v35 = vpop.f32.mrb[4].mxu1  ;;  %v2016_v58 = vpop.f32.mrb[40].mxu0 }
 0x337   : > { %v1895_v43 = vpop.f32.mrb[5].mxu1  ;;  %v2018_v42 = vpop.f32.mrb[41].mxu0  ;;  %v11014_v52 = vadd.f32 %v1893_v35, %v10972_v36  ;;  %v2017_v31 = vadd.f32 %v2016_v58, %v10976_v56 }
 0x338   : > { %v1897_v63 = vpop.f32.mrb[6].mxu1  ;;  %v2020_v53 = vpop.f32.mrb[42].mxu0  ;;  %v11022_v34 = vadd.f32 %v1895_v43, %v10980_v41  ;;  %v11025_v23 = vadd.f32 %v2018_v42, %v10984_v25 }
 0x339   : > { %v11018_v28 = vadd.f32 %v1897_v63, %v10972_v36  ;;  %v2021_v0 = vadd.f32 %v2020_v53, %v10976_v56  ;;  %v1899_v24 = vpop.f32.mrb[7].mxu1  ;;  %v2022_v51 = vpop.f32.mrb[43].mxu0 }
 0x33a   : > { %v11028_v12 = vadd.f32 %v1899_v24, %v10980_v41  ;;  %v11031_v35 = vadd.f32 %v2022_v51, %v10984_v25 }
 0x33b   : > { %v2306_v58 = vpack.c.bf16 %v2021_v0, %v2017_v31 }
 0x33d   : > { %2326 = vmatpush1.bf16.xpose.msra.mxu0 %v2306_v58 }
 0x33e   : > { %2327 = vmatprep.subr.bf16.mxu0 %v15956_v40 }
 0x33f   : > { %v1903_v42 = vpop.f32.mrb[8].mxu1  ;;  %v2026_v4 = vpop.f32.mrb[44].mxu0 }
 0x340   : > { %v1905_v24 = vpop.f32.mrb[9].mxu1  ;;  %v2028_v44 = vpop.f32.mrb[45].mxu0  ;;  %v11041_v31 = vadd.f32 %v1903_v42, %v10972_v36  ;;  %v2027_v0 = vadd.f32 %v2026_v4, %v10976_v56 }
 0x341   : > { %v1907_v3 = vpop.f32.mrb[10].mxu1  ;;  %v2030_v51 = vpop.f32.mrb[46].mxu0  ;;  %v11049_v54 = vadd.f32 %v1905_v24, %v10980_v41  ;;  %v11052_v55 = vadd.f32 %v2028_v44, %v10984_v25 }
 0x342   : > { %v11045_v63 = vadd.f32 %v1907_v3, %v10972_v36  ;;  %v2031_v53 = vadd.f32 %v2030_v51, %v10976_v56  ;;  %v1909_v43 = vpop.f32.mrb[11].mxu1  ;;  %v2032_v58 = vpop.f32.mrb[47].mxu0 }
 0x343   : > { %v11055_v27 = vadd.f32 %v1909_v43, %v10980_v41  ;;  %v11058_v42 = vadd.f32 %v2032_v58, %v10984_v25 }
 0x344   : > { %v2307_v4 = vpack.c.bf16 %v2031_v53, %v2027_v0 }
 0x346   : > { %2328 = vmatpush1.bf16.xpose.msra.mxu0 %v2307_v4 }
 0x347   : > { %2329 = vmatprep.subr.bf16.mxu0 %v15956_v40 }
 0x34b   : > { %v1913_v44 = vpop.f32.mrb[12].mxu1  ;;  %v2036_v20 = vpop.f32.mrb[48].mxu0 }
 0x34c   : > { %v1915_v43 = vpop.f32.mrb[13].mxu1  ;;  %v2038_v5 = vpop.f32.mrb[49].mxu0  ;;  %v11068_v53 = vadd.f32 %v1913_v44, %v10972_v36  ;;  %v2037_v0 = vadd.f32 %v2036_v20, %v10976_v56 }
 0x34d   : > { %v1917_v61 = vpop.f32.mrb[14].mxu1  ;;  %v2040_v58 = vpop.f32.mrb[50].mxu0  ;;  %v11076_v62 = vadd.f32 %v1915_v43, %v10980_v41  ;;  %v11079_v32 = vadd.f32 %v2038_v5, %v10984_v25 }
 0x34e   : > { %v11072_v3 = vadd.f32 %v1917_v61, %v10972_v36  ;;  %v2041_v51 = vadd.f32 %v2040_v58, %v10976_v56  ;;  %v1919_v24 = vpop.f32.mrb[15].mxu1  ;;  %v2042_v4 = vpop.f32.mrb[51].mxu0 }
 0x34f   : > { %v11082_v33 = vadd.f32 %v1919_v24, %v10980_v41  ;;  %v11085_v44 = vadd.f32 %v2042_v4, %v10984_v25 }
 0x350   : > { %v2308_v20 = vpack.c.bf16 %v2041_v51, %v2037_v0 }
 0x352   : > { %2330 = vmatpush1.bf16.xpose.msra.mxu0 %v2308_v20 }
 0x353   : > { %2331 = vmatprep.subr.bf16.mxu0 %v15956_v40 }
 0x356   : > { %v1923_v5 = vpop.f32.mrb[16].mxu1  ;;  %v2046_v49 = vpop.f32.mrb[52].mxu0 }
 0x357   : > { %v1925_v24 = vpop.f32.mrb[17].mxu1  ;;  %v2048_v17 = vpop.f32.mrb[53].mxu0  ;;  %v11095_v51 = vadd.f32 %v1923_v5, %v10972_v36  ;;  %v2047_v0 = vadd.f32 %v2046_v49, %v10976_v56 }
 0x358   : > { %v1927_v22 = vpop.f32.mrb[18].mxu1  ;;  %v2050_v4 = vpop.f32.mrb[54].mxu0  ;;  %v11103_v18 = vadd.f32 %v1925_v24, %v10980_v41  ;;  %v11106_v7 = vadd.f32 %v2048_v17, %v10984_v25 }
 0x359   : > { %v11099_v61 = vadd.f32 %v1927_v22, %v10972_v36  ;;  %v2051_v58 = vadd.f32 %v2050_v4, %v10976_v56  ;;  %v1929_v43 = vpop.f32.mrb[19].mxu1  ;;  %v2052_v20 = vpop.f32.mrb[55].mxu0 }
 0x35a   : > { %v11109_v50 = vadd.f32 %v1929_v43, %v10980_v41  ;;  %v11112_v5 = vadd.f32 %v2052_v20, %v10984_v25 }
 0x35b   : > { %v2309_v49 = vpack.c.bf16 %v2051_v58, %v2047_v0 }
 0x35d   : > { %2332 = vmatpush1.bf16.xpose.msra.mxu0 %v2309_v49 }
 0x35e   : > { %v1933_v8 = vpop.f32.mrb[20].mxu1  ;;  %v2056_v17 = vpop.f32.mrb[56].mxu0  ;;  %2333 = vmatprep.subr.bf16.mxu0 %v15956_v40 }
 0x35f   : > { %v1935_v43 = vpop.f32.mrb[21].mxu1  ;;  %v2058_v59 = vpop.f32.mrb[57].mxu0  ;;  %v11122_v58 = vadd.f32 %v1933_v8, %v10972_v36  ;;  %v2057_v0 = vadd.f32 %v2056_v17, %v10976_v56 }
 0x360   : > { %v1937_v26 = vpop.f32.mrb[22].mxu1  ;;  %v2060_v20 = vpop.f32.mrb[58].mxu0  ;;  %v11130_v45 = vadd.f32 %v1935_v43, %v10980_v41  ;;  %v11133_v11 = vadd.f32 %v2058_v59, %v10984_v25 }
 0x361   : > { %v11126_v22 = vadd.f32 %v1937_v26, %v10972_v36  ;;  %v2061_v4 = vadd.f32 %v2060_v20, %v10976_v56  ;;  %v1939_v24 = vpop.f32.mrb[23].mxu1  ;;  %v2062_v49 = vpop.f32.mrb[59].mxu0 }
 0x362   : > { %15976 = vst [vmem:[#allocation43_spill] sm:$0xff] %v11130_v45  ;;  %v11136_v9 = vadd.f32 %v1939_v24, %v10980_v41  ;;  %v11139_v8 = vadd.f32 %v2062_v49, %v10984_v25  ;;  %v11217_v45 = vsub.s32 4, %v10474_v21 }
 0x363   : > { %v2310_v17 = vpack.c.bf16 %v2061_v4, %v2057_v0 }
 0x364   : > { %15977 = vst [vmem:[#allocation44_spill] sm:$0xff] %v11136_v9  ;;  %15982 = vst [vmem:[#allocation49_spill] sm:$0xff] %v11217_v45  ;;  %v11226_v9 = vsub.s32 5, %v10474_v21 }
 0x365   : > { %2334 = vmatpush1.bf16.xpose.msra.mxu0 %v2310_v17 }
 0x366   : > { %v1943_v15 = vpop.f32.mrb[24].mxu1  ;;  %v2066_v59 = vpop.f32.mrb[60].mxu0  ;;  %2335 = vmatprep.subr.bf16.mxu0 %v15956_v40  ;;  %15983 = vst [vmem:[#allocation50_spill] sm:$0xff] %v11226_v9 }
 0x367   : > { %v1945_v24 = vpop.f32.mrb[25].mxu1  ;;  %v2068_v60 = vpop.f32.mrb[61].mxu0  ;;  %v11149_v4 = vadd.f32 %v1943_v15, %v10972_v36  ;;  %v2067_v0 = vadd.f32 %v2066_v59, %v10976_v56 }
 0x368   : > { %v1947_v2 = vpop.f32.mrb[26].mxu1  ;;  %v2070_v49 = vpop.f32.mrb[62].mxu0  ;;  %v11157_v30 = vadd.f32 %v1945_v24, %v10980_v41  ;;  %v11160_v46 = vadd.f32 %v2068_v60, %v10984_v25 }
 0x369   : > { %v11153_v26 = vadd.f32 %v1947_v2, %v10972_v36  ;;  %v2071_v20 = vadd.f32 %v2070_v49, %v10976_v56  ;;  %v1949_v43 = vpop.f32.mrb[27].mxu1  ;;  %v2072_v17 = vpop.f32.mrb[63].mxu0 }
 0x36a   : > { %15978 = vst [vmem:[#allocation45_spill] sm:$0xff] %v11157_v30  ;;  %v11163_v16 = vadd.f32 %v1949_v43, %v10980_v41  ;;  %v11166_v15 = vadd.f32 %v2072_v17, %v10984_v25 }
 0x36b   : > { %v2311_v59 = vpack.c.bf16 %v2071_v20, %v2067_v0 }
 0x36c   : > { %15979 = vst [vmem:[#allocation46_spill] sm:$0xff] %v11163_v16 }
 0x36d   : > { %2336 = vmatpush1.bf16.xpose.msra.mxu0 %v2311_v59 }
 0x36e   : > { %v1953_v1 = vpop.f32.mrb[28].mxu1  ;;  %v2076_v60 = vpop.f32.mrb[64].mxu0  ;;  %2337 = vmatprep.subr.bf16.mxu0 %v15956_v40 }
 0x36f   : > { %v1955_v43 = vpop.f32.mrb[29].mxu1  ;;  %v2078_v10 = vpop.f32.mrb[65].mxu0  ;;  %v11176_v20 = vadd.f32 %v1953_v1, %v10972_v36  ;;  %v2077_v0 = vadd.f32 %v2076_v60, %v10976_v56 }
 0x370   : > { %v1957_v37 = vpop.f32.mrb[30].mxu1  ;;  %v2080_v17 = vpop.f32.mrb[66].mxu0  ;;  %v11184_v13 = vadd.f32 %v1955_v43, %v10980_v41  ;;  %v11187_v29 = vadd.f32 %v2078_v10, %v10984_v25 }
 0x371   : > { %v11180_v2 = vadd.f32 %v1957_v37, %v10972_v36  ;;  %v2081_v49 = vadd.f32 %v2080_v17, %v10976_v56  ;;  %v1959_v24 = vpop.f32.mrb[31].mxu1  ;;  %v2082_v59 = vpop.f32.mrb[67].mxu0 }
 0x372   : > { %15980 = vst [vmem:[#allocation47_spill] sm:$0xff] %v11184_v13  ;;  %v11190_v19 = vadd.f32 %v1959_v24, %v10980_v41  ;;  %v11193_v1 = vadd.f32 %v2082_v59, %v10984_v25 }
 0x373   : > { %v2312_v60 = vpack.c.bf16 %v2081_v49, %v2077_v0 }
 0x374   : > { %15981 = vst [vmem:[#allocation48_spill] sm:$0xff] %v11190_v19 }
 0x375   : > { %2338 = vmatpush1.bf16.xpose.msra.mxu0 %v2312_v60 }
 0x376   : > { %v1963_v30 = vpop.f32.mrb[32].mxu1  ;;  %v2086_v10 = vpop.f32.mrb[68].mxu0  ;;  %2339 = vmatprep.subr.bf16.mxu0 %v15956_v40 }
 0x377   : > { %v11203_v24 = vadd.f32 %v1963_v30, %v10972_v36  ;;  %v1965_v59 = vpop.f32.mrb[33].mxu1  ;;  %v2088_v16 = vpop.f32.mrb[69].mxu0  ;;  %v2087_v43 = vadd.f32 %v2086_v10, %v10976_v56 }
 0x378   : > { %v11206_v49 = vadd.f32 %v1965_v59, %v10980_v41  ;;  %v11209_v0 = vadd.f32 %v2088_v16, %v10984_v25  ;;  %v1967_v17 = vpop.f32.mrb[34].mxu1  ;;  %v2090_v37 = vpop.f32.mrb[70].mxu0 }
 0x379   : > { %v11213_v60 = vadd.f32 %v1967_v17, %v10972_v36  ;;  %v2091_v13 = vadd.f32 %v2090_v37, %v10976_v56  ;;  %v1969_v19 = vpop.f32.mrb[35].mxu1  ;;  %v2092_v30 = vpop.f32.mrb[71].mxu0 }
 0x37a   : > { %v11220_v59 = vadd.f32 %v1969_v19, %v10980_v41  ;;  %v11223_v16 = vadd.f32 %v2092_v30, %v10984_v25  ;;  %v11236_v19 = vrot.slane %v10965_v48, %v11217_v45  ;;  %v11240_v25 = vrot.slane %v10965_v48, %v11226_v9 }
 0x37b   : > { %v2313_v10 = vpack.c.bf16 %v2091_v13, %v2087_v43  ;;  %v15986_v9 = vpack.c.bf16 %v10991_v6, %v10987_v14 }
 0x37d   : > { %2340 = vmatpush1.bf16.xpose.msra.mxu0 %v2313_v10 }
 0x37e   : > { %v2129_v41 = vpop.f32.mrb[36].mxu1  ;;  %3002 = vmatprep.subr.bf16.mxu0 %v15956_v40 }
 0x37f   : > { %v2131_v13 = vpop.f32.mrb[37].mxu1  ;;  %v2130_v43 = vadd.f32 %v2129_v41, %v11236_v19  ;;  %v15987_v41 = vpack.c.bf16 %v11004_v47, %v10998_v38 }
 0x380   : > { %v2133_v17 = vpop.f32.mrb[38].mxu1  ;;  %v11246_v10 = vadd.f32 %v2131_v13, %v11240_v25 }
 0x381   : > { %v2134_v30 = vadd.f32 %v2133_v17, %v11236_v19  ;;  %v2135_v56 = vpop.f32.mrb[39].mxu1 }
 0x382   : > { %15984 = vst [vmem:[#allocation51_spill] sm:$0xff] %v11246_v10  ;;  %v11249_v37 = vadd.f32 %v2135_v56, %v11240_v25 }
 0x383   : > { %v2314_v36 = vpack.c.bf16 %v2134_v30, %v2130_v43 }
 0x384   : > { %15985 = vst [vmem:[#allocation52_spill] sm:$0xff] %v11249_v37  ;;  %2356 = vmatmul.mubr.bf16.vlgmr.msra.gmra.mrb[72].mxu0 %v15986_v9 }
 0x385   : > { %2871 = vmatpush1.bf16.msra.mxu1 %v2314_v36  ;;  %3003 = vmatpush1.bf16.xpose.msra.mxu0 %v15987_v41  ;;  %v15990_v36 = vpack.c.bf16 %v11018_v28, %v11014_v52  ;;  %v15991_v41 = vpack.c.bf16 %v11031_v35, %v11025_v23 }
 0x386   : > { %v2139_v17 = vpop.f32.mrb[40].mxu1  ;;  %2365 = vmatprep.mubr.bf16.mxu0 %v15956_v40  ;;  %2872 = vmatprep.subr.bf16.mxu1 %v15956_v40 }
 0x387   : > { %v2141_v56 = vpop.f32.mrb[41].mxu1  ;;  %3004 = vmatprep.subr.bf16.mxu0 %v15956_v40  ;;  %v2140_v43 = vadd.f32 %v2139_v17, %v11236_v19 }
 0x388   : > { %v2143_v13 = vpop.f32.mrb[42].mxu1  ;;  %v11265_v9 = vadd.f32 %v2141_v56, %v11240_v25 }
 0x389   : > { %v2144_v30 = vadd.f32 %v2143_v13, %v11236_v19  ;;  %v2145_v14 = vpop.f32.mrb[43].mxu1 }
 0x38a   : > { %15988 = vst [vmem:[#allocation53_spill] sm:$0xff] %v11265_v9  ;;  %v11268_v6 = vadd.f32 %v2145_v14, %v11240_v25 }
 0x38b   : > { %v2315_v38 = vpack.c.bf16 %v2144_v30, %v2140_v43 }
 0x38c   : > { %15989 = vst [vmem:[#allocation54_spill] sm:$0xff] %v11268_v6  ;;  %2366 = vmatmul.mubr.bf16.gmra.mrb[76].mxu0 %v15990_v36  ;;  %v15995_v36 = vpack.c.bf16 %v11058_v42, %v11052_v55 }
 0x38d   : > { %2873 = vmatpush1.bf16.msra.mxu1 %v2315_v38  ;;  %3005 = vmatpush1.bf16.xpose.msra.mxu0 %v15991_v41  ;;  %v15994_v38 = vpack.c.bf16 %v11045_v63, %v11041_v31 }
 0x38e   : > { %v2149_v17 = vpop.f32.mrb[44].mxu1  ;;  %2375 = vmatprep.mubr.bf16.mxu0 %v15956_v40  ;;  %2874 = vmatprep.subr.bf16.mxu1 %v15956_v40 }
 0x38f   : > { %v2151_v56 = vpop.f32.mrb[45].mxu1  ;;  %3006 = vmatprep.subr.bf16.mxu0 %v15956_v40  ;;  %v2150_v43 = vadd.f32 %v2149_v17, %v11236_v19 }
 0x390   : > { %v2153_v13 = vpop.f32.mrb[46].mxu1  ;;  %v11284_v28 = vadd.f32 %v2151_v56, %v11240_v25 }
 0x391   : > { %v2154_v30 = vadd.f32 %v2153_v13, %v11236_v19  ;;  %v2155_v52 = vpop.f32.mrb[47].mxu1 }
 0x392   : > { %15992 = vst [vmem:[#allocation55_spill] sm:$0xff] %v11284_v28  ;;  %v11287_v23 = vadd.f32 %v2155_v52, %v11240_v25  ;;  %v15998_v52 = vpack.c.bf16 %v11072_v3, %v11068_v53 }
 0x393   : > { %v2316_v35 = vpack.c.bf16 %v2154_v30, %v2150_v43  ;;  %v16075_v30 = vmov 0 }
 0x394   : > { %15993 = vst [vmem:[#allocation56_spill] sm:$0xff] %v11287_v23  ;;  %2376 = vmatmul.mubr.bf16.gmra.mrb[80].mxu0 %v15994_v38 }
 0x395   : > { %2875 = vmatpush1.bf16.msra.mxu1 %v2316_v35  ;;  %3007 = vmatpush1.bf16.xpose.msra.mxu0 %v15995_v36  ;;  %v15999_v35 = vpack.c.bf16 %v11085_v44, %v11079_v32 }
 0x396   : > { %v2159_v41 = vpop.f32.mrb[48].mxu1  ;;  %2385 = vmatprep.mubr.bf16.mxu0 %v15956_v40  ;;  %2876 = vmatprep.subr.bf16.mxu1 %v15956_v40 }
 0x397   : > { %v2161_v17 = vpop.f32.mrb[49].mxu1  ;;  %3008 = vmatprep.subr.bf16.mxu0 %v15956_v40  ;;  %v2160_v13 = vadd.f32 %v2159_v41, %v11236_v19 }
 0x398   : > { %v2163_v56 = vpop.f32.mrb[50].mxu1  ;;  %v11303_v31 = vadd.f32 %v2161_v17, %v11240_v25 }
 0x399   : > { %v2164_v43 = vadd.f32 %v2163_v56, %v11236_v19  ;;  %v2165_v63 = vpop.f32.mrb[51].mxu1 }
 0x39a   : > { %15996 = vst [vmem:[#allocation57_spill] sm:$0xff] %v11303_v31  ;;  %v11306_v55 = vadd.f32 %v2165_v63, %v11240_v25  ;;  %v16003_v63 = vpack.c.bf16 %v11112_v5, %v11106_v7 }
 0x39b   : > { %v2317_v42 = vpack.c.bf16 %v2164_v43, %v2160_v13  ;;  %v16002_v43 = vpack.c.bf16 %v11099_v61, %v11095_v51 }
 0x39c   : > { %15997 = vst [vmem:[#allocation58_spill] sm:$0xff] %v11306_v55  ;;  %2386 = vmatmul.mubr.bf16.gmra.mrb[84].mxu0 %v15998_v52  ;;  %v16103_v55 = vmov 0 }
 0x39d   : > { %2877 = vmatpush1.bf16.msra.mxu1 %v2317_v42  ;;  %3009 = vmatpush1.bf16.xpose.msra.mxu0 %v15999_v35 }
 0x39e   : > { %v2169_v38 = vpop.f32.mrb[52].mxu1  ;;  %2395 = vmatprep.mubr.bf16.mxu0 %v15956_v40  ;;  %2878 = vmatprep.subr.bf16.mxu1 %v15956_v40 }
 0x39f   : > { %v2171_v36 = vpop.f32.mrb[53].mxu1  ;;  %3010 = vmatprep.subr.bf16.mxu0 %v15956_v40  ;;  %v2170_v17 = vadd.f32 %v2169_v38, %v11236_v19 }
 0x3a0   : > { %v2173_v41 = vpop.f32.mrb[54].mxu1  ;;  %v11322_v53 = vadd.f32 %v2171_v36, %v11240_v25 }
 0x3a1   : > { %v2174_v56 = vadd.f32 %v2173_v41, %v11236_v19  ;;  %v2175_v3 = vpop.f32.mrb[55].mxu1 }
 0x3a2   : > { %16000 = vst [vmem:[#allocation59_spill] sm:$0xff] %v11322_v53  ;;  %v11325_v32 = vadd.f32 %v2175_v3, %v11240_v25 }
 0x3a3   : > { %v2318_v44 = vpack.c.bf16 %v2174_v56, %v2170_v17  ;;  %v16006_v17 = vpack.c.bf16 %v11126_v22, %v11122_v58  ;;  %v16007_v56 = vpack.c.bf16 %v11139_v8, %v11133_v11 }
 0x3a4   : > { %16001 = vst [vmem:[#allocation60_spill] sm:$0xff] %v11325_v32  ;;  %2396 = vmatmul.mubr.bf16.gmra.mrb[88].mxu0 %v16002_v43 }
 0x3a5   : > { %2879 = vmatpush1.bf16.msra.mxu1 %v2318_v44  ;;  %3011 = vmatpush1.bf16.xpose.msra.mxu0 %v16003_v63 }
 0x3a6   : > { %v2179_v42 = vpop.f32.mrb[56].mxu1  ;;  %2405 = vmatprep.mubr.bf16.mxu0 %v15956_v40  ;;  %2880 = vmatprep.subr.bf16.mxu1 %v15956_v40 }
 0x3a7   : > { %v2181_v52 = vpop.f32.mrb[57].mxu1  ;;  %3012 = vmatprep.subr.bf16.mxu0 %v15956_v40  ;;  %v2180_v38 = vadd.f32 %v2179_v42, %v11236_v19 }
 0x3a8   : > { %v2183_v35 = vpop.f32.mrb[58].mxu1  ;;  %v11341_v51 = vadd.f32 %v2181_v52, %v11240_v25 }
 0x3a9   : > { %v2184_v36 = vadd.f32 %v2183_v35, %v11236_v19  ;;  %v2185_v61 = vpop.f32.mrb[59].mxu1  ;;  %v16010_v35 = vpack.c.bf16 %v11153_v26, %v11149_v4 }
 0x3aa   : > { %16004 = vst [vmem:[#allocation61_spill] sm:$0xff] %v11341_v51  ;;  %v11344_v7 = vadd.f32 %v2185_v61, %v11240_v25 }
 0x3ab   : > { %v2319_v5 = vpack.c.bf16 %v2184_v36, %v2180_v38  ;;  %v16011_v38 = vpack.c.bf16 %v11166_v15, %v11160_v46 }
 0x3ac   : > { %16005 = vst [vmem:[#allocation62_spill] sm:$0xff] %v11344_v7  ;;  %2406 = vmatmul.mubr.bf16.gmra.mrb[92].mxu0 %v16006_v17 }
 0x3ad   : > { %2881 = vmatpush1.bf16.msra.mxu1 %v2319_v5  ;;  %3013 = vmatpush1.bf16.xpose.msra.mxu0 %v16007_v56 }
 0x3ae   : > { %v2189_v3 = vpop.f32.mrb[60].mxu1  ;;  %2415 = vmatprep.mubr.bf16.mxu0 %v15956_v40  ;;  %2882 = vmatprep.subr.bf16.mxu1 %v15956_v40 }
 0x3af   : > { %v2191_v44 = vpop.f32.mrb[61].mxu1  ;;  %3014 = vmatprep.subr.bf16.mxu0 %v15956_v40  ;;  %v2190_v63 = vadd.f32 %v2189_v3, %v11236_v19 }
 0x3b0   : > { %v2193_v43 = vpop.f32.mrb[62].mxu1  ;;  %v11360_v58 = vadd.f32 %v2191_v44, %v11240_v25  ;;  %v16014_v44 = vpack.c.bf16 %v11180_v2, %v11176_v20 }
 0x3b1   : > { %v2194_v42 = vadd.f32 %v2193_v43, %v11236_v19  ;;  %v2195_v22 = vpop.f32.mrb[63].mxu1  ;;  %v16015_v43 = vpack.c.bf16 %v11193_v1, %v11187_v29 }
 0x3b2   : > { %16008 = vst [vmem:[#allocation63_spill] sm:$0xff] %v11360_v58  ;;  %v11363_v11 = vadd.f32 %v2195_v22, %v11240_v25 }
 0x3b3   : > { %v2320_v8 = vpack.c.bf16 %v2194_v42, %v2190_v63 }
 0x3b4   : > { %16009 = vst [vmem:[#allocation64_spill] sm:$0xff] %v11363_v11  ;;  %2416 = vmatmul.mubr.bf16.gmra.mrb[96].mxu0 %v16010_v35 }
 0x3b5   : > { %2883 = vmatpush1.bf16.msra.mxu1 %v2320_v8  ;;  %3015 = vmatpush1.bf16.xpose.msra.mxu0 %v16011_v38 }
 0x3b6   : > { %v2199_v36 = vpop.f32.mrb[64].mxu1  ;;  %2425 = vmatprep.mubr.bf16.mxu0 %v15956_v40  ;;  %2884 = vmatprep.subr.bf16.mxu1 %v15956_v40 }
 0x3b7   : > { %v2201_v61 = vpop.f32.mrb[65].mxu1  ;;  %3016 = vmatprep.subr.bf16.mxu0 %v15956_v40  ;;  %v2200_v17 = vadd.f32 %v2199_v36, %v11236_v19  ;;  %v16018_v36 = vpack.c.bf16 %v11213_v60, %v11203_v24  ;;  %v16022_v24 = vpack.c.bf16 %v11055_v27, %v11049_v54  ;;  %v16028_v54 = vld [vmem:[#allocation46_spill] sm:$0xff]  ;;  %v16029_v27 = vld [vmem:[#allocation45_spill] sm:$0xff] }
 0x3b8   : > { %v2203_v5 = vpop.f32.mrb[66].mxu1  ;;  %v11379_v4 = vadd.f32 %v2201_v61, %v11240_v25  ;;  %v16019_v61 = vpack.c.bf16 %v11223_v16, %v11209_v0  ;;  %v16023_v0 = vpack.c.bf16 %v11082_v33, %v11076_v62  ;;  %v16030_v60 = vpack.c.bf16 %v16028_v54, %v16029_v27  ;;  %v16031_v33 = vld [vmem:[#allocation48_spill] sm:$0xff]  ;;  %v16032_v62 = vld [vmem:[#allocation47_spill] sm:$0xff] }
 0x3b9   : > { %v2204_v56 = vadd.f32 %v2203_v5, %v11236_v19  ;;  %v2205_v26 = vpop.f32.mrb[67].mxu1  ;;  %v16033_v16 = vpack.c.bf16 %v16031_v33, %v16032_v62 }
 0x3ba   : > { %16012 = vst [vmem:[#allocation65_spill] sm:$0xff] %v11379_v4  ;;  %v11382_v46 = vadd.f32 %v2205_v26, %v11240_v25  ;;  %v2237_v26 = vand.u32 7, %v10474_v21 }
 0x3bb   : > { %v2321_v15 = vpack.c.bf16 %v2204_v56, %v2200_v17  ;;  %v2220_v56 = vadd.s32 8, %v10474_v21 }
 0x3bc   : > { %16013 = vst [vmem:[#allocation66_spill] sm:$0xff] %v11382_v46  ;;  %2426 = vmatmul.mubr.bf16.gmra.mrb[100].mxu0 %v16014_v44  ;;  %v16089_v46 = vmov 0 }
 0x3bd   : > { %2885 = vmatpush1.bf16.msra.mxu1 %v2321_v15  ;;  %3017 = vmatpush1.bf16.xpose.msra.mxu0 %v16015_v43  ;;  %v2238_v43 = vand.u32 7, %v2220_v56 }
 0x3be   : > { %v2209_v63 = vpop.f32.mrb[68].mxu1  ;;  %2435 = vmatprep.mubr.bf16.mxu0 %v15956_v40  ;;  %2886 = vmatprep.subr.bf16.mxu1 %v15956_v40 }
 0x3bf   : > { %v2210_v42 = vadd.f32 %v2209_v63, %v11236_v19  ;;  %v2211_v22 = vpop.f32.mrb[69].mxu1  ;;  %3018 = vmatprep.subr.bf16.mxu0 %v15956_v40 }
 0x3c0   : > { %v2213_v8 = vpop.f32.mrb[70].mxu1  ;;  %v11398_v20 = vadd.f32 %v2211_v22, %v11240_v25 }
 0x3c1   : > { %v2214_v35 = vadd.f32 %v2213_v8, %v11236_v19  ;;  %v2215_v2 = vpop.f32.mrb[71].mxu1  ;;  %v16020_v19 = vpack.c.bf16 %v11001_v39, %v10995_v57  ;;  %v16024_v57 = vpack.c.bf16 %v11109_v50, %v11103_v18  ;;  %v16025_v39 = vld [vmem:[#allocation44_spill] sm:$0xff]  ;;  %v16034_v50 = vpack.c.bf16 %v11220_v59, %v11206_v49 }
 0x3c2   : > { %16016 = vst [vmem:[#allocation67_spill] sm:$0xff] %v11398_v20  ;;  %v11401_v29 = vadd.f32 %v2215_v2, %v11240_v25  ;;  %v16021_v25 = vpack.c.bf16 %v11028_v12, %v11022_v34  ;;  %v16026_v12 = vld [vmem:[#allocation43_spill] sm:$0xff]  ;;  %v16035_v18 = vlaneseq  ;;  %v16036_v8 = vmov 0 }
 0x3c3   : > { %v2322_v1 = vpack.c.bf16 %v2214_v35, %v2210_v42  ;;  %v16027_v34 = vpack.c.bf16 %v16025_v39, %v16026_v12  ;;  %v2221_v49 = vadd.s32 16, %v10474_v21  ;;  %v16039_v2 = vmov 0 }
 0x3c4   : > { %16017 = vst [vmem:[#allocation68_spill] sm:$0xff] %v11401_v29  ;;  %2436 = vmatmul.mubr.bf16.gmra.mrb[104].mxu0 %v16018_v36  ;;  %v2256_v5 = vand.u32 127, %v16035_v18 }
 0x3c5   : > { %2887 = vmatpush1.bf16.msra.mxu1 %v2322_v1  ;;  %3019 = vmatpush1.bf16.xpose.msra.mxu0 %v16019_v61  ;;  %v16042_v61 = vmov 0  ;;  %v2239_v12 = vand.u32 7, %v2221_v49  ;;  %v2224_v49 = vadd.s32 40, %v10474_v21 }
 0x3c6   : > { %3034 = vmatprep.mubr.bf16.mxu0 %v15956_v40  ;;  %3548 = vmatprep.subr.bf16.mxu1 %v15956_v40  ;;  %v2257_v17 = vadd.s32 128, %v2256_v5  ;;  %v11453_v44 = vand.u32 7, %v2256_v5  ;;  %v16048_v5 = vmov 0 }
 0x3c8   : > { %v11451_v15 = vand.u32 7, %v2257_v17  ;;  %vm11462_vm2 = vcmp.eq.s32.totalorder %v2237_v26, %v11453_v44  ;;  %vm11477_vm5 = vcmp.eq.s32.totalorder %v2238_v43, %v11453_v44  ;;  %v2223_v17 = vadd.s32 32, %v10474_v21 }
 0x3c9   : > { %v16040_v2 = vsel %vm11462_vm2, 4294967295, %v16039_v2  ;;  %vm11506_vm7 = vcmp.eq.s32.totalorder %v2239_v12, %v11453_v44 }
 0x3ca   : > { %vm11456_vm1 = vcmp.eq.s32.totalorder %v2237_v26, %v11451_v15  ;;  %16041 = vst [vmem:[#allocation43_spill] sm:$0xff] %v16040_v2  ;;  %vm11467_vm4 = vcmp.eq.s32.totalorder %v2238_v43, %v11451_v15  ;;  %vm11500_vm6 = vcmp.eq.s32.totalorder %v2239_v12, %v11451_v15  ;;  %v16051_v43 = vmov 0 }
 0x3cb   : > { %v16037_v8 = vsel %vm11456_vm1, 4294967295, %v16036_v8  ;;  %v16043_v61 = vsel %vm11467_vm4, 4294967295, %v16042_v61  ;;  %v16049_v5 = vsel %vm11500_vm6, 4294967295, %v16048_v5  ;;  %v16052_v43 = vsel %vm11506_vm7, 4294967295, %v16051_v43 }
 0x3cc   : > { %3035 = vmatmul.mubr.bf16.vlgmr.msra.gmra.mrb[108].mxu0 %v16020_v19  ;;  %16038 = vst [vmem:[#allocation44_spill] sm:$0xff] %v16037_v8  ;;  %16044 = vst [vmem:[#allocation46_spill] sm:$0xff] %v16043_v61  ;;  %v2222_v19 = vadd.s32 24, %v10474_v21 }
 0x3cd   : > { %3044 = vmatprep.mubr.bf16.mxu0 %v15956_v40  ;;  %16050 = vst [vmem:[#allocation48_spill] sm:$0xff] %v16049_v5  ;;  %16053 = vst [vmem:[#allocation47_spill] sm:$0xff] %v16052_v43 }
 0x3ce   : > { %v2240_v33 = vand.u32 7, %v2222_v19 }
 0x3d0   : > { %vm11511_vm8 = vcmp.eq.s32.totalorder %v2240_v33, %v11451_v15  ;;  %vm11521_vm9 = vcmp.eq.s32.totalorder %v2240_v33, %v11453_v44  ;;  %v2242_v33 = vand.u32 7, %v2224_v49 }
 0x3d2   : > { %vm11555_vm12 = vcmp.eq.s32.totalorder %v2242_v33, %v11451_v15  ;;  %vm11565_vm13 = vcmp.eq.s32.totalorder %v2242_v33, %v11453_v44 }
 0x3d4   : > { %3045 = vmatmul.mubr.bf16.gmra.mrb[112].mxu0 %v16021_v25 }
 0x3d5   : > { %3054 = vmatprep.mubr.bf16.mxu0 %v15956_v40 }
 0x3dc   : > { %3055 = vmatmul.mubr.bf16.gmra.mrb[116].mxu0 %v16022_v24 }
 0x3dd   : > { %3064 = vmatprep.mubr.bf16.mxu0 %v15956_v40 }
 0x3e4   : > { %3065 = vmatmul.mubr.bf16.gmra.mrb[120].mxu0 %v16023_v0  ;;  %v16045_v0 = vmov 0 }
 0x3e5   : > { %3074 = vmatprep.mubr.bf16.mxu0 %v15956_v40  ;;  %v16046_v0 = vsel %vm11477_vm5, 4294967295, %v16045_v0 }
 0x3e6   : > { %16047 = vst [vmem:[#allocation45_spill] sm:$0xff] %v16046_v0 }
 0x3ec   : > { %3075 = vmatmul.mubr.bf16.gmra.mrb[124].mxu0 %v16024_v57 }
 0x3ed   : > { %3084 = vmatprep.mubr.bf16.mxu0 %v15956_v40 }
 0x3f4   : > { %3085 = vmatmul.mubr.bf16.gmra.mrb[128].mxu0 %v16027_v34 }
 0x3f5   : > { %3094 = vmatprep.mubr.bf16.mxu0 %v15956_v40 }
 0x3fc   : > { %3095 = vmatmul.mubr.bf16.gmra.mrb[132].mxu0 %v16030_v60 }
 0x3fd   : > { %3104 = vmatprep.mubr.bf16.mxu0 %v15956_v40 }
 0x404   : > { %3105 = vmatmul.mubr.bf16.gmra.mrb[136].mxu0 %v16033_v16 }
 0x405   : > { %3114 = vmatprep.mubr.bf16.mxu0 %v15956_v40 }
 0x40c   : > { %3115 = vmatmul.mubr.bf16.gmra.mrb[140].mxu0 %v16034_v50 }
 0x457   : > { %v2357_v63 = vpop.f32.mrb[72].mxu0 }
 0x458   : > { %v2446_v42 = vmul.f32 0.1118034, %v2357_v63  ;;  %v2359_v22 = vpop.f32.mrb[73].mxu0 }
 0x459   : > { %v2447_v59 = vmul.f32 0.1118034, %v2359_v22  ;;  %v2361_v35 = vpop.f32.mrb[74].mxu0  ;;  %v16054_v22 = vmov 0 }
 0x45a   : > { %v2448_v1 = vmul.f32 0.1118034, %v2361_v35  ;;  %v2363_v36 = vpop.f32.mrb[75].mxu0  ;;  %v11483_v57 = vsel %vm11462_vm2, %v2446_v42, -1e+30  ;;  %v16055_v22 = vsel %vm11511_vm8, 4294967295, %v16054_v22 }
 0x45b   : > { %v2449_v25 = vmul.f32 0.1118034, %v2363_v36  ;;  %v11474_v24 = vsel %vm11456_vm1, %v2447_v59, -1e+30  ;;  %16056 = vst [vmem:[#allocation69_spill] sm:$0xff] %v16055_v22 }
 0x45c   : > { %v2519_v39 = vsel %vm15640_vm3, %v11474_v24, -inf  ;;  %v11494_v27 = vsel %vm11477_vm5, %v2448_v1, -1e+30  ;;  %v16057_v1 = vmov 0 }
 0x45d   : > { %v2520_v34 = vmax.f32 %v11483_v57, %v2519_v39  ;;  %v11490_v54 = vsel %vm11467_vm4, %v2449_v25, -1e+30  ;;  %v16058_v1 = vsel %vm11521_vm9, 4294967295, %v16057_v1  ;;  %v2241_v25 = vand.u32 7, %v2223_v17 }
 0x45e   : > { %v2523_v60 = vsel %vm15640_vm3, %v11490_v54, -inf  ;;  %16059 = vst [vmem:[#allocation70_spill] sm:$0xff] %v16058_v1  ;;  %v16060_v17 = vmov 0 }
 0x45f   : > { %2521 = vmax.xlane.f32.xlu0 %v2520_v34  ;;  %v2367_v62 = vpop.f32.mrb[76].mxu0  ;;  %v2524_v16 = vmax.f32 %v11494_v27, %v2523_v60  ;;  %vm11544_vm10 = vcmp.eq.s32.totalorder %v2241_v25, %v11451_v15  ;;  %vm11550_vm11 = vcmp.eq.s32.totalorder %v2241_v25, %v11453_v44  ;;  %v16069_v25 = vmov 0 }
 0x460   : > { %v2450_v50 = vmul.f32 0.1118034, %v2367_v62  ;;  %v2369_v18 = vpop.f32.mrb[77].mxu0  ;;  %v16061_v17 = vsel %vm11544_vm10, 4294967295, %v16060_v17  ;;  %v16070_v25 = vsel %vm11565_vm13, 4294967295, %v16069_v25 }
 0x461   : > { %v2451_v56 = vmul.f32 0.1118034, %v2369_v18  ;;  %2525 = vmax.xlane.f32.xlu1 %v2524_v16  ;;  %v2371_v26 = vpop.f32.mrb[78].mxu0  ;;  %16062 = vst [vmem:[#allocation71_spill] sm:$0xff] %v16061_v17  ;;  %16071 = vst [vmem:[#allocation74_spill] sm:$0xff] %v16070_v25 }
 0x462   : > { %v2452_v63 = vmul.f32 0.1118034, %v2371_v26  ;;  %v2373_v42 = vpop.f32.mrb[79].mxu0  ;;  %v11527_v36 = vsel %vm11506_vm7, %v2450_v50, -1e+30 }
 0x463   : > { %v2453_v59 = vmul.f32 0.1118034, %v2373_v42  ;;  %v11518_v35 = vsel %vm11500_vm6, %v2451_v56, -1e+30  ;;  %v2225_v56 = vadd.s32 48, %v10474_v21  ;;  %v16063_v42 = vmov 0 }
 0x464   : > { %v2527_v19 = vsel %vm15640_vm3, %v11518_v35, -inf  ;;  %v11538_v34 = vsel %vm11521_vm9, %v2452_v63, -1e+30  ;;  %v16064_v42 = vsel %vm11550_vm11, 4294967295, %v16063_v42 }
 0x465   : > { %v2528_v39 = vmax.f32 %v11527_v36, %v2527_v19  ;;  %v11534_v12 = vsel %vm11511_vm8, %v2453_v59, -1e+30  ;;  %16065 = vst [vmem:[#allocation72_spill] sm:$0xff] %v16064_v42  ;;  %v16066_v19 = vmov 0 }
 0x466   : > { %v2531_v60 = vsel %vm15640_vm3, %v11534_v12, -inf  ;;  %v16067_v19 = vsel %vm11555_vm12, 4294967295, %v16066_v19 }
 0x467   : > { %2529 = vmax.xlane.f32.xlu0 %v2528_v39  ;;  %v2377_v62 = vpop.f32.mrb[80].mxu0  ;;  %v2532_v16 = vmax.f32 %v11538_v34, %v2531_v60  ;;  %16068 = vst [vmem:[#allocation73_spill] sm:$0xff] %v16067_v19  ;;  %v2226_v39 = vadd.s32 56, %v10474_v21 }
 0x468   : > { %v2454_v50 = vmul.f32 0.1118034, %v2377_v62  ;;  %v2379_v18 = vpop.f32.mrb[81].mxu0 }
 0x469   : > { %v2455_v26 = vmul.f32 0.1118034, %v2379_v18  ;;  %2533 = vmax.xlane.f32.xlu1 %v2532_v16  ;;  %v2381_v63 = vpop.f32.mrb[82].mxu0  ;;  %v2244_v3 = vand.u32 7, %v2226_v39 }
 0x46a   : > { %v2456_v49 = vmul.f32 0.1118034, %v2381_v63  ;;  %v2383_v59 = vpop.f32.mrb[83].mxu0  ;;  %v11571_v16 = vsel %vm11550_vm11, %v2454_v50, -1e+30  ;;  %v2243_v63 = vand.u32 7, %v2225_v56 }
 0x46b   : > { %v2457_v60 = vmul.f32 0.1118034, %v2383_v59  ;;  %v11562_v62 = vsel %vm11544_vm10, %v2455_v26, -1e+30  ;;  %vm11599_vm0 = vcmp.eq.s32.totalorder %v2244_v3, %v11451_v15 }
 0x46c   : > { %v2535_v18 = vsel %vm15640_vm3, %v11562_v62, -inf  ;;  %v11582_v33 = vsel %vm11565_vm13, %v2456_v49, -1e+30  ;;  %vm11588_vm14 = vcmp.eq.s32.totalorder %v2243_v63, %v11451_v15  ;;  %vm11594_vm15 = vcmp.eq.s32.totalorder %v2243_v63, %v11453_v44 }
 0x46d   : > { %v2536_v38 = vmax.f32 %v11571_v16, %v2535_v18  ;;  %v11578_v59 = vsel %vm11555_vm12, %v2457_v60, -1e+30  ;;  %v16072_v18 = vmov 0  ;;  %v2227_v60 = vadd.s32 64, %v10474_v21 }
 0x46e   : > { %v2539_v26 = vsel %vm15640_vm3, %v11578_v59, -inf  ;;  %v16073_v18 = vsel %vm11588_vm14, 4294967295, %v16072_v18  ;;  %v16076_v30 = vsel %vm11594_vm15, 4294967295, %v16075_v30  ;;  %vm11609_vm3 = vcmp.eq.s32.totalorder %v2244_v3, %v11453_v44 }
 0x46f   : > { %2537 = vmax.xlane.f32.xlu0 %v2536_v38  ;;  %v2387_v50 = vpop.f32.mrb[84].mxu0  ;;  %v2540_v52 = vmax.f32 %v11582_v33, %v2539_v26  ;;  %16074 = vst [vmem:[#allocation75_spill] sm:$0xff] %v16073_v18  ;;  %16077 = vst [vmem:[#allocation76_spill] sm:$0xff] %v16076_v30  ;;  %v16078_v26 = vmov 0  ;;  %vm16084_vm13 = vcmask 130048   ;;  %v2245_v47 = vand.u32 7, %v2227_v60 }
 0x470   : > { %v2458_v41 = vmul.f32 0.1118034, %v2387_v50  ;;  %v2389_v56 = vpop.f32.mrb[85].mxu0  ;;  %v16079_v26 = vsel %vm11599_vm0, 4294967295, %v16078_v26  ;;  %v2228_v50 = vadd.s32 72, %v10474_v21 }
 0x471   : > { %v2459_v13 = vmul.f32 0.1118034, %v2389_v56  ;;  %2541 = vmax.xlane.f32.xlu1 %v2540_v52  ;;  %v2391_v49 = vpop.f32.mrb[86].mxu0  ;;  %16080 = vst [vmem:[#allocation77_spill] sm:$0xff] %v16079_v26  ;;  %v16081_v52 = vmov 0 }
 0x472   : > { %v2460_v38 = vmul.f32 0.1118034, %v2391_v49  ;;  %v2393_v39 = vpop.f32.mrb[87].mxu0  ;;  %v16082_v52 = vsel %vm11609_vm3, 4294967295, %v16081_v52  ;;  %v11615_v63 = vsel %vm11594_vm15, %v2458_v41, -1e+30 }
 0x473   : > { %v2461_v14 = vmul.f32 0.1118034, %v2393_v39  ;;  %v11606_v56 = vsel %vm11588_vm14, %v2459_v13, -1e+30  ;;  %16083 = vst [vmem:[#allocation78_spill] sm:$0xff] %v16082_v52  ;;  %vm16085_vm14 = vmmov %vm16084_vm13  ;;  %v2246_v45 = vand.u32 7, %v2228_v50 }
 0x474   : > { %v2543_v49 = vsel %vm16084_vm13, %v11606_v56, -inf  ;;  %v11626_v13 = vsel %vm11609_vm3, %v2460_v38, -1e+30  ;;  %vm11632_vm13 = vcmp.eq.s32.totalorder %v2245_v47, %v11451_v15  ;;  %vm11638_vm3 = vcmp.eq.s32.totalorder %v2245_v47, %v11453_v44 }
 0x475   : > { %v2544_v48 = vmax.f32 %v11615_v63, %v2543_v49  ;;  %v11622_v39 = vsel %vm11599_vm0, %v2461_v14, -1e+30  ;;  %v16086_v49 = vmov 0  ;;  %v2229_v14 = vadd.s32 80, %v10474_v21 }
 0x476   : > { %v2547_v3 = vsel %vm16085_vm14, %v11622_v39, -inf  ;;  %v16087_v49 = vsel %vm11632_vm13, 4294967295, %v16086_v49  ;;  %v16090_v46 = vsel %vm11638_vm3, 4294967295, %v16089_v46  ;;  %vm11643_vm14 = vcmp.eq.s32.totalorder %v2246_v45, %v11451_v15 }
 0x477   : > { %2545 = vmax.xlane.f32.xlu0 %v2544_v48  ;;  %v2397_v41 = vpop.f32.mrb[88].mxu0  ;;  %v2548_v20 = vmax.f32 %v11626_v13, %v2547_v3  ;;  %16088 = vst [vmem:[#allocation79_spill] sm:$0xff] %v16087_v49  ;;  %16091 = vst [vmem:[#allocation80_spill] sm:$0xff] %v16090_v46  ;;  %v16092_v3 = vmov 0  ;;  %vm11653_vm15 = vcmp.eq.s32.totalorder %v2246_v45, %v11453_v44  ;;  %v16095_v47 = vmov 0 }
 0x478   : > { %v2462_v29 = vmul.f32 0.1118034, %v2397_v41  ;;  %v2399_v60 = vpop.f32.mrb[89].mxu0  ;;  %v16093_v3 = vsel %vm11643_vm14, 4294967295, %v16092_v3  ;;  %v2230_v41 = vadd.s32 88, %v10474_v21  ;;  %v16096_v47 = vsel %vm11653_vm15, 4294967295, %v16095_v47 }
 0x479   : > { %v2463_v4 = vmul.f32 0.1118034, %v2399_v60  ;;  %2549 = vmax.xlane.f32.xlu1 %v2548_v20  ;;  %v2401_v38 = vpop.f32.mrb[90].mxu0  ;;  %16094 = vst [vmem:[#allocation81_spill] sm:$0xff] %v16093_v3  ;;  %16097 = vst [vmem:[#allocation82_spill] sm:$0xff] %v16096_v47  ;;  %vm16098_vm0 = vcmask 130048  }
 0x47a   : > { %v2464_v48 = vmul.f32 0.1118034, %v2401_v38  ;;  %v2403_v50 = vpop.f32.mrb[91].mxu0  ;;  %v11659_v20 = vsel %vm11638_vm3, %v2462_v29, -1e+30  ;;  %v2247_v11 = vand.u32 7, %v2229_v14 }
 0x47b   : > { %v2465_v58 = vmul.f32 0.1118034, %v2403_v50  ;;  %v11650_v60 = vsel %vm11632_vm13, %v2463_v4, -1e+30  ;;  %vm16099_vm13 = vmmov %vm16098_vm0  ;;  %v2248_v7 = vand.u32 7, %v2230_v41 }
 0x47c   : > { %v2551_v38 = vsel %vm16098_vm0, %v11650_v60, -inf  ;;  %v11670_v45 = vsel %vm11653_vm15, %v2464_v48, -1e+30  ;;  %vm11676_vm0 = vcmp.eq.s32.totalorder %v2247_v11, %v11451_v15  ;;  %vm11682_vm15 = vcmp.eq.s32.totalorder %v2247_v11, %v11453_v44 }
 0x47d   : > { %v2552_v51 = vmax.f32 %v11659_v20, %v2551_v38  ;;  %v11666_v50 = vsel %vm11643_vm14, %v2465_v58, -1e+30  ;;  %v16100_v38 = vmov 0  ;;  %v2231_v58 = vadd.s32 96, %v10474_v21 }
 0x47e   : > { %v2555_v4 = vsel %vm16099_vm13, %v11666_v50, -inf  ;;  %v16101_v38 = vsel %vm11676_vm0, 4294967295, %v16100_v38  ;;  %v16104_v55 = vsel %vm11682_vm15, 4294967295, %v16103_v55  ;;  %vm11687_vm13 = vcmp.eq.s32.totalorder %v2248_v7, %v11451_v15 }
 0x47f   : > { %2553 = vmax.xlane.f32.xlu0 %v2552_v51  ;;  %v2407_v29 = vpop.f32.mrb[92].mxu0  ;;  %v2556_v53 = vmax.f32 %v11670_v45, %v2555_v4  ;;  %16102 = vst [vmem:[#allocation83_spill] sm:$0xff] %v16101_v38  ;;  %16105 = vst [vmem:[#allocation84_spill] sm:$0xff] %v16104_v55  ;;  %v16106_v4 = vmov 0  ;;  %vm11697_vm3 = vcmp.eq.s32.totalorder %v2248_v7, %v11453_v44  ;;  %vm16114_vm14 = vcmask 130048  }
 0x480   : > { %v2466_v32 = vmul.f32 0.1118034, %v2407_v29  ;;  %v2409_v14 = vpop.f32.mrb[93].mxu0  ;;  %v16107_v4 = vsel %vm11687_vm13, 4294967295, %v16106_v4  ;;  %v2232_v29 = vadd.s32 104, %v10474_v21  ;;  %v2249_v23 = vand.u32 7, %v2231_v58 }
 0x481   : > { %v2467_v31 = vmul.f32 0.1118034, %v2409_v14  ;;  %2557 = vmax.xlane.f32.xlu1 %v2556_v53  ;;  %v2411_v48 = vpop.f32.mrb[94].mxu0  ;;  %16108 = vst [vmem:[#allocation85_spill] sm:$0xff] %v16107_v4  ;;  %v16110_v53 = vmov 0 }
 0x482   : > { %v2468_v51 = vmul.f32 0.1118034, %v2411_v48  ;;  %v2413_v41 = vpop.f32.mrb[95].mxu0  ;;  %v16111_v53 = vsel %vm11697_vm3, 4294967295, %v16110_v53  ;;  %v11703_v11 = vsel %vm11682_vm15, %v2466_v32, -1e+30 }
 0x483   : > { %v2469_v28 = vmul.f32 0.1118034, %v2413_v41  ;;  %v11694_v14 = vsel %vm11676_vm0, %v2467_v31, -1e+30  ;;  %16112 = vst [vmem:[#allocation87_spill] sm:$0xff] %v16111_v53  ;;  %16113 = vst [vmem:[#allocation88_spill] sm:$0xff] %v11703_v11 }
 0x484   : > { %16109 = vst [vmem:[#allocation86_spill] sm:$0xff] %v11694_v14  ;;  %v2559_v48 = vsel %vm16114_vm14, %v11694_v14, -inf  ;;  %v11714_v31 = vsel %vm11697_vm3, %v2468_v51, -1e+30  ;;  %vm16117_vm0 = vmmov %vm16114_vm14  ;;  %v2250_v6 = vand.u32 7, %v2232_v29  ;;  %vm11720_vm14 = vcmp.eq.s32.totalorder %v2249_v23, %v11451_v15 }
 0x485   : > { %v2560_v9 = vmax.f32 %v11703_v11, %v2559_v48  ;;  %v11710_v41 = vsel %vm11687_vm13, %v2469_v28, -1e+30  ;;  %16116 = vst [vmem:[#allocation90_spill] sm:$0xff] %v11714_v31  ;;  %v16118_v48 = vmov 0  ;;  %v2233_v28 = vadd.s32 112, %v10474_v21 }
 0x486   : > { %16115 = vst [vmem:[#allocation89_spill] sm:$0xff] %v11710_v41  ;;  %v2563_v7 = vsel %vm16117_vm0, %v11710_v41, -inf  ;;  %v16119_v48 = vsel %vm11720_vm14, 4294967295, %v16118_v48  ;;  %vm11726_vm3 = vcmp.eq.s32.totalorder %v2249_v23, %v11453_v44  ;;  %v16121_v41 = vmov 0 }
 0x487   : > { %2561 = vmax.xlane.f32.xlu0 %v2560_v9  ;;  %v2417_v32 = vpop.f32.mrb[96].mxu0  ;;  %v2564_v40 = vmax.f32 %v11714_v31, %v2563_v7  ;;  %16120 = vst [vmem:[#allocation91_spill] sm:$0xff] %v16119_v48  ;;  %v16122_v41 = vsel %vm11726_vm3, 4294967295, %v16121_v41  ;;  %vm11731_vm0 = vcmp.eq.s32.totalorder %v2250_v6, %v11451_v15  ;;  %v16124_v7 = vmov 0 }
 0x488   : > { %v2470_v10 = vmul.f32 0.1118034, %v2417_v32  ;;  %v2419_v58 = vpop.f32.mrb[97].mxu0  ;;  %16123 = vst [vmem:[#allocation92_spill] sm:$0xff] %v16122_v41  ;;  %v16125_v7 = vsel %vm11731_vm0, 4294967295, %v16124_v7  ;;  %v2234_v32 = vadd.s32 120, %v10474_v21  ;;  %vm11741_vm15 = vcmp.eq.s32.totalorder %v2250_v6, %v11453_v44 }
 0x489   : > { %v2471_v37 = vmul.f32 0.1118034, %v2419_v58  ;;  %2565 = vmax.xlane.f32.xlu1 %v2564_v40  ;;  %v2421_v51 = vpop.f32.mrb[98].mxu0  ;;  %16126 = vst [vmem:[#allocation93_spill] sm:$0xff] %v16125_v7  ;;  %v16128_v40 = vmov 0  ;;  %vm16132_vm13 = vcmask 130048  }
 0x48a   : > { %v2472_v9 = vmul.f32 0.1118034, %v2421_v51  ;;  %v2423_v29 = vpop.f32.mrb[99].mxu0  ;;  %v16129_v40 = vsel %vm11741_vm15, 4294967295, %v16128_v40  ;;  %v11747_v23 = vsel %vm11726_vm3, %v2470_v10, -1e+30 }
 0x48b   : > { %v2473_v31 = vmul.f32 0.1118034, %v2423_v29  ;;  %v11738_v58 = vsel %vm11720_vm14, %v2471_v37, -1e+30  ;;  %16130 = vst [vmem:[#allocation95_spill] sm:$0xff] %v16129_v40  ;;  %16131 = vst [vmem:[#allocation96_spill] sm:$0xff] %v11747_v23 }
 0x48c   : > { %16127 = vst [vmem:[#allocation94_spill] sm:$0xff] %v11738_v58  ;;  %v2567_v51 = vsel %vm16132_vm13, %v11738_v58, -inf  ;;  %v2251_v14 = vand.u32 7, %v2233_v28  ;;  %v11758_v37 = vsel %vm11741_vm15, %v2472_v9, -1e+30  ;;  %vm16135_vm14 = vmmov %vm16132_vm13  ;;  %v2252_v41 = vand.u32 7, %v2234_v32 }
 0x48d   : > { %v2568_v11 = vmax.f32 %v11747_v23, %v2567_v51  ;;  %v11754_v29 = vsel %vm11731_vm0, %v2473_v31, -1e+30  ;;  %16134 = vst [vmem:[#allocation98_spill] sm:$0xff] %v11758_v37  ;;  %v16136_v51 = vmov 0  ;;  %v2235_v31 = vadd.s32 128, %v10474_v21 }
 0x48e   : > { %16133 = vst [vmem:[#allocation97_spill] sm:$0xff] %v11754_v29  ;;  %v2571_v6 = vsel %vm16135_vm14, %v11754_v29, -inf  ;;  %vm11764_vm13 = vcmp.eq.s32.totalorder %v2251_v14, %v11451_v15  ;;  %vm11770_vm15 = vcmp.eq.s32.totalorder %v2251_v14, %v11453_v44  ;;  %v16139_v29 = vmov 0 }
 0x48f   : > { %2569 = vmax.xlane.f32.xlu0 %v2568_v11  ;;  %v2427_v10 = vpop.f32.mrb[100].mxu0  ;;  %v2572_v53 = vmax.f32 %v11758_v37, %v2571_v6  ;;  %v16137_v51 = vsel %vm11764_vm13, 4294967295, %v16136_v51  ;;  %v16140_v29 = vsel %vm11770_vm15, 4294967295, %v16139_v29  ;;  %vm11775_vm14 = vcmp.eq.s32.totalorder %v2252_v41, %v11451_v15 }
 0x490   : > { %v2474_v58 = vmul.f32 0.1118034, %v2427_v10  ;;  %v2429_v28 = vpop.f32.mrb[101].mxu0  ;;  %16138 = vst [vmem:[#allocation99_spill] sm:$0xff] %v16137_v51  ;;  %16141 = vst [vmem:[#allocation100_spill] sm:$0xff] %v16140_v29  ;;  %v16142_v6 = vmov 0  ;;  %vm11785_vm3 = vcmp.eq.s32.totalorder %v2252_v41, %v11453_v44 }
 0x491   : > { %v2475_v23 = vmul.f32 0.1118034, %v2429_v28  ;;  %2573 = vmax.xlane.f32.xlu1 %v2572_v53  ;;  %v2431_v9 = vpop.f32.mrb[102].mxu0  ;;  %v16143_v6 = vsel %vm11775_vm14, 4294967295, %v16142_v6  ;;  %v2236_v10 = vadd.s32 136, %v10474_v21  ;;  %v16146_v14 = vmov 0 }
 0x492   : > { %v2476_v11 = vmul.f32 0.1118034, %v2431_v9  ;;  %v2433_v32 = vpop.f32.mrb[103].mxu0  ;;  %16144 = vst [vmem:[#allocation101_spill] sm:$0xff] %v16143_v6  ;;  %v16147_v14 = vsel %vm11785_vm3, 4294967295, %v16146_v14  ;;  %vm16150_vm0 = vcmask 130048  }
 0x493   : > { %v2477_v37 = vmul.f32 0.1118034, %v2433_v32  ;;  %v11782_v28 = vsel %vm11764_vm13, %v2475_v23, -1e+30  ;;  %16148 = vst [vmem:[#allocation103_spill] sm:$0xff] %v16147_v14  ;;  %v2253_v40 = vand.u32 7, %v2235_v31  ;;  %vm16153_vm13 = vmmov %vm16150_vm0 }
 0x494   : > { %16145 = vst [vmem:[#allocation102_spill] sm:$0xff] %v11782_v28  ;;  %v11791_v53 = vsel %vm11770_vm15, %v2474_v58, -1e+30  ;;  %v2575_v9 = vsel %vm16150_vm0, %v11782_v28, -inf  ;;  %v11802_v41 = vsel %vm11785_vm3, %v2476_v11, -1e+30 }
 0x495   : > { %16149 = vst [vmem:[#allocation104_spill] sm:$0xff] %v11791_v53  ;;  %v2576_v21 = vmax.f32 %v11791_v53, %v2575_v9  ;;  %v11798_v32 = vsel %vm11775_vm14, %v2477_v37, -1e+30  ;;  %16152 = vst [vmem:[#allocation106_spill] sm:$0xff] %v11802_v41  ;;  %v2254_v29 = vand.u32 7, %v2236_v10  ;;  %vm11808_vm0 = vcmp.eq.s32.totalorder %v2253_v40, %v11451_v15 }
 0x496   : > { %16151 = vst [vmem:[#allocation105_spill] sm:$0xff] %v11798_v32  ;;  %v2579_v23 = vsel %vm16153_vm13, %v11798_v32, -inf  ;;  %v16154_v9 = vmov 0  ;;  %vm11813_vm3 = vcmp.eq.s32.totalorder %v2253_v40, %v11453_v44  ;;  %v16157_v11 = vmov 0 }
 0x497   : > { %2577 = vmax.xlane.f32.xlu0 %v2576_v21  ;;  %v2437_v58 = vpop.f32.mrb[104].mxu0  ;;  %v2580_v51 = vmax.f32 %v11802_v41, %v2579_v23  ;;  %v16155_v9 = vsel %vm11808_vm0, 4294967295, %v16154_v9  ;;  %v16158_v11 = vsel %vm11813_vm3, 4294967295, %v16157_v11  ;;  %vm11818_vm13 = vcmp.eq.s32.totalorder %v2254_v29, %v11451_v15 }
 0x498   : > { %v2478_v28 = vmul.f32 0.1118034, %v2437_v58  ;;  %v2439_v31 = vpop.f32.mrb[105].mxu0  ;;  %16156 = vst [vmem:[#allocation107_spill] sm:$0xff] %v16155_v9  ;;  %16159 = vst [vmem:[#allocation108_spill] sm:$0xff] %v16158_v11  ;;  %v16160_v23 = vmov 0  ;;  %vm11827_vm15 = vcmp.eq.s32.totalorder %v2254_v29, %v11453_v44 }
 0x499   : > { %v2479_v37 = vmul.f32 0.1118034, %v2439_v31  ;;  %2581 = vmax.xlane.f32.xlu1 %v2580_v51  ;;  %v2441_v53 = vpop.f32.mrb[106].mxu0  ;;  %v16161_v23 = vsel %vm11818_vm13, 4294967295, %v16160_v23  ;;  %v16164_v51 = vmov 0  ;;  %vm16168_vm14 = vcmask 130048  }
 0x49a   : > { %v2480_v10 = vmul.f32 0.1118034, %v2441_v53  ;;  %v2443_v21 = vpop.f32.mrb[107].mxu0  ;;  %16162 = vst [vmem:[#allocation109_spill] sm:$0xff] %v16161_v23  ;;  %v16165_v51 = vsel %vm11827_vm15, 4294967295, %v16164_v51 }
 0x49b   : > { %v2481_v58 = vmul.f32 0.1118034, %v2443_v21  ;;  %v11824_v32 = vsel %vm11808_vm0, %v2479_v37, -1e+30  ;;  %16166 = vst [vmem:[#allocation111_spill] sm:$0xff] %v16165_v51  ;;  %vm16171_vm0 = vmmov %vm16168_vm14 }
 0x49c   : > { %16163 = vst [vmem:[#allocation110_spill] sm:$0xff] %v11824_v32  ;;  %v11833_v40 = vsel %vm11813_vm3, %v2478_v28, -1e+30  ;;  %v2583_v15 = vsel %vm16168_vm14, %v11824_v32, -inf  ;;  %v11844_v37 = vsel %vm11827_vm15, %v2480_v10, -1e+30  ;;  %vm16174_vm14 = vmmov %vm16171_vm0 }
 0x49d   : > { %16167 = vst [vmem:[#allocation112_spill] sm:$0xff] %v11833_v40  ;;  %v2584_v53 = vmax.f32 %v11833_v40, %v2583_v15  ;;  %v11840_v31 = vsel %vm11818_vm13, %v2481_v58, -1e+30  ;;  %16170 = vst [vmem:[#allocation114_spill] sm:$0xff] %v11844_v37 }
 0x49e   : > { %16169 = vst [vmem:[#allocation113_spill] sm:$0xff] %v11840_v31  ;;  %v2587_v44 = vsel %vm16171_vm0, %v11840_v31, -inf }
 0x49f   : > { %2585 = vmax.xlane.f32.xlu0 %v2584_v53  ;;  %v3036_v29 = vpop.f32.mrb[108].mxu0  ;;  %v2588_v28 = vmax.f32 %v11844_v37, %v2587_v44 }
 0x4a0   : > { %v3125_v21 = vmul.f32 0.1118034, %v3036_v29  ;;  %v3038_v11 = vpop.f32.mrb[109].mxu0 }
 0x4a1   : > { %v3126_v32 = vmul.f32 0.1118034, %v3038_v11  ;;  %v3040_v41 = vpop.f32.mrb[110].mxu0  ;;  %2589 = vmax.xlane.f32.xlu1 %v2588_v28 }
 0x4a2   : > { %v3127_v15 = vmul.f32 0.1118034, %v3040_v41  ;;  %v3042_v40 = vpop.f32.mrb[111].mxu0  ;;  %v11855_v10 = vsel %vm11462_vm2, %v3125_v21, -1e+30 }
 0x4a3   : > { %v3128_v58 = vmul.f32 0.1118034, %v3042_v40  ;;  %v11851_v51 = vsel %vm11456_vm1, %v3126_v32, -1e+30  ;;  %16173 = vst [vmem:[#allocation116_spill] sm:$0xff] %v11855_v10 }
 0x4a4   : > { %16172 = vst [vmem:[#allocation115_spill] sm:$0xff] %v11851_v51  ;;  %v3197_v53 = vsel %vm16174_vm14, %v11851_v51, -inf  ;;  %v11866_v41 = vsel %vm11477_vm5, %v3127_v15, -1e+30  ;;  %vm16179_vm14 = vmmov %vm16171_vm0 }
 0x4a5   : > { %v3198_v44 = vmax.f32 %v11855_v10, %v3197_v53  ;;  %v11862_v11 = vsel %vm11467_vm4, %v3128_v58, -1e+30  ;;  %16176 = vst [vmem:[#allocation118_spill] sm:$0xff] %v11866_v41 }
 0x4a6   : > { %16175 = vst [vmem:[#allocation117_spill] sm:$0xff] %v11862_v11  ;;  %v3201_v32 = vsel %vm16171_vm0, %v11862_v11, -inf }
 0x4a7   : > { %3199 = vmax.xlane.f32.xlu0 %v3198_v44  ;;  %v3046_v40 = vpop.f32.mrb[112].mxu0  ;;  %v3202_v29 = vmax.f32 %v11866_v41, %v3201_v32 }
 0x4a8   : > { %v3129_v28 = vmul.f32 0.1118034, %v3046_v40  ;;  %v3048_v21 = vpop.f32.mrb[113].mxu0 }
 0x4a9   : > { %v3130_v2 = vmul.f32 0.1118034, %v3048_v21  ;;  %v3050_v8 = vpop.f32.mrb[114].mxu0  ;;  %3203 = vmax.xlane.f32.xlu1 %v3202_v29 }
 0x4aa   : > { %v3131_v53 = vmul.f32 0.1118034, %v3050_v8  ;;  %v3052_v61 = vpop.f32.mrb[115].mxu0  ;;  %v11877_v15 = vsel %vm11506_vm7, %v3129_v28, -1e+30 }
 0x4ab   : > { %v3132_v58 = vmul.f32 0.1118034, %v3052_v61  ;;  %v11873_v0 = vsel %vm11500_vm6, %v3130_v2, -1e+30  ;;  %16178 = vst [vmem:[#allocation120_spill] sm:$0xff] %v11877_v15 }
 0x4ac   : > { %16177 = vst [vmem:[#allocation119_spill] sm:$0xff] %v11873_v0  ;;  %v3205_v44 = vsel %vm16179_vm14, %v11873_v0, -inf  ;;  %v11888_v8 = vsel %vm11521_vm9, %v3131_v53, -1e+30  ;;  %vm16184_vm14 = vmmov %vm16171_vm0 }
 0x4ad   : > { %v3206_v32 = vmax.f32 %v11877_v15, %v3205_v44  ;;  %v11884_v40 = vsel %vm11511_vm8, %v3132_v58, -1e+30  ;;  %16181 = vst [vmem:[#allocation122_spill] sm:$0xff] %v11888_v8 }
 0x4ae   : > { %16180 = vst [vmem:[#allocation121_spill] sm:$0xff] %v11884_v40  ;;  %v3209_v2 = vsel %vm16171_vm0, %v11884_v40, -inf  ;;  %vm16186_vm0 = vnez %v16070_v25 }
 0x4af   : > { %3207 = vmax.xlane.f32.xlu0 %v3206_v32  ;;  %v3056_v61 = vpop.f32.mrb[116].mxu0  ;;  %v3210_v29 = vmax.f32 %v11888_v8, %v3209_v2 }
 0x4b0   : > { %v3133_v28 = vmul.f32 0.1118034, %v3056_v61  ;;  %v3058_v21 = vpop.f32.mrb[117].mxu0 }
 0x4b1   : > { %v3134_v43 = vmul.f32 0.1118034, %v3058_v21  ;;  %v3060_v5 = vpop.f32.mrb[118].mxu0  ;;  %3211 = vmax.xlane.f32.xlu1 %v3210_v29 }
 0x4b2   : > { %v3135_v44 = vmul.f32 0.1118034, %v3060_v5  ;;  %v3062_v22 = vpop.f32.mrb[119].mxu0  ;;  %v11899_v53 = vsel %vm11550_vm11, %v3133_v28, -1e+30 }
 0x4b3   : > { %v3136_v58 = vmul.f32 0.1118034, %v3062_v22  ;;  %v11895_v1 = vsel %vm11544_vm10, %v3134_v43, -1e+30  ;;  %16183 = vst [vmem:[#allocation124_spill] sm:$0xff] %v11899_v53  ;;  %vm16188_vm10 = vmmov %vm16184_vm14 }
 0x4b4   : > { %16182 = vst [vmem:[#allocation123_spill] sm:$0xff] %v11895_v1  ;;  %v3213_v32 = vsel %vm16184_vm14, %v11895_v1, -inf  ;;  %v11910_v5 = vsel %vm16186_vm0, %v3135_v44, -1e+30  ;;  %vm16197_vm0 = vnez %v16079_v26 }
 0x4b5   : > { %v3214_v2 = vmax.f32 %v11899_v53, %v3213_v32  ;;  %v11906_v61 = vsel %vm11555_vm12, %v3136_v58, -1e+30  ;;  %16187 = vst [vmem:[#allocation126_spill] sm:$0xff] %v11910_v5  ;;  %vm16199_vm12 = vnez %v16076_v30 }
 0x4b6   : > { %16185 = vst [vmem:[#allocation125_spill] sm:$0xff] %v11906_v61  ;;  %v3217_v43 = vsel %vm16188_vm10, %v11906_v61, -inf  ;;  %vm16195_vm10 = vnez %v16073_v18 }
 0x4b7   : > { %3215 = vmax.xlane.f32.xlu0 %v3214_v2  ;;  %v3066_v22 = vpop.f32.mrb[120].mxu0  ;;  %v3218_v29 = vmax.f32 %v11910_v5, %v3217_v43 }
 0x4b8   : > { %v3068_v28 = vpop.f32.mrb[121].mxu0 }
 0x4b9   : > { %v11915_v21 = vpop.f32.mrb[122].mxu0  ;;  %3219 = vmax.xlane.f32.xlu1 %v3218_v29 }
 0x4ba   : > { %v3072_v32 = vpop.f32.mrb[123].mxu0 }
 0x4bf   : > { %v11917_v42 = vpop.f32.mrb[124].mxu0 }
 0x4c0   : > { %v3078_v58 = vpop.f32.mrb[125].mxu0 }
 0x4c1   : > { %v11919_v19 = vpop.f32.mrb[126].mxu0 }
 0x4c2   : > { %v11921_v25 = vpop.f32.mrb[127].mxu0 }
 0x4c7   : > { %v11923_v44 = vpop.f32.mrb[128].mxu0 }
 0x4c8   : > { %v11925_v17 = vpop.f32.mrb[129].mxu0 }
 0x4c9   : > { %v11927_v2 = vpop.f32.mrb[130].mxu0 }
 0x4ca   : > { %v11929_v61 = vpop.f32.mrb[131].mxu0 }
 0x4cf   : > { %v11931_v43 = vpop.f32.mrb[132].mxu0 }
 0x4d0   : > { %v11933_v5 = vpop.f32.mrb[133].mxu0 }
 0x4d1   : > { %v11935_v29 = vpop.f32.mrb[134].mxu0 }
 0x4d2   : > { %v11937_v1 = vpop.f32.mrb[135].mxu0 }
 0x4d7   : > { %v11939_v53 = vpop.f32.mrb[136].mxu0 }
 0x4d8   : > { %16189 = vst [vmem:[#allocation127_spill] sm:$0xff] %v11939_v53  ;;  %v11941_v40 = vpop.f32.mrb[137].mxu0 }
 0x4d9   : > { %v11943_v8 = vpop.f32.mrb[138].mxu0 }
 0x4da   : > { %16190 = vst [vmem:[#allocation128_spill] sm:$0xff] %v11943_v8  ;;  %v11945_v0 = vpop.f32.mrb[139].mxu0 }
 0x4df   : > { %v11947_v15 = vpop.f32.mrb[140].mxu0 }
 0x4e0   : > { %16191 = vst [vmem:[#allocation129_spill] sm:$0xff] %v11947_v15  ;;  %v11949_v11 = vpop.f32.mrb[141].mxu0 }
 0x4e1   : > { %16192 = vst [vmem:[#allocation130_spill] sm:$0xff] %v11949_v11  ;;  %v11951_v41 = vpop.f32.mrb[142].mxu0  ;;  %v3138_v11 = vmul.f32 0.1118034, %v3068_v28 }
 0x4e2   : > { %16193 = vst [vmem:[#allocation131_spill] sm:$0xff] %v11951_v41  ;;  %v11953_v51 = vpop.f32.mrb[143].mxu0 }
 0x4e3   : > { %16194 = vst [vmem:[#allocation132_spill] sm:$0xff] %v11953_v51 }
 0x4e9   : > { %v16257_v30 = vld [vmem:[#allocation131_spill] sm:$0xff] }
 0x4ea   : > { %v3159_v18 = vmul.f32 0.1118034, %v16257_v30 }
 0x4ec   : > { %v2522_v10 = vpop.xlane.xlu0 %2521 }
 0x4ed   : > { %v2591_v31 = vsub.f32 %v11483_v57, %v2522_v10  ;;  %v2592_v37 = vsub.f32 %v11474_v24, %v2522_v10 }
 0x4ee   : > { %v2526_v23 = vpop.xlane.xlu1 %2525 }
 0x4ef   : > { %v2627_v14 = vmul.f32 1.442695, %v2591_v31  ;;  %v2629_v9 = vmul.f32 1.442695, %v2592_v37  ;;  %v2593_v8 = vsub.f32 %v11494_v27, %v2526_v23  ;;  %v2594_v6 = vsub.f32 %v11490_v54, %v2526_v23 }
 0x4f0   : > { %v3137_v23 = vmul.f32 0.1118034, %v3066_v22 }
 0x4f1   : > { %9252 = vpow2.f32 %v2627_v14  ;;  %v2631_v15 = vmul.f32 1.442695, %v2593_v8  ;;  %v2633_v53 = vmul.f32 1.442695, %v2594_v6  ;;  %v3140_v6 = vmul.f32 0.1118034, %v3072_v32 }
 0x4f2   : > { %9254 = vpow2.f32 %v2629_v9 }
 0x4f3   : > { %9256 = vpow2.f32 %v2631_v15  ;;  %v11984_v32 = vsel %vm16197_vm0, %v3140_v6, -1e+30  ;;  %vm16201_vm0 = vnez %v16082_v52 }
 0x4f4   : > { %9258 = vpow2.f32 %v2633_v53  ;;  %v2530_v41 = vpop.xlane.xlu0 %2529  ;;  %v3142_v53 = vmul.f32 0.1118034, %v3078_v58 }
 0x4f5   : > { %v2595_v51 = vsub.f32 %v11527_v36, %v2530_v41  ;;  %v2596_v57 = vsub.f32 %v11518_v35, %v2530_v41  ;;  %v11967_v36 = vsel %vm16195_vm10, %v3138_v11, -1e+30  ;;  %vm16196_vm10 = vmmov %vm16184_vm14 }
 0x4f6   : > { %v2534_v24 = vpop.xlane.xlu1 %2533  ;;  %v3221_v22 = vsel %vm16196_vm10, %v11967_v36, -inf }
 0x4f7   : > { %v2635_v10 = vmul.f32 1.442695, %v2595_v51  ;;  %v2637_v31 = vmul.f32 1.442695, %v2596_v57  ;;  %v2597_v37 = vsub.f32 %v11538_v34, %v2534_v24  ;;  %v2598_v27 = vsub.f32 %v11534_v12, %v2534_v24 }
 0x4f9   : > { %9260 = vpow2.f32 %v2635_v10  ;;  %v2639_v54 = vmul.f32 1.442695, %v2597_v37  ;;  %v2641_v14 = vmul.f32 1.442695, %v2598_v27  ;;  %v3139_v10 = vmul.f32 0.1118034, %v11915_v21 }
 0x4fa   : > { %9262 = vpow2.f32 %v2637_v31  ;;  %v11993_v31 = vsel %vm16199_vm12, %v3137_v23, -1e+30  ;;  %vm16204_vm12 = vnez %v16090_v46 }
 0x4fb   : > { %v11963_v9 = vpop.eup %9252  ;;  %9264 = vpow2.f32 %v2639_v54 }
 0x4fc   : > { %v11969_v35 = vpop.eup %9254  ;;  %9266 = vpow2.f32 %v2641_v14  ;;  %v2538_v51 = vpop.xlane.xlu0 %2537  ;;  %v3144_v14 = vmul.f32 0.1118034, %v11921_v25 }
 0x4fd   : > { %v11971_v34 = vpop.eup %9256  ;;  %v2599_v12 = vsub.f32 %v11571_v16, %v2538_v51  ;;  %v2600_v41 = vsub.f32 %v11562_v62, %v2538_v51  ;;  %v2699_v15 = vsel %vm16184_vm14, %v11969_v35, 0.0  ;;  %vm16198_vm14 = vmmov %vm16196_vm10  ;;  %v3141_v51 = vmul.f32 0.1118034, %v11917_v42 }
 0x4fe   : > { %v11977_v8 = vpop.eup %9258  ;;  %v2542_v28 = vpop.xlane.xlu1 %2541  ;;  %v2700_v11 = vadd.f32 %v11963_v9, %v2699_v15  ;;  %v3146_v42 = vmul.f32 0.1118034, %v11925_v17 }
 0x4ff   : > { %v2643_v57 = vmul.f32 1.442695, %v2599_v12  ;;  %v2645_v16 = vmul.f32 1.442695, %v2600_v41  ;;  %v2601_v62 = vsub.f32 %v11582_v33, %v2542_v28  ;;  %v2602_v24 = vsub.f32 %v11578_v59, %v2542_v28 }
 0x500   : > { %2701 = vadd.xlane.f32.xlu0 %v2700_v11  ;;  %v2703_v58 = vsel %vm16198_vm14, %v11977_v8, 0.0  ;;  %v3222_v59 = vmax.f32 %v11993_v31, %v3221_v22  ;;  %v3225_v33 = vsel %vm16196_vm10, %v11984_v32, -inf  ;;  %vm16200_vm14 = vnez %v16087_v49 }
 0x501   : > { %9268 = vpow2.f32 %v2643_v57  ;;  %v2647_v37 = vmul.f32 1.442695, %v2601_v62  ;;  %v2649_v27 = vmul.f32 1.442695, %v2602_v24  ;;  %v2704_v54 = vadd.f32 %v11971_v34, %v2703_v58 }
 0x502   : > { %9270 = vpow2.f32 %v2645_v16  ;;  %v12004_v6 = vsel %vm16200_vm14, %v3142_v53, -1e+30  ;;  %v12011_v12 = vsel %vm16201_vm0, %v3139_v10, -1e+30  ;;  %vm16202_vm14 = vmmov %vm16196_vm10  ;;  %vm16203_vm0 = vnez %v16093_v3 }
 0x503   : > { %v12000_v21 = vpop.eup %9260  ;;  %9272 = vpow2.f32 %v2647_v37  ;;  %2705 = vadd.xlane.f32.xlu1 %v2704_v54  ;;  %v3226_v53 = vmax.f32 %v12011_v12, %v3225_v33  ;;  %v3229_v62 = vsel %vm16202_vm14, %v12004_v6, -inf  ;;  %v3143_v37 = vmul.f32 0.1118034, %v11919_v19  ;;  %vm16205_vm14 = vmmov %vm16196_vm10 }
 0x504   : > { %v12006_v23 = vpop.eup %9262  ;;  %9274 = vpow2.f32 %v2649_v27  ;;  %3223 = vmax.xlane.f32.xlu0 %v3222_v59  ;;  %v2546_v25 = vpop.xlane.xlu0 %2545  ;;  %v12037_v27 = vsel %vm16204_vm12, %v3141_v51, -1e+30  ;;  %v3148_v33 = vmul.f32 0.1118034, %v11929_v61  ;;  %vm16211_vm12 = vnez %v16104_v55  ;;  %v16236_v55 = vld [vmem:[#allocation97_spill] sm:$0xff] }
 0x505   : > { %v12013_v41 = vpop.eup %9264  ;;  %v2603_v15 = vsub.f32 %v11615_v63, %v2546_v25  ;;  %v2604_v28 = vsub.f32 %v11606_v56, %v2546_v25  ;;  %v2707_v11 = vsel %vm16196_vm10, %v12006_v23, 0.0  ;;  %v12028_v63 = vsel %vm16203_vm0, %v3144_v14, -1e+30 }
 0x506   : > { %v12020_v22 = vpop.eup %9266  ;;  %v2550_v57 = vpop.xlane.xlu1 %2549  ;;  %v2708_v16 = vadd.f32 %v12000_v21, %v2707_v11  ;;  %v3233_v19 = vsel %vm16205_vm14, %v12028_v63, -inf  ;;  %vm16207_vm0 = vnez %v16096_v47  ;;  %v16237_v47 = vld [vmem:[#allocation128_spill] sm:$0xff] }
 0x507   : > { %v2651_v56 = vmul.f32 1.442695, %v2603_v15  ;;  %v2653_v24 = vmul.f32 1.442695, %v2604_v28  ;;  %3227 = vmax.xlane.f32.xlu1 %v3226_v53  ;;  %v2605_v10 = vsub.f32 %v11626_v13, %v2550_v57  ;;  %v2606_v58 = vsub.f32 %v11622_v39, %v2550_v57 }
 0x508   : > { %2709 = vadd.xlane.f32.xlu0 %v2708_v16  ;;  %v2711_v17 = vsel %vm16196_vm10, %v12020_v22, 0.0  ;;  %v3230_v39 = vmax.f32 %v12037_v27, %v3229_v62  ;;  %vm16206_vm10 = vnez %v16101_v38  ;;  %v3145_v15 = vmul.f32 0.1118034, %v11923_v44 }
 0x509   : > { %9276 = vpow2.f32 %v2651_v56  ;;  %v2655_v54 = vmul.f32 1.442695, %v2605_v10  ;;  %v2657_v14 = vmul.f32 1.442695, %v2606_v58  ;;  %v2712_v59 = vadd.f32 %v12013_v41, %v2711_v17 }
 0x50a   : > { %9278 = vpow2.f32 %v2653_v24  ;;  %v12048_v51 = vsel %vm16206_vm10, %v3146_v42, -1e+30  ;;  %v12055_v28 = vsel %vm16207_vm0, %v3143_v37, -1e+30  ;;  %v3150_v44 = vmul.f32 0.1118034, %v11933_v5  ;;  %vm16208_vm10 = vmmov %vm16205_vm14 }
 0x50b   : > { %v12044_v13 = vpop.eup %9268  ;;  %9280 = vpow2.f32 %v2655_v54  ;;  %2713 = vadd.xlane.f32.xlu1 %v2712_v59  ;;  %v3234_v42 = vmax.f32 %v12055_v28, %v3233_v19  ;;  %v3237_v10 = vsel %vm16208_vm10, %v12048_v51, -inf  ;;  %vm16209_vm0 = vnez %v16107_v4 }
 0x50c   : > { %v12050_v25 = vpop.eup %9270  ;;  %9282 = vpow2.f32 %v2657_v14  ;;  %3231 = vmax.xlane.f32.xlu0 %v3230_v39  ;;  %v2554_v61 = vpop.xlane.xlu0 %2553  ;;  %v3147_v54 = vmul.f32 0.1118034, %v11927_v2  ;;  %v12081_v14 = vsel %vm16211_vm12, %v3145_v15, -1e+30  ;;  %v3152_v19 = vmul.f32 0.1118034, %v11937_v1 }
 0x50d   : > { %v12057_v53 = vpop.eup %9272  ;;  %v2607_v11 = vsub.f32 %v11659_v20, %v2554_v61  ;;  %v2608_v57 = vsub.f32 %v11650_v60, %v2554_v61  ;;  %v2715_v16 = vsel %vm16205_vm14, %v12050_v25, 0.0  ;;  %v12072_v20 = vsel %vm16209_vm0, %v3148_v33, -1e+30  ;;  %vm16210_vm14 = vmmov %vm16208_vm10 }
 0x50e   : > { %v12064_v62 = vpop.eup %9274  ;;  %v2558_v56 = vpop.xlane.xlu1 %2557  ;;  %v2716_v24 = vadd.f32 %v12044_v13, %v2715_v16  ;;  %v3155_v3 = vmul.f32 0.1118034, %v16237_v47 }
 0x50f   : > { %v2659_v60 = vmul.f32 1.442695, %v2607_v11  ;;  %v2661_v58 = vmul.f32 1.442695, %v2608_v57  ;;  %3235 = vmax.xlane.f32.xlu1 %v3234_v42  ;;  %v2609_v37 = vsub.f32 %v11670_v45, %v2558_v56  ;;  %v2610_v17 = vsub.f32 %v11666_v50, %v2558_v56  ;;  %v16213_v57 = vld [vmem:[#allocation87_spill] sm:$0xff]  ;;  %v16215_v56 = vld [vmem:[#allocation88_spill] sm:$0xff] }
 0x510   : > { %2717 = vadd.xlane.f32.xlu0 %v2716_v24  ;;  %v2719_v5 = vsel %vm16210_vm14, %v12064_v62, 0.0  ;;  %v3238_v50 = vmax.f32 %v12081_v14, %v3237_v10  ;;  %v3241_v45 = vsel %vm16208_vm10, %v12072_v20, -inf  ;;  %vm16212_vm14 = vnez %v16119_v48  ;;  %v16216_v10 = vld [vmem:[#allocation86_spill] sm:$0xff] }
 0x511   : > { %9284 = vpow2.f32 %v2659_v60  ;;  %v2663_v59 = vmul.f32 1.442695, %v2609_v37  ;;  %v2665_v33 = vmul.f32 1.442695, %v2610_v17  ;;  %v2720_v39 = vadd.f32 %v12057_v53, %v2719_v5 }
 0x512   : > { %9286 = vpow2.f32 %v2661_v58  ;;  %v12092_v15 = vsel %vm16212_vm14, %v3150_v44, -1e+30  ;;  %v3149_v11 = vmul.f32 0.1118034, %v11931_v43  ;;  %vm16214_vm0 = vnez %v16213_v57  ;;  %vm16217_vm14 = vmmov %vm16208_vm10  ;;  %v16233_v57 = vld [vmem:[#allocation101_spill] sm:$0xff] }
 0x513   : > { %v12088_v2 = vpop.eup %9276  ;;  %9288 = vpow2.f32 %v2663_v59  ;;  %2721 = vadd.xlane.f32.xlu1 %v2720_v39  ;;  %v12099_v42 = vsel %vm16214_vm0, %v3147_v54, -1e+30  ;;  %v3154_v43 = vmul.f32 0.1118034, %v11941_v40  ;;  %v3245_v54 = vsel %vm16217_vm14, %v12092_v15, -inf  ;;  %vm16223_vm14 = vmmov %vm16208_vm10 }
 0x514   : > { %v12094_v61 = vpop.eup %9278  ;;  %9290 = vpow2.f32 %v2665_v33  ;;  %3239 = vmax.xlane.f32.xlu0 %v3238_v50  ;;  %v2562_v1 = vpop.xlane.xlu0 %2561  ;;  %v3242_v44 = vmax.f32 %v12099_v42, %v3241_v45  ;;  %vm16218_vm0 = vnez %v16125_v7  ;;  %v16219_v50 = vld [vmem:[#allocation90_spill] sm:$0xff] }
 0x515   : > { %v12101_v16 = vpop.eup %9280  ;;  %v2611_v24 = vsub.f32 %v16215_v56, %v2562_v1  ;;  %v2612_v60 = vsub.f32 %v16216_v10, %v2562_v1  ;;  %v2723_v58 = vsel %vm16208_vm10, %v12094_v61, 0.0  ;;  %v12116_v59 = vsel %vm16218_vm0, %v3152_v19, -1e+30  ;;  %v16220_v1 = vld [vmem:[#allocation89_spill] sm:$0xff] }
 0x516   : > { %v12108_v37 = vpop.eup %9282  ;;  %v2566_v17 = vpop.xlane.xlu1 %2565  ;;  %v2724_v5 = vadd.f32 %v12088_v2, %v2723_v58  ;;  %v3151_v10 = vmul.f32 0.1118034, %v11935_v29  ;;  %v16221_v58 = vld [vmem:[#allocation92_spill] sm:$0xff]  ;;  %v3249_v29 = vsel %vm16223_vm14, %v12116_v59, -inf }
 0x517   : > { %v2667_v33 = vmul.f32 1.442695, %v2611_v24  ;;  %v2669_v39 = vmul.f32 1.442695, %v2612_v60  ;;  %3243 = vmax.xlane.f32.xlu1 %v3242_v44  ;;  %v2613_v45 = vsub.f32 %v16219_v50, %v2566_v17  ;;  %v2614_v56 = vsub.f32 %v16220_v1, %v2566_v17  ;;  %v16226_v50 = vld [vmem:[#allocation127_spill] sm:$0xff] }
 0x518   : > { %2725 = vadd.xlane.f32.xlu0 %v2724_v5  ;;  %v2727_v40 = vsel %vm16208_vm10, %v12108_v37, 0.0  ;;  %vm16222_vm12 = vnez %v16221_v58  ;;  %v3156_v60 = vmul.f32 0.1118034, %v11945_v0  ;;  %v16224_v5 = vld [vmem:[#allocation99_spill] sm:$0xff] }
 0x519   : > { %v12125_v48 = vsel %vm16222_vm12, %v3149_v11, -1e+30  ;;  %9292 = vpow2.f32 %v2667_v33  ;;  %v2671_v19 = vmul.f32 1.442695, %v2613_v45  ;;  %v2673_v7 = vmul.f32 1.442695, %v2614_v56 }
 0x51a   : > { %v2728_v24 = vadd.f32 %v12101_v16, %v2727_v40  ;;  %9294 = vpow2.f32 %v2669_v39  ;;  %v3246_v44 = vmax.f32 %v12125_v48, %v3245_v54  ;;  %vm16225_vm10 = vnez %v16224_v5  ;;  %v16227_v39 = vld [vmem:[#allocation95_spill] sm:$0xff]  ;;  %v16229_v56 = vld [vmem:[#allocation96_spill] sm:$0xff] }
 0x51b   : > { %v12132_v17 = vpop.eup %9284  ;;  %9296 = vpow2.f32 %v2671_v19  ;;  %v12136_v11 = vsel %vm16225_vm10, %v3154_v43, -1e+30  ;;  %v3153_v45 = vmul.f32 0.1118034, %v16226_v50  ;;  %vm16228_vm0 = vnez %v16227_v39  ;;  %v16230_v19 = vld [vmem:[#allocation94_spill] sm:$0xff]  ;;  %vm16232_vm10 = vmmov %vm16223_vm14 }
 0x51c   : > { %2729 = vadd.xlane.f32.xlu1 %v2728_v24  ;;  %v12138_v33 = vpop.eup %9286  ;;  %9298 = vpow2.f32 %v2673_v7  ;;  %3247 = vmax.xlane.f32.xlu0 %v3246_v44  ;;  %v2570_v0 = vpop.xlane.xlu0 %2569  ;;  %v12143_v54 = vsel %vm16228_vm0, %v3151_v10, -1e+30  ;;  %v16231_v7 = vld [vmem:[#allocation130_spill] sm:$0xff]  ;;  %v3253_v10 = vsel %vm16232_vm10, %v12136_v11, -inf  ;;  %vm16234_vm0 = vnez %v16233_v57 }
 0x51d   : > { %v12145_v1 = vpop.eup %9288  ;;  %v2615_v40 = vsub.f32 %v16229_v56, %v2570_v0  ;;  %v2616_v24 = vsub.f32 %v16230_v19, %v2570_v0  ;;  %v3250_v43 = vmax.f32 %v12143_v54, %v3249_v29  ;;  %v2731_v5 = vsel %vm16223_vm14, %v12138_v33, 0.0  ;;  %v16235_v29 = vld [vmem:[#allocation98_spill] sm:$0xff]  ;;  %vm16238_vm14 = vmmov %vm16232_vm10 }
 0x51e   : > { %v12152_v58 = vpop.eup %9290  ;;  %v3158_v44 = vmul.f32 0.1118034, %v16231_v7  ;;  %v2574_v50 = vpop.xlane.xlu1 %2573  ;;  %v2732_v39 = vadd.f32 %v12132_v17, %v2731_v5  ;;  %v12160_v56 = vsel %vm16234_vm0, %v3156_v60, -1e+30  ;;  %v16239_v7 = vld [vmem:[#allocation100_spill] sm:$0xff] }
 0x51f   : > { %v2675_v0 = vmul.f32 1.442695, %v2615_v40  ;;  %v2677_v19 = vmul.f32 1.442695, %v2616_v24  ;;  %v2617_v4 = vsub.f32 %v16235_v29, %v2574_v50  ;;  %v2618_v38 = vsub.f32 %v16236_v55, %v2574_v50  ;;  %v16241_v24 = vld [vmem:[#allocation132_spill] sm:$0xff]  ;;  %v16243_v50 = vld [vmem:[#allocation107_spill] sm:$0xff] }
 0x520   : > { %3251 = vmax.xlane.f32.xlu1 %v3250_v43  ;;  %2733 = vadd.xlane.f32.xlu0 %v2732_v39  ;;  %v2735_v5 = vsel %vm16238_vm14, %v12152_v58, 0.0  ;;  %vm16240_vm12 = vnez %v16239_v7  ;;  %v3160_v43 = vmul.f32 0.1118034, %v16241_v24  ;;  %v3257_v47 = vsel %vm16232_vm10, %v12160_v56, -inf  ;;  %v16250_v24 = vld [vmem:[#allocation104_spill] sm:$0xff] }
 0x521   : > { %v12169_v46 = vsel %vm16240_vm12, %v3153_v45, -1e+30  ;;  %9300 = vpow2.f32 %v2675_v0  ;;  %v2679_v60 = vmul.f32 1.442695, %v2617_v4  ;;  %v2681_v57 = vmul.f32 1.442695, %v2618_v38 }
 0x522   : > { %v2736_v40 = vadd.f32 %v12145_v1, %v2735_v5  ;;  %9302 = vpow2.f32 %v2677_v19  ;;  %v3254_v55 = vmax.f32 %v12169_v46, %v3253_v10  ;;  %vm16244_vm14 = vnez %v16243_v50  ;;  %v16246_v38 = vld [vmem:[#allocation129_spill] sm:$0xff]  ;;  %v16247_v19 = vld [vmem:[#allocation103_spill] sm:$0xff]  ;;  %v16251_v50 = vld [vmem:[#allocation102_spill] sm:$0xff] }
 0x523   : > { %v12176_v39 = vpop.eup %9292  ;;  %v12180_v29 = vsel %vm16244_vm14, %v3158_v44, -1e+30  ;;  %9304 = vpow2.f32 %v2679_v60  ;;  %v3157_v45 = vmul.f32 0.1118034, %v16246_v38  ;;  %vm16248_vm0 = vnez %v16247_v19  ;;  %vm16254_vm14 = vmmov %vm16232_vm10 }
 0x524   : > { %16242 = vst [vmem:[#allocation88_spill] sm:$0xff] %v12176_v39  ;;  %2737 = vadd.xlane.f32.xlu1 %v2736_v40  ;;  %v12182_v4 = vpop.eup %9294  ;;  %9306 = vpow2.f32 %v2681_v57  ;;  %3255 = vmax.xlane.f32.xlu0 %v3254_v55  ;;  %v2578_v0 = vpop.xlane.xlu0 %2577  ;;  %v12187_v10 = vsel %vm16248_vm0, %v3155_v3, -1e+30  ;;  %v12200_v55 = vsel %vm11818_vm13, %v3160_v43, -1e+30  ;;  %v3261_v19 = vsel %vm16254_vm14, %v12180_v29, -inf  ;;  %vm16259_vm14 = vmmov %vm16232_vm10 }
 0x525   : > { %16245 = vst [vmem:[#allocation86_spill] sm:$0xff] %v12182_v4  ;;  %v12189_v5 = vpop.eup %9296  ;;  %v2619_v7 = vsub.f32 %v16250_v24, %v2578_v0  ;;  %v2620_v44 = vsub.f32 %v16251_v50, %v2578_v0  ;;  %v3258_v60 = vmax.f32 %v12187_v10, %v3257_v47  ;;  %v2739_v40 = vsel %vm16232_vm10, %v12182_v4, 0.0  ;;  %v16255_v50 = vld [vmem:[#allocation106_spill] sm:$0xff]  ;;  %v16256_v0 = vld [vmem:[#allocation105_spill] sm:$0xff] }
 0x526   : > { %16249 = vst [vmem:[#allocation90_spill] sm:$0xff] %v12189_v5  ;;  %v12196_v49 = vpop.eup %9298  ;;  %v2582_v38 = vpop.xlane.xlu1 %2581  ;;  %v2740_v3 = vadd.f32 %v12176_v39, %v2739_v40  ;;  %v12212_v4 = vsel %vm11813_vm3, %v3157_v45, -1e+30 }
 0x527   : > { %16252 = vst [vmem:[#allocation89_spill] sm:$0xff] %v12196_v49  ;;  %v2683_v24 = vmul.f32 1.442695, %v2619_v7  ;;  %v2685_v52 = vmul.f32 1.442695, %v2620_v44  ;;  %v2621_v47 = vsub.f32 %v16255_v50, %v2582_v38  ;;  %v2622_v26 = vsub.f32 %v16256_v0, %v2582_v38  ;;  %v16265_v50 = vld [vmem:[#allocation110_spill] sm:$0xff] }
 0x528   : > { %3259 = vmax.xlane.f32.xlu1 %v3258_v60  ;;  %2741 = vadd.xlane.f32.xlu0 %v2740_v3  ;;  %v2743_v43 = vsel %vm16232_vm10, %v12196_v49, 0.0  ;;  %v3262_v44 = vmax.f32 %v12212_v4, %v3261_v19  ;;  %v3265_v60 = vsel %vm16259_vm14, %v12200_v55, -inf  ;;  %vm16268_vm14 = vmmov %vm16232_vm10 }
 0x529   : > { %9308 = vpow2.f32 %v2683_v24  ;;  %v2687_v40 = vmul.f32 1.442695, %v2621_v47  ;;  %v2689_v39 = vmul.f32 1.442695, %v2622_v26  ;;  %v2744_v7 = vadd.f32 %v12189_v5, %v2743_v43  ;;  %v16267_v5 = vld [vmem:[#allocation113_spill] sm:$0xff] }
 0x52a   : > { %9310 = vpow2.f32 %v2685_v52  ;;  %v12224_v26 = vsel %vm11827_vm15, %v3159_v18, -1e+30  ;;  %v16264_v52 = vld [vmem:[#allocation112_spill] sm:$0xff]  ;;  %v16266_v18 = vld [vmem:[#allocation114_spill] sm:$0xff]  ;;  %vm16300_vm15 = vmmov %vm16232_vm10 }
 0x52b   : > { %v12218_v30 = vpop.eup %9300  ;;  %9312 = vpow2.f32 %v2687_v40  ;;  %v3266_v0 = vmax.f32 %v12224_v26, %v3265_v60 }
 0x52c   : > { %16260 = vst [vmem:[#allocation127_spill] sm:$0xff] %v12218_v30  ;;  %2745 = vadd.xlane.f32.xlu1 %v2744_v7  ;;  %v12220_v38 = vpop.eup %9302  ;;  %9314 = vpow2.f32 %v2689_v39  ;;  %3263 = vmax.xlane.f32.xlu0 %v3262_v44  ;;  %v2586_v45 = vpop.xlane.xlu0 %2585 }
 0x52d   : > { %16261 = vst [vmem:[#allocation96_spill] sm:$0xff] %v12220_v38  ;;  %v12226_v24 = vpop.eup %9304  ;;  %v2623_v19 = vsub.f32 %v16264_v52, %v2586_v45  ;;  %v2624_v47 = vsub.f32 %v16265_v50, %v2586_v45  ;;  %v2747_v43 = vsel %vm16232_vm10, %v12220_v38, 0.0 }
 0x52e   : > { %16263 = vst [vmem:[#allocation94_spill] sm:$0xff] %v12226_v24  ;;  %v12233_v40 = vpop.eup %9306  ;;  %v2590_v39 = vpop.xlane.xlu1 %2589  ;;  %v2748_v7 = vadd.f32 %v12218_v30, %v2747_v43 }
 0x52f   : > { %v2691_v44 = vmul.f32 1.442695, %v2623_v19  ;;  %v2693_v3 = vmul.f32 1.442695, %v2624_v47  ;;  %v2625_v57 = vsub.f32 %v16266_v18, %v2590_v39  ;;  %v2626_v49 = vsub.f32 %v16267_v5, %v2590_v39  ;;  %v16272_v5 = vld [vmem:[#allocation116_spill] sm:$0xff]  ;;  %v16273_v39 = vld [vmem:[#allocation115_spill] sm:$0xff] }
 0x530   : > { %3267 = vmax.xlane.f32.xlu1 %v3266_v0  ;;  %2749 = vadd.xlane.f32.xlu0 %v2748_v7  ;;  %v2751_v45 = vsel %vm16268_vm14, %v12233_v40, 0.0  ;;  %vm16277_vm14 = vmmov %vm16232_vm10 }
 0x531   : > { %9316 = vpow2.f32 %v2691_v44  ;;  %v2695_v60 = vmul.f32 1.442695, %v2625_v57  ;;  %v2697_v52 = vmul.f32 1.442695, %v2626_v49  ;;  %v2752_v50 = vadd.f32 %v12226_v24, %v2751_v45 }
 0x532   : > { %9318 = vpow2.f32 %v2693_v3 }
 0x533   : > { %v12241_v38 = vpop.eup %9308  ;;  %9320 = vpow2.f32 %v2695_v60  ;;  %v16275_v60 = vld [vmem:[#allocation118_spill] sm:$0xff] }
 0x534   : > { %16269 = vst [vmem:[#allocation130_spill] sm:$0xff] %v12241_v38  ;;  %2753 = vadd.xlane.f32.xlu1 %v2752_v50  ;;  %v12243_v19 = vpop.eup %9310  ;;  %9322 = vpow2.f32 %v2697_v52  ;;  %v3200_v47 = vpop.xlane.xlu0 %3199  ;;  %v16276_v52 = vld [vmem:[#allocation117_spill] sm:$0xff] }
 0x535   : > { %16270 = vst [vmem:[#allocation98_spill] sm:$0xff] %v12243_v19  ;;  %v12245_v0 = vpop.eup %9312  ;;  %v3269_v43 = vsub.f32 %v16272_v5, %v3200_v47  ;;  %v3270_v7 = vsub.f32 %v16273_v39, %v3200_v47  ;;  %v2755_v49 = vsel %vm16232_vm10, %v12243_v19, 0.0 }
 0x536   : > { %16271 = vst [vmem:[#allocation97_spill] sm:$0xff] %v12245_v0  ;;  %v12251_v57 = vpop.eup %9314  ;;  %v3204_v3 = vpop.xlane.xlu1 %3203  ;;  %v2756_v44 = vadd.f32 %v12241_v38, %v2755_v49 }
 0x537   : > { %16274 = vst [vmem:[#allocation128_spill] sm:$0xff] %v12251_v57  ;;  %v3305_v18 = vmul.f32 1.442695, %v3269_v43  ;;  %v3307_v45 = vmul.f32 1.442695, %v3270_v7  ;;  %v3271_v50 = vsub.f32 %v16275_v60, %v3204_v3  ;;  %v3272_v24 = vsub.f32 %v16276_v52, %v3204_v3  ;;  %v16281_v3 = vld [vmem:[#allocation120_spill] sm:$0xff] }
 0x538   : > { %2757 = vadd.xlane.f32.xlu0 %v2756_v44  ;;  %v2759_v5 = vsel %vm16277_vm14, %v12251_v57, 0.0  ;;  %v16282_v60 = vld [vmem:[#allocation119_spill] sm:$0xff]  ;;  %vm16286_vm14 = vmmov %vm16232_vm10 }
 0x539   : > { %9324 = vpow2.f32 %v3305_v18  ;;  %v3309_v47 = vmul.f32 1.442695, %v3271_v50  ;;  %v3311_v39 = vmul.f32 1.442695, %v3272_v24  ;;  %v2760_v19 = vadd.f32 %v12245_v0, %v2759_v5 }
 0x53a   : > { %9326 = vpow2.f32 %v3307_v45 }
 0x53b   : > { %v12259_v30 = vpop.eup %9316  ;;  %9328 = vpow2.f32 %v3309_v47  ;;  %2761 = vadd.xlane.f32.xlu1 %v2760_v19  ;;  %v16284_v47 = vld [vmem:[#allocation122_spill] sm:$0xff] }
 0x53c   : > { %16278 = vst [vmem:[#allocation132_spill] sm:$0xff] %v12259_v30  ;;  %v12261_v43 = vpop.eup %9318  ;;  %9330 = vpow2.f32 %v3311_v39  ;;  %v3208_v7 = vpop.xlane.xlu0 %3207  ;;  %v16285_v39 = vld [vmem:[#allocation121_spill] sm:$0xff] }
 0x53d   : > { %16279 = vst [vmem:[#allocation129_spill] sm:$0xff] %v12261_v43  ;;  %v12263_v49 = vpop.eup %9320  ;;  %v3273_v44 = vsub.f32 %v16281_v3, %v3208_v7  ;;  %v3274_v52 = vsub.f32 %v16282_v60, %v3208_v7  ;;  %v2763_v24 = vsel %vm16232_vm10, %v12261_v43, 0.0 }
 0x53e   : > { %16280 = vst [vmem:[#allocation104_spill] sm:$0xff] %v12263_v49  ;;  %v12269_v18 = vpop.eup %9322  ;;  %v3212_v45 = vpop.xlane.xlu1 %3211  ;;  %v2764_v50 = vadd.f32 %v12259_v30, %v2763_v24 }
 0x53f   : > { %16283 = vst [vmem:[#allocation102_spill] sm:$0xff] %v12269_v18  ;;  %v3313_v5 = vmul.f32 1.442695, %v3273_v44  ;;  %v3315_v19 = vmul.f32 1.442695, %v3274_v52  ;;  %v3275_v38 = vsub.f32 %v16284_v47, %v3212_v45  ;;  %v3276_v0 = vsub.f32 %v16285_v39, %v3212_v45  ;;  %v16288_v45 = vld [vmem:[#allocation124_spill] sm:$0xff] }
 0x540   : > { %2765 = vadd.xlane.f32.xlu0 %v2764_v50  ;;  %v2767_v3 = vsel %vm16286_vm14, %v12269_v18, 0.0  ;;  %v16289_v47 = vld [vmem:[#allocation123_spill] sm:$0xff]  ;;  %vm16292_vm14 = vmmov %vm16232_vm10 }
 0x541   : > { %9332 = vpow2.f32 %v3313_v5  ;;  %v3317_v7 = vmul.f32 1.442695, %v3275_v38  ;;  %v3319_v60 = vmul.f32 1.442695, %v3276_v0  ;;  %v2768_v43 = vadd.f32 %v12263_v49, %v2767_v3 }
 0x542   : > { %9334 = vpow2.f32 %v3315_v19 }
 0x543   : > { %v12277_v57 = vpop.eup %9324  ;;  %9336 = vpow2.f32 %v3317_v7  ;;  %2769 = vadd.xlane.f32.xlu1 %v2768_v43  ;;  %v16290_v7 = vld [vmem:[#allocation126_spill] sm:$0xff] }
 0x544   : > { %v12279_v44 = vpop.eup %9326  ;;  %9338 = vpow2.f32 %v3319_v60  ;;  %v3216_v52 = vpop.xlane.xlu0 %3215  ;;  %v16291_v60 = vld [vmem:[#allocation125_spill] sm:$0xff] }
 0x545   : > { %16287 = vst [vmem:[#allocation106_spill] sm:$0xff] %v12279_v44  ;;  %v12281_v24 = vpop.eup %9328  ;;  %v3277_v50 = vsub.f32 %v16288_v45, %v3216_v52  ;;  %v3278_v39 = vsub.f32 %v16289_v47, %v3216_v52  ;;  %v3377_v38 = vsel %vm16232_vm10, %v12279_v44, 0.0 }
 0x546   : > { %v12287_v0 = vpop.eup %9330  ;;  %v3220_v5 = vpop.xlane.xlu1 %3219  ;;  %v3378_v19 = vadd.f32 %v12277_v57, %v3377_v38 }
 0x547   : > { %v3321_v3 = vmul.f32 1.442695, %v3277_v50  ;;  %v3323_v43 = vmul.f32 1.442695, %v3278_v39  ;;  %v3279_v30 = vsub.f32 %v16290_v7, %v3220_v5  ;;  %v3280_v49 = vsub.f32 %v16291_v60, %v3220_v5 }
 0x548   : > { %3379 = vadd.xlane.f32.xlu0 %v3378_v19  ;;  %v3381_v45 = vsel %vm16292_vm14, %v12287_v0, 0.0  ;;  %vm16296_vm14 = vmmov %vm16232_vm10 }
 0x549   : > { %9340 = vpow2.f32 %v3321_v3  ;;  %v3325_v52 = vmul.f32 1.442695, %v3279_v30  ;;  %v3327_v47 = vmul.f32 1.442695, %v3280_v49  ;;  %v3382_v44 = vadd.f32 %v12281_v24, %v3381_v45 }
 0x54a   : > { %9342 = vpow2.f32 %v3323_v43 }
 0x54b   : > { %v12295_v18 = vpop.eup %9332  ;;  %9344 = vpow2.f32 %v3325_v52  ;;  %3383 = vadd.xlane.f32.xlu1 %v3382_v44 }
 0x54c   : > { %16293 = vst [vmem:[#allocation105_spill] sm:$0xff] %v12295_v18  ;;  %v12297_v50 = vpop.eup %9334  ;;  %9346 = vpow2.f32 %v3327_v47 }
 0x54d   : > { %v12299_v39 = vpop.eup %9336  ;;  %v3385_v38 = vsel %vm16232_vm10, %v12297_v50, 0.0 }
 0x54e   : > { %16294 = vst [vmem:[#allocation131_spill] sm:$0xff] %v12299_v39  ;;  %v12303_v5 = vpop.eup %9338  ;;  %v3386_v30 = vadd.f32 %v12295_v18, %v3385_v38 }
 0x54f   : > { %16295 = vst [vmem:[#allocation112_spill] sm:$0xff] %v12303_v5  ;;  %v3389_v49 = vsel %vm16296_vm14, %v12303_v5, 0.0  ;;  %vm16305_vm14 = vmmov %vm16232_vm10 }
 0x550   : > { %3387 = vadd.xlane.f32.xlu0 %v3386_v30  ;;  %v3390_v19 = vadd.f32 %v12299_v39, %v3389_v49 }
 0x552   : > { %3391 = vadd.xlane.f32.xlu1 %v3390_v19 }
 0x553   : > { %v12309_v44 = vpop.eup %9340 }
 0x554   : > { %16297 = vst [vmem:[#allocation110_spill] sm:$0xff] %v12309_v44  ;;  %v12311_v3 = vpop.eup %9342 }
 0x555   : > { %16298 = vst [vmem:[#allocation114_spill] sm:$0xff] %v12311_v3  ;;  %v12313_v43 = vpop.eup %9344  ;;  %v3393_v7 = vsel %vm16300_vm15, %v12311_v3, 0.0  ;;  %vm16301_vm15 = vmmov %vm16232_vm10 }
 0x556   : > { %16299 = vst [vmem:[#allocation113_spill] sm:$0xff] %v12313_v43  ;;  %v12317_v60 = vpop.eup %9346  ;;  %v3394_v45 = vadd.f32 %v12309_v44, %v3393_v7 }
 0x557   : > { %v3397_v52 = vsel %vm16232_vm10, %v12317_v60, 0.0 }
 0x558   : > { %3395 = vadd.xlane.f32.xlu0 %v3394_v45  ;;  %v3398_v47 = vadd.f32 %v12313_v43, %v3397_v52 }
 0x55a   : > { %3399 = vadd.xlane.f32.xlu1 %v3398_v47 }
 0x58d   : > { %v2702_v38 = vpop.xlane.xlu0 %2701 }
 0x58e   : > { %9348 = vrcp.f32 %v2702_v38 }
 0x590   : > { %v2706_v30 = vpop.xlane.xlu1 %2705 }
 0x591   : > { %9350 = vrcp.f32 %v2706_v30  ;;  %v3224_v49 = vpop.xlane.xlu0 %3223 }
 0x592   : > { %v3281_v19 = vsub.f32 %v11993_v31, %v3224_v49  ;;  %v3282_v3 = vsub.f32 %v11967_v36, %v3224_v49 }
 0x594   : > { %v3329_v18 = vmul.f32 1.442695, %v3281_v19  ;;  %v3331_v39 = vmul.f32 1.442695, %v3282_v3  ;;  %v3228_v5 = vpop.xlane.xlu1 %3227 }
 0x595   : > { %v3283_v7 = vsub.f32 %v12011_v12, %v3228_v5  ;;  %v3284_v44 = vsub.f32 %v11984_v32, %v3228_v5  ;;  %v2710_v45 = vpop.xlane.xlu0 %2709 }
 0x596   : > { %9352 = vpow2.f32 %v3329_v18 }
 0x597   : > { %9354 = vpow2.f32 %v3331_v39  ;;  %v3333_v52 = vmul.f32 1.442695, %v3283_v7  ;;  %v3335_v47 = vmul.f32 1.442695, %v3284_v44 }
 0x598   : > { %v9349_v38 = vpop.eup %9348  ;;  %9356 = vrcp.f32 %v2710_v45  ;;  %v2714_v30 = vpop.xlane.xlu1 %2713 }
 0x599   : > { %9358 = vpow2.f32 %v3333_v52  ;;  %v3232_v43 = vpop.xlane.xlu0 %3231  ;;  %v2789_v12 = vmul.f32 %v9349_v38, %v11963_v9  ;;  %v2790_v32 = vmul.f32 %v9349_v38, %v11969_v35 }
 0x59a   : > { %9360 = vpow2.f32 %v3335_v47  ;;  %v3285_v36 = vsub.f32 %v12037_v27, %v3232_v43  ;;  %v3286_v31 = vsub.f32 %v12004_v6, %v3232_v43  ;;  %v16303_v47 = vld [vmem:[#allocation51_spill] sm:$0xff] }
 0x59b   : > { %v9351_v3 = vpop.eup %9350  ;;  %9362 = vrcp.f32 %v2714_v30 }
 0x59c   : > { %v2791_v18 = vmul.f32 %v9351_v3, %v11971_v34  ;;  %v3337_v39 = vmul.f32 1.442695, %v3285_v36  ;;  %v3339_v5 = vmul.f32 1.442695, %v3286_v31  ;;  %v3236_v44 = vpop.xlane.xlu1 %3235  ;;  %v2792_v49 = vmul.f32 %v9351_v3, %v11977_v8 }
 0x59d   : > { %v3287_v19 = vsub.f32 %v12055_v28, %v3236_v44  ;;  %v3288_v7 = vsub.f32 %v12028_v63, %v3236_v44  ;;  %v2718_v27 = vpop.xlane.xlu0 %2717  ;;  %v16302_v63 = vld [vmem:[#allocation52_spill] sm:$0xff] }
 0x59e   : > { %9364 = vpow2.f32 %v3337_v39  ;;  %v2826_v6 = vpack.c.bf16 %v2792_v49, %v2790_v32  ;;  %v2825_v43 = vpack.c.bf16 %v2791_v18, %v2789_v12  ;;  %v16304_v38 = vpack.c.bf16 %v16302_v63, %v16303_v47 }
 0x59f   : > { %9366 = vpow2.f32 %v3339_v5  ;;  %v3341_v9 = vmul.f32 1.442695, %v3287_v19  ;;  %v3343_v45 = vmul.f32 1.442695, %v3288_v7  ;;  %v16306_v12 = vmov 0  }
 0x5a0   : > { %v12335_v52 = vpop.eup %9352  ;;  %9368 = vrcp.f32 %v2718_v27  ;;  %8411 = vmatprep.mubr.msk.bf16.mxu1 %vm16301_vm15, %v2826_v6  ;;  %v2722_v35 = vpop.xlane.xlu1 %2721  ;;  %vm16310_vm15 = vmmov %vm16232_vm10 }
 0x5a1   : > { %v12338_v34 = vpop.eup %9354  ;;  %9370 = vpow2.f32 %v3341_v9  ;;  %2903 = vmatmul.mubr.bf16.vlgmr.msra.gmra.mrb[72].mxu1 %v2825_v43  ;;  %v3240_v8 = vpop.xlane.xlu0 %3239  ;;  %v16307_v43 = vld [vmem:[#allocation54_spill] sm:$0xff]  ;;  %v16308_v9 = vld [vmem:[#allocation53_spill] sm:$0xff] }
 0x5a2   : > { %v9357_v28 = vpop.eup %9356  ;;  %9372 = vpow2.f32 %v3343_v45  ;;  %3549 = vmatpush1.bf16.msra.mxu1 %v16304_v38  ;;  %v3289_v30 = vsub.f32 %v12081_v14, %v3240_v8  ;;  %v3290_v36 = vsub.f32 %v12048_v51, %v3240_v8  ;;  %v3401_v31 = vsel %vm16305_vm14, %v12338_v34, 0.0  ;;  %vm16314_vm14 = vmmov %vm16232_vm10 }
 0x5a3   : > { %v12347_v3 = vpop.eup %9358  ;;  %9374 = vrcp.f32 %v2722_v35  ;;  %3550 = vmatprep.subr.bf16.mxu1 %v16306_v12  ;;  %v3402_v32 = vadd.f32 %v12335_v52, %v3401_v31  ;;  %v2794_v49 = vmul.f32 %v9357_v28, %v12006_v23  ;;  %v2793_v6 = vmul.f32 %v9357_v28, %v12000_v21 }
 0x5a4   : > { %v12351_v18 = vpop.eup %9360  ;;  %v3345_v39 = vmul.f32 1.442695, %v3289_v30  ;;  %v3347_v5 = vmul.f32 1.442695, %v3290_v36  ;;  %v3244_v44 = vpop.xlane.xlu1 %3243  ;;  %v16309_v45 = vpack.c.bf16 %v16307_v43, %v16308_v9 }
 0x5a5   : > { %v9363_v14 = vpop.eup %9362  ;;  %v3291_v51 = vsub.f32 %v12099_v42, %v3244_v44  ;;  %v3292_v19 = vsub.f32 %v12072_v20, %v3244_v44  ;;  %3403 = vadd.xlane.f32.xlu0 %v3402_v32  ;;  %v2726_v7 = vpop.xlane.xlu0 %2725  ;;  %v3405_v27 = vsel %vm16232_vm10, %v12351_v18, 0.0 }
 0x5a6   : > { %9376 = vpow2.f32 %v3345_v39  ;;  %3551 = vmatpush1.bf16.msra.mxu1 %v16309_v45  ;;  %v3406_v35 = vadd.f32 %v12347_v3, %v3405_v27  ;;  %v2796_v23 = vmul.f32 %v9363_v14, %v12020_v22  ;;  %v2795_v42 = vmul.f32 %v9363_v14, %v12013_v41  ;;  %v16311_v41 = vld [vmem:[#allocation56_spill] sm:$0xff]  ;;  %v16312_v22 = vld [vmem:[#allocation55_spill] sm:$0xff] }
 0x5a7   : > { %9378 = vpow2.f32 %v3347_v5  ;;  %v3349_v20 = vmul.f32 1.442695, %v3291_v51  ;;  %v3351_v8 = vmul.f32 1.442695, %v3292_v19  ;;  %3552 = vmatprep.subr.bf16.mxu1 %v16306_v12  ;;  %v16313_v31 = vpack.c.bf16 %v16311_v41, %v16312_v22 }
 0x5a8   : > { %v12366_v63 = vpop.eup %9364  ;;  %9380 = vrcp.f32 %v2726_v7  ;;  %3407 = vadd.xlane.f32.xlu1 %v3406_v35  ;;  %v2828_v21 = vpack.c.bf16 %v2796_v23, %v2794_v49  ;;  %v2827_v47 = vpack.c.bf16 %v2795_v42, %v2793_v6  ;;  %v16315_v35 = vld [vmem:[#allocation58_spill] sm:$0xff]  ;;  %v16316_v23 = vld [vmem:[#allocation57_spill] sm:$0xff] }
 0x5a9   : > { %v2730_v28 = vpop.xlane.xlu1 %2729  ;;  %v12368_v38 = vpop.eup %9366  ;;  %9382 = vpow2.f32 %v3349_v20  ;;  %v16317_v42 = vpack.c.bf16 %v16315_v35, %v16316_v23  ;;  %v16324_v35 = vld [vmem:[#allocation61_spill] sm:$0xff] }
 0x5aa   : > { %v3248_v30 = vpop.xlane.xlu0 %3247  ;;  %v9369_v36 = vpop.eup %9368  ;;  %9384 = vpow2.f32 %v3351_v8  ;;  %8412 = vmatprep.mubr.msk.bf16.mxu1 %vm16310_vm15, %v2828_v21  ;;  %3553 = vmatpush1.bf16.msra.mxu1 %v16313_v31  ;;  %v3409_v5 = vsel %vm16314_vm14, %v12368_v38, 0.0  ;;  %vm16318_vm15 = vmmov %vm16232_vm10 }
 0x5ab   : > { %v3293_v32 = vsub.f32 %v12125_v48, %v3248_v30  ;;  %v3294_v39 = vsub.f32 %v12092_v15, %v3248_v30  ;;  %v12378_v44 = vpop.eup %9370  ;;  %9386 = vrcp.f32 %v2730_v28  ;;  %2911 = vmatmul.mubr.bf16.gmra.mrb[76].mxu1 %v2827_v47  ;;  %3554 = vmatprep.subr.bf16.mxu1 %v16306_v12  ;;  %v3410_v49 = vadd.f32 %v12366_v63, %v3409_v5  ;;  %vm16322_vm14 = vmmov %vm16232_vm10 }
 0x5ac   : > { %v12382_v14 = vpop.eup %9372  ;;  %v2798_v48 = vmul.f32 %v9369_v36, %v12050_v25  ;;  %v2797_v45 = vmul.f32 %v9369_v36, %v12044_v13 }
 0x5ad   : > { %v3353_v51 = vmul.f32 1.442695, %v3293_v32  ;;  %v3355_v19 = vmul.f32 1.442695, %v3294_v39  ;;  %v3252_v7 = vpop.xlane.xlu1 %3251  ;;  %v9375_v27 = vpop.eup %9374  ;;  %3411 = vadd.xlane.f32.xlu0 %v3410_v49  ;;  %v3413_v9 = vsel %vm16232_vm10, %v12382_v14, 0.0 }
 0x5ae   : > { %v3295_v15 = vsub.f32 %v12143_v54, %v3252_v7  ;;  %v3296_v6 = vsub.f32 %v12116_v59, %v3252_v7  ;;  %v2734_v43 = vpop.xlane.xlu0 %2733  ;;  %3555 = vmatpush1.bf16.msra.mxu1 %v16317_v42  ;;  %v3414_v20 = vadd.f32 %v12378_v44, %v3413_v9  ;;  %v2800_v25 = vmul.f32 %v9375_v27, %v12064_v62  ;;  %v16320_v62 = vld [vmem:[#allocation59_spill] sm:$0xff] }
 0x5af   : > { %9388 = vpow2.f32 %v3353_v51  ;;  %v2799_v54 = vmul.f32 %v9375_v27, %v12057_v53  ;;  %3556 = vmatprep.subr.bf16.mxu1 %v16306_v12  ;;  %v16319_v53 = vld [vmem:[#allocation60_spill] sm:$0xff] }
 0x5b0   : > { %9390 = vpow2.f32 %v3355_v19  ;;  %v3357_v59 = vmul.f32 1.442695, %v3295_v15  ;;  %v3359_v8 = vmul.f32 1.442695, %v3296_v6  ;;  %v12397_v21 = vpop.eup %9376  ;;  %3415 = vadd.xlane.f32.xlu1 %v3414_v20  ;;  %v2830_v13 = vpack.c.bf16 %v2800_v25, %v2798_v48 }
 0x5b1   : > { %9392 = vrcp.f32 %v2734_v43  ;;  %v2738_v28 = vpop.xlane.xlu1 %2737  ;;  %v2829_v47 = vpack.c.bf16 %v2799_v54, %v2797_v45  ;;  %v12399_v30 = vpop.eup %9378  ;;  %v16321_v22 = vpack.c.bf16 %v16319_v53, %v16320_v62  ;;  %v16323_v45 = vld [vmem:[#allocation62_spill] sm:$0xff] }
 0x5b2   : > { %9394 = vpow2.f32 %v3357_v59  ;;  %v3256_v36 = vpop.xlane.xlu0 %3255  ;;  %v9381_v41 = vpop.eup %9380  ;;  %8413 = vmatprep.mubr.msk.bf16.mxu1 %vm16318_vm15, %v2830_v13  ;;  %v3417_v39 = vsel %vm16322_vm14, %v12399_v30, 0.0  ;;  %v16325_v23 = vpack.c.bf16 %v16323_v45, %v16324_v35  ;;  %vm16326_vm15 = vmmov %vm16232_vm10 }
 0x5b3   : > { %9396 = vpow2.f32 %v3359_v8  ;;  %3557 = vmatpush1.bf16.msra.mxu1 %v16321_v22  ;;  %v3297_v31 = vsub.f32 %v12169_v46, %v3256_v36  ;;  %v3298_v32 = vsub.f32 %v12136_v11, %v3256_v36  ;;  %v12409_v5 = vpop.eup %9382  ;;  %v3418_v49 = vadd.f32 %v12397_v21, %v3417_v39  ;;  %vm16330_vm14 = vmmov %vm16232_vm10 }
 0x5b4   : > { %9398 = vrcp.f32 %v2738_v28  ;;  %2919 = vmatmul.mubr.bf16.gmra.mrb[80].mxu1 %v2829_v47  ;;  %3558 = vmatprep.subr.bf16.mxu1 %v16306_v12  ;;  %v12413_v51 = vpop.eup %9384  ;;  %v2802_v46 = vmul.f32 %v9381_v41, %v12094_v61  ;;  %v2801_v9 = vmul.f32 %v9381_v41, %v12088_v2 }
 0x5b5   : > { %v3361_v19 = vmul.f32 1.442695, %v3297_v31  ;;  %v3363_v7 = vmul.f32 1.442695, %v3298_v32  ;;  %v3260_v48 = vpop.xlane.xlu1 %3259  ;;  %v9387_v27 = vpop.eup %9386  ;;  %3419 = vadd.xlane.f32.xlu0 %v3418_v49  ;;  %v3421_v43 = vsel %vm16232_vm10, %v12413_v51, 0.0 }
 0x5b6   : > { %v3299_v11 = vsub.f32 %v12187_v10, %v3260_v48  ;;  %v3300_v15 = vsub.f32 %v12160_v56, %v3260_v48  ;;  %v2742_v6 = vpop.xlane.xlu0 %2741  ;;  %v3422_v42 = vadd.f32 %v12409_v5, %v3421_v43  ;;  %v2804_v61 = vmul.f32 %v9387_v27, %v12108_v37  ;;  %v16328_v37 = vld [vmem:[#allocation63_spill] sm:$0xff] }
 0x5b7   : > { %9400 = vpow2.f32 %v3361_v19  ;;  %3559 = vmatpush1.bf16.msra.mxu1 %v16325_v23  ;;  %v2803_v10 = vmul.f32 %v9387_v27, %v12101_v16  ;;  %v16327_v16 = vld [vmem:[#allocation64_spill] sm:$0xff] }
 0x5b8   : > { %9402 = vpow2.f32 %v3363_v7  ;;  %v3365_v56 = vmul.f32 1.442695, %v3299_v11  ;;  %v3367_v20 = vmul.f32 1.442695, %v3300_v15  ;;  %3560 = vmatprep.subr.bf16.mxu1 %v16306_v12  ;;  %3423 = vadd.xlane.f32.xlu1 %v3422_v42  ;;  %v2832_v2 = vpack.c.bf16 %v2804_v61, %v2802_v46  ;;  %v16331_v11 = vld [vmem:[#allocation66_spill] sm:$0xff]  ;;  %v16332_v15 = vld [vmem:[#allocation65_spill] sm:$0xff] }
 0x5b9   : > { %v12428_v25 = vpop.eup %9388  ;;  %9404 = vrcp.f32 %v2742_v6  ;;  %v2746_v54 = vpop.xlane.xlu1 %2745  ;;  %v2831_v59 = vpack.c.bf16 %v2803_v10, %v2801_v9  ;;  %v16329_v47 = vpack.c.bf16 %v16327_v16, %v16328_v37  ;;  %v16333_v6 = vpack.c.bf16 %v16331_v11, %v16332_v15  ;;  %v16339_v16 = vld [vmem:[#allocation86_spill] sm:$0xff] }
 0x5ba   : > { %v12430_v8 = vpop.eup %9390  ;;  %9406 = vpow2.f32 %v3365_v56  ;;  %v3264_v13 = vpop.xlane.xlu0 %3263  ;;  %8414 = vmatprep.mubr.msk.bf16.mxu1 %vm16326_vm15, %v2832_v2  ;;  %vm16334_vm15 = vmmov %vm16232_vm10 }
 0x5bb   : > { %v9393_v28 = vpop.eup %9392  ;;  %9408 = vpow2.f32 %v3367_v20  ;;  %3561 = vmatpush1.bf16.msra.mxu1 %v16329_v47  ;;  %v3301_v36 = vsub.f32 %v12212_v4, %v3264_v13  ;;  %v3302_v41 = vsub.f32 %v12180_v29, %v3264_v13  ;;  %v3425_v53 = vsel %vm16330_vm14, %v12430_v8, 0.0  ;;  %vm16338_vm14 = vmmov %vm16232_vm10 }
 0x5bc   : > { %v12440_v62 = vpop.eup %9394  ;;  %9410 = vrcp.f32 %v2746_v54  ;;  %2927 = vmatmul.mubr.bf16.gmra.mrb[84].mxu1 %v2831_v59  ;;  %3562 = vmatprep.subr.bf16.mxu1 %v16306_v12  ;;  %v3426_v22 = vadd.f32 %v12428_v25, %v3425_v53  ;;  %v2806_v4 = vmul.f32 %v9393_v28, %v12138_v33  ;;  %v2805_v27 = vmul.f32 %v9393_v28, %v12132_v17  ;;  %v16341_v53 = vld [vmem:[#allocation88_spill] sm:$0xff] }
 0x5bd   : > { %v12444_v31 = vpop.eup %9396  ;;  %v3369_v32 = vmul.f32 1.442695, %v3301_v36  ;;  %v3371_v39 = vmul.f32 1.442695, %v3302_v41  ;;  %v3268_v49 = vpop.xlane.xlu1 %3267  ;;  %v16340_v36 = vld [vmem:[#allocation89_spill] sm:$0xff] }
 0x5be   : > { %v9399_v19 = vpop.eup %9398  ;;  %v3303_v29 = vsub.f32 %v12224_v26, %v3268_v49  ;;  %v3304_v7 = vsub.f32 %v12200_v55, %v3268_v49  ;;  %3427 = vadd.xlane.f32.xlu0 %v3426_v22  ;;  %v2750_v48 = vpop.xlane.xlu0 %2749  ;;  %v3429_v46 = vsel %vm16232_vm10, %v12444_v31, 0.0 }
 0x5bf   : > { %9412 = vpow2.f32 %v3369_v32  ;;  %3563 = vmatpush1.bf16.msra.mxu1 %v16333_v6  ;;  %v3430_v43 = vadd.f32 %v12440_v62, %v3429_v46  ;;  %v2808_v33 = vmul.f32 %v9399_v19, %v12152_v58  ;;  %v2807_v26 = vmul.f32 %v9399_v19, %v12145_v1  ;;  %v16335_v58 = vld [vmem:[#allocation68_spill] sm:$0xff]  ;;  %v16336_v1 = vld [vmem:[#allocation67_spill] sm:$0xff]  ;;  %v16342_v32 = vld [vmem:[#allocation90_spill] sm:$0xff] }
 0x5c0   : > { %9414 = vpow2.f32 %v3371_v39  ;;  %v3373_v55 = vmul.f32 1.442695, %v3303_v29  ;;  %v3375_v9 = vmul.f32 1.442695, %v3304_v7  ;;  %3564 = vmatprep.subr.bf16.mxu1 %v16306_v12  ;;  %v16337_v10 = vpack.c.bf16 %v16335_v58, %v16336_v1 }
 0x5c1   : > { %v12459_v45 = vpop.eup %9400  ;;  %9416 = vrcp.f32 %v2750_v48  ;;  %3431 = vadd.xlane.f32.xlu1 %v3430_v43  ;;  %v2834_v17 = vpack.c.bf16 %v2808_v33, %v2806_v4  ;;  %v2754_v35 = vpop.xlane.xlu1 %2753  ;;  %v2833_v23 = vpack.c.bf16 %v2807_v26, %v2805_v27  ;;  %v16345_v26 = vld [vmem:[#allocation96_spill] sm:$0xff] }
 0x5c2   : > { %v12461_v42 = vpop.eup %9402  ;;  %9418 = vpow2.f32 %v3373_v55 }
 0x5c3   : > { %v9405_v61 = vpop.eup %9404  ;;  %9420 = vpow2.f32 %v3375_v9  ;;  %8415 = vmatprep.mubr.msk.bf16.mxu1 %vm16334_vm15, %v2834_v17  ;;  %3565 = vmatpush1.bf16.msra.mxu1 %v16337_v10  ;;  %v3433_v56 = vsel %vm16338_vm14, %v12461_v42, 0.0  ;;  %vm16343_vm15 = vmmov %vm16232_vm10 }
 0x5c4   : > { %v12469_v20 = vpop.eup %9406  ;;  %9422 = vrcp.f32 %v2754_v35  ;;  %2935 = vmatmul.mubr.bf16.gmra.mrb[88].mxu1 %v2833_v23  ;;  %v3434_v2 = vadd.f32 %v12459_v45, %v3433_v56  ;;  %v2810_v37 = vmul.f32 %v9405_v61, %v16339_v16  ;;  %v2809_v22 = vmul.f32 %v9405_v61, %v16341_v53  ;;  %vm16344_vm14 = vmmov %vm16232_vm10  ;;  %v16346_v35 = vld [vmem:[#allocation127_spill] sm:$0xff]  ;;  %v16347_v61 = vld [vmem:[#allocation94_spill] sm:$0xff] }
 0x5c5   : > { %v12472_v54 = vpop.eup %9408  ;;  %v2758_v13 = vpop.xlane.xlu0 %2757  ;;  %v16350_v16 = vld [vmem:[#allocation128_spill] sm:$0xff] }
 0x5c6   : > { %v9411_v59 = vpop.eup %9410  ;;  %3435 = vadd.xlane.f32.xlu0 %v3434_v2  ;;  %v3437_v28 = vsel %vm16232_vm10, %v12472_v54, 0.0  ;;  %9424 = vrcp.f32 %v2758_v13  ;;  %v16349_v13 = vld [vmem:[#allocation98_spill] sm:$0xff] }
 0x5c7   : > { %v3438_v47 = vadd.f32 %v12469_v20, %v3437_v28  ;;  %v2812_v41 = vmul.f32 %v9411_v59, %v16340_v36  ;;  %v2811_v39 = vmul.f32 %v9411_v59, %v16342_v32 }
 0x5c8   : > { %v2762_v19 = vpop.xlane.xlu1 %2761 }
 0x5c9   : > { %v12481_v49 = vpop.eup %9412  ;;  %3439 = vadd.xlane.f32.xlu1 %v3438_v47  ;;  %v2836_v4 = vpack.c.bf16 %v2812_v41, %v2810_v37  ;;  %v2835_v29 = vpack.c.bf16 %v2811_v39, %v2809_v22  ;;  %9426 = vrcp.f32 %v2762_v19  ;;  %v16352_v41 = vld [vmem:[#allocation130_spill] sm:$0xff] }
 0x5ca   : > { %v12483_v7 = vpop.eup %9414 }
 0x5cb   : > { %v9417_v48 = vpop.eup %9416  ;;  %8416 = vmatprep.mubr.msk.bf16.mxu1 %vm16343_vm15, %v2836_v4  ;;  %v3441_v46 = vsel %vm16344_vm14, %v12483_v7, 0.0  ;;  %vm16348_vm15 = vmmov %vm16232_vm10 }
 0x5cc   : > { %v12488_v27 = vpop.eup %9418  ;;  %2943 = vmatmul.mubr.bf16.gmra.mrb[92].mxu1 %v2835_v29  ;;  %v3442_v11 = vadd.f32 %v12481_v49, %v3441_v46  ;;  %v2814_v55 = vmul.f32 %v9417_v48, %v16345_v26  ;;  %v2813_v23 = vmul.f32 %v9417_v48, %v16346_v35  ;;  %vm16353_vm14 = vmmov %vm16232_vm10  ;;  %v16354_v29 = vld [vmem:[#allocation129_spill] sm:$0xff]  ;;  %v16355_v46 = vld [vmem:[#allocation102_spill] sm:$0xff] }
 0x5cd   : > { %v12491_v15 = vpop.eup %9420  ;;  %v2766_v43 = vpop.xlane.xlu0 %2765  ;;  %v16357_v26 = vld [vmem:[#allocation132_spill] sm:$0xff] }
 0x5ce   : > { %v9423_v6 = vpop.eup %9422  ;;  %3443 = vadd.xlane.f32.xlu0 %v3442_v11  ;;  %v3445_v33 = vsel %vm16232_vm10, %v12491_v15, 0.0  ;;  %9428 = vrcp.f32 %v2766_v43 }
 0x5cf   : > { %v3446_v9 = vadd.f32 %v12488_v27, %v3445_v33  ;;  %v2816_v17 = vmul.f32 %v9423_v6, %v12233_v40  ;;  %v2815_v58 = vmul.f32 %v9423_v6, %v16347_v61  ;;  %v16351_v40 = vld [vmem:[#allocation97_spill] sm:$0xff]  ;;  %v16356_v6 = vld [vmem:[#allocation104_spill] sm:$0xff] }
 0x5d0   : > { %v2770_v10 = vpop.xlane.xlu1 %2769  ;;  %v9425_v2 = vpop.eup %9424 }
 0x5d1   : > { %3447 = vadd.xlane.f32.xlu1 %v3446_v9  ;;  %v2838_v1 = vpack.c.bf16 %v2816_v17, %v2814_v55  ;;  %v2837_v56 = vpack.c.bf16 %v2815_v58, %v2813_v23  ;;  %9430 = vrcp.f32 %v2770_v10  ;;  %v2818_v28 = vmul.f32 %v9425_v2, %v16349_v13 }
 0x5d2   : > { %v2817_v53 = vmul.f32 %v9425_v2, %v16352_v41  ;;  %v16361_v41 = vld [vmem:[#allocation131_spill] sm:$0xff] }
 0x5d3   : > { %8417 = vmatprep.mubr.msk.bf16.mxu1 %vm16348_vm15, %v2838_v1  ;;  %v9427_v59 = vpop.eup %9426  ;;  %v16358_v1 = vld [vmem:[#allocation106_spill] sm:$0xff]  ;;  %vm16359_vm15 = vmmov %vm16232_vm10 }
 0x5d4   : > { %2951 = vmatmul.mubr.bf16.gmra.mrb[96].mxu1 %v2837_v56  ;;  %v2820_v37 = vmul.f32 %v9427_v59, %v16350_v16  ;;  %v2819_v47 = vmul.f32 %v9427_v59, %v16351_v40 }
 0x5d5   : > { %v3380_v36 = vpop.xlane.xlu0 %3379 }
 0x5d6   : > { %v2840_v22 = vpack.c.bf16 %v2820_v37, %v2818_v28  ;;  %9432 = vrcp.f32 %v3380_v36  ;;  %v2839_v32 = vpack.c.bf16 %v2819_v47, %v2817_v53 }
 0x5d8   : > { %8418 = vmatprep.mubr.msk.bf16.mxu1 %vm16353_vm14, %v2840_v22  ;;  %v3384_v39 = vpop.xlane.xlu1 %3383  ;;  %v9429_v4 = vpop.eup %9428  ;;  %v16362_v22 = vld [vmem:[#allocation105_spill] sm:$0xff]  ;;  %vm16363_vm14 = vmmov %vm16232_vm10 }
 0x5d9   : > { %9434 = vrcp.f32 %v3384_v39  ;;  %v2822_v48 = vmul.f32 %v9429_v4, %v16354_v29  ;;  %v2821_v55 = vmul.f32 %v9429_v4, %v16357_v26  ;;  %v8848_v26 = vld [vmem:[%s15574_s4] ss:$8 sps:$4 sm:$0xff]  }
 0x5db   : > { %v9431_v19 = vpop.eup %9430 }
 0x5dc   : > { %2959 = vmatmul.mubr.bf16.gmra.mrb[100].mxu1 %v2839_v32  ;;  %v2824_v11 = vmul.f32 %v9431_v19, %v16355_v46  ;;  %v2823_v43 = vmul.f32 %v9431_v19, %v16356_v6  ;;  %v16364_v19 = vld [vmem:[#allocation114_spill] sm:$0xff]  ;;  %v16365_v46 = vld [vmem:[#allocation113_spill] sm:$0xff] }
 0x5dd   : > { %v3388_v33 = vpop.xlane.xlu0 %3387  ;;  %v16366_v6 = vld [vmem:[#allocation110_spill] sm:$0xff] }
 0x5de   : > { %9436 = vrcp.f32 %v3388_v33  ;;  %v2842_v9 = vpack.c.bf16 %v2824_v11, %v2822_v48  ;;  %v2841_v35 = vpack.c.bf16 %v2823_v43, %v2821_v55  ;;  %v8850_v55 = vld [vmem:[%s15574_s4 + $0x4] ss:$8 sps:$4 sm:$0xff]  }
 0x5df   : > { %v3392_v17 = vpop.xlane.xlu1 %3391  ;;  %3831 = vmatprep.subr.bf16.mxu0 %v8850_v55 }
 0x5e0   : > { %8419 = vmatprep.mubr.msk.bf16.mxu1 %vm16232_vm10, %v2842_v9  ;;  %9438 = vrcp.f32 %v3392_v17  ;;  %v9433_v23 = vpop.eup %9432  ;;  %3832 = vmatpush1.bf16.msra.mxu0 %v8848_v26  ;;  %v8851_v9 = vld [vmem:[%s15574_s4 + $0x10] ss:$8 sps:$4 sm:$0xff]   ;;  %v8854_v17 = vld [vmem:[%s15574_s4 + $0x20] ss:$8 sps:$4 sm:$0xff]  }
 0x5e1   : > { %v3468_v10 = vmul.f32 %v9433_v23, %v16358_v1  ;;  %v3467_v2 = vmul.f32 %v9433_v23, %v12277_v57  ;;  %v8859_v23 = vld [vmem:[%s15574_s4 + $0x34] ss:$8 sps:$4 sm:$0xff]   ;;  %v8862_v1 = vld [vmem:[%s15574_s4 + $0x44] ss:$8 sps:$4 sm:$0xff]  }
 0x5e3   : > { %v9435_v61 = vpop.eup %9434 }
 0x5e4   : > { %2967 = vmatmul.mubr.bf16.gmra.mrb[104].mxu1 %v2841_v35  ;;  %v3469_v58 = vmul.f32 %v9435_v61, %v12281_v24  ;;  %v3470_v56 = vmul.f32 %v9435_v61, %v12287_v0  ;;  %v16360_v24 = vld [vmem:[#allocation112_spill] sm:$0xff]  ;;  %v8856_v35 = vld [vmem:[%s15574_s4 + $0x24] ss:$8 sps:$4 sm:$0xff]  }
 0x5e5   : > { %v3396_v59 = vpop.xlane.xlu0 %3395  ;;  %v8857_v61 = vld [vmem:[%s15574_s4 + $0x30] ss:$8 sps:$4 sm:$0xff]  }
 0x5e6   : > { %9440 = vrcp.f32 %v3396_v59  ;;  %v3504_v13 = vpack.c.bf16 %v3470_v56, %v3468_v10  ;;  %v3503_v16 = vpack.c.bf16 %v3469_v58, %v3467_v2  ;;  %v8860_v58 = vld [vmem:[%s15574_s4 + $0x40] ss:$8 sps:$4 sm:$0xff]   ;;  %v8865_v10 = vld [vmem:[%s15574_s4 + $0x54] ss:$8 sps:$4 sm:$0xff]   ;;  %v8863_v56 = vld [vmem:[%s15574_s4 + $0x50] ss:$8 sps:$4 sm:$0xff]  }
 0x5e7   : > { %v3400_v28 = vpop.xlane.xlu1 %3399  ;;  %v8866_v2 = vld [vmem:[%s15574_s4 + $0x60] ss:$8 sps:$4 sm:$0xff]   ;;  %v8868_v59 = vld [vmem:[%s15574_s4 + $0x64] ss:$8 sps:$4 sm:$0xff]  }
 0x5e8   : > { %v9437_v37 = vpop.eup %9436  ;;  %8420 = vmatprep.mubr.msk.bf16.mxu1 %vm16359_vm15, %v3504_v13  ;;  %9442 = vrcp.f32 %v3400_v28  ;;  %v8871_v13 = vld [vmem:[%s15574_s4 + $0x74] ss:$8 sps:$4 sm:$0xff]   ;;  %v8869_v28 = vld [vmem:[%s15574_s4 + $0x70] ss:$8 sps:$4 sm:$0xff]   ;;  %vm16367_vm15 = vmmov %vm16232_vm10 }
 0x5e9   : > { %v3472_v47 = vmul.f32 %v9437_v37, %v12297_v50  ;;  %v3471_v57 = vmul.f32 %v9437_v37, %v16362_v22  ;;  %v8874_v37 = vld [vmem:[%s15574_s4 + $0x84] ss:$8 sps:$4 sm:$0xff]  }
 0x5ea   : > { %v9439_v40 = vpop.eup %9438  ;;  %v8886_v22 = vld [vmem:[%s15574_s4 + $0xc4] ss:$8 sps:$4 sm:$0xff]  }
 0x5eb   : > { %v3474_v36 = vmul.f32 %v9439_v40, %v16360_v24  ;;  %v3473_v53 = vmul.f32 %v9439_v40, %v16361_v41  ;;  %v8877_v40 = vld [vmem:[%s15574_s4 + $0x94] ss:$8 sps:$4 sm:$0xff]   ;;  %v8878_v24 = vld [vmem:[%s15574_s4 + $0xa0] ss:$8 sps:$4 sm:$0xff]  }
 0x5ec   : > { %3581 = vmatmul.mubr.bf16.vlgmr.msra.gmra.mrb[108].mxu1 %v3503_v16  ;;  %v8872_v16 = vld [vmem:[%s15574_s4 + $0x80] ss:$8 sps:$4 sm:$0xff]   ;;  %v8883_v41 = vld [vmem:[%s15574_s4 + $0xb4] ss:$8 sps:$4 sm:$0xff]  }
 0x5ed   : > { %v3506_v0 = vpack.c.bf16 %v3474_v36, %v3472_v47  ;;  %v3505_v32 = vpack.c.bf16 %v3473_v53, %v3471_v57  ;;  %v8875_v47 = vld [vmem:[%s15574_s4 + $0x90] ss:$8 sps:$4 sm:$0xff]   ;;  %v8880_v36 = vld [vmem:[%s15574_s4 + $0xa4] ss:$8 sps:$4 sm:$0xff]  }
 0x5ee   : > { %v8881_v53 = vld [vmem:[%s15574_s4 + $0xb0] ss:$8 sps:$4 sm:$0xff]  }
 0x5ef   : > { %8421 = vmatprep.mubr.msk.bf16.mxu1 %vm16363_vm14, %v3506_v0  ;;  %v8884_v0 = vld [vmem:[%s15574_s4 + $0xc0] ss:$8 sps:$4 sm:$0xff]   ;;  %vm16368_vm14 = vmmov %vm16232_vm10 }
 0x5f0   : > { %v9441_v39 = vpop.eup %9440 }
 0x5f1   : > { %v3476_v29 = vmul.f32 %v9441_v39, %v16364_v19  ;;  %v3475_v43 = vmul.f32 %v9441_v39, %v16366_v6  ;;  %v8889_v39 = vld [vmem:[%s15574_s4 + $0xd4] ss:$8 sps:$4 sm:$0xff]   ;;  %v8890_v19 = vld [vmem:[%s15574_s4 + $0xe0] ss:$8 sps:$4 sm:$0xff]   ;;  %v8893_v6 = vld [vmem:[%s15574_s4 + $0xf0] ss:$8 sps:$4 sm:$0xff]  }
 0x5f2   : > { %v9443_v4 = vpop.eup %9442 }
 0x5f3   : > { %v3478_v48 = vmul.f32 %v9443_v4, %v12317_v60  ;;  %v3477_v11 = vmul.f32 %v9443_v4, %v16365_v46  ;;  %v8853_v60 = vld [vmem:[%s15574_s4 + $0x14] ss:$8 sps:$4 sm:$0xff]   ;;  %v8887_v4 = vld [vmem:[%s15574_s4 + $0xd0] ss:$8 sps:$4 sm:$0xff]  }
 0x5f4   : > { %3589 = vmatmul.mubr.bf16.gmra.mrb[112].mxu1 %v3505_v32  ;;  %3833 = vmatprep.subr.bf16.mxu0 %v8853_v60 }
 0x5f5   : > { %v3508_v50 = vpack.c.bf16 %v3478_v48, %v3476_v29  ;;  %v3507_v33 = vpack.c.bf16 %v3477_v11, %v3475_v43  ;;  %3834 = vmatpush1.bf16.msra.mxu0 %v8851_v9  ;;  %v8892_v29 = vld [vmem:[%s15574_s4 + $0xe4] ss:$8 sps:$4 sm:$0xff]  }
 0x5f6   : > { %3835 = vmatprep.subr.bf16.mxu0 %v8856_v35 }
 0x5f7   : > { %8422 = vmatprep.mubr.msk.bf16.mxu1 %vm16232_vm10, %v3508_v50  ;;  %v8895_v50 = vld [vmem:[%s15574_s4 + $0xf4] ss:$8 sps:$4 sm:$0xff]  }
 0x5f9   : > { %3836 = vmatpush1.bf16.msra.mxu0 %v8854_v17 }
 0x5fa   : > { %3837 = vmatprep.subr.bf16.mxu0 %v8859_v23 }
 0x5fc   : > { %3597 = vmatmul.mubr.bf16.gmra.mrb[116].mxu1 %v3507_v33 }
 0x5fd   : > { %3838 = vmatpush1.bf16.msra.mxu0 %v8857_v61 }
 0x5fe   : > { %3839 = vmatprep.subr.bf16.mxu0 %v8862_v1 }
 0x601   : > { %3840 = vmatpush1.bf16.msra.mxu0 %v8860_v58 }
 0x602   : > { %3841 = vmatprep.subr.bf16.mxu0 %v8865_v10 }
 0x605   : > { %3842 = vmatpush1.bf16.msra.mxu0 %v8863_v56 }
 0x606   : > { %3843 = vmatprep.subr.bf16.mxu0 %v8868_v59 }
 0x609   : > { %3844 = vmatpush1.bf16.msra.mxu0 %v8866_v2 }
 0x60a   : > { %3845 = vmatprep.subr.bf16.mxu0 %v8871_v13 }
 0x60d   : > { %3846 = vmatpush1.bf16.msra.mxu0 %v8869_v28 }
 0x60e   : > { %3847 = vmatprep.subr.bf16.mxu0 %v8874_v37 }
 0x611   : > { %3848 = vmatpush1.bf16.msra.mxu0 %v8872_v16 }
 0x612   : > { %3849 = vmatprep.subr.bf16.mxu0 %v8877_v40 }
 0x615   : > { %3850 = vmatpush1.bf16.msra.mxu0 %v8875_v47 }
 0x616   : > { %3851 = vmatprep.subr.bf16.mxu0 %v8880_v36 }
 0x619   : > { %3852 = vmatpush1.bf16.msra.mxu0 %v8878_v24 }
 0x61a   : > { %3853 = vmatprep.subr.bf16.mxu0 %v8883_v41 }
 0x61d   : > { %3854 = vmatpush1.bf16.msra.mxu0 %v8881_v53 }
 0x61e   : > { %3855 = vmatprep.subr.bf16.mxu0 %v8886_v22 }
 0x621   : > { %3856 = vmatpush1.bf16.msra.mxu0 %v8884_v0 }
 0x622   : > { %3857 = vmatprep.subr.bf16.mxu0 %v8889_v39 }
 0x625   : > { %3858 = vmatpush1.bf16.msra.mxu0 %v8887_v4 }
 0x626   : > { %3859 = vmatprep.subr.bf16.mxu0 %v8892_v29 }
 0x629   : > { %3860 = vmatpush1.bf16.msra.mxu0 %v8890_v19 }
 0x62a   : > { %3861 = vmatprep.subr.bf16.mxu0 %v8895_v50 }
 0x62d   : > { %3862 = vmatpush1.bf16.msra.mxu0 %v8893_v6 }
 0x632   : > { %v3404_v57 = vpop.xlane.xlu0 %3403 }
 0x633   : > { %9444 = vrcp.f32 %v3404_v57 }
 0x635   : > { %v3408_v32 = vpop.xlane.xlu1 %3407 }
 0x636   : > { %9446 = vrcp.f32 %v3408_v32 }
 0x63a   : > { %v3412_v48 = vpop.xlane.xlu0 %3411 }
 0x63b   : > { %9448 = vrcp.f32 %v3412_v48 }
 0x63d   : > { %v3416_v46 = vpop.xlane.xlu1 %3415  ;;  %v9445_v11 = vpop.eup %9444 }
 0x63e   : > { %9450 = vrcp.f32 %v3416_v46  ;;  %v3480_v33 = vmul.f32 %v9445_v11, %v12338_v34  ;;  %v3479_v55 = vmul.f32 %v9445_v11, %v12335_v52 }
 0x640   : > { %v9447_v43 = vpop.eup %9446 }
 0x641   : > { %v3482_v26 = vmul.f32 %v9447_v43, %v12351_v18  ;;  %v3481_v60 = vmul.f32 %v9447_v43, %v12347_v3 }
 0x642   : > { %v3420_v9 = vpop.xlane.xlu0 %3419 }
 0x643   : > { %v3510_v17 = vpack.c.bf16 %v3482_v26, %v3480_v33  ;;  %v3509_v35 = vpack.c.bf16 %v3481_v60, %v3479_v55  ;;  %9452 = vrcp.f32 %v3420_v9 }
 0x645   : > { %8423 = vmatprep.mubr.msk.bf16.mxu1 %vm16367_vm15, %v3510_v17  ;;  %v3424_v23 = vpop.xlane.xlu1 %3423  ;;  %v9449_v61 = vpop.eup %9448  ;;  %vm16369_vm15 = vmmov %vm16232_vm10 }
 0x646   : > { %9454 = vrcp.f32 %v3424_v23  ;;  %3605 = vmatmul.mubr.bf16.gmra.mrb[120].mxu1 %v3509_v35  ;;  %v3484_v34 = vmul.f32 %v9449_v61, %v12368_v38  ;;  %v3483_v52 = vmul.f32 %v9449_v61, %v12366_v63 }
 0x648   : > { %v9451_v58 = vpop.eup %9450 }
 0x649   : > { %v3486_v18 = vmul.f32 %v9451_v58, %v12382_v14  ;;  %v3485_v3 = vmul.f32 %v9451_v58, %v12378_v44 }
 0x64b   : > { %v3428_v1 = vpop.xlane.xlu0 %3427  ;;  %v3512_v10 = vpack.c.bf16 %v3486_v18, %v3484_v34  ;;  %v3511_v56 = vpack.c.bf16 %v3485_v3, %v3483_v52 }
 0x64c   : > { %9456 = vrcp.f32 %v3428_v1 }
 0x64d   : > { %8424 = vmatprep.mubr.msk.bf16.mxu1 %vm16368_vm14, %v3512_v10  ;;  %v9453_v59 = vpop.eup %9452  ;;  %vm16370_vm14 = vmmov %vm16232_vm10 }
 0x64e   : > { %v3432_v2 = vpop.xlane.xlu1 %3431  ;;  %3613 = vmatmul.mubr.bf16.gmra.mrb[124].mxu1 %v3511_v56  ;;  %v3488_v28 = vmul.f32 %v9453_v59, %v12399_v30  ;;  %v3487_v14 = vmul.f32 %v9453_v59, %v12397_v21 }
 0x64f   : > { %9458 = vrcp.f32 %v3432_v2 }
 0x650   : > { %v9455_v13 = vpop.eup %9454 }
 0x651   : > { %v3490_v38 = vmul.f32 %v9455_v13, %v12413_v51  ;;  %v3489_v63 = vmul.f32 %v9455_v13, %v12409_v5 }
 0x653   : > { %v3436_v44 = vpop.xlane.xlu0 %3435  ;;  %v3514_v16 = vpack.c.bf16 %v3490_v38, %v3488_v28  ;;  %v3513_v37 = vpack.c.bf16 %v3489_v63, %v3487_v14 }
 0x654   : > { %9460 = vrcp.f32 %v3436_v44 }
 0x655   : > { %8425 = vmatprep.mubr.msk.bf16.mxu1 %vm16232_vm10, %v3514_v16 }
 0x656   : > { %v3440_v40 = vpop.xlane.xlu1 %3439  ;;  %v9457_v47 = vpop.eup %9456  ;;  %3621 = vmatmul.mubr.bf16.gmra.mrb[128].mxu1 %v3513_v37 }
 0x657   : > { %9462 = vrcp.f32 %v3440_v40  ;;  %v3492_v36 = vmul.f32 %v9457_v47, %v12430_v8  ;;  %v3491_v51 = vmul.f32 %v9457_v47, %v12428_v25 }
 0x659   : > { %v9459_v24 = vpop.eup %9458 }
 0x65a   : > { %v3494_v30 = vmul.f32 %v9459_v24, %v12444_v31  ;;  %v3493_v21 = vmul.f32 %v9459_v24, %v12440_v62 }
 0x65b   : > { %v3444_v5 = vpop.xlane.xlu0 %3443 }
 0x65c   : > { %v3516_v41 = vpack.c.bf16 %v3494_v30, %v3492_v36  ;;  %v3515_v53 = vpack.c.bf16 %v3493_v21, %v3491_v51  ;;  %9464 = vrcp.f32 %v3444_v5 }
 0x65e   : > { %8426 = vmatprep.mubr.msk.bf16.mxu1 %vm16369_vm15, %v3516_v41  ;;  %v3448_v0 = vpop.xlane.xlu1 %3447  ;;  %v9461_v22 = vpop.eup %9460  ;;  %vm16377_vm15 = vcmask 261120  }
 0x65f   : > { %9466 = vrcp.f32 %v3448_v0  ;;  %3629 = vmatmul.mubr.bf16.gmra.mrb[132].mxu1 %v3515_v53  ;;  %v3496_v32 = vmul.f32 %v9461_v22, %v12461_v42  ;;  %v3495_v31 = vmul.f32 %v9461_v22, %v12459_v45 }
 0x661   : > { %v9463_v57 = vpop.eup %9462 }
 0x662   : > { %v3498_v8 = vmul.f32 %v9463_v57, %v12472_v54  ;;  %v3497_v25 = vmul.f32 %v9463_v57, %v12469_v20 }
 0x664   : > { %v3518_v62 = vpack.c.bf16 %v3498_v8, %v3496_v32  ;;  %v3517_v39 = vpack.c.bf16 %v3497_v25, %v3495_v31  ;;  %v8896_v25 = vld [vmem:[%s15575_s5] ss:$8 sps:$4 sm:$0xff]  }
 0x666   : > { %8427 = vmatprep.mubr.msk.bf16.mxu1 %vm16370_vm14, %v3518_v62  ;;  %v9465_v4 = vpop.eup %9464  ;;  %v8898_v62 = vld [vmem:[%s15575_s5 + $0x4] ss:$8 sps:$4 sm:$0xff]   ;;  %vm16382_vm14 = vmmov %vm16377_vm15 }
 0x667   : > { %3637 = vmatmul.mubr.bf16.gmra.mrb[136].mxu1 %v3517_v39  ;;  %v3500_v29 = vmul.f32 %v9465_v4, %v12483_v7  ;;  %v3499_v46 = vmul.f32 %v9465_v4, %v12481_v49  ;;  %v8901_v4 = vld [vmem:[%s15575_s5 + $0x14] ss:$8 sps:$4 sm:$0xff]   ;;  %4187 = vmatprep.subr.bf16.mxu1 %v8898_v62 }
 0x668   : > { %4188 = vmatpush1.bf16.msra.mxu1 %v8896_v25 }
 0x669   : > { %v9467_v19 = vpop.eup %9466  ;;  %4189 = vmatprep.subr.bf16.mxu1 %v8901_v4 }
 0x66a   : > { %v3502_v48 = vmul.f32 %v9467_v19, %v12491_v15  ;;  %v3501_v42 = vmul.f32 %v9467_v19, %v12488_v27 }
 0x66c   : > { %v3520_v54 = vpack.c.bf16 %v3502_v48, %v3500_v29  ;;  %v3519_v11 = vpack.c.bf16 %v3501_v42, %v3499_v46  ;;  %v8899_v48 = vld [vmem:[%s15575_s5 + $0x10] ss:$8 sps:$4 sm:$0xff]   ;;  %v8904_v46 = vld [vmem:[%s15575_s5 + $0x24] ss:$8 sps:$4 sm:$0xff]  }
 0x66d   : > { %4190 = vmatpush1.bf16.msra.mxu1 %v8899_v48  ;;  %v16373_v48 = vld [vmem:[#allocation7_spill] sm:$0xff] }
 0x66e   : > { %8428 = vmatprep.mubr.msk.bf16.mxu1 %vm16232_vm10, %v3520_v54  ;;  %v8902_v54 = vld [vmem:[%s15575_s5 + $0x20] ss:$8 sps:$4 sm:$0xff]   ;;  %4191 = vmatprep.subr.bf16.mxu1 %v8904_v46  ;;  %vm16386_vm10 = vmmov %vm16382_vm14 }
 0x66f   : > { %3645 = vmatmul.mubr.bf16.gmra.mrb[140].mxu1 %v3519_v11 }
 0x671   : > { %4192 = vmatpush1.bf16.msra.mxu1 %v8902_v54 }
 0x674   : > { %v2904_v45 = vpop.f32.mrb[72].mxu1 }
 0x675   : > { %v2906_v20 = vpop.f32.mrb[73].mxu1 }
 0x676   : > { %v2907_v50 = vpop.f32.mrb[74].mxu1 }
 0x677   : > { %v3653_v6 = vpack.c.bf16 %v2907_v50, %v2904_v45  ;;  %v2909_v43 = vpop.f32.mrb[75].mxu1  ;;  %v8907_v45 = vld [vmem:[%s15575_s5 + $0x34] ss:$8 sps:$4 sm:$0xff]  }
 0x678   : > { %v8905_v43 = vld [vmem:[%s15575_s5 + $0x30] ss:$8 sps:$4 sm:$0xff]   ;;  %4193 = vmatprep.subr.bf16.mxu1 %v8907_v45 }
 0x679   : > { %4194 = vmatpush1.bf16.msra.mxu1 %v8905_v43 }
 0x67e   : > { %v2912_v33 = vpop.f32.mrb[76].mxu1 }
 0x67f   : > { %v2914_v26 = vpop.f32.mrb[77].mxu1 }
 0x680   : > { %v2915_v55 = vpop.f32.mrb[78].mxu1  ;;  %v8908_v26 = vld [vmem:[%s15575_s5 + $0x40] ss:$8 sps:$4 sm:$0xff]  }
 0x681   : > { %v3655_v7 = vpack.c.bf16 %v2915_v55, %v2912_v33  ;;  %v2917_v60 = vpop.f32.mrb[79].mxu1  ;;  %v8910_v33 = vld [vmem:[%s15575_s5 + $0x44] ss:$8 sps:$4 sm:$0xff]   ;;  %v8913_v55 = vld [vmem:[%s15575_s5 + $0x54] ss:$8 sps:$4 sm:$0xff]  }
 0x682   : > { %4195 = vmatprep.subr.bf16.mxu1 %v8910_v33  ;;  %v8916_v60 = vld [vmem:[%s15575_s5 + $0x64] ss:$8 sps:$4 sm:$0xff]  }
 0x683   : > { %4196 = vmatpush1.bf16.msra.mxu1 %v8908_v26 }
 0x684   : > { %4197 = vmatprep.subr.bf16.mxu1 %v8913_v55 }
 0x687   : > { %v12652_v15 = vpop.f32.mrb[80].mxu1 }
 0x688   : > { %v2922_v49 = vpop.f32.mrb[81].mxu1 }
 0x689   : > { %v12654_v9 = vpop.f32.mrb[82].mxu1  ;;  %v8919_v49 = vld [vmem:[%s15575_s5 + $0x74] ss:$8 sps:$4 sm:$0xff]  }
 0x68a   : > { %v3657_v27 = vpack.c.bf16 %v12654_v9, %v12652_v15  ;;  %v2925_v17 = vpop.f32.mrb[83].mxu1  ;;  %v8914_v15 = vld [vmem:[%s15575_s5 + $0x60] ss:$8 sps:$4 sm:$0xff]   ;;  %v8917_v9 = vld [vmem:[%s15575_s5 + $0x70] ss:$8 sps:$4 sm:$0xff]  }
 0x68f   : > { %v12658_v35 = vpop.f32.mrb[84].mxu1 }
 0x690   : > { %v2930_v23 = vpop.f32.mrb[85].mxu1 }
 0x691   : > { %v12660_v61 = vpop.f32.mrb[86].mxu1  ;;  %v8920_v23 = vld [vmem:[%s15575_s5 + $0x80] ss:$8 sps:$4 sm:$0xff]  }
 0x692   : > { %v3659_v58 = vpack.c.bf16 %v12660_v61, %v12658_v35  ;;  %v2933_v34 = vpop.f32.mrb[87].mxu1 }
 0x697   : > { %v12664_v18 = vpop.f32.mrb[88].mxu1 }
 0x698   : > { %v2938_v52 = vpop.f32.mrb[89].mxu1 }
 0x699   : > { %v12666_v3 = vpop.f32.mrb[90].mxu1 }
 0x69a   : > { %v3661_v1 = vpack.c.bf16 %v12666_v3, %v12664_v18  ;;  %v2941_v10 = vpop.f32.mrb[91].mxu1 }
 0x69f   : > { %v12670_v56 = vpop.f32.mrb[92].mxu1 }
 0x6a0   : > { %v2946_v2 = vpop.f32.mrb[93].mxu1 }
 0x6a1   : > { %v12672_v59 = vpop.f32.mrb[94].mxu1 }
 0x6a2   : > { %v3663_v13 = vpack.c.bf16 %v12672_v59, %v12670_v56  ;;  %v2949_v28 = vpop.f32.mrb[95].mxu1 }
 0x6a3   : > { %v8925_v28 = vld [vmem:[%s15575_s5 + $0x94] ss:$8 sps:$4 sm:$0xff]  }
 0x6a7   : > { %v12676_v38 = vpop.f32.mrb[96].mxu1 }
 0x6a8   : > { %v2954_v14 = vpop.f32.mrb[97].mxu1 }
 0x6a9   : > { %v12678_v63 = vpop.f32.mrb[98].mxu1  ;;  %v8923_v14 = vld [vmem:[%s15575_s5 + $0x90] ss:$8 sps:$4 sm:$0xff]  }
 0x6aa   : > { %v3665_v44 = vpack.c.bf16 %v12678_v63, %v12676_v38  ;;  %v2957_v16 = vpop.f32.mrb[99].mxu1 }
 0x6af   : > { %v12682_v37 = vpop.f32.mrb[100].mxu1 }
 0x6b0   : > { %v2962_v40 = vpop.f32.mrb[101].mxu1 }
 0x6b1   : > { %v12684_v47 = vpop.f32.mrb[102].mxu1 }
 0x6b2   : > { %v3667_v24 = vpack.c.bf16 %v12684_v47, %v12682_v37  ;;  %v2965_v36 = vpop.f32.mrb[103].mxu1  ;;  %v16372_v37 = vld [vmem:[#allocation41_spill] sm:$0xff] }
 0x6b7   : > { %v12688_v30 = vpop.f32.mrb[104].mxu1 }
 0x6b8   : > { %v2970_v51 = vpop.f32.mrb[105].mxu1 }
 0x6b9   : > { %v12690_v21 = vpop.f32.mrb[106].mxu1 }
 0x6ba   : > { %v3669_v5 = vpack.c.bf16 %v12690_v21, %v12688_v30  ;;  %v2973_v41 = vpop.f32.mrb[107].mxu1  ;;  %v12789_v30 = vld [vmem:[%s15583_s13] sm:$0xff] }
 0x6bb   : > { %v12793_v21 = vrot.slane %v12789_v30, %v16372_v37 }
 0x6bf   : > { %v3582_v53 = vpop.f32.mrb[108].mxu1 }
 0x6c0   : > { %v3584_v0 = vpop.f32.mrb[109].mxu1 }
 0x6c1   : > { %v3585_v22 = vpop.f32.mrb[110].mxu1 }
 0x6c2   : > { %v3654_v57 = vpack.c.bf16 %v3585_v22, %v3582_v53  ;;  %v3587_v32 = vpop.f32.mrb[111].mxu1 }
 0x6c4   : > { %3863 = vmatprep.mubr.bf16.mxu0 %v3654_v57 }
 0x6c5   : > { %3864 = vmatmul.mubr.bf16.vlgmr.msra.gmra.mrb[144].mxu0 %v3653_v6 }
 0x6c7   : > { %v3590_v8 = vpop.f32.mrb[112].mxu1 }
 0x6c8   : > { %v3592_v31 = vpop.f32.mrb[113].mxu1 }
 0x6c9   : > { %v3593_v39 = vpop.f32.mrb[114].mxu1 }
 0x6ca   : > { %v3656_v19 = vpack.c.bf16 %v3593_v39, %v3590_v8  ;;  %v3595_v29 = vpop.f32.mrb[115].mxu1 }
 0x6cb   : > { %v12779_v29 = vld [vmem:[%s15583_s13 + $0x8] sm:$0xff] }
 0x6cc   : > { %3873 = vmatprep.mubr.bf16.mxu0 %v3656_v19  ;;  %v12783_v47 = vrot.slane %v12779_v29, %v16372_v37 }
 0x6cd   : > { %3874 = vmatmul.mubr.bf16.gmra.mrb[148].mxu0 %v3655_v7  ;;  %v8911_v7 = vld [vmem:[%s15575_s5 + $0x50] ss:$8 sps:$4 sm:$0xff]  }
 0x6ce   : > { %4198 = vmatpush1.bf16.msra.mxu1 %v8911_v7 }
 0x6cf   : > { %v3598_v42 = vpop.f32.mrb[116].mxu1  ;;  %4199 = vmatprep.subr.bf16.mxu1 %v8916_v60  ;;  %v16376_v60 = vld [vmem:[#allocation9_spill] sm:$0xff] }
 0x6d0   : > { %v3600_v11 = vpop.f32.mrb[117].mxu1 }
 0x6d1   : > { %v3601_v20 = vpop.f32.mrb[118].mxu1  ;;  %v16375_v11 = vld [vmem:[#allocation6_spill] sm:$0xff] }
 0x6d2   : > { %v3658_v50 = vpack.c.bf16 %v3601_v20, %v3598_v42  ;;  %v3603_v6 = vpop.f32.mrb[119].mxu1  ;;  %4200 = vmatpush1.bf16.msra.mxu1 %v8914_v15 }
 0x6d3   : > { %4201 = vmatprep.subr.bf16.mxu1 %v8919_v49 }
 0x6d4   : > { %3883 = vmatprep.mubr.bf16.mxu0 %v3658_v50 }
 0x6d5   : > { %3884 = vmatmul.mubr.bf16.gmra.mrb[152].mxu0 %v3657_v27  ;;  %v8922_v27 = vld [vmem:[%s15575_s5 + $0x84] ss:$8 sps:$4 sm:$0xff]  }
 0x6d6   : > { %4202 = vmatpush1.bf16.msra.mxu1 %v8917_v9  ;;  %v16378_v9 = vld [vmem:[#allocation11_spill] sm:$0xff] }
 0x6d7   : > { %4203 = vmatprep.subr.bf16.mxu1 %v8922_v27 }
 0x6da   : > { %4204 = vmatpush1.bf16.msra.mxu1 %v8920_v23 }
 0x6db   : > { %4205 = vmatprep.subr.bf16.mxu1 %v8925_v28 }
 0x6de   : > { %4206 = vmatpush1.bf16.msra.mxu1 %v8923_v14 }
 0x719   : > { %v3606_v17 = vpop.f32.mrb[120].mxu1 }
 0x71a   : > { %v3608_v34 = vpop.f32.mrb[121].mxu1 }
 0x71b   : > { %v3609_v52 = vpop.f32.mrb[122].mxu1 }
 0x71c   : > { %v3660_v10 = vpack.c.bf16 %v3609_v52, %v3606_v17  ;;  %v3611_v2 = vpop.f32.mrb[123].mxu1  ;;  %v16379_v17 = vld [vmem:[#allocation12_spill] sm:$0xff]  ;;  %v16380_v52 = vld [vmem:[#allocation10_spill] sm:$0xff] }
 0x71e   : > { %3893 = vmatprep.mubr.bf16.mxu0 %v3660_v10 }
 0x71f   : > { %3894 = vmatmul.mubr.bf16.gmra.mrb[156].mxu0 %v3659_v58 }
 0x721   : > { %v3614_v16 = vpop.f32.mrb[124].mxu1 }
 0x722   : > { %v3616_v40 = vpop.f32.mrb[125].mxu1 }
 0x723   : > { %v3617_v36 = vpop.f32.mrb[126].mxu1  ;;  %v8928_v40 = vld [vmem:[%s15580_s10 + $0x4] ss:$8 sps:$4 sm:$0xff]  }
 0x724   : > { %v3662_v51 = vpack.c.bf16 %v3617_v36, %v3614_v16  ;;  %v3619_v41 = vpop.f32.mrb[127].mxu1  ;;  %v8926_v16 = vld [vmem:[%s15580_s10] ss:$8 sps:$4 sm:$0xff]   ;;  %4699 = vmatprep.subr.bf16.mxu0 %v8928_v40  ;;  %v16391_v40 = vld [vmem:[#allocation21_spill] sm:$0xff] }
 0x725   : > { %4700 = vmatpush1.bf16.msra.mxu0 %v8926_v16  ;;  %v8943_v16 = vld [vmem:[%s15580_s10 + $0x54] ss:$8 sps:$4 sm:$0xff]  }
 0x726   : > { %3903 = vmatprep.mubr.bf16.mxu0 %v3662_v51  ;;  %v8931_v51 = vld [vmem:[%s15580_s10 + $0x14] ss:$8 sps:$4 sm:$0xff]  }
 0x727   : > { %3904 = vmatmul.mubr.bf16.gmra.mrb[160].mxu0 %v3661_v1  ;;  %4701 = vmatprep.subr.bf16.mxu0 %v8931_v51 }
 0x729   : > { %v3622_v53 = vpop.f32.mrb[128].mxu1 }
 0x72a   : > { %v3624_v0 = vpop.f32.mrb[129].mxu1 }
 0x72b   : > { %v3625_v22 = vpop.f32.mrb[130].mxu1 }
 0x72c   : > { %v3664_v57 = vpack.c.bf16 %v3625_v22, %v3622_v53  ;;  %v3627_v32 = vpop.f32.mrb[131].mxu1 }
 0x72d   : > { %v16381_v32 = vld [vmem:[#allocation13_spill] sm:$0xff] }
 0x72e   : > { %3913 = vmatprep.mubr.bf16.mxu0 %v3664_v57  ;;  %v8929_v57 = vld [vmem:[%s15580_s10 + $0x10] ss:$8 sps:$4 sm:$0xff]  }
 0x72f   : > { %3914 = vmatmul.mubr.bf16.gmra.mrb[164].mxu0 %v3663_v13 }
 0x730   : > { %4702 = vmatpush1.bf16.msra.mxu0 %v8929_v57  ;;  %v16394_v57 = vld [vmem:[#allocation24_spill] sm:$0xff] }
 0x732   : > { %v3630_v35 = vpop.f32.mrb[132].mxu1 }
 0x733   : > { %v3632_v61 = vpop.f32.mrb[133].mxu1 }
 0x734   : > { %v3633_v58 = vpop.f32.mrb[134].mxu1 }
 0x735   : > { %v3666_v8 = vpack.c.bf16 %v3633_v58, %v3630_v35  ;;  %v3635_v31 = vpop.f32.mrb[135].mxu1  ;;  %v8934_v58 = vld [vmem:[%s15580_s10 + $0x24] ss:$8 sps:$4 sm:$0xff]  }
 0x736   : > { %4703 = vmatprep.subr.bf16.mxu0 %v8934_v58 }
 0x737   : > { %3923 = vmatprep.mubr.bf16.mxu0 %v3666_v8  ;;  %v16383_v8 = vld [vmem:[#allocation15_spill] sm:$0xff] }
 0x738   : > { %3924 = vmatmul.mubr.bf16.gmra.mrb[168].mxu0 %v3665_v44  ;;  %v16371_v44 = vld [vmem:[#allocation5_spill] sm:$0xff] }
 0x73a   : > { %v3638_v18 = vpop.f32.mrb[136].mxu1 }
 0x73b   : > { %v3640_v3 = vpop.f32.mrb[137].mxu1 }
 0x73c   : > { %v3641_v1 = vpop.f32.mrb[138].mxu1 }
 0x73d   : > { %v3668_v25 = vpack.c.bf16 %v3641_v1, %v3638_v18  ;;  %v3643_v62 = vpop.f32.mrb[139].mxu1  ;;  %v16384_v18 = vld [vmem:[#allocation16_spill] sm:$0xff] }
 0x73f   : > { %3933 = vmatprep.mubr.bf16.mxu0 %v3668_v25  ;;  %v16385_v25 = vld [vmem:[#allocation14_spill] sm:$0xff] }
 0x740   : > { %3934 = vmatmul.mubr.bf16.gmra.mrb[172].mxu0 %v3667_v24 }
 0x742   : > { %v3646_v56 = vpop.f32.mrb[140].mxu1 }
 0x743   : > { %v3648_v59 = vpop.f32.mrb[141].mxu1 }
 0x744   : > { %v3649_v13 = vpop.f32.mrb[142].mxu1  ;;  %v8932_v59 = vld [vmem:[%s15580_s10 + $0x20] ss:$8 sps:$4 sm:$0xff]  }
 0x745   : > { %v3670_v39 = vpack.c.bf16 %v3649_v13, %v3646_v56  ;;  %v3651_v4 = vpop.f32.mrb[143].mxu1  ;;  %4704 = vmatpush1.bf16.msra.mxu0 %v8932_v59 }
 0x747   : > { %3943 = vmatprep.mubr.bf16.mxu0 %v3670_v39 }
 0x748   : > { %3944 = vmatmul.mubr.bf16.gmra.mrb[176].mxu0 %v3669_v5  ;;  %v16374_v5 = vld [vmem:[#allocation8_spill] sm:$0xff] }
 0x798   : > { %v3865_v38 = vpop.f32.mrb[144].mxu0 }
 0x799   : > { %v3867_v63 = vpop.f32.mrb[145].mxu0  ;;  %v3954_v46 = vadd.f32 %v3865_v38, %v16373_v48  ;;  %v16387_v48 = vld [vmem:[#allocation17_spill] sm:$0xff] }
 0x79a   : > { %v3955_v19 = vadd.f32 %v3867_v63, %v16371_v44  ;;  %v3869_v24 = vpop.f32.mrb[146].mxu0 }
 0x79b   : > { %v3956_v42 = vadd.f32 %v3869_v24, %v16374_v5  ;;  %v3871_v54 = vpop.f32.mrb[147].mxu0  ;;  %v12807_v43 = vadd.f32 %v12793_v21, %v3954_v46  ;;  %v8937_v24 = vld [vmem:[%s15580_s10 + $0x34] ss:$8 sps:$4 sm:$0xff]  }
 0x79c   : > { %v3957_v45 = vadd.f32 %v3871_v54, %v16375_v11  ;;  %v12801_v50 = vadd.f32 %v12783_v47, %v3955_v19  ;;  %v16388_v54 = vld [vmem:[#allocation19_spill] sm:$0xff]  ;;  %4705 = vmatprep.subr.bf16.mxu0 %v8937_v24 }
 0x79d   : > { %v12798_v20 = vadd.f32 %v12793_v21, %v3956_v42  ;;  %v8935_v42 = vld [vmem:[%s15580_s10 + $0x30] ss:$8 sps:$4 sm:$0xff]  }
 0x79e   : > { %v12804_v6 = vadd.f32 %v12783_v47, %v3957_v45  ;;  %v16389_v45 = vld [vmem:[#allocation20_spill] sm:$0xff]  ;;  %4706 = vmatpush1.bf16.msra.mxu0 %v8935_v42 }
 0x79f   : > { %v4034_v55 = vpack.c.bf16 %v12798_v20, %v12807_v43 }
 0x7a0   : > { %v4035_v33 = vpack.c.bf16 %v12804_v6, %v12801_v50  ;;  %v3875_v26 = vpop.f32.mrb[148].mxu0 }
 0x7a1   : > { %v3877_v7 = vpop.f32.mrb[149].mxu0  ;;  %v3958_v27 = vadd.f32 %v3875_v26, %v16378_v9 }
 0x7a2   : > { %v3959_v15 = vadd.f32 %v3877_v7, %v16376_v60  ;;  %v3879_v49 = vpop.f32.mrb[150].mxu0  ;;  %8481 = vmatprep.mubr.msk.bf16.mxu1 %vm16377_vm15, %v4035_v33  ;;  %vm16392_vm15 = vmmov %vm16386_vm10 }
 0x7a3   : > { %v3960_v23 = vadd.f32 %v3879_v49, %v16379_v17  ;;  %v3881_v34 = vpop.f32.mrb[151].mxu0  ;;  %4220 = vmatmul.mubr.bf16.vlgmr.msra.gmra.mrb[144].mxu1 %v4034_v55  ;;  %v12834_v36 = vadd.f32 %v12793_v21, %v3958_v27  ;;  %v16390_v55 = vld [vmem:[#allocation18_spill] sm:$0xff] }
 0x7a4   : > { %v3961_v10 = vadd.f32 %v3881_v34, %v16380_v52  ;;  %v12822_v28 = vadd.f32 %v12783_v47, %v3959_v15  ;;  %v8940_v15 = vld [vmem:[%s15580_s10 + $0x44] ss:$8 sps:$4 sm:$0xff]   ;;  %v8938_v27 = vld [vmem:[%s15580_s10 + $0x40] ss:$8 sps:$4 sm:$0xff]  }
 0x7a5   : > { %v12819_v2 = vadd.f32 %v12793_v21, %v3960_v23  ;;  %4707 = vmatprep.subr.bf16.mxu0 %v8940_v15 }
 0x7a6   : > { %v12825_v14 = vadd.f32 %v12783_v47, %v3961_v10  ;;  %4708 = vmatpush1.bf16.msra.mxu0 %v8938_v27 }
 0x7a7   : > { %v4036_v22 = vpack.c.bf16 %v12819_v2, %v12834_v36  ;;  %4709 = vmatprep.subr.bf16.mxu0 %v8943_v16 }
 0x7a8   : > { %v4037_v41 = vpack.c.bf16 %v12825_v14, %v12822_v28  ;;  %v3885_v53 = vpop.f32.mrb[152].mxu0 }
 0x7a9   : > { %v3887_v0 = vpop.f32.mrb[153].mxu0  ;;  %v3962_v31 = vadd.f32 %v3885_v53, %v16383_v8  ;;  %v8941_v53 = vld [vmem:[%s15580_s10 + $0x50] ss:$8 sps:$4 sm:$0xff]  }
 0x7aa   : > { %v3963_v35 = vadd.f32 %v3887_v0, %v16381_v32  ;;  %v3889_v61 = vpop.f32.mrb[154].mxu0  ;;  %8482 = vmatprep.mubr.msk.bf16.mxu1 %vm16382_vm14, %v4037_v41  ;;  %v16393_v0 = vld [vmem:[#allocation23_spill] sm:$0xff]  ;;  %4710 = vmatpush1.bf16.msra.mxu0 %v8941_v53  ;;  %vm16397_vm14 = vmmov %vm16386_vm10 }
 0x7ab   : > { %v3964_v3 = vadd.f32 %v3889_v61, %v16384_v18  ;;  %v3891_v1 = vpop.f32.mrb[155].mxu0  ;;  %4230 = vmatmul.mubr.bf16.gmra.mrb[148].mxu1 %v4036_v22  ;;  %v12867_v4 = vadd.f32 %v12793_v21, %v3962_v31  ;;  %v16395_v61 = vld [vmem:[#allocation22_spill] sm:$0xff] }
 0x7ac   : > { %v3965_v62 = vadd.f32 %v3891_v1, %v16385_v25  ;;  %v12861_v13 = vadd.f32 %v12783_v47, %v3963_v35  ;;  %v8946_v31 = vld [vmem:[%s15580_s10 + $0x64] ss:$8 sps:$4 sm:$0xff]   ;;  %v8944_v1 = vld [vmem:[%s15580_s10 + $0x60] ss:$8 sps:$4 sm:$0xff]  }
 0x7ad   : > { %v12855_v56 = vadd.f32 %v12793_v21, %v3964_v3  ;;  %4711 = vmatprep.subr.bf16.mxu0 %v8946_v31 }
 0x7ae   : > { %v12864_v39 = vadd.f32 %v12783_v47, %v3965_v62  ;;  %4712 = vmatpush1.bf16.msra.mxu0 %v8944_v1  ;;  %v8953_v1 = vld [vmem:[%s15580_s10 + $0x90] ss:$8 sps:$4 sm:$0xff]  }
 0x7af   : > { %v4038_v63 = vpack.c.bf16 %v12855_v56, %v12867_v4 }
 0x7b0   : > { %v4039_v38 = vpack.c.bf16 %v12864_v39, %v12861_v13 }
 0x7b2   : > { %8483 = vmatprep.mubr.msk.bf16.mxu1 %vm16386_vm10, %v4039_v38 }
 0x7b3   : > { %4240 = vmatmul.mubr.bf16.gmra.mrb[152].mxu1 %v4038_v63 }
 0x7f2   : > { %v3895_v44 = vpop.f32.mrb[156].mxu0 }
 0x7f3   : > { %v3897_v19 = vpop.f32.mrb[157].mxu0  ;;  %v3966_v11 = vadd.f32 %v3895_v44, %v16388_v54  ;;  %v8949_v44 = vld [vmem:[%s15580_s10 + $0x74] ss:$8 sps:$4 sm:$0xff]  }
 0x7f4   : > { %v3967_v46 = vadd.f32 %v3897_v19, %v16387_v48  ;;  %v3899_v5 = vpop.f32.mrb[158].mxu0  ;;  %v16396_v19 = vld [vmem:[#allocation25_spill] sm:$0xff]  ;;  %v16399_v54 = vld [vmem:[#allocation28_spill] sm:$0xff]  ;;  %4713 = vmatprep.subr.bf16.mxu0 %v8949_v44 }
 0x7f5   : > { %v3968_v33 = vadd.f32 %v3899_v5, %v16389_v45  ;;  %v3901_v26 = vpop.f32.mrb[159].mxu0  ;;  %v12900_v17 = vadd.f32 %v12793_v21, %v3966_v11  ;;  %v16398_v5 = vld [vmem:[#allocation27_spill] sm:$0xff] }
 0x7f6   : > { %v3969_v7 = vadd.f32 %v3901_v26, %v16390_v55  ;;  %v12891_v49 = vadd.f32 %v12783_v47, %v3967_v46  ;;  %v8947_v46 = vld [vmem:[%s15580_s10 + $0x70] ss:$8 sps:$4 sm:$0xff]  }
 0x7f7   : > { %v12885_v60 = vadd.f32 %v12793_v21, %v3968_v33  ;;  %v16400_v33 = vld [vmem:[#allocation26_spill] sm:$0xff]  ;;  %4714 = vmatpush1.bf16.msra.mxu0 %v8947_v46  ;;  %v16405_v46 = vld [vmem:[#allocation33_spill] sm:$0xff] }
 0x7f8   : > { %v12894_v9 = vadd.f32 %v12783_v47, %v3969_v7 }
 0x7f9   : > { %v4040_v10 = vpack.c.bf16 %v12885_v60, %v12900_v17 }
 0x7fa   : > { %v4041_v23 = vpack.c.bf16 %v12894_v9, %v12891_v49  ;;  %v3905_v34 = vpop.f32.mrb[160].mxu0 }
 0x7fb   : > { %v3907_v52 = vpop.f32.mrb[161].mxu0  ;;  %v3970_v22 = vadd.f32 %v3905_v34, %v16393_v0  ;;  %v16402_v0 = vld [vmem:[#allocation31_spill] sm:$0xff] }
 0x7fc   : > { %v3971_v51 = vadd.f32 %v3907_v52, %v16391_v40  ;;  %v3909_v41 = vpop.f32.mrb[162].mxu0  ;;  %8484 = vmatprep.mubr.msk.bf16.mxu1 %vm16392_vm15, %v4041_v23  ;;  %v8952_v23 = vld [vmem:[%s15580_s10 + $0x84] ss:$8 sps:$4 sm:$0xff]   ;;  %vm16406_vm15 = vmmov %vm16386_vm10 }
 0x7fd   : > { %v3972_v32 = vadd.f32 %v3909_v41, %v16394_v57  ;;  %v3911_v35 = vpop.f32.mrb[163].mxu0  ;;  %4250 = vmatmul.mubr.bf16.gmra.mrb[156].mxu1 %v4040_v10  ;;  %v12933_v25 = vadd.f32 %v12793_v21, %v3970_v22  ;;  %v8950_v10 = vld [vmem:[%s15580_s10 + $0x80] ss:$8 sps:$4 sm:$0xff]   ;;  %4715 = vmatprep.subr.bf16.mxu0 %v8952_v23  ;;  %v16403_v57 = vld [vmem:[#allocation32_spill] sm:$0xff] }
 0x7fe   : > { %v3973_v58 = vadd.f32 %v3911_v35, %v16395_v61  ;;  %v12924_v18 = vadd.f32 %v12783_v47, %v3971_v51  ;;  %v16401_v51 = vld [vmem:[#allocation29_spill] sm:$0xff]  ;;  %4716 = vmatpush1.bf16.msra.mxu0 %v8950_v10  ;;  %v16409_v23 = vld [vmem:[#allocation34_spill] sm:$0xff] }
 0x7ff   : > { %v12918_v8 = vadd.f32 %v12793_v21, %v3972_v32  ;;  %v8955_v61 = vld [vmem:[%s15580_s10 + $0x94] ss:$8 sps:$4 sm:$0xff]  }
 0x800   : > { %v12927_v3 = vadd.f32 %v12783_v47, %v3973_v58  ;;  %v16404_v58 = vld [vmem:[#allocation30_spill] sm:$0xff]  ;;  %4717 = vmatprep.subr.bf16.mxu0 %v8955_v61 }
 0x801   : > { %v4042_v63 = vpack.c.bf16 %v12918_v8, %v12933_v25 }
 0x802   : > { %v4043_v62 = vpack.c.bf16 %v12927_v3, %v12924_v18  ;;  %v3915_v59 = vpop.f32.mrb[164].mxu0  ;;  %4718 = vmatpush1.bf16.msra.mxu0 %v8953_v1 }
 0x803   : > { %v3917_v38 = vpop.f32.mrb[165].mxu0  ;;  %v3974_v42 = vadd.f32 %v3915_v59, %v16398_v5 }
 0x804   : > { %v3975_v24 = vadd.f32 %v3917_v38, %v16396_v19  ;;  %v3919_v48 = vpop.f32.mrb[166].mxu0  ;;  %8485 = vmatprep.mubr.msk.bf16.mxu1 %vm16397_vm14, %v4043_v62  ;;  %vm16411_vm14 = vmmov %vm16386_vm10 }
 0x805   : > { %v3976_v11 = vadd.f32 %v3919_v48, %v16399_v54  ;;  %v3921_v45 = vpop.f32.mrb[167].mxu0  ;;  %4260 = vmatmul.mubr.bf16.gmra.mrb[160].mxu1 %v4042_v63  ;;  %v12960_v27 = vadd.f32 %v12793_v21, %v3974_v42  ;;  %v16407_v54 = vld [vmem:[#allocation36_spill] sm:$0xff] }
 0x806   : > { %v3977_v26 = vadd.f32 %v3921_v45, %v16400_v33  ;;  %v12954_v7 = vadd.f32 %v12783_v47, %v3975_v24  ;;  %v16408_v45 = vld [vmem:[#allocation35_spill] sm:$0xff] }
 0x807   : > { %v12951_v55 = vadd.f32 %v12793_v21, %v3976_v11 }
 0x808   : > { %v12957_v15 = vadd.f32 %v12783_v47, %v3977_v26 }
 0x809   : > { %v4044_v40 = vpack.c.bf16 %v12951_v55, %v12960_v27 }
 0x80a   : > { %v4045_v34 = vpack.c.bf16 %v12957_v15, %v12954_v7 }
 0x80b   : > { %v3925_v52 = vpop.f32.mrb[168].mxu0 }
 0x80c   : > { %v3927_v16 = vpop.f32.mrb[169].mxu0  ;;  %8486 = vmatprep.mubr.msk.bf16.mxu1 %vm16386_vm10, %v4045_v34  ;;  %v3978_v22 = vadd.f32 %v3925_v52, %v16402_v0 }
 0x80d   : > { %v3979_v41 = vadd.f32 %v3927_v16, %v16401_v51  ;;  %v3929_v53 = vpop.f32.mrb[170].mxu0  ;;  %4270 = vmatmul.mubr.bf16.gmra.mrb[164].mxu1 %v4044_v40 }
 0x80e   : > { %v3980_v32 = vadd.f32 %v3929_v53, %v16403_v57  ;;  %v3931_v35 = vpop.f32.mrb[171].mxu0  ;;  %v12993_v63 = vadd.f32 %v12793_v21, %v3978_v22  ;;  %v16410_v22 = vld [vmem:[#allocation37_spill] sm:$0xff] }
 0x80f   : > { %v3981_v31 = vadd.f32 %v3931_v35, %v16404_v58  ;;  %v12987_v59 = vadd.f32 %v12783_v47, %v3979_v41  ;;  %v16412_v35 = vld [vmem:[#allocation40_spill] sm:$0xff]  ;;  %v16413_v58 = vld [vmem:[#allocation39_spill] sm:$0xff] }
 0x810   : > { %v12984_v62 = vadd.f32 %v12793_v21, %v3980_v32 }
 0x811   : > { %v12990_v38 = vadd.f32 %v12783_v47, %v3981_v31 }
 0x812   : > { %v4046_v48 = vpack.c.bf16 %v12984_v62, %v12993_v63 }
 0x813   : > { %v4047_v44 = vpack.c.bf16 %v12990_v38, %v12987_v59  ;;  %v3935_v19 = vpop.f32.mrb[172].mxu0 }
 0x814   : > { %v3937_v24 = vpop.f32.mrb[173].mxu0  ;;  %v3982_v11 = vadd.f32 %v3935_v19, %v16407_v54 }
 0x815   : > { %v3983_v5 = vadd.f32 %v3937_v24, %v16405_v46  ;;  %v3939_v42 = vpop.f32.mrb[174].mxu0  ;;  %8487 = vmatprep.mubr.msk.bf16.mxu1 %vm16406_vm15, %v4047_v44  ;;  %v16414_v44 = vld [vmem:[#allocation38_spill] sm:$0xff]  ;;  %vm16422_vm15 = vmmov %vm16386_vm10 }
 0x816   : > { %v3984_v33 = vadd.f32 %v3939_v42, %v16408_v45  ;;  %v3941_v26 = vpop.f32.mrb[175].mxu0  ;;  %4280 = vmatmul.mubr.bf16.gmra.mrb[168].mxu1 %v4046_v48  ;;  %v13014_v40 = vadd.f32 %v12793_v21, %v3982_v11  ;;  %v16417_v11 = vld [vmem:[#allocation42_spill] sm:$0xff] }
 0x817   : > { %v3985_v34 = vadd.f32 %v3941_v26, %v16409_v23  ;;  %v13008_v10 = vadd.f32 %v12783_v47, %v3983_v5  ;;  %v13044_v45 = vrot.slane %v12789_v30, %v16417_v11 }
 0x818   : > { %v13005_v52 = vadd.f32 %v12793_v21, %v3984_v33 }
 0x819   : > { %v13011_v16 = vadd.f32 %v12783_v47, %v3985_v34 }
 0x81a   : > { %v4048_v0 = vpack.c.bf16 %v13005_v52, %v13014_v40 }
 0x81b   : > { %v4049_v51 = vpack.c.bf16 %v13011_v16, %v13008_v10  ;;  %v3945_v41 = vpop.f32.mrb[176].mxu0 }
 0x81c   : > { %v3947_v53 = vpop.f32.mrb[177].mxu0  ;;  %v3986_v61 = vadd.f32 %v3945_v41, %v16412_v35 }
 0x81d   : > { %v3987_v57 = vadd.f32 %v3947_v53, %v16410_v22  ;;  %v3949_v32 = vpop.f32.mrb[178].mxu0  ;;  %8488 = vmatprep.mubr.msk.bf16.mxu1 %vm16411_vm14, %v4049_v51  ;;  %vm16427_vm14 = vmmov %vm16386_vm10 }
 0x81e   : > { %v3988_v31 = vadd.f32 %v3949_v32, %v16413_v58  ;;  %v3951_v1 = vpop.f32.mrb[179].mxu0  ;;  %4290 = vmatmul.mubr.bf16.gmra.mrb[172].mxu1 %v4048_v0  ;;  %v13035_v5 = vadd.f32 %v12793_v21, %v3986_v61 }
 0x81f   : > { %v3989_v19 = vadd.f32 %v3951_v1, %v16414_v44  ;;  %v13029_v48 = vadd.f32 %v12783_v47, %v3987_v57 }
 0x820   : > { %v13026_v24 = vadd.f32 %v12793_v21, %v3988_v31  ;;  %16416 = vst [vmem:[#allocation115_spill] sm:$0xff] %v13035_v5  ;;  %v8958_v21 = vld [vmem:[%s15576_s6 + $0x4] ss:$24 sps:$4 sm:$0xff]  }
 0x821   : > { %v13032_v46 = vadd.f32 %v12783_v47, %v3989_v19  ;;  %v13048_v47 = vrot.slane %v12779_v29, %v16417_v11  ;;  %5643 = vmatprep.subr.bf16.mxu0 %v8958_v21 }
 0x822   : > { %16415 = vst [vmem:[#allocation116_spill] sm:$0xff] %v13026_v24  ;;  %v4050_v54 = vpack.c.bf16 %v13026_v24, %v13035_v5 }
 0x823   : > { %v4051_v42 = vpack.c.bf16 %v13032_v46, %v13029_v48 }
 0x825   : > { %8489 = vmatprep.mubr.msk.bf16.mxu1 %vm16386_vm10, %v4051_v42 }
 0x826   : > { %4300 = vmatmul.mubr.bf16.gmra.mrb[176].mxu1 %v4050_v54 }
 0x876   : > { %v4221_v33 = vpop.f32.mrb[144].mxu1 }
 0x877   : > { %v4222_v26 = vadd.f32 %v4221_v33, %v13044_v45  ;;  %v4223_v23 = vpop.f32.mrb[145].mxu1 }
 0x878   : > { %v4224_v34 = vadd.f32 %v4223_v23, %v13048_v47  ;;  %v4225_v51 = vpop.f32.mrb[146].mxu1 }
 0x879   : > { %v4346_v41 = vmul.f32 0.70710677, %v4222_v26  ;;  %v4226_v30 = vadd.f32 %v4225_v51, %v13044_v45  ;;  %v4227_v53 = vpop.f32.mrb[147].mxu1  ;;  %v4310_v11 = vmul.f32 0.5, %v4222_v26 }
 0x87a   : > { %v4347_v0 = vmul.f32 0.70710677, %v4224_v34  ;;  %v4228_v29 = vadd.f32 %v4227_v53, %v13048_v47 }
 0x87b   : > { %9468 = verf.f32 %v4346_v41  ;;  %v4348_v22 = vmul.f32 0.70710677, %v4226_v30 }
 0x87c   : > { %9470 = verf.f32 %v4347_v0  ;;  %v4349_v57 = vmul.f32 0.70710677, %v4228_v29  ;;  %v4313_v12 = vmul.f32 0.5, %v4228_v29 }
 0x87d   : > { %9472 = verf.f32 %v4348_v22  ;;  %v4311_v22 = vmul.f32 0.5, %v4224_v34 }
 0x87e   : > { %9474 = verf.f32 %v4349_v57  ;;  %v4231_v32 = vpop.f32.mrb[148].mxu1 }
 0x87f   : > { %v4232_v35 = vadd.f32 %v4231_v32, %v13044_v45  ;;  %v4233_v61 = vpop.f32.mrb[149].mxu1 }
 0x880   : > { %v4234_v58 = vadd.f32 %v4233_v61, %v13048_v47  ;;  %v4235_v31 = vpop.f32.mrb[150].mxu1 }
 0x881   : > { %v4350_v1 = vmul.f32 0.70710677, %v4232_v35  ;;  %v4236_v44 = vadd.f32 %v4235_v31, %v13044_v45  ;;  %v4237_v19 = vpop.f32.mrb[151].mxu1 }
 0x882   : > { %v4351_v42 = vmul.f32 0.70710677, %v4234_v58  ;;  %v4238_v54 = vadd.f32 %v4237_v19, %v13048_v47  ;;  %v4312_v19 = vmul.f32 0.5, %v4226_v30 }
 0x883   : > { %9476 = verf.f32 %v4350_v1  ;;  %v4352_v33 = vmul.f32 0.70710677, %v4236_v44 }
 0x884   : > { %9478 = verf.f32 %v4351_v42  ;;  %v4353_v21 = vmul.f32 0.70710677, %v4238_v54 }
 0x885   : > { %v9469_v23 = vpop.eup %9468  ;;  %9480 = verf.f32 %v4352_v33 }
 0x886   : > { %v9471_v51 = vpop.eup %9470  ;;  %v4418_v41 = vadd.f32 1.0, %v9469_v23  ;;  %9482 = verf.f32 %v4353_v21  ;;  %v4241_v53 = vpop.f32.mrb[152].mxu1 }
 0x887   : > { %v9473_v0 = vpop.eup %9472  ;;  %v4419_v57 = vadd.f32 1.0, %v9471_v51  ;;  %v13062_v32 = vadd.f32 %v4241_v53, %v13044_v45  ;;  %v4243_v61 = vpop.f32.mrb[153].mxu1 }
 0x888   : > { %v9475_v31 = vpop.eup %9474  ;;  %v4420_v1 = vadd.f32 1.0, %v9473_v0  ;;  %v13065_v42 = vadd.f32 %v4243_v61, %v13048_v47  ;;  %v4245_v37 = vpop.f32.mrb[154].mxu1  ;;  %v4454_v34 = vmul.f32 %v4418_v41, %v4310_v11  ;;  %v4314_v61 = vmul.f32 0.5, %v4232_v35 }
 0x889   : > { %v4455_v33 = vmul.f32 %v4419_v57, %v4311_v22  ;;  %v4421_v23 = vadd.f32 1.0, %v9475_v31  ;;  %v4354_v21 = vmul.f32 0.70710677, %v13062_v32  ;;  %v4247_v5 = vpop.f32.mrb[155].mxu1  ;;  %v4246_v26 = vadd.f32 %v4245_v37, %v13044_v45 }
 0x88a   : > { %v4456_v51 = vmul.f32 %v4420_v1, %v4312_v19  ;;  %v4355_v53 = vmul.f32 0.70710677, %v13065_v42  ;;  %v4248_v0 = vadd.f32 %v4247_v5, %v13048_v47  ;;  %v4315_v19 = vmul.f32 0.5, %v4234_v58  ;;  %v8961_v58 = vld [vmem:[%s15576_s6 + $0x34] ss:$24 sps:$4 sm:$0xff]  }
 0x88b   : > { %v4457_v24 = vmul.f32 %v4421_v23, %v4313_v12  ;;  %9484 = verf.f32 %v4354_v21  ;;  %v13075_v29 = vadd.f32 %v4455_v33, %v12801_v50  ;;  %v4356_v11 = vmul.f32 0.70710677, %v4246_v26  ;;  %v8956_v50 = vld [vmem:[%s15576_s6] ss:$24 sps:$4 sm:$0xff]  }
 0x88c   : > { %v13071_v30 = vadd.f32 %v4456_v51, %v12798_v20  ;;  %9486 = verf.f32 %v4355_v53  ;;  %v13081_v12 = vadd.f32 %v4454_v34, %v12807_v43  ;;  %v4357_v31 = vmul.f32 0.70710677, %v4248_v0 }
 0x88d   : > { %v9477_v22 = vpop.eup %9476  ;;  %16419 = vst [vmem:[#allocation117_spill] sm:$0xff] %v13075_v29  ;;  %v13078_v57 = vadd.f32 %v4457_v24, %v12804_v6  ;;  %9488 = verf.f32 %v4356_v11  ;;  %v4316_v24 = vmul.f32 0.5, %v4236_v44  ;;  %v4317_v23 = vmul.f32 0.5, %v4238_v54  ;;  %v8959_v44 = vld [vmem:[%s15576_s6 + $0x30] ss:$24 sps:$4 sm:$0xff]  }
 0x88e   : > { %16418 = vst [vmem:[#allocation118_spill] sm:$0xff] %v13071_v30  ;;  %v9479_v41 = vpop.eup %9478  ;;  %16421 = vst [vmem:[#allocation119_spill] sm:$0xff] %v13081_v12  ;;  %v4422_v37 = vadd.f32 1.0, %v9477_v22  ;;  %v13092_v43 = vpack.c.bf16 %v13071_v30, %v13081_v12  ;;  %9490 = verf.f32 %v4357_v31  ;;  %v8964_v54 = vld [vmem:[%s15576_s6 + $0x64] ss:$24 sps:$4 sm:$0xff]  }
 0x88f   : > { %16420 = vst [vmem:[#allocation120_spill] sm:$0xff] %v13078_v57  ;;  %v9481_v20 = vpop.eup %9480  ;;  %v4423_v1 = vadd.f32 1.0, %v9479_v41  ;;  %v13085_v5 = vpack.c.bf16 %v13078_v57, %v13075_v29 }
 0x890   : > { %v9483_v6 = vpop.eup %9482  ;;  %v4424_v35 = vadd.f32 1.0, %v9481_v20  ;;  %v4458_v34 = vmul.f32 %v4422_v37, %v4314_v61 }
 0x891   : > { %v4459_v33 = vmul.f32 %v4423_v1, %v4315_v19  ;;  %v4425_v21 = vadd.f32 1.0, %v9483_v6  ;;  %8510 = vmatprep.mubr.msk.bf16.mxu0 %vm16422_vm15, %v13085_v5  ;;  %v8962_v19 = vld [vmem:[%s15576_s6 + $0x60] ss:$24 sps:$4 sm:$0xff]   ;;  %vm16436_vm15 = vmmov %vm16386_vm10 }
 0x892   : > { %v4460_v51 = vmul.f32 %v4424_v35, %v4316_v24  ;;  %4732 = vmatmul.mubr.bf16.vlgmr.msra.gmra.mrb[180].mxu0 %v13092_v43  ;;  %v13116_v31 = vadd.f32 %v4458_v34, %v12834_v36  ;;  %v4318_v24 = vmul.f32 0.5, %v13062_v32  ;;  %v4320_v35 = vmul.f32 0.5, %v4246_v26  ;;  %v8965_v34 = vld [vmem:[%s15576_s6 + $0x90] ss:$24 sps:$4 sm:$0xff]  }
 0x893   : > { %v4461_v53 = vmul.f32 %v4425_v21, %v4317_v23  ;;  %5644 = vmatpush1.bf16.msra.mxu0 %v8956_v50  ;;  %v13110_v41 = vadd.f32 %v4459_v33, %v12822_v28  ;;  %v4319_v50 = vmul.f32 0.5, %v13065_v42  ;;  %v4321_v23 = vmul.f32 0.5, %v4248_v0 }
 0x894   : > { %v13104_v22 = vadd.f32 %v4460_v51, %v12819_v2  ;;  %5645 = vmatprep.subr.bf16.mxu0 %v8961_v58  ;;  %16426 = vst [vmem:[#allocation123_spill] sm:$0xff] %v13116_v31 }
 0x895   : > { %v9485_v11 = vpop.eup %9484  ;;  %16424 = vst [vmem:[#allocation121_spill] sm:$0xff] %v13110_v41  ;;  %v13113_v61 = vadd.f32 %v4461_v53, %v12825_v14  ;;  %v8967_v14 = vld [vmem:[%s15576_s6 + $0x94] ss:$24 sps:$4 sm:$0xff]   ;;  %v8970_v53 = vld [vmem:[%s15576_s6 + $0xc4] ss:$24 sps:$4 sm:$0xff]  }
 0x896   : > { %16423 = vst [vmem:[#allocation122_spill] sm:$0xff] %v13104_v22  ;;  %v9487_v37 = vpop.eup %9486  ;;  %v4426_v1 = vadd.f32 1.0, %v9485_v11  ;;  %v13127_v28 = vpack.c.bf16 %v13104_v22, %v13116_v31 }
 0x897   : > { %16425 = vst [vmem:[#allocation124_spill] sm:$0xff] %v13113_v61  ;;  %v4427_v20 = vadd.f32 1.0, %v9487_v37  ;;  %v13120_v2 = vpack.c.bf16 %v13113_v61, %v13110_v41  ;;  %5646 = vmatpush1.bf16.msra.mxu0 %v8959_v44  ;;  %v9489_v36 = vpop.eup %9488  ;;  %v8976_v37 = vld [vmem:[%s15576_s6 + $0x124] ss:$24 sps:$4 sm:$0xff]  }
 0x898   : > { %5647 = vmatprep.subr.bf16.mxu0 %v8964_v54  ;;  %v9491_v6 = vpop.eup %9490  ;;  %v4428_v58 = vadd.f32 1.0, %v9489_v36  ;;  %v4462_v51 = vmul.f32 %v4426_v1, %v4318_v24  ;;  %v8968_v54 = vld [vmem:[%s15576_s6 + $0xc0] ss:$24 sps:$4 sm:$0xff]   ;;  %v8977_v1 = vld [vmem:[%s15576_s6 + $0x150] ss:$24 sps:$4 sm:$0xff]  }
 0x899   : > { %8511 = vmatprep.mubr.msk.bf16.mxu0 %vm16427_vm14, %v13120_v2  ;;  %v4463_v33 = vmul.f32 %v4427_v20, %v4319_v50  ;;  %v4429_v21 = vadd.f32 1.0, %v9491_v6  ;;  %v8974_v20 = vld [vmem:[%s15576_s6 + $0x120] ss:$24 sps:$4 sm:$0xff]   ;;  %v8985_v50 = vld [vmem:[%s15576_s6 + $0x1b4] ss:$24 sps:$4 sm:$0xff]   ;;  %vm16441_vm14 = vmmov %vm16386_vm10 }
 0x89a   : > { %4742 = vmatmul.mubr.bf16.gmra.mrb[184].mxu0 %v13127_v28  ;;  %v4464_v42 = vmul.f32 %v4428_v58, %v4320_v35  ;;  %v13156_v11 = vadd.f32 %v4462_v51, %v12867_v4  ;;  %v8971_v4 = vld [vmem:[%s15576_s6 + $0xf0] ss:$24 sps:$4 sm:$0xff]   ;;  %v8980_v36 = vld [vmem:[%s15576_s6 + $0x180] ss:$24 sps:$4 sm:$0xff]   ;;  %v8988_v24 = vld [vmem:[%s15576_s6 + $0x14] ss:$24 sps:$4 sm:$0xff]  }
 0x89b   : > { %5648 = vmatpush1.bf16.msra.mxu0 %v8962_v19  ;;  %v4465_v32 = vmul.f32 %v4429_v21, %v4321_v23  ;;  %v13147_v44 = vadd.f32 %v4463_v33, %v12861_v13  ;;  %v8979_v19 = vld [vmem:[%s15576_s6 + $0x154] ss:$24 sps:$4 sm:$0xff]   ;;  %v8983_v6 = vld [vmem:[%s15576_s6 + $0x1b0] ss:$24 sps:$4 sm:$0xff]  }
 0x89c   : > { %5649 = vmatprep.subr.bf16.mxu0 %v8967_v14  ;;  %v13144_v26 = vadd.f32 %v4464_v42, %v12855_v56  ;;  %16431 = vst [vmem:[#allocation51_spill] sm:$0xff] %v13156_v11  ;;  %v8973_v56 = vld [vmem:[%s15576_s6 + $0xf4] ss:$24 sps:$4 sm:$0xff]   ;;  %v8982_v14 = vld [vmem:[%s15576_s6 + $0x184] ss:$24 sps:$4 sm:$0xff]  }
 0x89d   : > { %16429 = vst [vmem:[#allocation125_spill] sm:$0xff] %v13147_v44  ;;  %v13150_v0 = vadd.f32 %v4465_v32, %v12864_v39 }
 0x89e   : > { %16428 = vst [vmem:[#allocation126_spill] sm:$0xff] %v13144_v26  ;;  %v13167_v39 = vpack.c.bf16 %v13144_v26, %v13156_v11 }
 0x89f   : > { %16430 = vst [vmem:[#allocation52_spill] sm:$0xff] %v13150_v0  ;;  %5650 = vmatpush1.bf16.msra.mxu0 %v8965_v34  ;;  %v13163_v13 = vpack.c.bf16 %v13150_v0, %v13147_v44 }
 0x8a0   : > { %5651 = vmatprep.subr.bf16.mxu0 %v8970_v53 }
 0x8a1   : > { %8512 = vmatprep.mubr.msk.bf16.mxu0 %vm16386_vm10, %v13163_v13 }
 0x8a2   : > { %4752 = vmatmul.mubr.bf16.gmra.mrb[188].mxu0 %v13167_v39 }
 0x8a3   : > { %5652 = vmatpush1.bf16.msra.mxu0 %v8968_v54 }
 0x8a4   : > { %5653 = vmatprep.subr.bf16.mxu0 %v8973_v56 }
 0x8a7   : > { %5654 = vmatpush1.bf16.msra.mxu0 %v8971_v4 }
 0x8a8   : > { %5655 = vmatprep.subr.bf16.mxu0 %v8976_v37 }
 0x8ab   : > { %5656 = vmatpush1.bf16.msra.mxu0 %v8974_v20 }
 0x8ac   : > { %5657 = vmatprep.subr.bf16.mxu0 %v8979_v19 }
 0x8af   : > { %5658 = vmatpush1.bf16.msra.mxu0 %v8977_v1 }
 0x8b0   : > { %5659 = vmatprep.subr.bf16.mxu0 %v8982_v14 }
 0x8b3   : > { %5660 = vmatpush1.bf16.msra.mxu0 %v8980_v36 }
 0x8b4   : > { %5661 = vmatprep.subr.bf16.mxu0 %v8985_v50 }
 0x8b7   : > { %5662 = vmatpush1.bf16.msra.mxu0 %v8983_v6 }
 0x8b8   : > { %5889 = vmatprep.subr.bf16.mxu0 %v8988_v24 }
 0x8d0   : > { %v4251_v35 = vpop.f32.mrb[156].mxu1 }
 0x8d1   : > { %v4252_v58 = vadd.f32 %v4251_v35, %v13044_v45  ;;  %v4253_v33 = vpop.f32.mrb[157].mxu1 }
 0x8d2   : > { %v4254_v23 = vadd.f32 %v4253_v33, %v13048_v47  ;;  %v4255_v21 = vpop.f32.mrb[158].mxu1 }
 0x8d3   : > { %v4358_v34 = vmul.f32 0.70710677, %v4252_v58  ;;  %v4256_v51 = vadd.f32 %v4255_v21, %v13044_v45  ;;  %v4257_v42 = vpop.f32.mrb[159].mxu1  ;;  %v4322_v26 = vmul.f32 0.5, %v4252_v58 }
 0x8d4   : > { %v4359_v53 = vmul.f32 0.70710677, %v4254_v23  ;;  %v4258_v32 = vadd.f32 %v4257_v42, %v13048_v47 }
 0x8d5   : > { %9492 = verf.f32 %v4358_v34  ;;  %v4360_v54 = vmul.f32 0.70710677, %v4256_v51 }
 0x8d6   : > { %9494 = verf.f32 %v4359_v53  ;;  %v4361_v56 = vmul.f32 0.70710677, %v4258_v32  ;;  %v4325_v44 = vmul.f32 0.5, %v4258_v32 }
 0x8d7   : > { %9496 = verf.f32 %v4360_v54 }
 0x8d8   : > { %9498 = verf.f32 %v4361_v56  ;;  %v4261_v4 = vpop.f32.mrb[160].mxu1  ;;  %v4323_v56 = vmul.f32 0.5, %v4254_v23 }
 0x8d9   : > { %v4262_v37 = vadd.f32 %v4261_v4, %v13044_v45  ;;  %v4263_v20 = vpop.f32.mrb[161].mxu1 }
 0x8da   : > { %v4264_v19 = vadd.f32 %v4263_v20, %v13048_v47  ;;  %v4265_v1 = vpop.f32.mrb[162].mxu1 }
 0x8db   : > { %v4362_v14 = vmul.f32 0.70710677, %v4262_v37  ;;  %v4266_v36 = vadd.f32 %v4265_v1, %v13044_v45  ;;  %v4267_v50 = vpop.f32.mrb[163].mxu1  ;;  %v4326_v31 = vmul.f32 0.5, %v4262_v37 }
 0x8dc   : > { %v4363_v6 = vmul.f32 0.70710677, %v4264_v19  ;;  %v4268_v24 = vadd.f32 %v4267_v50, %v13048_v47  ;;  %v4324_v50 = vmul.f32 0.5, %v4256_v51 }
 0x8dd   : > { %9500 = verf.f32 %v4362_v14  ;;  %v4364_v35 = vmul.f32 0.70710677, %v4266_v36 }
 0x8de   : > { %9502 = verf.f32 %v4363_v6  ;;  %v4365_v33 = vmul.f32 0.70710677, %v4268_v24 }
 0x8df   : > { %v9493_v21 = vpop.eup %9492  ;;  %9504 = verf.f32 %v4364_v35 }
 0x8e0   : > { %v9495_v34 = vpop.eup %9494  ;;  %v4430_v42 = vadd.f32 1.0, %v9493_v21  ;;  %9506 = verf.f32 %v4365_v33  ;;  %v4271_v53 = vpop.f32.mrb[164].mxu1 }
 0x8e1   : > { %v9497_v54 = vpop.eup %9496  ;;  %v4431_v4 = vadd.f32 1.0, %v9495_v34  ;;  %v13211_v20 = vadd.f32 %v4271_v53, %v13044_v45  ;;  %v4273_v1 = vpop.f32.mrb[165].mxu1 }
 0x8e2   : > { %v9499_v0 = vpop.eup %9498  ;;  %v4432_v14 = vadd.f32 1.0, %v9497_v54  ;;  %v13214_v6 = vadd.f32 %v4273_v1, %v13048_v47  ;;  %v4275_v11 = vpop.f32.mrb[166].mxu1  ;;  %v4466_v23 = vmul.f32 %v4430_v42, %v4322_v26  ;;  %v4327_v54 = vmul.f32 0.5, %v4264_v19 }
 0x8e3   : > { %v4467_v35 = vmul.f32 %v4431_v4, %v4323_v56  ;;  %v4433_v21 = vadd.f32 1.0, %v9499_v0  ;;  %v4366_v33 = vmul.f32 0.70710677, %v13211_v20  ;;  %v4277_v61 = vpop.f32.mrb[167].mxu1  ;;  %v13219_v58 = vadd.f32 %v4275_v11, %v13044_v45 }
 0x8e4   : > { %v4468_v34 = vmul.f32 %v4432_v14, %v4324_v50  ;;  %v4367_v53 = vmul.f32 0.70710677, %v13214_v6  ;;  %v13225_v32 = vadd.f32 %v4277_v61, %v13048_v47  ;;  %v13235_v37 = vadd.f32 %v4466_v23, %v12900_v17 }
 0x8e5   : > { %v4469_v22 = vmul.f32 %v4433_v21, %v4325_v44  ;;  %9508 = verf.f32 %v4366_v33  ;;  %v13228_v56 = vadd.f32 %v4467_v35, %v12891_v49  ;;  %v4368_v44 = vmul.f32 0.70710677, %v13219_v58 }
 0x8e6   : > { %v13222_v51 = vadd.f32 %v4468_v34, %v12885_v60  ;;  %9510 = verf.f32 %v4367_v53  ;;  %16435 = vst [vmem:[#allocation55_spill] sm:$0xff] %v13235_v37  ;;  %v4328_v19 = vmul.f32 0.5, %v4266_v36  ;;  %v4369_v42 = vmul.f32 0.70710677, %v13225_v32 }
 0x8e7   : > { %v9501_v0 = vpop.eup %9500  ;;  %16433 = vst [vmem:[#allocation53_spill] sm:$0xff] %v13228_v56  ;;  %v13231_v26 = vadd.f32 %v4469_v22, %v12894_v9  ;;  %9512 = verf.f32 %v4368_v44  ;;  %v4329_v33 = vmul.f32 0.5, %v4268_v24 }
 0x8e8   : > { %16432 = vst [vmem:[#allocation54_spill] sm:$0xff] %v13222_v51  ;;  %v9503_v11 = vpop.eup %9502  ;;  %v4434_v60 = vadd.f32 1.0, %v9501_v0  ;;  %9514 = verf.f32 %v4369_v42  ;;  %v13250_v35 = vpack.c.bf16 %v13222_v51, %v13235_v37 }
 0x8e9   : > { %16434 = vst [vmem:[#allocation56_spill] sm:$0xff] %v13231_v26  ;;  %v4281_v61 = vpop.f32.mrb[168].mxu1  ;;  %v9505_v4 = vpop.eup %9504  ;;  %v4435_v1 = vadd.f32 1.0, %v9503_v11  ;;  %v13243_v22 = vpack.c.bf16 %v13231_v26, %v13228_v56 }
 0x8ea   : > { %v13239_v49 = vadd.f32 %v4281_v61, %v13044_v45  ;;  %v4283_v9 = vpop.f32.mrb[169].mxu1  ;;  %v9507_v50 = vpop.eup %9506  ;;  %v4436_v14 = vadd.f32 1.0, %v9505_v4  ;;  %v4470_v53 = vmul.f32 %v4434_v60, %v4326_v31 }
 0x8eb   : > { %v13246_v17 = vadd.f32 %v4283_v9, %v13048_v47  ;;  %v4285_v36 = vpop.f32.mrb[170].mxu1  ;;  %v4471_v21 = vmul.f32 %v4435_v1, %v4327_v54  ;;  %v4437_v23 = vadd.f32 1.0, %v9507_v50  ;;  %8513 = vmatprep.mubr.msk.bf16.mxu0 %vm16436_vm15, %v13243_v22  ;;  %vm16450_vm15 = vmmov %vm16386_vm10 }
 0x8ec   : > { %v4287_v34 = vpop.f32.mrb[171].mxu1  ;;  %v4472_v0 = vmul.f32 %v4436_v14, %v4328_v19  ;;  %v4370_v44 = vmul.f32 0.70710677, %v13239_v49  ;;  %4762 = vmatmul.mubr.bf16.gmra.mrb[192].mxu0 %v13250_v35  ;;  %v4286_v61 = vadd.f32 %v4285_v36, %v13044_v45  ;;  %v13269_v1 = vadd.f32 %v4470_v53, %v12933_v25 }
 0x8ed   : > { %v4371_v11 = vmul.f32 0.70710677, %v13246_v17  ;;  %v4473_v42 = vmul.f32 %v4437_v23, %v4329_v33  ;;  %v4288_v24 = vadd.f32 %v4287_v34, %v13048_v47  ;;  %v13263_v54 = vadd.f32 %v4471_v21, %v12924_v18 }
 0x8ee   : > { %v13259_v4 = vadd.f32 %v4472_v0, %v12918_v8  ;;  %v4372_v60 = vmul.f32 0.70710677, %v4286_v61  ;;  %16440 = vst [vmem:[#allocation59_spill] sm:$0xff] %v13269_v1 }
 0x8ef   : > { %9516 = verf.f32 %v4371_v11  ;;  %16438 = vst [vmem:[#allocation57_spill] sm:$0xff] %v13263_v54  ;;  %v13266_v31 = vadd.f32 %v4473_v42, %v12927_v3  ;;  %v9509_v19 = vpop.eup %9508  ;;  %v4373_v9 = vmul.f32 0.70710677, %v4288_v24 }
 0x8f0   : > { %16437 = vst [vmem:[#allocation58_spill] sm:$0xff] %v13259_v4  ;;  %9518 = verf.f32 %v4370_v44  ;;  %v9511_v14 = vpop.eup %9510  ;;  %v13283_v25 = vpack.c.bf16 %v13259_v4, %v13269_v1  ;;  %v4438_v23 = vadd.f32 1.0, %v9509_v19  ;;  %v4332_v19 = vmul.f32 0.5, %v13219_v58 }
 0x8f1   : > { %16439 = vst [vmem:[#allocation60_spill] sm:$0xff] %v13266_v31  ;;  %v4291_v50 = vpop.f32.mrb[172].mxu1  ;;  %9520 = verf.f32 %v4372_v60  ;;  %v13276_v18 = vpack.c.bf16 %v13266_v31, %v13263_v54  ;;  %v9513_v33 = vpop.eup %9512  ;;  %v4439_v11 = vadd.f32 1.0, %v9511_v14 }
 0x8f2   : > { %v13272_v8 = vadd.f32 %v4291_v50, %v13044_v45  ;;  %v4293_v36 = vpop.f32.mrb[173].mxu1  ;;  %9522 = verf.f32 %v4373_v9  ;;  %v9515_v44 = vpop.eup %9514  ;;  %v4440_v42 = vadd.f32 1.0, %v9513_v33  ;;  %v4330_v9 = vmul.f32 0.5, %v13211_v20 }
 0x8f3   : > { %v13279_v3 = vadd.f32 %v4293_v36, %v13048_v47  ;;  %v4295_v21 = vpop.f32.mrb[174].mxu1  ;;  %8514 = vmatprep.mubr.msk.bf16.mxu0 %vm16441_vm14, %v13276_v18  ;;  %v4333_v50 = vmul.f32 0.5, %v13225_v32  ;;  %v4441_v36 = vadd.f32 1.0, %v9515_v44  ;;  %vm16455_vm14 = vmmov %vm16386_vm10 }
 0x8f4   : > { %v4374_v34 = vmul.f32 0.70710677, %v13272_v8  ;;  %v13287_v53 = vadd.f32 %v4295_v21, %v13044_v45  ;;  %v4297_v0 = vpop.f32.mrb[175].mxu1  ;;  %4772 = vmatmul.mubr.bf16.gmra.mrb[196].mxu0 %v13283_v25  ;;  %v4331_v21 = vmul.f32 0.5, %v13214_v6  ;;  %v4474_v14 = vmul.f32 %v4438_v23, %v4330_v9 }
 0x8f5   : > { %v4375_v60 = vmul.f32 0.70710677, %v13279_v3  ;;  %v13299_v4 = vadd.f32 %v4297_v0, %v13048_v47  ;;  %v4476_v33 = vmul.f32 %v4440_v42, %v4332_v19  ;;  %v4477_v54 = vmul.f32 %v4441_v36, %v4333_v50 }
 0x8f6   : > { %v4376_v31 = vmul.f32 0.70710677, %v13287_v53  ;;  %v4475_v26 = vmul.f32 %v4439_v11, %v4331_v21  ;;  %v4335_v23 = vmul.f32 0.5, %v13246_v17  ;;  %v4336_v0 = vmul.f32 0.5, %v4286_v61 }
 0x8f7   : > { %9524 = verf.f32 %v4375_v60  ;;  %v4377_v32 = vmul.f32 0.70710677, %v13299_v4  ;;  %v13306_v51 = vadd.f32 %v4477_v54, %v12957_v15  ;;  %v13316_v42 = vadd.f32 %v4476_v33, %v12951_v55 }
 0x8f8   : > { %9526 = verf.f32 %v4374_v34  ;;  %v4337_v9 = vmul.f32 0.5, %v4288_v24  ;;  %v13319_v15 = vadd.f32 %v4475_v26, %v12954_v7  ;;  %v4334_v55 = vmul.f32 0.5, %v13239_v49 }
 0x8f9   : > { %v9517_v1 = vpop.eup %9516  ;;  %9528 = verf.f32 %v4376_v31  ;;  %v4301_v20 = vpop.f32.mrb[176].mxu1  ;;  %16442 = vst [vmem:[#allocation62_spill] sm:$0xff] %v13306_v51  ;;  %16444 = vst [vmem:[#allocation64_spill] sm:$0xff] %v13316_v42 }
 0x8fa   : > { %v4443_v58 = vadd.f32 1.0, %v9517_v1  ;;  %v13303_v44 = vadd.f32 %v4301_v20, %v13044_v45  ;;  %v4303_v6 = vpop.f32.mrb[177].mxu1  ;;  %v9519_v60 = vpop.eup %9518  ;;  %v13313_v1 = vadd.f32 %v4474_v14, %v12960_v27  ;;  %9530 = verf.f32 %v4377_v32  ;;  %16445 = vst [vmem:[#allocation63_spill] sm:$0xff] %v13319_v15 }
 0x8fb   : > { %v13310_v34 = vadd.f32 %v4303_v6, %v13048_v47  ;;  %v4305_v11 = vpop.f32.mrb[178].mxu1  ;;  %v9521_v31 = vpop.eup %9520  ;;  %v4442_v36 = vadd.f32 1.0, %v9519_v60  ;;  %v13328_v14 = vpack.c.bf16 %v13306_v51, %v13319_v15 }
 0x8fc   : > { %16443 = vst [vmem:[#allocation61_spill] sm:$0xff] %v13313_v1  ;;  %v4307_v19 = vpop.f32.mrb[179].mxu1  ;;  %v9523_v50 = vpop.eup %9522  ;;  %v4444_v17 = vadd.f32 1.0, %v9521_v31  ;;  %v4378_v61 = vmul.f32 0.70710677, %v13303_v44  ;;  %v4479_v21 = vmul.f32 %v4443_v58, %v4335_v23  ;;  %v4306_v27 = vadd.f32 %v4305_v11, %v13044_v45 }
 0x8fd   : > { %v4379_v54 = vmul.f32 0.70710677, %v13310_v34  ;;  %v4445_v20 = vadd.f32 1.0, %v9523_v50  ;;  %v4308_v24 = vadd.f32 %v4307_v19, %v13048_v47  ;;  %v13332_v32 = vpack.c.bf16 %v13316_v42, %v13313_v1  ;;  %8515 = vmatprep.mubr.msk.bf16.mxu0 %vm16386_vm10, %v13328_v14 }
 0x8fe   : > { %v4480_v7 = vmul.f32 %v4444_v17, %v4336_v0  ;;  %v4380_v33 = vmul.f32 0.70710677, %v4306_v27  ;;  %v4478_v49 = vmul.f32 %v4442_v36, %v4334_v55  ;;  %v13337_v47 = vadd.f32 %v4479_v21, %v12987_v59 }
 0x8ff   : > { %9532 = verf.f32 %v4379_v54  ;;  %v4481_v26 = vmul.f32 %v4445_v20, %v4337_v9  ;;  %v4381_v6 = vmul.f32 0.70710677, %v4308_v24  ;;  %4782 = vmatmul.mubr.bf16.gmra.mrb[200].mxu0 %v13332_v32  ;;  %v4339_v59 = vmul.f32 0.5, %v13279_v3 }
 0x900   : > { %9534 = verf.f32 %v4378_v61  ;;  %16446 = vst [vmem:[#allocation66_spill] sm:$0xff] %v13337_v47  ;;  %v13344_v11 = vadd.f32 %v4480_v7, %v12984_v62  ;;  %v4340_v17 = vmul.f32 0.5, %v13287_v53  ;;  %v4341_v62 = vmul.f32 0.5, %v13299_v4 }
 0x901   : > { %v9525_v58 = vpop.eup %9524  ;;  %v13340_v60 = vadd.f32 %v4481_v26, %v12990_v38  ;;  %9536 = verf.f32 %v4380_v33  ;;  %v13352_v38 = vadd.f32 %v4478_v49, %v12993_v63  ;;  %v4338_v36 = vmul.f32 0.5, %v13272_v8 }
 0x902   : > { %v9527_v45 = vpop.eup %9526  ;;  %v4447_v0 = vadd.f32 1.0, %v9525_v58  ;;  %9538 = verf.f32 %v4381_v6  ;;  %16448 = vst [vmem:[#allocation68_spill] sm:$0xff] %v13344_v11  ;;  %v4343_v58 = vmul.f32 0.5, %v13310_v34 }
 0x903   : > { %16447 = vst [vmem:[#allocation65_spill] sm:$0xff] %v13340_v60  ;;  %v9529_v23 = vpop.eup %9528  ;;  %v13348_v9 = vpack.c.bf16 %v13340_v60, %v13337_v47  ;;  %16449 = vst [vmem:[#allocation67_spill] sm:$0xff] %v13352_v38  ;;  %v4446_v50 = vadd.f32 1.0, %v9527_v45  ;;  %v13361_v3 = vpack.c.bf16 %v13344_v11, %v13352_v38  ;;  %v4344_v45 = vmul.f32 0.5, %v4306_v27 }
 0x904   : > { %v4448_v31 = vadd.f32 1.0, %v9529_v23  ;;  %v9531_v19 = vpop.eup %9530  ;;  %v4483_v61 = vmul.f32 %v4447_v0, %v4339_v59  ;;  %v4345_v23 = vmul.f32 0.5, %v4308_v24 }
 0x905   : > { %8516 = vmatprep.mubr.msk.bf16.mxu0 %vm16450_vm15, %v13348_v9  ;;  %v4449_v54 = vadd.f32 1.0, %v9531_v19  ;;  %v4482_v55 = vmul.f32 %v4446_v50, %v4338_v36  ;;  %vm16462_vm15 = vmmov %vm16386_vm10  ;;  %v8991_v36 = vld [vmem:[%s15576_s6 + $0x44] ss:$24 sps:$4 sm:$0xff]  }
 0x906   : > { %v4484_v21 = vmul.f32 %v4448_v31, %v4340_v17  ;;  %v13365_v26 = vadd.f32 %v4483_v61, %v13008_v10  ;;  %v16458_v17 = vld [vmem:[#allocation116_spill] sm:$0xff] }
 0x907   : > { %v4485_v63 = vmul.f32 %v4449_v54, %v4341_v62  ;;  %4792 = vmatmul.mubr.bf16.gmra.mrb[204].mxu0 %v13361_v3  ;;  %v13379_v10 = vadd.f32 %v4482_v55, %v13014_v40  ;;  %v16460_v62 = vld [vmem:[#allocation115_spill] sm:$0xff]  ;;  %v8997_v55 = vld [vmem:[%s15576_s6 + $0xa4] ss:$24 sps:$4 sm:$0xff]  }
 0x908   : > { %16451 = vst [vmem:[#allocation86_spill] sm:$0xff] %v13365_v26  ;;  %v13371_v8 = vadd.f32 %v4484_v21, %v13005_v52  ;;  %v4342_v52 = vmul.f32 0.5, %v13303_v44  ;;  %v8989_v21 = vld [vmem:[%s15576_s6 + $0x40] ss:$24 sps:$4 sm:$0xff]  }
 0x909   : > { %v9533_v20 = vpop.eup %9532  ;;  %v13368_v4 = vadd.f32 %v4485_v63, %v13011_v16  ;;  %16454 = vst [vmem:[#allocation90_spill] sm:$0xff] %v13379_v10  ;;  %v8992_v63 = vld [vmem:[%s15576_s6 + $0x70] ss:$24 sps:$4 sm:$0xff]  }
 0x90a   : > { %v4451_v7 = vadd.f32 1.0, %v9533_v20  ;;  %v9535_v53 = vpop.eup %9534  ;;  %16453 = vst [vmem:[#allocation88_spill] sm:$0xff] %v13371_v8  ;;  %v13386_v27 = vpack.c.bf16 %v13371_v8, %v13379_v10  ;;  %v8994_v20 = vld [vmem:[%s15576_s6 + $0x74] ss:$24 sps:$4 sm:$0xff]  }
 0x90b   : > { %16452 = vst [vmem:[#allocation89_spill] sm:$0xff] %v13368_v4  ;;  %v9537_v33 = vpop.eup %9536  ;;  %v13376_v0 = vpack.c.bf16 %v13368_v4, %v13365_v26  ;;  %v4450_v31 = vadd.f32 1.0, %v9535_v53  ;;  %v9000_v53 = vld [vmem:[%s15576_s6 + $0xd4] ss:$24 sps:$4 sm:$0xff]  }
 0x90c   : > { %v9539_v6 = vpop.eup %9538  ;;  %v4452_v49 = vadd.f32 1.0, %v9537_v33  ;;  %v4487_v16 = vmul.f32 %v4451_v7, %v4343_v58  ;;  %v8995_v7 = vld [vmem:[%s15576_s6 + $0xa0] ss:$24 sps:$4 sm:$0xff]   ;;  %v8998_v33 = vld [vmem:[%s15576_s6 + $0xd0] ss:$24 sps:$4 sm:$0xff]  }
 0x90d   : > { %v4453_v59 = vadd.f32 1.0, %v9539_v6  ;;  %8517 = vmatprep.mubr.msk.bf16.mxu0 %vm16455_vm14, %v13376_v0  ;;  %v4486_v24 = vmul.f32 %v4450_v31, %v4342_v52  ;;  %vm16463_vm14 = vmmov %vm16386_vm10  ;;  %v9003_v58 = vld [vmem:[%s15576_s6 + $0x104] ss:$24 sps:$4 sm:$0xff]   ;;  %v9001_v6 = vld [vmem:[%s15576_s6 + $0x100] ss:$24 sps:$4 sm:$0xff]  }
 0x90e   : > { %v4488_v34 = vmul.f32 %v4452_v49, %v4344_v45  ;;  %v13389_v50 = vadd.f32 %v4487_v16, %v13029_v48  ;;  %v9006_v45 = vld [vmem:[%s15576_s6 + $0x134] ss:$24 sps:$4 sm:$0xff]   ;;  %v9004_v49 = vld [vmem:[%s15576_s6 + $0x130] ss:$24 sps:$4 sm:$0xff]   ;;  %v9007_v31 = vld [vmem:[%s15576_s6 + $0x160] ss:$24 sps:$4 sm:$0xff]  }
 0x90f   : > { %v4489_v19 = vmul.f32 %v4453_v59, %v4345_v23  ;;  %4802 = vmatmul.mubr.bf16.gmra.mrb[208].mxu0 %v13386_v27  ;;  %v13403_v54 = vadd.f32 %v4486_v24, %v16460_v62  ;;  %v9009_v23 = vld [vmem:[%s15576_s6 + $0x164] ss:$24 sps:$4 sm:$0xff]   ;;  %v9012_v16 = vld [vmem:[%s15576_s6 + $0x194] ss:$24 sps:$4 sm:$0xff]   ;;  %v9010_v59 = vld [vmem:[%s15576_s6 + $0x190] ss:$24 sps:$4 sm:$0xff]  }
 0x910   : > { %16456 = vst [vmem:[#allocation96_spill] sm:$0xff] %v13389_v50  ;;  %v13396_v61 = vadd.f32 %v4488_v34, %v16458_v17  ;;  %v9015_v52 = vld [vmem:[%s15576_s6 + $0x1c4] ss:$24 sps:$4 sm:$0xff]   ;;  %v9013_v34 = vld [vmem:[%s15576_s6 + $0x1c0] ss:$24 sps:$4 sm:$0xff]  }
 0x911   : > { %v13392_v40 = vadd.f32 %v4489_v19, %v13032_v46  ;;  %16461 = vst [vmem:[#allocation98_spill] sm:$0xff] %v13403_v54  ;;  %v8986_v46 = vld [vmem:[%s15576_s6 + $0x10] ss:$24 sps:$4 sm:$0xff]   ;;  %v16466_v19 = vmov 0   ;;  %v16469_v24 = vld [vmem:[#allocation2_spill] sm:$0xff] }
 0x912   : > { %16459 = vst [vmem:[#allocation94_spill] sm:$0xff] %v13396_v61  ;;  %v13409_v48 = vpack.c.bf16 %v13396_v61, %v13403_v54  ;;  %v4566_v17 = vsub.s32 6, %v16469_v24  ;;  %v9854_v62 = vld [vmem:[%s15583_s13] sm:$0xff] }
 0x913   : > { %16457 = vst [vmem:[#allocation127_spill] sm:$0xff] %v13392_v40  ;;  %v13400_v44 = vpack.c.bf16 %v13392_v40, %v13389_v50 }
 0x915   : > { %8518 = vmatprep.mubr.msk.bf16.mxu0 %vm16386_vm10, %v13400_v44 }
 0x917   : > { %4812 = vmatmul.mubr.bf16.gmra.mrb[212].mxu0 %v13409_v48 }
 0x918   : > { %8593 = vmatprep.mubr.msk.bf16.mxu0 %vm16462_vm15, %v13085_v5  ;;  %vm16464_vm15 = vmmov %vm16386_vm10 }
 0x91f   : > { %5676 = vmatmul.mubr.bf16.vlgmr.msra.gmra.mrb[216].mxu0 %v13092_v43 }
 0x920   : > { %8594 = vmatprep.mubr.msk.bf16.mxu0 %vm16463_vm14, %v13120_v2  ;;  %5890 = vmatpush1.bf16.msra.mxu0 %v8986_v46  ;;  %vm16465_vm14 = vmmov %vm16386_vm10  ;;  %v13501_v46 = vrot.slane %v9854_v62, %v4566_v17 }
 0x921   : > { %5891 = vmatprep.subr.bf16.mxu0 %v8991_v36  ;;  %v9855_v36 = vld [vmem:[%s15583_s13 + $0x8] sm:$0xff] }
 0x924   : > { %5892 = vmatpush1.bf16.msra.mxu0 %v8989_v21  ;;  %v13508_v21 = vrot.slane %v9855_v36, %v4566_v17 }
 0x925   : > { %5893 = vmatprep.subr.bf16.mxu0 %v8994_v20 }
 0x927   : > { %5686 = vmatmul.mubr.bf16.gmra.mrb[220].mxu0 %v13127_v28 }
 0x928   : > { %8595 = vmatprep.mubr.msk.bf16.mxu0 %vm16386_vm10, %v13163_v13  ;;  %5894 = vmatpush1.bf16.msra.mxu0 %v8992_v63 }
 0x929   : > { %5895 = vmatprep.subr.bf16.mxu0 %v8997_v55 }
 0x92c   : > { %5896 = vmatpush1.bf16.msra.mxu0 %v8995_v7 }
 0x92d   : > { %5897 = vmatprep.subr.bf16.mxu0 %v9000_v53 }
 0x92f   : > { %5696 = vmatmul.mubr.bf16.gmra.mrb[224].mxu0 %v13167_v39 }
 0x930   : > { %8596 = vmatprep.mubr.msk.bf16.mxu0 %vm16464_vm15, %v13243_v22  ;;  %5898 = vmatpush1.bf16.msra.mxu0 %v8998_v33  ;;  %vm16467_vm15 = vmmov %vm16386_vm10 }
 0x931   : > { %5899 = vmatprep.subr.bf16.mxu0 %v9003_v58 }
 0x934   : > { %5900 = vmatpush1.bf16.msra.mxu0 %v9001_v6 }
 0x935   : > { %5901 = vmatprep.subr.bf16.mxu0 %v9006_v45 }
 0x937   : > { %5706 = vmatmul.mubr.bf16.gmra.mrb[228].mxu0 %v13250_v35 }
 0x938   : > { %8597 = vmatprep.mubr.msk.bf16.mxu0 %vm16465_vm14, %v13276_v18  ;;  %5902 = vmatpush1.bf16.msra.mxu0 %v9004_v49  ;;  %vm16468_vm14 = vmmov %vm16386_vm10 }
 0x939   : > { %5903 = vmatprep.subr.bf16.mxu0 %v9009_v23 }
 0x93c   : > { %5904 = vmatpush1.bf16.msra.mxu0 %v9007_v31 }
 0x93d   : > { %5905 = vmatprep.subr.bf16.mxu0 %v9012_v16 }
 0x93f   : > { %5716 = vmatmul.mubr.bf16.gmra.mrb[232].mxu0 %v13283_v25 }
 0x940   : > { %8598 = vmatprep.mubr.msk.bf16.mxu0 %vm16386_vm10, %v13328_v14  ;;  %5906 = vmatpush1.bf16.msra.mxu0 %v9010_v59 }
 0x941   : > { %5907 = vmatprep.subr.bf16.mxu0 %v9015_v52 }
 0x944   : > { %5908 = vmatpush1.bf16.msra.mxu0 %v9013_v34 }
 0x945   : > { %6585 = vmatprep.subr.bf16.mxu0 %v16466_v19 }
 0x947   : > { %5726 = vmatmul.mubr.bf16.gmra.mrb[236].mxu0 %v13332_v32 }
 0x948   : > { %8599 = vmatprep.mubr.msk.bf16.mxu0 %vm16467_vm15, %v13348_v9  ;;  %vm16470_vm15 = vmmov %vm16386_vm10 }
 0x94f   : > { %5736 = vmatmul.mubr.bf16.gmra.mrb[240].mxu0 %v13361_v3 }
 0x950   : > { %8600 = vmatprep.mubr.msk.bf16.mxu0 %vm16468_vm14, %v13376_v0  ;;  %vm16471_vm14 = vmmov %vm16386_vm10 }
 0x957   : > { %5746 = vmatmul.mubr.bf16.gmra.mrb[244].mxu0 %v13386_v27 }
 0x958   : > { %8601 = vmatprep.mubr.msk.bf16.mxu0 %vm16386_vm10, %v13400_v44 }
 0x95f   : > { %5756 = vmatmul.mubr.bf16.gmra.mrb[248].mxu0 %v13409_v48 }
 0x960   : > { %8611 = vmatprep.mubr.msk.bf16.mxu0 %vm16470_vm15, %v13085_v5  ;;  %vm16472_vm15 = vmmov %vm16386_vm10 }
 0x965   : > { %v4733_v20 = vpop.f32.mrb[180].mxu0 }
 0x966   : > { %v4734_v63 = vadd.f32 %v4733_v20, %v13501_v46  ;;  %v4735_v55 = vpop.f32.mrb[181].mxu0 }
 0x967   : > { %v4736_v7 = vadd.f32 %v4735_v55, %v13508_v21  ;;  %v4737_v53 = vpop.f32.mrb[182].mxu0  ;;  %5922 = vmatmul.mubr.bf16.vlgmr.msra.gmra.mrb[252].mxu0 %v13092_v43 }
 0x968   : > { %v4858_v33 = vmul.f32 0.70710677, %v4734_v63  ;;  %v4738_v58 = vadd.f32 %v4737_v53, %v13501_v46  ;;  %v4739_v6 = vpop.f32.mrb[183].mxu0  ;;  %8612 = vmatprep.mubr.msk.bf16.mxu0 %vm16471_vm14, %v13120_v2  ;;  %v4822_v24 = vmul.f32 0.5, %v4734_v63  ;;  %vm16473_vm14 = vmmov %vm16386_vm10 }
 0x969   : > { %v4859_v45 = vmul.f32 0.70710677, %v4736_v7  ;;  %v4740_v49 = vadd.f32 %v4739_v6, %v13508_v21  ;;  %v4823_v61 = vmul.f32 0.5, %v4736_v7 }
 0x96a   : > { %9540 = verf.f32 %v4858_v33  ;;  %v4860_v23 = vmul.f32 0.70710677, %v4738_v58  ;;  %v4824_v40 = vmul.f32 0.5, %v4738_v58 }
 0x96b   : > { %9542 = verf.f32 %v4859_v45  ;;  %v4861_v31 = vmul.f32 0.70710677, %v4740_v49  ;;  %v4825_v50 = vmul.f32 0.5, %v4740_v49 }
 0x96c   : > { %9544 = verf.f32 %v4860_v23 }
 0x96d   : > { %9546 = verf.f32 %v4861_v31  ;;  %v4743_v16 = vpop.f32.mrb[184].mxu0 }
 0x96e   : > { %v4744_v59 = vadd.f32 %v4743_v16, %v13501_v46  ;;  %v4745_v52 = vpop.f32.mrb[185].mxu0 }
 0x96f   : > { %v4746_v34 = vadd.f32 %v4745_v52, %v13508_v21  ;;  %v4747_v17 = vpop.f32.mrb[186].mxu0  ;;  %5932 = vmatmul.mubr.bf16.gmra.mrb[0].mxu0 %v13127_v28 }
 0x970   : > { %v4862_v62 = vmul.f32 0.70710677, %v4744_v59  ;;  %v4748_v36 = vadd.f32 %v4747_v17, %v13501_v46  ;;  %v4749_v20 = vpop.f32.mrb[187].mxu0  ;;  %8613 = vmatprep.mubr.msk.bf16.mxu0 %vm16386_vm10, %v13163_v13  ;;  %vm16475_vm10 = vcmask 130048  }
 0x971   : > { %v4863_v55 = vmul.f32 0.70710677, %v4746_v34  ;;  %v4750_v53 = vadd.f32 %v4749_v20, %v13508_v21 }
 0x972   : > { %9548 = verf.f32 %v4862_v62  ;;  %v4864_v33 = vmul.f32 0.70710677, %v4748_v36 }
 0x973   : > { %9550 = verf.f32 %v4863_v55  ;;  %v4865_v6 = vmul.f32 0.70710677, %v4750_v53 }
 0x974   : > { %v9541_v45 = vpop.eup %9540  ;;  %9552 = verf.f32 %v4864_v33 }
 0x975   : > { %v9543_v23 = vpop.eup %9542  ;;  %v4930_v31 = vadd.f32 1.0, %v9541_v45  ;;  %9554 = verf.f32 %v4865_v6  ;;  %v4753_v62 = vpop.f32.mrb[188].mxu0 }
 0x976   : > { %v9545_v16 = vpop.eup %9544  ;;  %v4931_v52 = vadd.f32 1.0, %v9543_v23  ;;  %v4754_v55 = vadd.f32 %v4753_v62, %v13501_v46  ;;  %v4755_v4 = vpop.f32.mrb[189].mxu0 }
 0x977   : > { %v9547_v17 = vpop.eup %9546  ;;  %v4932_v20 = vadd.f32 1.0, %v9545_v16  ;;  %v4966_v8 = vmul.f32 %v4930_v31, %v4822_v24  ;;  %v4756_v33 = vadd.f32 %v4755_v4, %v13508_v21  ;;  %v4757_v10 = vpop.f32.mrb[190].mxu0  ;;  %5942 = vmatmul.mubr.bf16.gmra.mrb[4].mxu0 %v13167_v39 }
 0x978   : > { %v4933_v54 = vadd.f32 1.0, %v9547_v17  ;;  %v4967_v45 = vmul.f32 %v4931_v52, %v4823_v61  ;;  %v4866_v60 = vmul.f32 0.70710677, %v4754_v55  ;;  %v4758_v63 = vadd.f32 %v4757_v10, %v13501_v46  ;;  %v4759_v58 = vpop.f32.mrb[191].mxu0  ;;  %8614 = vmatprep.mubr.msk.bf16.mxu0 %vm16472_vm15, %v13243_v22  ;;  %vm16476_vm15 = vmmov %vm16473_vm14 }
 0x979   : > { %v4968_v26 = vmul.f32 %v4932_v20, %v4824_v40  ;;  %v4867_v7 = vmul.f32 0.70710677, %v4756_v33  ;;  %v4760_v49 = vadd.f32 %v4759_v58, %v13508_v21  ;;  %v4827_v17 = vmul.f32 0.5, %v4746_v34 }
 0x97a   : > { %v4969_v6 = vmul.f32 %v4933_v54, %v4825_v50  ;;  %9556 = verf.f32 %v4866_v60  ;;  %v4868_v40 = vmul.f32 0.70710677, %v4758_v63  ;;  %v4829_v20 = vmul.f32 0.5, %v4750_v53 }
 0x97b   : > { %v5006_v23 = vpack.c.bf16 %v4968_v26, %v4966_v8  ;;  %9558 = verf.f32 %v4867_v7  ;;  %v4869_v50 = vmul.f32 0.70710677, %v4760_v49  ;;  %v4826_v26 = vmul.f32 0.5, %v4744_v59 }
 0x97c   : > { %v9549_v24 = vpop.eup %9548  ;;  %v5007_v4 = vpack.c.bf16 %v4969_v6, %v4967_v45  ;;  %9560 = verf.f32 %v4868_v40  ;;  %v4828_v8 = vmul.f32 0.5, %v4748_v36 }
 0x97d   : > { %v9551_v31 = vpop.eup %9550  ;;  %v4934_v61 = vadd.f32 1.0, %v9549_v24  ;;  %9562 = verf.f32 %v4869_v50 }
 0x97e   : > { %v9553_v54 = vpop.eup %9552  ;;  %v4935_v16 = vadd.f32 1.0, %v9551_v31  ;;  %5027 = vmatprep.subr.bf16.mxu1 %v5007_v4 }
 0x97f   : > { %v9555_v10 = vpop.eup %9554  ;;  %v4936_v52 = vadd.f32 1.0, %v9553_v54  ;;  %5028 = vmatpush1.bf16.msra.mxu1 %v5006_v23  ;;  %v4970_v60 = vmul.f32 %v4934_v61, %v4826_v26  ;;  %5952 = vmatmul.mubr.bf16.gmra.mrb[8].mxu0 %v13250_v35  ;;  %v9867_v23 = vmov 0.0   ;;  %v4830_v54 = vmul.f32 0.5, %v4754_v55 }
 0x980   : > { %v4937_v62 = vadd.f32 1.0, %v9555_v10  ;;  %v4971_v45 = vmul.f32 %v4935_v16, %v4827_v17  ;;  %8615 = vmatprep.mubr.msk.bf16.mxu0 %vm16473_vm14, %v13276_v18  ;;  %v5003_v53 = vsel %vm11456_vm1, 1.0, %v9867_v23  ;;  %v4832_v16 = vmul.f32 0.5, %v4758_v63 }
 0x981   : > { %v4972_v58 = vmul.f32 %v4936_v52, %v4828_v8  ;;  %v5005_v61 = vpack.c.bf16 %v5003_v53, %v5003_v53  ;;  %v4831_v26 = vmul.f32 0.5, %v4756_v33  ;;  %v4833_v8 = vmul.f32 0.5, %v4760_v49 }
 0x982   : > { %v4973_v6 = vmul.f32 %v4937_v62, %v4829_v20 }
 0x983   : > { %v5008_v7 = vpack.c.bf16 %v4972_v58, %v4970_v60  ;;  %8519 = vmatprep.mubr.msk.bf16.mxu1 %vm16475_vm10, %v5005_v61  ;;  %vm16477_vm10 = vmmov %vm16473_vm14 }
 0x984   : > { %v5009_v24 = vpack.c.bf16 %v4973_v6, %v4971_v45  ;;  %v9557_v40 = vpop.eup %9556  ;;  %vm16514_vm13 = vmmov %vm16477_vm10 }
 0x985   : > { %v9559_v59 = vpop.eup %9558  ;;  %v4938_v36 = vadd.f32 1.0, %v9557_v40  ;;  %vm16516_vm3 = vmmov %vm16477_vm10 }
 0x986   : > { %5029 = vmatprep.subr.bf16.mxu1 %v5009_v24  ;;  %v9561_v4 = vpop.eup %9560  ;;  %v4939_v31 = vadd.f32 1.0, %v9559_v59 }
 0x987   : > { %5030 = vmatpush1.bf16.msra.mxu1 %v5008_v7  ;;  %v9563_v50 = vpop.eup %9562  ;;  %v4940_v10 = vadd.f32 1.0, %v9561_v4  ;;  %5962 = vmatmul.mubr.bf16.gmra.mrb[12].mxu0 %v13283_v25  ;;  %v4974_v17 = vmul.f32 %v4938_v36, %v4830_v54 }
 0x988   : > { %v4941_v52 = vadd.f32 1.0, %v9563_v50  ;;  %8616 = vmatprep.mubr.msk.bf16.mxu0 %vm16476_vm15, %v13328_v14  ;;  %v4975_v62 = vmul.f32 %v4939_v31, %v4831_v26  ;;  %vm16478_vm15 = vmmov %vm16477_vm10 }
 0x989   : > { %v4976_v20 = vmul.f32 %v4940_v10, %v4832_v16 }
 0x98a   : > { %v4977_v60 = vmul.f32 %v4941_v52, %v4833_v8 }
 0x98b   : > { %v5010_v58 = vpack.c.bf16 %v4976_v20, %v4974_v17 }
 0x98c   : > { %v5011_v45 = vpack.c.bf16 %v4977_v60, %v4975_v62 }
 0x98e   : > { %5031 = vmatprep.subr.bf16.mxu1 %v5011_v45 }
 0x98f   : > { %5032 = vmatpush1.bf16.msra.mxu1 %v5010_v58  ;;  %5972 = vmatmul.mubr.bf16.gmra.mrb[16].mxu0 %v13332_v32 }
 0x990   : > { %8617 = vmatprep.mubr.msk.bf16.mxu0 %vm16473_vm14, %v13348_v9  ;;  %vm8520_vm14 = vmpackc.low %vm11462_vm2, %vm11462_vm2 }
 0x997   : > { %5982 = vmatmul.mubr.bf16.gmra.mrb[20].mxu0 %v13361_v3 }
 0x998   : > { %8618 = vmatprep.mubr.msk.bf16.mxu0 %vm16477_vm10, %v13376_v0 }
 0x99f   : > { %5992 = vmatmul.mubr.bf16.gmra.mrb[24].mxu0 %v13386_v27 }
 0x9a0   : > { %8619 = vmatprep.mubr.msk.bf16.mxu0 %vm16478_vm15, %v13400_v44  ;;  %vm16511_vm15 = vmmov %vm16477_vm10 }
 0x9a7   : > { %6002 = vmatmul.mubr.bf16.gmra.mrb[28].mxu0 %v13409_v48 }
 0x9bf   : > { %v4763_v55 = vpop.f32.mrb[192].mxu0 }
 0x9c0   : > { %v4764_v33 = vadd.f32 %v4763_v55, %v13501_v46  ;;  %v4765_v63 = vpop.f32.mrb[193].mxu0 }
 0x9c1   : > { %v4766_v49 = vadd.f32 %v4765_v63, %v13508_v21  ;;  %v4767_v6 = vpop.f32.mrb[194].mxu0 }
 0x9c2   : > { %v4870_v7 = vmul.f32 0.70710677, %v4764_v33  ;;  %v4768_v24 = vadd.f32 %v4767_v6, %v13501_v46  ;;  %v4769_v40 = vpop.f32.mrb[195].mxu0  ;;  %v4834_v6 = vmul.f32 0.5, %v4764_v33 }
 0x9c3   : > { %v4871_v59 = vmul.f32 0.70710677, %v4766_v49  ;;  %v4770_v36 = vadd.f32 %v4769_v40, %v13508_v21 }
 0x9c4   : > { %9564 = verf.f32 %v4870_v7  ;;  %v4872_v23 = vmul.f32 0.70710677, %v4768_v24  ;;  %v4836_v7 = vmul.f32 0.5, %v4768_v24 }
 0x9c5   : > { %9566 = verf.f32 %v4871_v59  ;;  %v4873_v53 = vmul.f32 0.70710677, %v4770_v36  ;;  %v4835_v59 = vmul.f32 0.5, %v4766_v49 }
 0x9c6   : > { %9568 = verf.f32 %v4872_v23  ;;  %v4837_v23 = vmul.f32 0.5, %v4770_v36 }
 0x9c7   : > { %9570 = verf.f32 %v4873_v53  ;;  %v4773_v4 = vpop.f32.mrb[196].mxu0 }
 0x9c8   : > { %v4774_v31 = vadd.f32 %v4773_v4, %v13501_v46  ;;  %v4775_v61 = vpop.f32.mrb[197].mxu0 }
 0x9c9   : > { %v4776_v50 = vadd.f32 %v4775_v61, %v13508_v21  ;;  %v4777_v54 = vpop.f32.mrb[198].mxu0 }
 0x9ca   : > { %v4874_v16 = vmul.f32 0.70710677, %v4774_v31  ;;  %v4778_v10 = vadd.f32 %v4777_v54, %v13501_v46  ;;  %v4779_v26 = vpop.f32.mrb[199].mxu0 }
 0x9cb   : > { %v4875_v8 = vmul.f32 0.70710677, %v4776_v50  ;;  %v4780_v52 = vadd.f32 %v4779_v26, %v13508_v21 }
 0x9cc   : > { %9572 = verf.f32 %v4874_v16  ;;  %v4876_v17 = vmul.f32 0.70710677, %v4778_v10 }
 0x9cd   : > { %9574 = verf.f32 %v4875_v8  ;;  %v4877_v20 = vmul.f32 0.70710677, %v4780_v52 }
 0x9ce   : > { %v9565_v62 = vpop.eup %9564  ;;  %9576 = verf.f32 %v4876_v17 }
 0x9cf   : > { %v9567_v60 = vpop.eup %9566  ;;  %v4942_v58 = vadd.f32 1.0, %v9565_v62  ;;  %9578 = verf.f32 %v4877_v20 }
 0x9d0   : > { %v9569_v45 = vpop.eup %9568  ;;  %v4943_v55 = vadd.f32 1.0, %v9567_v60 }
 0x9d1   : > { %v9571_v63 = vpop.eup %9570  ;;  %v4944_v40 = vadd.f32 1.0, %v9569_v45  ;;  %v4978_v4 = vmul.f32 %v4942_v58, %v4834_v6 }
 0x9d2   : > { %v4945_v53 = vadd.f32 1.0, %v9571_v63  ;;  %v4979_v54 = vmul.f32 %v4943_v55, %v4835_v59  ;;  %v4783_v26 = vpop.f32.mrb[200].mxu0  ;;  %v4838_v63 = vmul.f32 0.5, %v4774_v31  ;;  %v4839_v59 = vmul.f32 0.5, %v4776_v50 }
 0x9d3   : > { %v4980_v61 = vmul.f32 %v4944_v40, %v4836_v7  ;;  %v4784_v17 = vadd.f32 %v4783_v26, %v13501_v46  ;;  %v4785_v11 = vpop.f32.mrb[201].mxu0 }
 0x9d4   : > { %v4981_v16 = vmul.f32 %v4945_v53, %v4837_v23  ;;  %v4786_v20 = vadd.f32 %v4785_v11, %v13508_v21  ;;  %v4787_v60 = vpop.f32.mrb[202].mxu0  ;;  %v4840_v23 = vmul.f32 0.5, %v4778_v10  ;;  %v4841_v11 = vmul.f32 0.5, %v4780_v52 }
 0x9d5   : > { %v5012_v8 = vpack.c.bf16 %v4980_v61, %v4978_v4  ;;  %v4878_v45 = vmul.f32 0.70710677, %v4784_v17  ;;  %v4788_v49 = vadd.f32 %v4787_v60, %v13501_v46  ;;  %v4789_v36 = vpop.f32.mrb[203].mxu0 }
 0x9d6   : > { %v9573_v62 = vpop.eup %9572  ;;  %v5013_v47 = vpack.c.bf16 %v4981_v16, %v4979_v54  ;;  %v4879_v6 = vmul.f32 0.70710677, %v4786_v20  ;;  %v4790_v7 = vadd.f32 %v4789_v36, %v13508_v21 }
 0x9d7   : > { %v9575_v33 = vpop.eup %9574  ;;  %v4946_v24 = vadd.f32 1.0, %v9573_v62  ;;  %9580 = verf.f32 %v4878_v45  ;;  %v4880_v61 = vmul.f32 0.70710677, %v4788_v49 }
 0x9d8   : > { %v9577_v58 = vpop.eup %9576  ;;  %v4947_v55 = vadd.f32 1.0, %v9575_v33  ;;  %5033 = vmatprep.subr.bf16.mxu1 %v5013_v47  ;;  %9582 = verf.f32 %v4879_v6  ;;  %v4881_v26 = vmul.f32 0.70710677, %v4790_v7 }
 0x9d9   : > { %v9579_v40 = vpop.eup %9578  ;;  %v4948_v53 = vadd.f32 1.0, %v9577_v58  ;;  %5034 = vmatpush1.bf16.msra.mxu1 %v5012_v8  ;;  %v4982_v54 = vmul.f32 %v4946_v24, %v4838_v63  ;;  %9584 = verf.f32 %v4880_v61 }
 0x9da   : > { %v4949_v4 = vadd.f32 1.0, %v9579_v40  ;;  %v4983_v62 = vmul.f32 %v4947_v55, %v4839_v59  ;;  %v4793_v60 = vpop.f32.mrb[204].mxu0  ;;  %9586 = verf.f32 %v4881_v26 }
 0x9db   : > { %v4984_v16 = vmul.f32 %v4948_v53, %v4840_v23  ;;  %v4794_v47 = vadd.f32 %v4793_v60, %v13501_v46  ;;  %v4795_v50 = vpop.f32.mrb[205].mxu0  ;;  %v4843_v60 = vmul.f32 0.5, %v4786_v20 }
 0x9dc   : > { %v4985_v31 = vmul.f32 %v4949_v4, %v4841_v11  ;;  %v13564_v10 = vadd.f32 %v4795_v50, %v13508_v21  ;;  %v4797_v8 = vpop.f32.mrb[206].mxu0 }
 0x9dd   : > { %v5014_v33 = vpack.c.bf16 %v4984_v16, %v4982_v54  ;;  %v4882_v45 = vmul.f32 0.70710677, %v4794_v47  ;;  %v4798_v36 = vadd.f32 %v4797_v8, %v13501_v46  ;;  %v4799_v24 = vpop.f32.mrb[207].mxu0  ;;  %v4842_v54 = vmul.f32 0.5, %v4784_v17 }
 0x9de   : > { %v5015_v52 = vpack.c.bf16 %v4985_v31, %v4983_v62  ;;  %v4883_v58 = vmul.f32 0.70710677, %v13564_v10  ;;  %v4800_v63 = vadd.f32 %v4799_v24, %v13508_v21 }
 0x9df   : > { %9588 = verf.f32 %v4882_v45  ;;  %v4884_v55 = vmul.f32 0.70710677, %v4798_v36  ;;  %v4845_v45 = vmul.f32 0.5, %v4790_v7 }
 0x9e0   : > { %5035 = vmatprep.subr.bf16.mxu1 %v5015_v52  ;;  %9590 = verf.f32 %v4883_v58  ;;  %v4885_v6 = vmul.f32 0.70710677, %v4800_v63 }
 0x9e1   : > { %5036 = vmatpush1.bf16.msra.mxu1 %v5014_v33  ;;  %v9581_v40 = vpop.eup %9580  ;;  %9592 = verf.f32 %v4884_v55  ;;  %v4844_v33 = vmul.f32 0.5, %v4788_v49 }
 0x9e2   : > { %v9583_v59 = vpop.eup %9582  ;;  %9594 = verf.f32 %v4885_v6  ;;  %v4803_v23 = vpop.f32.mrb[208].mxu0  ;;  %v4950_v53 = vadd.f32 1.0, %v9581_v40 }
 0x9e3   : > { %v13570_v11 = vadd.f32 %v4803_v23, %v13501_v46  ;;  %v4805_v4 = vpop.f32.mrb[209].mxu0  ;;  %v9585_v61 = vpop.eup %9584  ;;  %v4951_v16 = vadd.f32 1.0, %v9583_v59 }
 0x9e4   : > { %v13573_v26 = vadd.f32 %v4805_v4, %v13508_v21  ;;  %v4807_v62 = vpop.f32.mrb[210].mxu0  ;;  %v9587_v31 = vpop.eup %9586  ;;  %v4952_v50 = vadd.f32 1.0, %v9585_v61  ;;  %v4986_v17 = vmul.f32 %v4950_v53, %v4842_v54 }
 0x9e5   : > { %v4886_v8 = vmul.f32 0.70710677, %v13570_v11  ;;  %v4809_v52 = vpop.f32.mrb[211].mxu0  ;;  %v4953_v24 = vadd.f32 1.0, %v9587_v31  ;;  %v13578_v55 = vadd.f32 %v4807_v62, %v13501_v46  ;;  %v4987_v59 = vmul.f32 %v4951_v16, %v4843_v60 }
 0x9e6   : > { %v4887_v58 = vmul.f32 0.70710677, %v13573_v26  ;;  %v4988_v6 = vmul.f32 %v4952_v50, %v4844_v33  ;;  %v13581_v40 = vadd.f32 %v4809_v52, %v13508_v21  ;;  %v4846_v50 = vmul.f32 0.5, %v4794_v47 }
 0x9e7   : > { %9596 = verf.f32 %v4886_v8  ;;  %v4989_v20 = vmul.f32 %v4953_v24, %v4845_v45  ;;  %v4888_v49 = vmul.f32 0.70710677, %v13578_v55  ;;  %v4848_v8 = vmul.f32 0.5, %v4798_v36  ;;  %v13598_v36 = vld [vmem:[%s15577_s7] sm:$0x3f] }
 0x9e8   : > { %9598 = verf.f32 %v4887_v58  ;;  %v5016_v4 = vpack.c.bf16 %v4988_v6, %v4986_v17  ;;  %v4889_v7 = vmul.f32 0.70710677, %v13581_v40  ;;  %v4847_v58 = vmul.f32 0.5, %v13564_v10 }
 0x9e9   : > { %v9589_v23 = vpop.eup %9588  ;;  %9600 = verf.f32 %v4888_v49  ;;  %v5017_v38 = vpack.c.bf16 %v4989_v20, %v4987_v59  ;;  %v4849_v17 = vmul.f32 0.5, %v4800_v63 }
 0x9ea   : > { %v9591_v61 = vpop.eup %9590  ;;  %v4954_v31 = vadd.f32 1.0, %v9589_v23  ;;  %v4813_v62 = vpop.f32.mrb[212].mxu0  ;;  %9602 = verf.f32 %v4889_v7 }
 0x9eb   : > { %v9593_v53 = vpop.eup %9592  ;;  %v4955_v54 = vadd.f32 1.0, %v9591_v61  ;;  %v13586_v33 = vadd.f32 %v4813_v62, %v13501_v46  ;;  %v4815_v16 = vpop.f32.mrb[213].mxu0  ;;  %5037 = vmatprep.subr.bf16.mxu1 %v5017_v38 }
 0x9ec   : > { %v9595_v60 = vpop.eup %9594  ;;  %v4956_v52 = vadd.f32 1.0, %v9593_v53  ;;  %v13589_v45 = vadd.f32 %v4815_v16, %v13508_v21  ;;  %v4817_v24 = vpop.f32.mrb[214].mxu0  ;;  %5038 = vmatpush1.bf16.msra.mxu1 %v5016_v4  ;;  %v4990_v49 = vmul.f32 %v4954_v31, %v4846_v50  ;;  %v16479_v53 = vld [vmem:[#allocation3_spill] sm:$0xff] }
 0x9ed   : > { %v4957_v6 = vadd.f32 1.0, %v9595_v60  ;;  %v4890_v59 = vmul.f32 0.70710677, %v13586_v33  ;;  %v4819_v20 = vpop.f32.mrb[215].mxu0  ;;  %v4818_v47 = vadd.f32 %v4817_v24, %v13501_v46  ;;  %v4991_v38 = vmul.f32 %v4955_v54, %v4847_v58 }
 0x9ee   : > { %v4992_v23 = vmul.f32 %v4956_v52, %v4848_v8  ;;  %v4891_v7 = vmul.f32 0.70710677, %v13589_v45  ;;  %v4820_v10 = vadd.f32 %v4819_v20, %v13508_v21  ;;  %v13603_v16 = vrot.slane %v13598_v36, %v16479_v53  ;;  %v16480_v8 = vld [vmem:[#allocation4_spill] sm:$0xff] }
 0x9ef   : > { %v4993_v61 = vmul.f32 %v4957_v6, %v4849_v17  ;;  %9604 = verf.f32 %v4890_v59  ;;  %v4892_v4 = vmul.f32 0.70710677, %v4818_v47  ;;  %v13607_v54 = vrot.slane %v13598_v36, %v16480_v8 }
 0x9f0   : > { %v5018_v63 = vpack.c.bf16 %v4992_v23, %v4990_v49  ;;  %9606 = verf.f32 %v4891_v7  ;;  %v4893_v31 = vmul.f32 0.70710677, %v4820_v10  ;;  %v4850_v58 = vmul.f32 0.5, %v13570_v11 }
 0x9f1   : > { %v9597_v62 = vpop.eup %9596  ;;  %v5019_v46 = vpack.c.bf16 %v4993_v61, %v4991_v38  ;;  %9608 = verf.f32 %v4892_v4  ;;  %v4851_v17 = vmul.f32 0.5, %v13573_v26  ;;  %v4852_v49 = vmul.f32 0.5, %v13578_v55 }
 0x9f2   : > { %v9599_v60 = vpop.eup %9598  ;;  %v5677_v50 = vpop.f32.mrb[216].mxu0  ;;  %v4958_v52 = vadd.f32 1.0, %v9597_v62  ;;  %9610 = verf.f32 %v4893_v31  ;;  %v4853_v4 = vmul.f32 0.5, %v13581_v40 }
 0x9f3   : > { %5039 = vmatprep.subr.bf16.mxu1 %v5019_v46  ;;  %v5679_v21 = vpop.f32.mrb[217].mxu0  ;;  %v9601_v24 = vpop.eup %9600  ;;  %v4959_v6 = vadd.f32 1.0, %v9599_v60  ;;  %v13613_v7 = vadd.f32 %v5677_v50, %v13603_v16 }
 0x9f4   : > { %5040 = vmatpush1.bf16.msra.mxu1 %v5018_v63  ;;  %v5681_v59 = vpop.f32.mrb[218].mxu0  ;;  %v9603_v20 = vpop.eup %9602  ;;  %v4960_v23 = vadd.f32 1.0, %v9601_v24  ;;  %v13620_v11 = vadd.f32 %v5679_v21, %v13607_v54  ;;  %v4994_v63 = vmul.f32 %v4958_v52, %v4850_v58  ;;  %v4855_v52 = vmul.f32 0.5, %v13589_v45 }
 0x9f5   : > { %v13616_v38 = vadd.f32 %v5681_v59, %v13603_v16  ;;  %v5683_v61 = vpop.f32.mrb[219].mxu0  ;;  %v4961_v62 = vadd.f32 1.0, %v9603_v20  ;;  %v4995_v46 = vmul.f32 %v4959_v6, %v4851_v17  ;;  %v4856_v6 = vmul.f32 0.5, %v4818_v47 }
 0x9f6   : > { %v13623_v26 = vadd.f32 %v5683_v61, %v13607_v54  ;;  %v4996_v31 = vmul.f32 %v4960_v23, %v4852_v49  ;;  %v4854_v61 = vmul.f32 0.5, %v13586_v33 }
 0x9f7   : > { %v4997_v60 = vmul.f32 %v4961_v62, %v4853_v4 }
 0x9f8   : > { %v5020_v24 = vpack.c.bf16 %v4996_v31, %v4994_v63  ;;  %v4857_v31 = vmul.f32 0.5, %v4820_v10 }
 0x9f9   : > { %v9605_v8 = vpop.eup %9604  ;;  %v5021_v20 = vpack.c.bf16 %v4997_v60, %v4995_v46 }
 0x9fa   : > { %v9607_v40 = vpop.eup %9606  ;;  %v5687_v59 = vpop.f32.mrb[220].mxu0  ;;  %v4962_v21 = vadd.f32 1.0, %v9605_v8 }
 0x9fb   : > { %v5689_v51 = vpop.f32.mrb[221].mxu0  ;;  %v9609_v42 = vpop.eup %9608  ;;  %v4963_v58 = vadd.f32 1.0, %v9607_v40  ;;  %5041 = vmatprep.subr.bf16.mxu1 %v5021_v20  ;;  %v13632_v4 = vadd.f32 %v5687_v59, %v13603_v16 }
 0x9fc   : > { %v5691_v49 = vpop.f32.mrb[222].mxu0  ;;  %v9611_v17 = vpop.eup %9610  ;;  %v4964_v23 = vadd.f32 1.0, %v9609_v42  ;;  %5042 = vmatpush1.bf16.msra.mxu1 %v5020_v24  ;;  %v13638_v33 = vadd.f32 %v5689_v51, %v13607_v54  ;;  %v4998_v60 = vmul.f32 %v4962_v21, %v4854_v61 }
 0x9fd   : > { %v13635_v62 = vadd.f32 %v5691_v49, %v13603_v16  ;;  %v5693_v63 = vpop.f32.mrb[223].mxu0  ;;  %v4965_v46 = vadd.f32 1.0, %v9611_v17  ;;  %v4999_v47 = vmul.f32 %v4963_v58, %v4855_v52  ;;  %v9016_v52 = vld [vmem:[%s15581_s11] sm:$0xff]  }
 0x9fe   : > { %v13641_v45 = vadd.f32 %v5693_v63, %v13607_v54  ;;  %v5000_v8 = vmul.f32 %v4964_v23, %v4856_v6 }
 0x9ff   : > { %v5001_v40 = vmul.f32 %v4965_v46, %v4857_v31  ;;  %v9868_v46 = vmov 1.0|1.0  }
 0xa00   : > { %v5022_v59 = vpack.c.bf16 %v5000_v8, %v4998_v60  ;;  %v9017_v60 = vld [vmem:[%s15581_s11 + $0x8] sm:$0xff]  }
 0xa01   : > { %v5023_v10 = vpack.c.bf16 %v5001_v40, %v4999_v47 }
 0xa02   : > { %v5697_v20 = vpop.f32.mrb[224].mxu0 }
 0xa03   : > { %v5699_v49 = vpop.f32.mrb[225].mxu0  ;;  %5043 = vmatprep.subr.bf16.mxu1 %v5023_v10  ;;  %v13648_v17 = vadd.f32 %v5697_v20, %v13603_v16 }
 0xa04   : > { %v5701_v51 = vpop.f32.mrb[226].mxu0  ;;  %5044 = vmatpush1.bf16.msra.mxu1 %v5022_v59  ;;  %v13660_v58 = vadd.f32 %v5699_v49, %v13607_v54  ;;  %v9018_v49 = vld [vmem:[%s15581_s11 + $0x10] sm:$0xff]  }
 0xa05   : > { %v13651_v21 = vadd.f32 %v5701_v51, %v13603_v16  ;;  %v5703_v61 = vpop.f32.mrb[227].mxu0  ;;  %5159 = vmatprep.subr.bf16.mxu1 %v16466_v19 }
 0xa06   : > { %v13663_v23 = vadd.f32 %v5703_v61, %v13607_v54 }
 0xa07   : > { %8521 = vmatmul.mubr.msk.bf16.vlgmr.msra.gmra.mrb[180].mxu1 %vm8520_vm14, %v9868_v46  ;;  %vm16512_vm14 = vmmov %vm16477_vm10 }
 0xa08   : > { %5160 = vmatpush1.bf16.msra.mxu1 %v9016_v52 }
 0xa09   : > { %5161 = vmatprep.subr.bf16.mxu1 %v16466_v19 }
 0xa0a   : > { %v5707_v8 = vpop.f32.mrb[228].mxu0 }
 0xa0b   : > { %v5709_v47 = vpop.f32.mrb[229].mxu0  ;;  %v13675_v59 = vadd.f32 %v5707_v8, %v13603_v16 }
 0xa0c   : > { %v5711_v40 = vpop.f32.mrb[230].mxu0  ;;  %5162 = vmatpush1.bf16.msra.mxu1 %v9017_v60  ;;  %v13684_v51 = vadd.f32 %v5709_v47, %v13607_v54  ;;  %v9019_v60 = vld [vmem:[%s15581_s11 + $0x18] sm:$0xff]  }
 0xa0d   : > { %v13678_v20 = vadd.f32 %v5711_v40, %v13603_v16  ;;  %v5713_v10 = vpop.f32.mrb[231].mxu0  ;;  %5163 = vmatprep.subr.bf16.mxu1 %v16466_v19 }
 0xa0e   : > { %v13687_v61 = vadd.f32 %v5713_v10, %v13607_v54 }
 0xa10   : > { %5164 = vmatpush1.bf16.msra.mxu1 %v9018_v49  ;;  %v9020_v49 = vld [vmem:[%s15581_s11 + $0x20] sm:$0xff]  }
 0xa11   : > { %5165 = vmatprep.subr.bf16.mxu1 %v16466_v19 }
 0xa12   : > { %v5717_v8 = vpop.f32.mrb[232].mxu0 }
 0xa13   : > { %v5719_v47 = vpop.f32.mrb[233].mxu0  ;;  %v13699_v10 = vadd.f32 %v5717_v8, %v13603_v16 }
 0xa14   : > { %v5721_v40 = vpop.f32.mrb[234].mxu0  ;;  %5166 = vmatpush1.bf16.msra.mxu1 %v9019_v60  ;;  %v13708_v46 = vadd.f32 %v5719_v47, %v13607_v54  ;;  %v9021_v60 = vld [vmem:[%s15581_s11 + $0x28] sm:$0xff]  }
 0xa15   : > { %v13702_v31 = vadd.f32 %v5721_v40, %v13603_v16  ;;  %v5723_v24 = vpop.f32.mrb[235].mxu0  ;;  %5167 = vmatprep.subr.bf16.mxu1 %v16466_v19 }
 0xa16   : > { %16482 = vst [vmem:[#allocation128_spill] sm:$0xff] %v13708_v46  ;;  %v13711_v50 = vadd.f32 %v5723_v24, %v13607_v54 }
 0xa18   : > { %5168 = vmatpush1.bf16.msra.mxu1 %v9020_v49  ;;  %v9022_v49 = vld [vmem:[%s15581_s11 + $0x30] sm:$0xff]  }
 0xa19   : > { %5169 = vmatprep.subr.bf16.mxu1 %v16466_v19 }
 0xa1a   : > { %v5727_v52 = vpop.f32.mrb[236].mxu0 }
 0xa1b   : > { %v5729_v47 = vpop.f32.mrb[237].mxu0  ;;  %v13723_v24 = vadd.f32 %v5727_v52, %v13603_v16 }
 0xa1c   : > { %v5731_v63 = vpop.f32.mrb[238].mxu0  ;;  %5170 = vmatpush1.bf16.msra.mxu1 %v9021_v60  ;;  %v13732_v40 = vadd.f32 %v5729_v47, %v13607_v54  ;;  %v9023_v60 = vld [vmem:[%s15581_s11 + $0x38] sm:$0xff]  }
 0xa1d   : > { %v13726_v42 = vadd.f32 %v5731_v63, %v13603_v16  ;;  %v5733_v8 = vpop.f32.mrb[239].mxu0  ;;  %5171 = vmatprep.subr.bf16.mxu1 %v16466_v19 }
 0xa1e   : > { %16483 = vst [vmem:[#allocation97_spill] sm:$0xff] %v13732_v40  ;;  %v13735_v55 = vadd.f32 %v5733_v8, %v13607_v54 }
 0xa20   : > { %16484 = vst [vmem:[#allocation130_spill] sm:$0xff] %v13735_v55  ;;  %5172 = vmatpush1.bf16.msra.mxu1 %v9022_v49  ;;  %v9024_v49 = vld [vmem:[%s15581_s11 + $0x40] sm:$0xff]  }
 0xa21   : > { %5173 = vmatprep.subr.bf16.mxu1 %v16466_v19 }
 0xa22   : > { %v5737_v15 = vpop.f32.mrb[240].mxu0 }
 0xa23   : > { %v5739_v47 = vpop.f32.mrb[241].mxu0  ;;  %v13747_v8 = vadd.f32 %v5737_v15, %v13603_v16 }
 0xa24   : > { %v5741_v1 = vpop.f32.mrb[242].mxu0  ;;  %5174 = vmatpush1.bf16.msra.mxu1 %v9023_v60  ;;  %v13756_v63 = vadd.f32 %v5739_v47, %v13607_v54 }
 0xa25   : > { %v13750_v56 = vadd.f32 %v5741_v1, %v13603_v16  ;;  %v5743_v52 = vpop.f32.mrb[243].mxu0  ;;  %5175 = vmatprep.subr.bf16.mxu1 %v16466_v19 }
 0xa26   : > { %16485 = vst [vmem:[#allocation129_spill] sm:$0xff] %v13756_v63  ;;  %v13759_v37 = vadd.f32 %v5743_v52, %v13607_v54 }
 0xa28   : > { %16486 = vst [vmem:[#allocation102_spill] sm:$0xff] %v13759_v37  ;;  %5176 = vmatpush1.bf16.msra.mxu1 %v9024_v49 }
 0xa29   : > { %5177 = vmatprep.subr.bf16.mxu1 %v16466_v19 }
 0xa2a   : > { %v5747_v60 = vpop.f32.mrb[244].mxu0 }
 0xa2b   : > { %v5749_v41 = vpop.f32.mrb[245].mxu0  ;;  %v13768_v47 = vadd.f32 %v5747_v60, %v13603_v16 }
 0xa2c   : > { %v5751_v57 = vpop.f32.mrb[246].mxu0  ;;  %v13774_v12 = vadd.f32 %v5749_v41, %v13607_v54 }
 0xa2d   : > { %v13771_v52 = vadd.f32 %v5751_v57, %v13603_v16  ;;  %v5753_v30 = vpop.f32.mrb[247].mxu0 }
 0xa2e   : > { %16487 = vst [vmem:[#allocation104_spill] sm:$0xff] %v13774_v12  ;;  %v13777_v15 = vadd.f32 %v5753_v30, %v13607_v54 }
 0xa30   : > { %16488 = vst [vmem:[#allocation132_spill] sm:$0xff] %v13777_v15  ;;  %v16492_v15 = vld [vmem:[#allocation50_spill] sm:$0xff] }
 0xa31   : > { %v13805_v37 = vrot.slane %v13598_v36, %v16492_v15 }
 0xa32   : > { %v5757_v29 = vpop.f32.mrb[248].mxu0 }
 0xa33   : > { %v13784_v60 = vadd.f32 %v5757_v29, %v13603_v16  ;;  %v5759_v6 = vpop.f32.mrb[249].mxu0  ;;  %v16491_v29 = vld [vmem:[#allocation49_spill] sm:$0xff] }
 0xa34   : > { %v13787_v57 = vadd.f32 %v5759_v6, %v13607_v54  ;;  %v5761_v34 = vpop.f32.mrb[250].mxu0  ;;  %v13801_v12 = vrot.slane %v13598_v36, %v16491_v29 }
 0xa35   : > { %v13790_v41 = vadd.f32 %v5761_v34, %v13603_v16  ;;  %v5763_v30 = vpop.f32.mrb[251].mxu0 }
 0xa36   : > { %16489 = vst [vmem:[#allocation106_spill] sm:$0xff] %v13787_v57  ;;  %v13793_v63 = vadd.f32 %v5763_v30, %v13607_v54 }
 0xa38   : > { %16490 = vst [vmem:[#allocation112_spill] sm:$0xff] %v13793_v63 }
 0xa3a   : > { %v5923_v6 = vpop.f32.mrb[252].mxu0 }
 0xa3b   : > { %v5925_v34 = vpop.f32.mrb[253].mxu0  ;;  %v5924_v54 = vadd.f32 %v5923_v6, %v13801_v12 }
 0xa3c   : > { %v5927_v16 = vpop.f32.mrb[254].mxu0  ;;  %v13810_v49 = vadd.f32 %v5925_v34, %v13805_v37 }
 0xa3d   : > { %v5928_v30 = vadd.f32 %v5927_v16, %v13801_v12  ;;  %v5929_v40 = vpop.f32.mrb[255].mxu0 }
 0xa3e   : > { %16493 = vst [vmem:[#allocation131_spill] sm:$0xff] %v13810_v49  ;;  %v13813_v1 = vadd.f32 %v5929_v40, %v13805_v37 }
 0xa3f   : > { %v6030_v29 = vpack.c.bf16 %v5928_v30, %v5924_v54 }
 0xa40   : > { %16494 = vst [vmem:[#allocation105_spill] sm:$0xff] %v13813_v1 }
 0xa41   : > { %6586 = vmatpush1.bf16.msra.mxu0 %v6030_v29 }
 0xa42   : > { %v5933_v15 = vpop.f32.mrb[0].mxu0  ;;  %6587 = vmatprep.subr.bf16.mxu0 %v16466_v19 }
 0xa43   : > { %v5935_v63 = vpop.f32.mrb[1].mxu0  ;;  %v5934_v6 = vadd.f32 %v5933_v15, %v13801_v12 }
 0xa44   : > { %v5937_v55 = vpop.f32.mrb[2].mxu0  ;;  %v13821_v34 = vadd.f32 %v5935_v63, %v13805_v37 }
 0xa45   : > { %v5938_v16 = vadd.f32 %v5937_v55, %v13801_v12  ;;  %v5939_v46 = vpop.f32.mrb[3].mxu0 }
 0xa46   : > { %16495 = vst [vmem:[#allocation114_spill] sm:$0xff] %v13821_v34  ;;  %v13824_v40 = vadd.f32 %v5939_v46, %v13805_v37 }
 0xa47   : > { %v6031_v54 = vpack.c.bf16 %v5938_v16, %v5934_v6 }
 0xa48   : > { %16496 = vst [vmem:[#allocation113_spill] sm:$0xff] %v13824_v40 }
 0xa49   : > { %6588 = vmatpush1.bf16.msra.mxu0 %v6031_v54 }
 0xa4a   : > { %v5943_v30 = vpop.f32.mrb[4].mxu0  ;;  %6589 = vmatprep.subr.bf16.mxu0 %v16466_v19 }
 0xa4b   : > { %v5945_v57 = vpop.f32.mrb[5].mxu0  ;;  %v5944_v15 = vadd.f32 %v5943_v30, %v13801_v12 }
 0xa4c   : > { %v5947_v49 = vpop.f32.mrb[6].mxu0  ;;  %v13832_v63 = vadd.f32 %v5945_v57, %v13805_v37 }
 0xa4d   : > { %v5948_v55 = vadd.f32 %v5947_v49, %v13801_v12  ;;  %v5949_v1 = vpop.f32.mrb[7].mxu0 }
 0xa4e   : > { %16497 = vst [vmem:[#allocation110_spill] sm:$0xff] %v13832_v63  ;;  %v13835_v46 = vadd.f32 %v5949_v1, %v13805_v37 }
 0xa4f   : > { %v6032_v6 = vpack.c.bf16 %v5948_v55, %v5944_v15  ;;  %v9028_v55 = vld [vmem:[%s15576_s6 + $0xc] ss:$24 sps:$4 sm:$0xff]  }
 0xa50   : > { %16498 = vst [vmem:[#allocation5_spill] sm:$0xff] %v13835_v46 }
 0xa51   : > { %6590 = vmatpush1.bf16.msra.mxu0 %v6032_v6 }
 0xa52   : > { %v5953_v54 = vpop.f32.mrb[8].mxu0  ;;  %6591 = vmatprep.subr.bf16.mxu0 %v16466_v19 }
 0xa53   : > { %v5955_v29 = vpop.f32.mrb[9].mxu0  ;;  %v5954_v30 = vadd.f32 %v5953_v54, %v13801_v12 }
 0xa54   : > { %v5957_v34 = vpop.f32.mrb[10].mxu0  ;;  %v13843_v57 = vadd.f32 %v5955_v29, %v13805_v37 }
 0xa55   : > { %v5958_v49 = vadd.f32 %v5957_v34, %v13801_v12  ;;  %v5959_v40 = vpop.f32.mrb[11].mxu0  ;;  %v9025_v34 = vld [vmem:[%s15581_s11 + $0x48] sm:$0xff]  }
 0xa56   : > { %16499 = vst [vmem:[#allocation7_spill] sm:$0xff] %v13843_v57  ;;  %v13846_v1 = vadd.f32 %v5959_v40, %v13805_v37  ;;  %5178 = vmatpush1.bf16.msra.mxu1 %v9025_v34 }
 0xa57   : > { %v6033_v15 = vpack.c.bf16 %v5958_v49, %v5954_v30  ;;  %5766 = vmatprep.subr.bf16.mxu1 %v9028_v55 }
 0xa58   : > { %16500 = vst [vmem:[#allocation8_spill] sm:$0xff] %v13846_v1 }
 0xa59   : > { %6592 = vmatpush1.bf16.msra.mxu0 %v6033_v15 }
 0xa5a   : > { %v5963_v6 = vpop.f32.mrb[12].mxu0  ;;  %6593 = vmatprep.subr.bf16.mxu0 %v16466_v19 }
 0xa5b   : > { %v5965_v16 = vpop.f32.mrb[13].mxu0  ;;  %v5964_v29 = vadd.f32 %v5963_v6, %v13801_v12 }
 0xa5c   : > { %v5967_v63 = vpop.f32.mrb[14].mxu0  ;;  %v13857_v30 = vadd.f32 %v5965_v16, %v13805_v37 }
 0xa5d   : > { %v5968_v54 = vadd.f32 %v5967_v63, %v13801_v12  ;;  %v5969_v40 = vpop.f32.mrb[15].mxu0 }
 0xa5e   : > { %16501 = vst [vmem:[#allocation6_spill] sm:$0xff] %v13857_v30  ;;  %v13860_v49 = vadd.f32 %v5969_v40, %v13805_v37 }
 0xa5f   : > { %v6034_v15 = vpack.c.bf16 %v5968_v54, %v5964_v29 }
 0xa60   : > { %16502 = vst [vmem:[#allocation9_spill] sm:$0xff] %v13860_v49 }
 0xa61   : > { %6594 = vmatpush1.bf16.msra.mxu0 %v6034_v15 }
 0xa62   : > { %v5973_v6 = vpop.f32.mrb[16].mxu0  ;;  %6595 = vmatprep.subr.bf16.mxu0 %v16466_v19 }
 0xa63   : > { %v5975_v63 = vpop.f32.mrb[17].mxu0  ;;  %v5974_v1 = vadd.f32 %v5973_v6, %v13801_v12 }
 0xa64   : > { %v5977_v16 = vpop.f32.mrb[18].mxu0  ;;  %v13871_v29 = vadd.f32 %v5975_v63, %v13805_v37 }
 0xa65   : > { %v5978_v40 = vadd.f32 %v5977_v16, %v13801_v12  ;;  %v5979_v34 = vpop.f32.mrb[19].mxu0 }
 0xa66   : > { %16503 = vst [vmem:[#allocation11_spill] sm:$0xff] %v13871_v29  ;;  %v13874_v54 = vadd.f32 %v5979_v34, %v13805_v37 }
 0xa67   : > { %v6035_v46 = vpack.c.bf16 %v5978_v40, %v5974_v1 }
 0xa68   : > { %16504 = vst [vmem:[#allocation12_spill] sm:$0xff] %v13874_v54 }
 0xa69   : > { %6596 = vmatpush1.bf16.msra.mxu0 %v6035_v46 }
 0xa6a   : > { %v5983_v15 = vpop.f32.mrb[20].mxu0  ;;  %6597 = vmatprep.subr.bf16.mxu0 %v16466_v19 }
 0xa6b   : > { %v5985_v57 = vpop.f32.mrb[21].mxu0  ;;  %v5984_v6 = vadd.f32 %v5983_v15, %v13801_v12 }
 0xa6c   : > { %v5987_v30 = vpop.f32.mrb[22].mxu0  ;;  %v13882_v63 = vadd.f32 %v5985_v57, %v13805_v37 }
 0xa6d   : > { %v5988_v16 = vadd.f32 %v5987_v30, %v13801_v12  ;;  %v5989_v49 = vpop.f32.mrb[23].mxu0 }
 0xa6e   : > { %16505 = vst [vmem:[#allocation10_spill] sm:$0xff] %v13882_v63  ;;  %v13885_v34 = vadd.f32 %v5989_v49, %v13805_v37 }
 0xa6f   : > { %v6036_v1 = vpack.c.bf16 %v5988_v16, %v5984_v6 }
 0xa70   : > { %16506 = vst [vmem:[#allocation13_spill] sm:$0xff] %v13885_v34 }
 0xa71   : > { %6598 = vmatpush1.bf16.msra.mxu0 %v6036_v1 }
 0xa72   : > { %v5993_v40 = vpop.f32.mrb[24].mxu0  ;;  %6599 = vmatprep.subr.bf16.mxu0 %v16466_v19 }
 0xa73   : > { %v5995_v55 = vpop.f32.mrb[25].mxu0  ;;  %v5994_v15 = vadd.f32 %v5993_v40, %v13801_v12 }
 0xa74   : > { %v5997_v29 = vpop.f32.mrb[26].mxu0  ;;  %v13893_v57 = vadd.f32 %v5995_v55, %v13805_v37 }
 0xa75   : > { %v5998_v30 = vadd.f32 %v5997_v29, %v13801_v12  ;;  %v5999_v54 = vpop.f32.mrb[27].mxu0 }
 0xa76   : > { %16507 = vst [vmem:[#allocation15_spill] sm:$0xff] %v13893_v57  ;;  %v13896_v49 = vadd.f32 %v5999_v54, %v13805_v37 }
 0xa77   : > { %v6037_v6 = vpack.c.bf16 %v5998_v30, %v5994_v15 }
 0xa78   : > { %16508 = vst [vmem:[#allocation16_spill] sm:$0xff] %v13896_v49 }
 0xa79   : > { %6600 = vmatpush1.bf16.msra.mxu0 %v6037_v6 }
 0xa7a   : > { %v6003_v1 = vpop.f32.mrb[28].mxu0  ;;  %6601 = vmatprep.subr.bf16.mxu0 %v16466_v19 }
 0xa7b   : > { %v6004_v46 = vadd.f32 %v6003_v1, %v13801_v12  ;;  %v6005_v40 = vpop.f32.mrb[29].mxu0 }
 0xa7c   : > { %v6007_v63 = vpop.f32.mrb[30].mxu0  ;;  %v13904_v55 = vadd.f32 %v6005_v40, %v13805_v37  ;;  %v9026_v40 = vld [vmem:[%s15576_s6 + $0x8] ss:$24 sps:$4 sm:$0xff]  }
 0xa7d   : > { %v6008_v29 = vadd.f32 %v6007_v63, %v13801_v12  ;;  %v6009_v34 = vpop.f32.mrb[31].mxu0 }
 0xa7e   : > { %16509 = vst [vmem:[#allocation14_spill] sm:$0xff] %v13904_v55  ;;  %v13907_v54 = vadd.f32 %v6009_v34, %v13805_v37  ;;  %v9031_v34 = vld [vmem:[%s15576_s6 + $0x3c] ss:$24 sps:$4 sm:$0xff]  }
 0xa7f   : > { %v6038_v15 = vpack.c.bf16 %v6008_v29, %v6004_v46  ;;  %v9029_v46 = vld [vmem:[%s15576_s6 + $0x38] ss:$24 sps:$4 sm:$0xff]   ;;  %v9040_v29 = vld [vmem:[%s15576_s6 + $0xcc] ss:$24 sps:$4 sm:$0xff]  }
 0xa80   : > { %16510 = vst [vmem:[#allocation17_spill] sm:$0xff] %v13907_v54  ;;  %v16599_v55 = vld [vmem:[#allocation92_spill] sm:$0xff] }
 0xa81   : > { %6602 = vmatpush1.bf16.msra.mxu0 %v6038_v15  ;;  %v9038_v15 = vld [vmem:[%s15576_s6 + $0xc8] ss:$24 sps:$4 sm:$0xff]  }
 0xa82   : > { %7263 = vmatprep.subr.bf16.mxu0 %v16466_v19 }
 0xada   : > { %v5061_v6 = vpop.f32.mrb[180].mxu1 }
 0xadb   : > { %v5068_v1 = vmul.f32 0.055555556, %v5061_v6  ;;  %v5063_v16 = vpop.f32.mrb[181].mxu1  ;;  %v9043_v6 = vld [vmem:[%s15576_s6 + $0xfc] ss:$24 sps:$4 sm:$0xff]  }
 0xadc   : > { %v5069_v57 = vmul.f32 0.055555556, %v5063_v16  ;;  %v5065_v49 = vpop.f32.mrb[182].mxu1  ;;  %v9037_v16 = vld [vmem:[%s15576_s6 + $0x9c] ss:$24 sps:$4 sm:$0xff]  }
 0xadd   : > { %v5066_v12 = vpop.f32.mrb[183].mxu1  ;;  %v5070_v37 = vpack.c.bf16 %v5068_v1, %v5068_v1  ;;  %v9032_v49 = vld [vmem:[%s15576_s6 + $0x68] ss:$24 sps:$4 sm:$0xff]   ;;  %v9041_v1 = vld [vmem:[%s15576_s6 + $0xf8] ss:$24 sps:$4 sm:$0xff]  }
 0xade   : > { %v5071_v63 = vpack.c.bf16 %v5069_v57, %v5069_v57  ;;  %v9034_v57 = vld [vmem:[%s15576_s6 + $0x6c] ss:$24 sps:$4 sm:$0xff]  }
 0xadf   : > { %v9046_v12 = vld [vmem:[%s15576_s6 + $0x12c] ss:$24 sps:$4 sm:$0xff]  }
 0xae0   : > { %8532 = vmatprep.mubr.msk.bf16.mxu1 %vm16477_vm10, %v5071_v63  ;;  %v9044_v63 = vld [vmem:[%s15576_s6 + $0x128] ss:$24 sps:$4 sm:$0xff]  }
 0xae1   : > { %5192 = vmatmul.mubr.bf16.vlgmr.msra.gmra.mrb[184].mxu1 %v5070_v37  ;;  %v9047_v37 = vld [vmem:[%s15576_s6 + $0x158] ss:$24 sps:$4 sm:$0xff]  }
 0xae2   : > { %5767 = vmatpush1.bf16.msra.mxu1 %v9026_v40  ;;  %8602 = vmatprep.mubr.msk.bf16.mxu1 %vm16511_vm15, %v13085_v5  ;;  %v9035_v5 = vld [vmem:[%s15576_s6 + $0x98] ss:$24 sps:$4 sm:$0xff]   ;;  %v9049_v40 = vld [vmem:[%s15576_s6 + $0x15c] ss:$24 sps:$4 sm:$0xff]   ;;  %vm16513_vm15 = vmmov %vm16477_vm10 }
 0xae3   : > { %5768 = vmatprep.subr.bf16.mxu1 %v9031_v34  ;;  %v9052_v34 = vld [vmem:[%s15576_s6 + $0x18c] ss:$24 sps:$4 sm:$0xff]  }
 0xae6   : > { %5769 = vmatpush1.bf16.msra.mxu1 %v9029_v46  ;;  %v9050_v46 = vld [vmem:[%s15576_s6 + $0x188] ss:$24 sps:$4 sm:$0xff]  }
 0xae7   : > { %5770 = vmatprep.subr.bf16.mxu1 %v9034_v57  ;;  %v9055_v57 = vld [vmem:[%s15576_s6 + $0x1bc] ss:$24 sps:$4 sm:$0xff]  }
 0xaea   : > { %5771 = vmatpush1.bf16.msra.mxu1 %v9032_v49  ;;  %v9053_v49 = vld [vmem:[%s15576_s6 + $0x1b8] ss:$24 sps:$4 sm:$0xff]  }
 0xaeb   : > { %5772 = vmatprep.subr.bf16.mxu1 %v9037_v16 }
 0xaee   : > { %5773 = vmatpush1.bf16.msra.mxu1 %v9035_v5 }
 0xaef   : > { %5774 = vmatprep.subr.bf16.mxu1 %v9040_v29 }
 0xaf2   : > { %5775 = vmatpush1.bf16.msra.mxu1 %v9038_v15 }
 0xaf3   : > { %5776 = vmatprep.subr.bf16.mxu1 %v9043_v6 }
 0xaf6   : > { %5777 = vmatpush1.bf16.msra.mxu1 %v9041_v1 }
 0xaf7   : > { %5778 = vmatprep.subr.bf16.mxu1 %v9046_v12 }
 0xafa   : > { %5779 = vmatpush1.bf16.msra.mxu1 %v9044_v63 }
 0xafb   : > { %5780 = vmatprep.subr.bf16.mxu1 %v9049_v40 }
 0xafe   : > { %5781 = vmatpush1.bf16.msra.mxu1 %v9047_v37 }
 0xaff   : > { %5782 = vmatprep.subr.bf16.mxu1 %v9052_v34 }
 0xb02   : > { %5783 = vmatpush1.bf16.msra.mxu1 %v9050_v46 }
 0xb03   : > { %5784 = vmatprep.subr.bf16.mxu1 %v9055_v57 }
 0xb06   : > { %5785 = vmatpush1.bf16.msra.mxu1 %v9053_v49 }
 0xb07   : > { %6039 = vmatprep.subr.bf16.mxu1 %v16466_v19 }
 0xb09   : > { %5799 = vmatmul.mubr.bf16.vlgmr.msra.gmra.mrb[188].mxu1 %v13092_v43  ;;  %v474_v43 = vld [vmem:[%s15583_s13 + $0x10] sm:$0xff] }
 0xb0a   : > { %8603 = vmatprep.mubr.msk.bf16.mxu1 %vm16512_vm14, %v13120_v2  ;;  %vm16515_vm14 = vmmov %vm16477_vm10  ;;  %v5095_v2 = vrot.slane %v474_v43, %v16479_v53 }
 0xb11   : > { %5809 = vmatmul.mubr.bf16.gmra.mrb[192].mxu1 %v13127_v28 }
 0xb12   : > { %8604 = vmatprep.mubr.msk.bf16.mxu1 %vm16477_vm10, %v13163_v13  ;;  %vm16517_vm10 = vmmov %vm16516_vm3 }
 0xb19   : > { %5819 = vmatmul.mubr.bf16.gmra.mrb[196].mxu1 %v13167_v39 }
 0xb1a   : > { %8605 = vmatprep.mubr.msk.bf16.mxu1 %vm16513_vm15, %v13243_v22  ;;  %vm16518_vm15 = vmmov %vm16516_vm3 }
 0xb21   : > { %5829 = vmatmul.mubr.bf16.gmra.mrb[200].mxu1 %v13250_v35 }
 0xb22   : > { %8606 = vmatprep.mubr.msk.bf16.mxu1 %vm16514_vm13, %v13276_v18  ;;  %v16519_v18 = vld [vmem:[#allocation41_spill] sm:$0xff] }
 0xb29   : > { %5839 = vmatmul.mubr.bf16.gmra.mrb[204].mxu1 %v13283_v25  ;;  %v14013_v25 = vrot.slane %v13598_v36, %v16519_v18 }
 0xb2a   : > { %8607 = vmatprep.mubr.msk.bf16.mxu1 %vm16515_vm14, %v13328_v14 }
 0xb31   : > { %5849 = vmatmul.mubr.bf16.gmra.mrb[208].mxu1 %v13332_v32  ;;  %v16520_v32 = vld [vmem:[#allocation42_spill] sm:$0xff] }
 0xb32   : > { %8608 = vmatprep.mubr.msk.bf16.mxu1 %vm16516_vm3, %v13348_v9  ;;  %v14017_v9 = vrot.slane %v13598_v36, %v16520_v32  ;;  %vm16552_vm3 = vcmask 130048  }
 0xb33   : > { %vm16555_vm13 = vmmov %vm16552_vm3 }
 0xb34   : > { %vm16558_vm14 = vmmov %vm16552_vm3 }
 0xb39   : > { %5859 = vmatmul.mubr.bf16.gmra.mrb[212].mxu1 %v13361_v3 }
 0xb3a   : > { %8609 = vmatprep.mubr.msk.bf16.mxu1 %vm16517_vm10, %v13376_v0  ;;  %vm16561_vm10 = vmmov %vm16552_vm3 }
 0xb41   : > { %5869 = vmatmul.mubr.bf16.gmra.mrb[216].mxu1 %v13386_v27 }
 0xb42   : > { %8610 = vmatprep.mubr.msk.bf16.mxu1 %vm16518_vm15, %v13400_v44 }
 0xb49   : > { %5879 = vmatmul.mubr.bf16.gmra.mrb[220].mxu1 %v13409_v48 }
 0xb4a   : > { %6071 = vmatprep.mubr.bf16.mxu1 %v16466_v19 }
 0xbb4   : > { %v5193_v28 = vpop.f32.mrb[184].mxu1 }
 0xbb5   : > { %v5194_v13 = vadd.f32 %v5193_v28, %v5095_v2  ;;  %v5195_v39 = vpop.f32.mrb[185].mxu1 }
 0xbb6   : > { %v5196_v22 = vpop.f32.mrb[186].mxu1 }
 0xbb7   : > { %8235 = vst [vmem:[%s14008_s16 + $0x30] sm:$0xff] %v5194_v13  ;;  %v5197_v35 = vpop.f32.mrb[187].mxu1 }
 0xbdc   : > { %v5800_v14 = vpop.f32.mrb[188].mxu1 }
 0xbdd   : > { %v5802_v3 = vpop.f32.mrb[189].mxu1  ;;  %v5801_v27 = vadd.f32 %v5800_v14, %v14013_v25 }
 0xbde   : > { %v5804_v0 = vpop.f32.mrb[190].mxu1  ;;  %v14022_v53 = vadd.f32 %v5802_v3, %v14017_v9 }
 0xbdf   : > { %v5805_v44 = vadd.f32 %v5804_v0, %v14013_v25  ;;  %v5806_v48 = vpop.f32.mrb[191].mxu1 }
 0xbe0   : > { %v14025_v16 = vadd.f32 %v5806_v48, %v14017_v9 }
 0xbe1   : > { %v6021_v5 = vpack.c.bf16 %v5805_v44, %v5801_v27 }
 0xbe2   : > { %v6699_v29 = vpack.c.bf16 %v14025_v16, %v14022_v53 }
 0xbe3   : > { %6040 = vmatpush1.bf16.xpose.msra.mxu1 %v6021_v5 }
 0xbe4   : > { %v5810_v36 = vpop.f32.mrb[192].mxu1  ;;  %6041 = vmatprep.subr.bf16.mxu1 %v16466_v19 }
 0xbe5   : > { %v5812_v15 = vpop.f32.mrb[193].mxu1  ;;  %v5811_v1 = vadd.f32 %v5810_v36, %v14013_v25 }
 0xbe6   : > { %v5814_v6 = vpop.f32.mrb[194].mxu1  ;;  %v14033_v40 = vadd.f32 %v5812_v15, %v14017_v9 }
 0xbe7   : > { %v5815_v12 = vadd.f32 %v5814_v6, %v14013_v25  ;;  %v5816_v63 = vpop.f32.mrb[195].mxu1 }
 0xbe8   : > { %v14036_v37 = vadd.f32 %v5816_v63, %v14017_v9 }
 0xbe9   : > { %v6022_v34 = vpack.c.bf16 %v5815_v12, %v5811_v1 }
 0xbea   : > { %v6700_v46 = vpack.c.bf16 %v14036_v37, %v14033_v40 }
 0xbeb   : > { %6042 = vmatpush1.bf16.xpose.msra.mxu1 %v6022_v34 }
 0xbec   : > { %v5820_v57 = vpop.f32.mrb[196].mxu1  ;;  %6043 = vmatprep.subr.bf16.mxu1 %v16466_v19 }
 0xbed   : > { %v5822_v49 = vpop.f32.mrb[197].mxu1  ;;  %v5821_v2 = vadd.f32 %v5820_v57, %v14013_v25 }
 0xbee   : > { %v5824_v43 = vpop.f32.mrb[198].mxu1  ;;  %v14044_v39 = vadd.f32 %v5822_v49, %v14017_v9 }
 0xbef   : > { %v5825_v28 = vadd.f32 %v5824_v43, %v14013_v25  ;;  %v5826_v13 = vpop.f32.mrb[199].mxu1 }
 0xbf0   : > { %v14047_v22 = vadd.f32 %v5826_v13, %v14017_v9 }
 0xbf1   : > { %v6023_v35 = vpack.c.bf16 %v5825_v28, %v5821_v2 }
 0xbf2   : > { %v6701_v18 = vpack.c.bf16 %v14047_v22, %v14044_v39 }
 0xbf3   : > { %6044 = vmatpush1.bf16.xpose.msra.mxu1 %v6023_v35 }
 0xbf4   : > { %v5830_v14 = vpop.f32.mrb[200].mxu1  ;;  %6045 = vmatprep.subr.bf16.mxu1 %v16466_v19 }
 0xbf5   : > { %v5832_v32 = vpop.f32.mrb[201].mxu1  ;;  %v5831_v0 = vadd.f32 %v5830_v14, %v14013_v25 }
 0xbf6   : > { %v5834_v3 = vpop.f32.mrb[202].mxu1  ;;  %v14055_v48 = vadd.f32 %v5832_v32, %v14017_v9 }
 0xbf7   : > { %v5835_v27 = vadd.f32 %v5834_v3, %v14013_v25  ;;  %v5836_v44 = vpop.f32.mrb[203].mxu1 }
 0xbf8   : > { %v14058_v5 = vadd.f32 %v5836_v44, %v14017_v9 }
 0xbf9   : > { %v6024_v36 = vpack.c.bf16 %v5835_v27, %v5831_v0 }
 0xbfb   : > { %6046 = vmatpush1.bf16.xpose.msra.mxu1 %v6024_v36 }
 0xbfc   : > { %v5840_v6 = vpop.f32.mrb[204].mxu1  ;;  %6047 = vmatprep.subr.bf16.mxu1 %v16466_v19 }
 0xbfd   : > { %v5842_v1 = vpop.f32.mrb[205].mxu1  ;;  %v5841_v63 = vadd.f32 %v5840_v6, %v14013_v25 }
 0xbfe   : > { %v5844_v12 = vpop.f32.mrb[206].mxu1  ;;  %v14066_v49 = vadd.f32 %v5842_v1, %v14017_v9 }
 0xbff   : > { %v5845_v34 = vadd.f32 %v5844_v12, %v14013_v25  ;;  %v5846_v57 = vpop.f32.mrb[207].mxu1 }
 0xc00   : > { %v14069_v43 = vadd.f32 %v5846_v57, %v14017_v9 }
 0xc01   : > { %v6025_v2 = vpack.c.bf16 %v5845_v34, %v5841_v63 }
 0xc03   : > { %6048 = vmatpush1.bf16.xpose.msra.mxu1 %v6025_v2 }
 0xc04   : > { %v5850_v13 = vpop.f32.mrb[208].mxu1  ;;  %6049 = vmatprep.subr.bf16.mxu1 %v16466_v19 }
 0xc05   : > { %v5852_v35 = vpop.f32.mrb[209].mxu1  ;;  %v5851_v32 = vadd.f32 %v5850_v13, %v14013_v25 }
 0xc06   : > { %v5854_v14 = vpop.f32.mrb[210].mxu1  ;;  %v14077_v27 = vadd.f32 %v5852_v35, %v14017_v9 }
 0xc07   : > { %v5855_v3 = vadd.f32 %v5854_v14, %v14013_v25  ;;  %v5856_v0 = vpop.f32.mrb[211].mxu1 }
 0xc08   : > { %v5857_v44 = vadd.f32 %v5856_v0, %v14017_v9 }
 0xc09   : > { %v6026_v36 = vpack.c.bf16 %v5855_v3, %v5851_v32 }
 0xc0a   : > { %v6704_v6 = vpack.c.bf16 %v5857_v44, %v14077_v27 }
 0xc0b   : > { %6050 = vmatpush1.bf16.xpose.msra.mxu1 %v6026_v36 }
 0xc0c   : > { %v5860_v1 = vpop.f32.mrb[212].mxu1  ;;  %6051 = vmatprep.subr.bf16.mxu1 %v16466_v19 }
 0xc0d   : > { %v5862_v12 = vpop.f32.mrb[213].mxu1  ;;  %v5861_v34 = vadd.f32 %v5860_v1, %v14013_v25 }
 0xc0e   : > { %v5864_v63 = vpop.f32.mrb[214].mxu1  ;;  %v5863_v13 = vadd.f32 %v5862_v12, %v14017_v9 }
 0xc0f   : > { %v5865_v57 = vadd.f32 %v5864_v63, %v14013_v25  ;;  %v5866_v2 = vpop.f32.mrb[215].mxu1 }
 0xc10   : > { %v5867_v35 = vadd.f32 %v5866_v2, %v14017_v9 }
 0xc11   : > { %v6027_v14 = vpack.c.bf16 %v5865_v57, %v5861_v34 }
 0xc12   : > { %v6705_v0 = vpack.c.bf16 %v5867_v35, %v5863_v13 }
 0xc13   : > { %6052 = vmatpush1.bf16.xpose.msra.mxu1 %v6027_v14 }
 0xc14   : > { %v5870_v32 = vpop.f32.mrb[216].mxu1  ;;  %6053 = vmatprep.subr.bf16.mxu1 %v16466_v19 }
 0xc15   : > { %v5872_v3 = vpop.f32.mrb[217].mxu1  ;;  %v5871_v44 = vadd.f32 %v5870_v32, %v14013_v25 }
 0xc16   : > { %v5874_v27 = vpop.f32.mrb[218].mxu1  ;;  %v5873_v63 = vadd.f32 %v5872_v3, %v14017_v9 }
 0xc17   : > { %v5875_v36 = vadd.f32 %v5874_v27, %v14013_v25  ;;  %v5876_v1 = vpop.f32.mrb[219].mxu1 }
 0xc18   : > { %v5877_v30 = vadd.f32 %v5876_v1, %v14017_v9 }
 0xc19   : > { %v6028_v12 = vpack.c.bf16 %v5875_v36, %v5871_v44 }
 0xc1a   : > { %v6706_v28 = vpack.c.bf16 %v5877_v30, %v5873_v63  ;;  %v16521_v30 = vpack.c.bf16 %v13616_v38, %v13613_v7  ;;  %v16523_v7 = vpack.c.bf16 %v13651_v21, %v13648_v17  ;;  %v16524_v38 = vpack.c.bf16 %v13678_v20, %v13675_v59 }
 0xc1b   : > { %6054 = vmatpush1.bf16.xpose.msra.mxu1 %v6028_v12  ;;  %v16527_v17 = vpack.c.bf16 %v14069_v43, %v14066_v49  ;;  %v16528_v21 = vpack.c.bf16 %v13726_v42, %v13723_v24  ;;  %v16530_v59 = vpack.c.bf16 %v13771_v52, %v13768_v47  ;;  %v16531_v42 = vpack.c.bf16 %v13790_v41, %v13784_v60  ;;  %v16548_v60 = vld [vmem:[#allocation106_spill] sm:$0xff] }
 0xc1c   : > { %v5880_v34 = vpop.f32.mrb[220].mxu1  ;;  %6055 = vmatprep.subr.bf16.mxu1 %v16466_v19  ;;  %v16533_v20 = vpack.c.bf16 %v13641_v45, %v13638_v33  ;;  %v16535_v24 = vpack.c.bf16 %v13687_v61, %v13684_v51  ;;  %v16538_v33 = vld [vmem:[#allocation130_spill] sm:$0xff]  ;;  %v16539_v45 = vld [vmem:[#allocation97_spill] sm:$0xff]  ;;  %v16544_v51 = vld [vmem:[#allocation132_spill] sm:$0xff] }
 0xc1d   : > { %v5881_v57 = vadd.f32 %v5880_v34, %v14013_v25  ;;  %v5882_v2 = vpop.f32.mrb[221].mxu1  ;;  %v16545_v61 = vld [vmem:[#allocation104_spill] sm:$0xff] }
 0xc1e   : > { %v5883_v13 = vadd.f32 %v5882_v2, %v14017_v9  ;;  %v5884_v35 = vpop.f32.mrb[222].mxu1  ;;  %v16546_v52 = vpack.c.bf16 %v16544_v51, %v16545_v61  ;;  %v16567_v61 = vld [vmem:[#allocation74_spill] sm:$0xff] }
 0xc1f   : > { %v5885_v14 = vadd.f32 %v5884_v35, %v14013_v25  ;;  %v5886_v32 = vpop.f32.mrb[223].mxu1  ;;  %v16522_v25 = vpack.c.bf16 %v13635_v62, %v13632_v4  ;;  %v16525_v4 = vpack.c.bf16 %v14058_v5, %v14055_v48  ;;  %v16526_v62 = vpack.c.bf16 %v13702_v31, %v13699_v10 }
 0xc20   : > { %v5887_v27 = vadd.f32 %v5886_v32, %v14017_v9  ;;  %v16529_v31 = vpack.c.bf16 %v13750_v56, %v13747_v8  ;;  %v16532_v56 = vpack.c.bf16 %v13623_v26, %v13620_v11  ;;  %v16534_v10 = vpack.c.bf16 %v13663_v23, %v13660_v58  ;;  %v16536_v11 = vld [vmem:[#allocation128_spill] sm:$0xff]  ;;  %v16541_v58 = vld [vmem:[#allocation102_spill] sm:$0xff]  ;;  %v16542_v23 = vld [vmem:[#allocation129_spill] sm:$0xff] }
 0xc21   : > { %v6029_v3 = vpack.c.bf16 %v5885_v14, %v5881_v57  ;;  %v16537_v26 = vpack.c.bf16 %v13711_v50, %v16536_v11  ;;  %v16540_v8 = vpack.c.bf16 %v16538_v33, %v16539_v45  ;;  %v16543_v47 = vpack.c.bf16 %v16541_v58, %v16542_v23  ;;  %v16547_v50 = vld [vmem:[#allocation112_spill] sm:$0xff]  ;;  %v16562_v11 = vld [vmem:[#allocation71_spill] sm:$0xff]  ;;  %v16565_v23 = vld [vmem:[#allocation73_spill] sm:$0xff] }
 0xc22   : > { %v6707_v15 = vpack.c.bf16 %v5887_v27, %v5883_v13  ;;  %v16549_v41 = vpack.c.bf16 %v16547_v50, %v16548_v60  ;;  %vm16563_vm15 = vnez %v16562_v11  ;;  %v16564_v45 = vld [vmem:[#allocation72_spill] sm:$0xff] }
 0xc23   : > { %6056 = vmatpush1.bf16.xpose.msra.mxu1 %v6029_v3 }
 0xc24   : > { %6717 = vmatprep.subr.bf16.mxu1 %v16466_v19 }
 0xc2a   : > { %6072 = vmatmul.mubr.bf16.vlgmr.msra.gmra.mrb[224].mxu1 %v16521_v30 }
 0xc2b   : > { %6718 = vmatpush1.bf16.xpose.msra.mxu1 %v6699_v29  ;;  %6081 = vmatprep.mubr.bf16.mxu1 %v16466_v19 }
 0xc2c   : > { %6719 = vmatprep.subr.bf16.mxu1 %v16466_v19 }
 0xc32   : > { %6082 = vmatmul.mubr.bf16.gmra.mrb[228].mxu1 %v16522_v25 }
 0xc33   : > { %6720 = vmatpush1.bf16.xpose.msra.mxu1 %v6700_v46  ;;  %6091 = vmatprep.mubr.bf16.mxu1 %v16466_v19 }
 0xc34   : > { %6721 = vmatprep.subr.bf16.mxu1 %v16466_v19 }
 0xc3a   : > { %6092 = vmatmul.mubr.bf16.gmra.mrb[232].mxu1 %v16523_v7 }
 0xc3b   : > { %6722 = vmatpush1.bf16.xpose.msra.mxu1 %v6701_v18  ;;  %6101 = vmatprep.mubr.bf16.mxu1 %v16466_v19 }
 0xc3c   : > { %6723 = vmatprep.subr.bf16.mxu1 %v16466_v19 }
 0xc42   : > { %6102 = vmatmul.mubr.bf16.gmra.mrb[236].mxu1 %v16524_v38 }
 0xc43   : > { %6724 = vmatpush1.bf16.xpose.msra.mxu1 %v16525_v4  ;;  %6111 = vmatprep.mubr.bf16.mxu1 %v16466_v19 }
 0xc44   : > { %6725 = vmatprep.subr.bf16.mxu1 %v16466_v19 }
 0xc4a   : > { %6112 = vmatmul.mubr.bf16.gmra.mrb[240].mxu1 %v16526_v62 }
 0xc4b   : > { %6726 = vmatpush1.bf16.xpose.msra.mxu1 %v16527_v17  ;;  %6121 = vmatprep.mubr.bf16.mxu1 %v16466_v19 }
 0xc4c   : > { %6727 = vmatprep.subr.bf16.mxu1 %v16466_v19 }
 0xc52   : > { %6122 = vmatmul.mubr.bf16.gmra.mrb[244].mxu1 %v16528_v21 }
 0xc53   : > { %6728 = vmatpush1.bf16.xpose.msra.mxu1 %v6704_v6  ;;  %6131 = vmatprep.mubr.bf16.mxu1 %v16466_v19 }
 0xc54   : > { %6729 = vmatprep.subr.bf16.mxu1 %v16466_v19 }
 0xc5a   : > { %6132 = vmatmul.mubr.bf16.gmra.mrb[248].mxu1 %v16529_v31 }
 0xc5b   : > { %6730 = vmatpush1.bf16.xpose.msra.mxu1 %v6705_v0  ;;  %6141 = vmatprep.mubr.bf16.mxu1 %v16466_v19 }
 0xc5c   : > { %6731 = vmatprep.subr.bf16.mxu1 %v16466_v19 }
 0xc62   : > { %6142 = vmatmul.mubr.bf16.gmra.mrb[252].mxu1 %v16530_v59 }
 0xc63   : > { %6732 = vmatpush1.bf16.xpose.msra.mxu1 %v6706_v28  ;;  %6151 = vmatprep.mubr.bf16.mxu1 %v16466_v19 }
 0xc64   : > { %6733 = vmatprep.subr.bf16.mxu1 %v16466_v19 }
 0xc6a   : > { %6152 = vmatmul.mubr.bf16.gmra.mrb[0].mxu1 %v16531_v42 }
 0xc6b   : > { %6734 = vmatpush1.bf16.xpose.msra.mxu1 %v6707_v15  ;;  %6749 = vmatprep.mubr.bf16.mxu1 %v16466_v19 }
 0xc72   : > { %6750 = vmatmul.mubr.bf16.vlgmr.msra.gmra.mrb[4].mxu1 %v16532_v56 }
 0xc73   : > { %6759 = vmatprep.mubr.bf16.mxu1 %v16466_v19 }
 0xc7a   : > { %6760 = vmatmul.mubr.bf16.gmra.mrb[8].mxu1 %v16533_v20 }
 0xc7b   : > { %6769 = vmatprep.mubr.bf16.mxu1 %v16466_v19 }
 0xc82   : > { %6770 = vmatmul.mubr.bf16.gmra.mrb[12].mxu1 %v16534_v10 }
 0xc83   : > { %6779 = vmatprep.mubr.bf16.mxu1 %v16466_v19 }
 0xc8a   : > { %6780 = vmatmul.mubr.bf16.gmra.mrb[16].mxu1 %v16535_v24 }
 0xc8b   : > { %6789 = vmatprep.mubr.bf16.mxu1 %v16466_v19 }
 0xc92   : > { %6790 = vmatmul.mubr.bf16.gmra.mrb[20].mxu1 %v16537_v26 }
 0xc93   : > { %6799 = vmatprep.mubr.bf16.mxu1 %v16466_v19 }
 0xc9a   : > { %6800 = vmatmul.mubr.bf16.gmra.mrb[24].mxu1 %v16540_v8 }
 0xc9b   : > { %6809 = vmatprep.mubr.bf16.mxu1 %v16466_v19 }
 0xca2   : > { %6810 = vmatmul.mubr.bf16.gmra.mrb[28].mxu1 %v16543_v47 }
 0xca3   : > { %6819 = vmatprep.mubr.bf16.mxu1 %v16466_v19 }
 0xcaa   : > { %6820 = vmatmul.mubr.bf16.gmra.mrb[32].mxu1 %v16546_v52 }
 0xcab   : > { %6829 = vmatprep.mubr.bf16.mxu1 %v16466_v19 }
 0xcb2   : > { %6830 = vmatmul.mubr.bf16.gmra.mrb[36].mxu1 %v16549_v41 }
 0xcfd   : > { %v6073_v9 = vpop.f32.mrb[224].mxu1 }
 0xcfe   : > { %v6162_v53 = vmul.f32 0.1118034, %v6073_v9  ;;  %v6075_v16 = vpop.f32.mrb[225].mxu1 }
 0xcff   : > { %v6163_v29 = vmul.f32 0.1118034, %v6075_v16  ;;  %v6077_v40 = vpop.f32.mrb[226].mxu1 }
 0xd00   : > { %v6164_v37 = vmul.f32 0.1118034, %v6077_v40  ;;  %v6079_v46 = vpop.f32.mrb[227].mxu1  ;;  %v14197_v5 = vsel %vm11462_vm2, %v6162_v53, -1e+30 }
 0xd01   : > { %v14193_v22 = vsel %vm11456_vm1, %v6163_v29, -1e+30  ;;  %v6165_v18 = vmul.f32 0.1118034, %v6079_v46  ;;  %v16570_v46 = vld [vmem:[#allocation75_spill] sm:$0xff] }
 0xd02   : > { %v6234_v15 = vsel %vm16552_vm3, %v14193_v22, -inf  ;;  %v14208_v0 = vsel %vm11477_vm5, %v6164_v37, -1e+30 }
 0xd03   : > { %v14203_v43 = vsel %vm11467_vm4, %v6165_v18, -1e+30  ;;  %v6235_v28 = vmax.f32 %v14197_v5, %v6234_v15 }
 0xd04   : > { %v6238_v44 = vsel %vm16555_vm13, %v14203_v43, -inf  ;;  %vm16566_vm13 = vnez %v16565_v23 }
 0xd05   : > { %6236 = vmax.xlane.f32.xlu0 %v6235_v28  ;;  %v6083_v36 = vpop.f32.mrb[228].mxu1  ;;  %v6239_v1 = vmax.f32 %v14208_v0, %v6238_v44  ;;  %v16572_v28 = vld [vmem:[#allocation76_spill] sm:$0xff] }
 0xd06   : > { %v6166_v63 = vmul.f32 0.1118034, %v6083_v36  ;;  %v6085_v12 = vpop.f32.mrb[229].mxu1 }
 0xd07   : > { %v6167_v34 = vmul.f32 0.1118034, %v6085_v12  ;;  %6240 = vmax.xlane.f32.xlu1 %v6239_v1  ;;  %v6087_v57 = vpop.f32.mrb[230].mxu1  ;;  %v16574_v1 = vld [vmem:[#allocation77_spill] sm:$0xff] }
 0xd08   : > { %v6168_v2 = vmul.f32 0.1118034, %v6087_v57  ;;  %v6089_v13 = vpop.f32.mrb[231].mxu1  ;;  %v14219_v3 = vsel %vm11506_vm7, %v6166_v63, -1e+30 }
 0xd09   : > { %v14215_v14 = vsel %vm11500_vm6, %v6167_v34, -1e+30  ;;  %v6169_v32 = vmul.f32 0.1118034, %v6089_v13  ;;  %v16576_v34 = vld [vmem:[#allocation78_spill] sm:$0xff] }
 0xd0a   : > { %v6242_v30 = vsel %vm16558_vm14, %v14215_v14, -inf  ;;  %v14230_v62 = vsel %vm11521_vm9, %v6168_v2, -1e+30  ;;  %vm16568_vm14 = vnez %v16567_v61 }
 0xd0b   : > { %v14225_v7 = vsel %vm11511_vm8, %v6169_v32, -1e+30  ;;  %v6243_v38 = vmax.f32 %v14219_v3, %v6242_v30 }
 0xd0c   : > { %v6246_v17 = vsel %vm16561_vm10, %v14225_v7, -inf  ;;  %vm16569_vm10 = vmmov %vm16552_vm3 }
 0xd0d   : > { %6244 = vmax.xlane.f32.xlu0 %v6243_v38  ;;  %v6093_v21 = vpop.f32.mrb[232].mxu1  ;;  %v6247_v31 = vmax.f32 %v14230_v62, %v6246_v17 }
 0xd0e   : > { %v6170_v59 = vmul.f32 0.1118034, %v6093_v21  ;;  %v6095_v42 = vpop.f32.mrb[233].mxu1 }
 0xd0f   : > { %v6171_v56 = vmul.f32 0.1118034, %v6095_v42  ;;  %6248 = vmax.xlane.f32.xlu1 %v6247_v31  ;;  %v6097_v20 = vpop.f32.mrb[234].mxu1  ;;  %v16579_v42 = vld [vmem:[#allocation79_spill] sm:$0xff] }
 0xd10   : > { %v6172_v10 = vmul.f32 0.1118034, %v6097_v20  ;;  %v6099_v24 = vpop.f32.mrb[235].mxu1  ;;  %v14241_v8 = vsel %vm11550_vm11, %v6170_v59, -1e+30  ;;  %vm16577_vm11 = vnez %v16576_v34 }
 0xd11   : > { %v14237_v26 = vsel %vm16563_vm15, %v6171_v56, -1e+30  ;;  %v6173_v33 = vmul.f32 0.1118034, %v6099_v24 }
 0xd12   : > { %v6250_v58 = vsel %vm16552_vm3, %v14237_v26, -inf  ;;  %v14252_v52 = vsel %vm16568_vm14, %v6172_v10, -1e+30  ;;  %vm16571_vm3 = vnez %v16570_v46  ;;  %vm16573_vm14 = vnez %v16572_v28  ;;  %v16581_v10 = vld [vmem:[#allocation80_spill] sm:$0xff] }
 0xd13   : > { %v14247_v47 = vsel %vm16566_vm13, %v6173_v33, -1e+30  ;;  %v6251_v51 = vmax.f32 %v14241_v8, %v6250_v58  ;;  %vm16575_vm13 = vnez %v16574_v1  ;;  %v16583_v58 = vld [vmem:[#allocation81_spill] sm:$0xff] }
 0xd14   : > { %v6254_v50 = vsel %vm16569_vm10, %v14247_v47, -inf }
 0xd15   : > { %6252 = vmax.xlane.f32.xlu0 %v6251_v51  ;;  %v6103_v60 = vpop.f32.mrb[236].mxu1  ;;  %v6255_v41 = vmax.f32 %v14252_v52, %v6254_v50 }
 0xd16   : > { %v6174_v9 = vmul.f32 0.1118034, %v6103_v60  ;;  %v6105_v53 = vpop.f32.mrb[237].mxu1  ;;  %v16585_v60 = vld [vmem:[#allocation82_spill] sm:$0xff] }
 0xd17   : > { %v6175_v16 = vmul.f32 0.1118034, %v6105_v53  ;;  %6256 = vmax.xlane.f32.xlu1 %v6255_v41  ;;  %v6107_v29 = vpop.f32.mrb[238].mxu1 }
 0xd18   : > { %v6176_v40 = vmul.f32 0.1118034, %v6107_v29  ;;  %v6109_v37 = vpop.f32.mrb[239].mxu1  ;;  %v14263_v44 = vsel %vm16573_vm14, %v6174_v9, -1e+30  ;;  %vm16584_vm14 = vnez %v16583_v58 }
 0xd19   : > { %v14259_v18 = vsel %vm16571_vm3, %v6175_v16, -1e+30  ;;  %v6177_v15 = vmul.f32 0.1118034, %v6109_v37  ;;  %vm16578_vm3 = vmmov %vm16569_vm10 }
 0xd1a   : > { %v6258_v36 = vsel %vm16569_vm10, %v14259_v18, -inf  ;;  %v14274_v57 = vsel %vm16577_vm11, %v6176_v40, -1e+30  ;;  %vm16580_vm10 = vnez %v16579_v42  ;;  %vm16582_vm11 = vnez %v16581_v10 }
 0xd1b   : > { %v14269_v63 = vsel %vm16575_vm13, %v6177_v15, -1e+30  ;;  %v6259_v12 = vmax.f32 %v14263_v44, %v6258_v36  ;;  %vm16586_vm13 = vnez %v16585_v60 }
 0xd1c   : > { %v6262_v2 = vsel %vm16578_vm3, %v14269_v63, -inf }
 0xd1d   : > { %6260 = vmax.xlane.f32.xlu0 %v6259_v12  ;;  %v6113_v13 = vpop.f32.mrb[240].mxu1  ;;  %v6263_v32 = vmax.f32 %v14274_v57, %v6262_v2  ;;  %v16588_v2 = vld [vmem:[#allocation83_spill] sm:$0xff] }
 0xd1e   : > { %v6178_v30 = vmul.f32 0.1118034, %v6113_v13  ;;  %v6115_v38 = vpop.f32.mrb[241].mxu1 }
 0xd1f   : > { %v6179_v17 = vmul.f32 0.1118034, %v6115_v38  ;;  %6264 = vmax.xlane.f32.xlu1 %v6263_v32  ;;  %v6117_v21 = vpop.f32.mrb[242].mxu1 }
 0xd20   : > { %v6180_v31 = vmul.f32 0.1118034, %v6117_v21  ;;  %v6119_v59 = vpop.f32.mrb[243].mxu1  ;;  %v14285_v24 = vsel %vm16582_vm11, %v6178_v30, -1e+30  ;;  %v16590_v30 = vld [vmem:[#allocation84_spill] sm:$0xff] }
 0xd21   : > { %v14281_v56 = vsel %vm16580_vm10, %v6179_v17, -1e+30  ;;  %v6181_v20 = vmul.f32 0.1118034, %v6119_v59  ;;  %vm16587_vm10 = vmmov %vm16578_vm3  ;;  %v16592_v21 = vld [vmem:[#allocation85_spill] sm:$0xff] }
 0xd22   : > { %v6266_v33 = vsel %vm16578_vm3, %v14281_v56, -inf  ;;  %v14296_v41 = vsel %vm16586_vm13, %v6180_v31, -1e+30  ;;  %vm16589_vm3 = vnez %v16588_v2  ;;  %vm16591_vm13 = vnez %v16590_v30  ;;  %v16613_v2 = vld [vmem:[#allocation107_spill] sm:$0xff] }
 0xd23   : > { %v14291_v51 = vsel %vm16584_vm14, %v6181_v20, -1e+30  ;;  %v6267_v50 = vmax.f32 %v14285_v24, %v6266_v33  ;;  %vm16593_vm11 = vnez %v16592_v21  ;;  %v16594_v20 = vld [vmem:[#allocation87_spill] sm:$0xff] }
 0xd24   : > { %v6270_v9 = vsel %vm16587_vm10, %v14291_v51, -inf  ;;  %vm16595_vm14 = vnez %v16594_v20 }
 0xd25   : > { %6268 = vmax.xlane.f32.xlu0 %v6267_v50  ;;  %v6123_v53 = vpop.f32.mrb[244].mxu1  ;;  %v6271_v16 = vmax.f32 %v14296_v41, %v6270_v9 }
 0xd26   : > { %v6182_v29 = vmul.f32 0.1118034, %v6123_v53  ;;  %v6125_v40 = vpop.f32.mrb[245].mxu1 }
 0xd27   : > { %v6183_v37 = vmul.f32 0.1118034, %v6125_v40  ;;  %6272 = vmax.xlane.f32.xlu1 %v6271_v16  ;;  %v6127_v15 = vpop.f32.mrb[246].mxu1 }
 0xd28   : > { %v6184_v36 = vmul.f32 0.1118034, %v6127_v15  ;;  %v6129_v12 = vpop.f32.mrb[247].mxu1  ;;  %v14307_v38 = vsel %vm16591_vm13, %v6182_v29, -1e+30 }
 0xd29   : > { %v14303_v13 = vsel %vm16589_vm3, %v6183_v37, -1e+30  ;;  %v6185_v32 = vmul.f32 0.1118034, %v6129_v12  ;;  %vm16596_vm3 = vmmov %vm16587_vm10 }
 0xd2a   : > { %v6274_v17 = vsel %vm16587_vm10, %v14303_v13, -inf  ;;  %v14318_v33 = vsel %vm16595_vm14, %v6184_v36, -1e+30  ;;  %vm16600_vm14 = vnez %v16599_v55 }
 0xd2b   : > { %v14313_v31 = vsel %vm16593_vm11, %v6185_v32, -1e+30  ;;  %v6275_v59 = vmax.f32 %v14307_v38, %v6274_v17  ;;  %v16597_v32 = vld [vmem:[#allocation91_spill] sm:$0xff] }
 0xd2c   : > { %v6278_v50 = vsel %vm16596_vm3, %v14313_v31, -inf  ;;  %vm16598_vm10 = vnez %v16597_v32  ;;  %v16606_v32 = vld [vmem:[#allocation99_spill] sm:$0xff] }
 0xd2d   : > { %6276 = vmax.xlane.f32.xlu0 %v6275_v59  ;;  %v6133_v9 = vpop.f32.mrb[248].mxu1  ;;  %v6279_v53 = vmax.f32 %v14318_v33, %v6278_v50  ;;  %v16601_v50 = vld [vmem:[#allocation93_spill] sm:$0xff] }
 0xd2e   : > { %v6186_v16 = vmul.f32 0.1118034, %v6133_v9  ;;  %v6135_v29 = vpop.f32.mrb[249].mxu1  ;;  %vm16602_vm13 = vnez %v16601_v50 }
 0xd2f   : > { %v6187_v40 = vmul.f32 0.1118034, %v6135_v29  ;;  %6280 = vmax.xlane.f32.xlu1 %v6279_v53  ;;  %v6137_v37 = vpop.f32.mrb[250].mxu1  ;;  %v16603_v29 = vld [vmem:[#allocation95_spill] sm:$0xff] }
 0xd30   : > { %v6188_v15 = vmul.f32 0.1118034, %v6137_v37  ;;  %v6139_v12 = vpop.f32.mrb[251].mxu1  ;;  %v14329_v54 = vsel %vm16600_vm14, %v6186_v16, -1e+30  ;;  %vm16604_vm11 = vnez %v16603_v29 }
 0xd31   : > { %v14325_v17 = vsel %vm16598_vm10, %v6187_v40, -1e+30  ;;  %v6189_v36 = vmul.f32 0.1118034, %v6139_v12  ;;  %vm16605_vm10 = vmmov %vm16596_vm3 }
 0xd32   : > { %v6282_v59 = vsel %vm16596_vm3, %v14325_v17, -inf  ;;  %v14340_v37 = vsel %vm16604_vm11, %v6188_v15, -1e+30  ;;  %vm16607_vm3 = vnez %v16606_v32  ;;  %vm16612_vm14 = vmmov %vm16605_vm10 }
 0xd33   : > { %v14335_v9 = vsel %vm16602_vm13, %v6189_v36, -1e+30  ;;  %v6283_v53 = vmax.f32 %v14329_v54, %v6282_v59 }
 0xd34   : > { %v6286_v40 = vsel %vm16605_vm10, %v14335_v9, -inf }
 0xd35   : > { %6284 = vmax.xlane.f32.xlu0 %v6283_v53  ;;  %v6143_v12 = vpop.f32.mrb[252].mxu1  ;;  %v6287_v16 = vmax.f32 %v14340_v37, %v6286_v40  ;;  %v16609_v40 = vld [vmem:[#allocation101_spill] sm:$0xff] }
 0xd36   : > { %v6190_v19 = vmul.f32 0.1118034, %v6143_v12  ;;  %v6145_v55 = vpop.f32.mrb[253].mxu1  ;;  %vm16610_vm11 = vnez %v16609_v40 }
 0xd37   : > { %v6191_v20 = vmul.f32 0.1118034, %v6145_v55  ;;  %6288 = vmax.xlane.f32.xlu1 %v6287_v16  ;;  %v6147_v50 = vpop.f32.mrb[254].mxu1 }
 0xd38   : > { %v6192_v36 = vmul.f32 0.1118034, %v6147_v50  ;;  %v6149_v30 = vpop.f32.mrb[255].mxu1  ;;  %v14351_v60 = vsel %vm16240_vm12, %v6190_v19, -1e+30  ;;  %v16615_v50 = vld [vmem:[#allocation108_spill] sm:$0xff] }
 0xd39   : > { %v14347_v59 = vsel %vm16607_vm3, %v6191_v20, -1e+30  ;;  %v6193_v15 = vmul.f32 0.1118034, %v6149_v30 }
 0xd3a   : > { %v6290_v53 = vsel %vm16605_vm10, %v14347_v59, -inf  ;;  %v14362_v16 = vsel %vm16248_vm0, %v6192_v36, -1e+30  ;;  %vm16614_vm10 = vnez %v16613_v2  ;;  %vm16616_vm0 = vnez %v16615_v50 }
 0xd3b   : > { %v14357_v12 = vsel %vm16610_vm11, %v6193_v15, -1e+30  ;;  %v6291_v55 = vmax.f32 %v14351_v60, %v6290_v53 }
 0xd3c   : > { %v6294_v30 = vsel %vm16612_vm14, %v14357_v12, -inf }
 0xd3d   : > { %6292 = vmax.xlane.f32.xlu0 %v6291_v55  ;;  %v6153_v20 = vpop.f32.mrb[0].mxu1  ;;  %v6295_v19 = vmax.f32 %v14362_v16, %v6294_v30  ;;  %v16617_v30 = vld [vmem:[#allocation109_spill] sm:$0xff] }
 0xd3e   : > { %v6194_v29 = vmul.f32 0.1118034, %v6153_v20  ;;  %v6155_v32 = vpop.f32.mrb[1].mxu1  ;;  %vm16618_vm12 = vnez %v16617_v30 }
 0xd3f   : > { %v6195_v21 = vmul.f32 0.1118034, %v6155_v32  ;;  %6296 = vmax.xlane.f32.xlu1 %v6295_v19  ;;  %v6157_v40 = vpop.f32.mrb[2].mxu1 }
 0xd40   : > { %v6196_v15 = vmul.f32 0.1118034, %v6157_v40  ;;  %v6159_v10 = vpop.f32.mrb[3].mxu1  ;;  %v14373_v34 = vsel %vm16616_vm0, %v6194_v29, -1e+30  ;;  %v16619_v40 = vld [vmem:[#allocation111_spill] sm:$0xff] }
 0xd41   : > { %v14369_v53 = vsel %vm16614_vm10, %v6195_v21, -1e+30  ;;  %v6197_v36 = vmul.f32 0.1118034, %v6159_v10  ;;  %vm16620_vm11 = vnez %v16619_v40  ;;  %vm16621_vm10 = vmmov %vm16612_vm14 }
 0xd42   : > { %v6298_v55 = vsel %vm16612_vm14, %v14369_v53, -inf  ;;  %v14384_v19 = vsel %vm16620_vm11, %v6196_v15, -1e+30 }
 0xd43   : > { %v14379_v20 = vsel %vm16618_vm12, %v6197_v36, -1e+30  ;;  %v6299_v32 = vmax.f32 %v14373_v34, %v6298_v55 }
 0xd44   : > { %v6302_v10 = vsel %vm16621_vm10, %v14379_v20, -inf }
 0xd45   : > { %6300 = vmax.xlane.f32.xlu0 %v6299_v32  ;;  %v6751_v21 = vpop.f32.mrb[4].mxu1  ;;  %v6303_v29 = vmax.f32 %v14384_v19, %v6302_v10 }
 0xd46   : > { %v6840_v50 = vmul.f32 0.1118034, %v6751_v21  ;;  %v6753_v2 = vpop.f32.mrb[5].mxu1 }
 0xd47   : > { %v6841_v58 = vmul.f32 0.1118034, %v6753_v2  ;;  %v6755_v28 = vpop.f32.mrb[6].mxu1  ;;  %6304 = vmax.xlane.f32.xlu1 %v6303_v29 }
 0xd48   : > { %v6842_v36 = vmul.f32 0.1118034, %v6755_v28  ;;  %v6757_v30 = vpop.f32.mrb[7].mxu1  ;;  %v14395_v40 = vsel %vm11462_vm2, %v6840_v50, -1e+30 }
 0xd49   : > { %v14391_v55 = vsel %vm11456_vm1, %v6841_v58, -1e+30  ;;  %v6843_v15 = vmul.f32 0.1118034, %v6757_v30  ;;  %vm16622_vm1 = vmmov %vm16621_vm10 }
 0xd4a   : > { %v6912_v32 = vsel %vm16621_vm10, %v14391_v55, -inf  ;;  %v14406_v28 = vsel %vm11477_vm5, %v6842_v36, -1e+30  ;;  %vm16623_vm2 = vmmov %vm16622_vm1  ;;  %vm16625_vm5 = vnez %v16564_v45 }
 0xd4b   : > { %v14401_v10 = vsel %vm11467_vm4, %v6843_v15, -1e+30  ;;  %v6913_v2 = vmax.f32 %v14395_v40, %v6912_v32  ;;  %vm16624_vm4 = vmmov %vm16622_vm1 }
 0xd4c   : > { %v6916_v39 = vsel %vm16622_vm1, %v14401_v10, -inf  ;;  %vm16653_vm14 = vmmov %vm16622_vm1 }
 0xd4d   : > { %6914 = vmax.xlane.f32.xlu0 %v6913_v2  ;;  %v6761_v48 = vpop.f32.mrb[8].mxu1  ;;  %v6917_v58 = vmax.f32 %v14406_v28, %v6916_v39  ;;  %vm16654_vm10 = vmmov %vm16622_vm1 }
 0xd4e   : > { %v6844_v50 = vmul.f32 0.1118034, %v6761_v48  ;;  %v6763_v30 = vpop.f32.mrb[9].mxu1 }
 0xd4f   : > { %v6845_v21 = vmul.f32 0.1118034, %v6763_v30  ;;  %v6765_v29 = vpop.f32.mrb[10].mxu1  ;;  %6918 = vmax.xlane.f32.xlu1 %v6917_v58 }
 0xd50   : > { %v6846_v49 = vmul.f32 0.1118034, %v6765_v29  ;;  %v6767_v15 = vpop.f32.mrb[11].mxu1  ;;  %v14417_v36 = vsel %vm11506_vm7, %v6844_v50, -1e+30  ;;  %vm16627_vm7 = vnez %v16565_v23 }
 0xd51   : > { %v14413_v32 = vsel %vm11500_vm6, %v6845_v21, -1e+30  ;;  %v6847_v6 = vmul.f32 0.1118034, %v6767_v15  ;;  %vm16626_vm6 = vmmov %vm16622_vm1 }
 0xd52   : > { %v6920_v2 = vsel %vm16623_vm2, %v14413_v32, -inf  ;;  %v14428_v58 = vsel %vm11521_vm9, %v6846_v49, -1e+30  ;;  %vm16629_vm9 = vmmov %vm16622_vm1 }
 0xd53   : > { %v14423_v39 = vsel %vm11511_vm8, %v6847_v6, -1e+30  ;;  %v6921_v48 = vmax.f32 %v14417_v36, %v6920_v2  ;;  %vm16628_vm8 = vnez %v16567_v61  ;;  %vm16655_vm2 = vmmov %vm16622_vm1 }
 0xd54   : > { %v6924_v35 = vsel %vm16624_vm4, %v14423_v39, -inf  ;;  %vm16656_vm4 = vmmov %vm16622_vm1 }
 0xd55   : > { %6922 = vmax.xlane.f32.xlu0 %v6921_v48  ;;  %v6771_v27 = vpop.f32.mrb[12].mxu1  ;;  %v6925_v50 = vmax.f32 %v14428_v58, %v6924_v35 }
 0xd56   : > { %v6848_v30 = vmul.f32 0.1118034, %v6771_v27  ;;  %v6773_v21 = vpop.f32.mrb[13].mxu1 }
 0xd57   : > { %v6849_v29 = vmul.f32 0.1118034, %v6773_v21  ;;  %v6775_v15 = vpop.f32.mrb[14].mxu1  ;;  %6926 = vmax.xlane.f32.xlu1 %v6925_v50 }
 0xd58   : > { %v6850_v25 = vmul.f32 0.1118034, %v6775_v15  ;;  %v6777_v6 = vpop.f32.mrb[15].mxu1  ;;  %v14439_v49 = vsel %vm16625_vm5, %v6848_v30, -1e+30  ;;  %vm16657_vm5 = vmmov %vm16622_vm1 }
 0xd59   : > { %v14435_v2 = vsel %vm16563_vm15, %v6849_v29, -1e+30  ;;  %v6851_v4 = vmul.f32 0.1118034, %v6777_v6  ;;  %vm16652_vm15 = vmmov %vm16622_vm1 }
 0xd5a   : > { %v6928_v48 = vsel %vm16626_vm6, %v14435_v2, -inf  ;;  %v14450_v50 = vsel %vm16628_vm8, %v6850_v25, -1e+30  ;;  %vm16658_vm6 = vmmov %vm16622_vm1 }
 0xd5b   : > { %v14445_v35 = vsel %vm16627_vm7, %v6851_v4, -1e+30  ;;  %v6929_v27 = vmax.f32 %v14439_v49, %v6928_v48  ;;  %vm16659_vm7 = vmmov %vm16622_vm1 }
 0xd5c   : > { %v6932_v11 = vsel %vm16629_vm9, %v14445_v35, -inf  ;;  %vm16660_vm8 = vmmov %vm16622_vm1 }
 0xd5d   : > { %6930 = vmax.xlane.f32.xlu0 %v6929_v27  ;;  %v14454_v45 = vpop.f32.mrb[16].mxu1  ;;  %v6933_v30 = vmax.f32 %v14450_v50, %v6932_v11  ;;  %vm16661_vm9 = vmmov %vm16622_vm1 }
 0xd5e   : > { %16630 = vst [vmem:[#allocation19_spill] sm:$0xff] %v14454_v45  ;;  %v14457_v21 = vpop.f32.mrb[17].mxu1 }
 0xd5f   : > { %v14459_v29 = vpop.f32.mrb[18].mxu1  ;;  %6934 = vmax.xlane.f32.xlu1 %v6933_v30 }
 0xd60   : > { %16631 = vst [vmem:[#allocation20_spill] sm:$0xff] %v14459_v29  ;;  %v14461_v23 = vpop.f32.mrb[19].mxu1 }
 0xd65   : > { %v14463_v15 = vpop.f32.mrb[20].mxu1 }
 0xd66   : > { %16632 = vst [vmem:[#allocation18_spill] sm:$0xff] %v14463_v15  ;;  %v14465_v61 = vpop.f32.mrb[21].mxu1 }
 0xd67   : > { %16633 = vst [vmem:[#allocation21_spill] sm:$0xff] %v14465_v61  ;;  %v14467_v25 = vpop.f32.mrb[22].mxu1 }
 0xd68   : > { %16634 = vst [vmem:[#allocation23_spill] sm:$0xff] %v14467_v25  ;;  %v14469_v6 = vpop.f32.mrb[23].mxu1 }
 0xd69   : > { %16635 = vst [vmem:[#allocation24_spill] sm:$0xff] %v14469_v6 }
 0xd6d   : > { %v14471_v4 = vpop.f32.mrb[24].mxu1 }
 0xd6e   : > { %16636 = vst [vmem:[#allocation22_spill] sm:$0xff] %v14471_v4  ;;  %v14473_v48 = vpop.f32.mrb[25].mxu1 }
 0xd6f   : > { %16637 = vst [vmem:[#allocation25_spill] sm:$0xff] %v14473_v48  ;;  %v14475_v27 = vpop.f32.mrb[26].mxu1 }
 0xd70   : > { %16638 = vst [vmem:[#allocation27_spill] sm:$0xff] %v14475_v27  ;;  %v14477_v11 = vpop.f32.mrb[27].mxu1 }
 0xd71   : > { %16639 = vst [vmem:[#allocation28_spill] sm:$0xff] %v14477_v11 }
 0xd75   : > { %v14479_v42 = vpop.f32.mrb[28].mxu1 }
 0xd76   : > { %16640 = vst [vmem:[#allocation26_spill] sm:$0xff] %v14479_v42  ;;  %v14481_v30 = vpop.f32.mrb[29].mxu1 }
 0xd77   : > { %16641 = vst [vmem:[#allocation29_spill] sm:$0xff] %v14481_v30  ;;  %v14483_v29 = vpop.f32.mrb[30].mxu1 }
 0xd78   : > { %16642 = vst [vmem:[#allocation31_spill] sm:$0xff] %v14483_v29  ;;  %v14485_v15 = vpop.f32.mrb[31].mxu1 }
 0xd79   : > { %16643 = vst [vmem:[#allocation32_spill] sm:$0xff] %v14485_v15 }
 0xd7d   : > { %v14487_v1 = vpop.f32.mrb[32].mxu1 }
 0xd7e   : > { %16644 = vst [vmem:[#allocation30_spill] sm:$0xff] %v14487_v1  ;;  %v14489_v25 = vpop.f32.mrb[33].mxu1 }
 0xd7f   : > { %16645 = vst [vmem:[#allocation33_spill] sm:$0xff] %v14489_v25  ;;  %v14491_v6 = vpop.f32.mrb[34].mxu1 }
 0xd80   : > { %16646 = vst [vmem:[#allocation36_spill] sm:$0xff] %v14491_v6  ;;  %v14493_v4 = vpop.f32.mrb[35].mxu1 }
 0xd81   : > { %16647 = vst [vmem:[#allocation35_spill] sm:$0xff] %v14493_v4 }
 0xd85   : > { %v14495_v48 = vpop.f32.mrb[36].mxu1 }
 0xd86   : > { %16648 = vst [vmem:[#allocation34_spill] sm:$0xff] %v14495_v48  ;;  %v14497_v27 = vpop.f32.mrb[37].mxu1 }
 0xd87   : > { %16649 = vst [vmem:[#allocation37_spill] sm:$0xff] %v14497_v27  ;;  %v14499_v11 = vpop.f32.mrb[38].mxu1 }
 0xd88   : > { %16650 = vst [vmem:[#allocation40_spill] sm:$0xff] %v14499_v11  ;;  %v14501_v42 = vpop.f32.mrb[39].mxu1 }
 0xd89   : > { %16651 = vst [vmem:[#allocation39_spill] sm:$0xff] %v14501_v42 }
 0xd92   : > { %v6237_v30 = vpop.xlane.xlu0 %6236 }
 0xd93   : > { %v6306_v29 = vsub.f32 %v14197_v5, %v6237_v30  ;;  %v6307_v15 = vsub.f32 %v14193_v22, %v6237_v30 }
 0xd94   : > { %v6241_v1 = vpop.xlane.xlu1 %6240 }
 0xd95   : > { %v6342_v45 = vmul.f32 1.442695, %v6306_v29  ;;  %v6344_v25 = vmul.f32 1.442695, %v6307_v15  ;;  %v6308_v6 = vsub.f32 %v14208_v0, %v6241_v1  ;;  %v6309_v4 = vsub.f32 %v14203_v43, %v6241_v1 }
 0xd97   : > { %9612 = vpow2.f32 %v6342_v45  ;;  %v6346_v48 = vmul.f32 1.442695, %v6308_v6  ;;  %v6348_v61 = vmul.f32 1.442695, %v6309_v4 }
 0xd98   : > { %9614 = vpow2.f32 %v6344_v25 }
 0xd99   : > { %9616 = vpow2.f32 %v6346_v48 }
 0xd9a   : > { %9618 = vpow2.f32 %v6348_v61  ;;  %v6245_v11 = vpop.xlane.xlu0 %6244 }
 0xd9b   : > { %v6310_v42 = vsub.f32 %v14219_v3, %v6245_v11  ;;  %v6311_v5 = vsub.f32 %v14215_v14, %v6245_v11 }
 0xd9c   : > { %v6249_v27 = vpop.xlane.xlu1 %6248 }
 0xd9d   : > { %v6350_v22 = vmul.f32 1.442695, %v6310_v42  ;;  %v6352_v30 = vmul.f32 1.442695, %v6311_v5  ;;  %v6312_v29 = vsub.f32 %v14230_v62, %v6249_v27  ;;  %v6313_v0 = vsub.f32 %v14225_v7, %v6249_v27 }
 0xd9f   : > { %9620 = vpow2.f32 %v6350_v22  ;;  %v6354_v43 = vmul.f32 1.442695, %v6312_v29  ;;  %v6356_v1 = vmul.f32 1.442695, %v6313_v0 }
 0xda0   : > { %9622 = vpow2.f32 %v6352_v30 }
 0xda1   : > { %v14511_v45 = vpop.eup %9612  ;;  %9624 = vpow2.f32 %v6354_v43 }
 0xda2   : > { %v14513_v15 = vpop.eup %9614  ;;  %9626 = vpow2.f32 %v6356_v1  ;;  %v6253_v3 = vpop.xlane.xlu0 %6252 }
 0xda3   : > { %v14515_v61 = vpop.eup %9616  ;;  %v6314_v14 = vsub.f32 %v14241_v8, %v6253_v3  ;;  %v6315_v42 = vsub.f32 %v14237_v26, %v6253_v3  ;;  %v6414_v7 = vsel %vm16652_vm15, %v14513_v15, 0.0  ;;  %vm16662_vm15 = vmmov %vm16622_vm1 }
 0xda4   : > { %v14521_v62 = vpop.eup %9618  ;;  %v6257_v25 = vpop.xlane.xlu1 %6256  ;;  %v6415_v6 = vadd.f32 %v14511_v45, %v6414_v7 }
 0xda5   : > { %v6358_v4 = vmul.f32 1.442695, %v6314_v14  ;;  %v6360_v48 = vmul.f32 1.442695, %v6315_v42  ;;  %v6316_v27 = vsub.f32 %v14252_v52, %v6257_v25  ;;  %v6317_v11 = vsub.f32 %v14247_v47, %v6257_v25 }
 0xda6   : > { %6416 = vadd.xlane.f32.xlu0 %v6415_v6  ;;  %v6418_v8 = vsel %vm16653_vm14, %v14521_v62, 0.0  ;;  %vm16663_vm14 = vmmov %vm16622_vm1 }
 0xda7   : > { %9628 = vpow2.f32 %v6358_v4  ;;  %v6362_v26 = vmul.f32 1.442695, %v6316_v27  ;;  %v6364_v5 = vmul.f32 1.442695, %v6317_v11  ;;  %v6419_v22 = vadd.f32 %v14515_v61, %v6418_v8 }
 0xda8   : > { %9630 = vpow2.f32 %v6360_v48 }
 0xda9   : > { %v14529_v30 = vpop.eup %9620  ;;  %9632 = vpow2.f32 %v6362_v26  ;;  %6420 = vadd.xlane.f32.xlu1 %v6419_v22 }
 0xdaa   : > { %v14531_v29 = vpop.eup %9622  ;;  %9634 = vpow2.f32 %v6364_v5  ;;  %v6261_v52 = vpop.xlane.xlu0 %6260 }
 0xdab   : > { %v14533_v0 = vpop.eup %9624  ;;  %v6318_v47 = vsub.f32 %v14263_v44, %v6261_v52  ;;  %v6319_v43 = vsub.f32 %v14259_v18, %v6261_v52  ;;  %v6422_v1 = vsel %vm16654_vm10, %v14531_v29, 0.0  ;;  %vm16664_vm10 = vmmov %vm16622_vm1 }
 0xdac   : > { %v14539_v3 = vpop.eup %9626  ;;  %v6265_v14 = vpop.xlane.xlu1 %6264  ;;  %v6423_v42 = vadd.f32 %v14529_v30, %v6422_v1 }
 0xdad   : > { %v6366_v7 = vmul.f32 1.442695, %v6318_v47  ;;  %v6368_v25 = vmul.f32 1.442695, %v6319_v43  ;;  %v6320_v6 = vsub.f32 %v14274_v57, %v6265_v14  ;;  %v6321_v4 = vsub.f32 %v14269_v63, %v6265_v14 }
 0xdae   : > { %6424 = vadd.xlane.f32.xlu0 %v6423_v42  ;;  %v6426_v44 = vsel %vm16622_vm1, %v14539_v3, 0.0 }
 0xdaf   : > { %9636 = vpow2.f32 %v6366_v7  ;;  %v6370_v18 = vmul.f32 1.442695, %v6320_v6  ;;  %v6372_v48 = vmul.f32 1.442695, %v6321_v4  ;;  %v6427_v27 = vadd.f32 %v14533_v0, %v6426_v44 }
 0xdb0   : > { %9638 = vpow2.f32 %v6368_v25 }
 0xdb1   : > { %v14547_v11 = vpop.eup %9628  ;;  %9640 = vpow2.f32 %v6370_v18  ;;  %6428 = vadd.xlane.f32.xlu1 %v6427_v27 }
 0xdb2   : > { %v14549_v8 = vpop.eup %9630  ;;  %9642 = vpow2.f32 %v6372_v48  ;;  %v6269_v57 = vpop.xlane.xlu0 %6268 }
 0xdb3   : > { %v14551_v26 = vpop.eup %9632  ;;  %v6322_v63 = vsub.f32 %v14285_v24, %v6269_v57  ;;  %v6323_v5 = vsub.f32 %v14281_v56, %v6269_v57  ;;  %v6430_v22 = vsel %vm16655_vm2, %v14549_v8, 0.0  ;;  %vm16665_vm2 = vmmov %vm16622_vm1 }
 0xdb4   : > { %v14557_v52 = vpop.eup %9634  ;;  %v6273_v47 = vpop.xlane.xlu1 %6272  ;;  %v6431_v43 = vadd.f32 %v14547_v11, %v6430_v22 }
 0xdb5   : > { %v6374_v1 = vmul.f32 1.442695, %v6322_v63  ;;  %v6376_v14 = vmul.f32 1.442695, %v6323_v5  ;;  %v6324_v42 = vsub.f32 %v14296_v41, %v6273_v47  ;;  %v6325_v7 = vsub.f32 %v14291_v51, %v6273_v47 }
 0xdb6   : > { %6432 = vadd.xlane.f32.xlu0 %v6431_v43  ;;  %v6434_v24 = vsel %vm16656_vm4, %v14557_v52, 0.0  ;;  %vm16666_vm4 = vmmov %vm16622_vm1 }
 0xdb7   : > { %9644 = vpow2.f32 %v6374_v1  ;;  %v6378_v56 = vmul.f32 1.442695, %v6324_v42  ;;  %v6380_v25 = vmul.f32 1.442695, %v6325_v7  ;;  %v6435_v6 = vadd.f32 %v14551_v26, %v6434_v24 }
 0xdb8   : > { %9646 = vpow2.f32 %v6376_v14 }
 0xdb9   : > { %v14565_v4 = vpop.eup %9636  ;;  %9648 = vpow2.f32 %v6378_v56  ;;  %6436 = vadd.xlane.f32.xlu1 %v6435_v6 }
 0xdba   : > { %v14567_v44 = vpop.eup %9638  ;;  %9650 = vpow2.f32 %v6380_v25  ;;  %v6277_v41 = vpop.xlane.xlu0 %6276 }
 0xdbb   : > { %v14569_v18 = vpop.eup %9640  ;;  %v6326_v51 = vsub.f32 %v14307_v38, %v6277_v41  ;;  %v6327_v48 = vsub.f32 %v14303_v13, %v6277_v41  ;;  %v6438_v27 = vsel %vm16657_vm5, %v14567_v44, 0.0  ;;  %vm16667_vm5 = vmmov %vm16622_vm1 }
 0xdbc   : > { %v14575_v57 = vpop.eup %9642  ;;  %v6281_v63 = vpop.xlane.xlu1 %6280  ;;  %v6439_v5 = vadd.f32 %v14565_v4, %v6438_v27 }
 0xdbd   : > { %v6382_v22 = vmul.f32 1.442695, %v6326_v51  ;;  %v6384_v47 = vmul.f32 1.442695, %v6327_v48  ;;  %v6328_v43 = vsub.f32 %v14318_v33, %v6281_v63  ;;  %v6329_v1 = vsub.f32 %v14313_v31, %v6281_v63 }
 0xdbe   : > { %6440 = vadd.xlane.f32.xlu0 %v6439_v5  ;;  %v6442_v38 = vsel %vm16658_vm6, %v14575_v57, 0.0  ;;  %vm16668_vm6 = vmmov %vm16622_vm1 }
 0xdbf   : > { %9652 = vpow2.f32 %v6382_v22  ;;  %v6386_v13 = vmul.f32 1.442695, %v6328_v43  ;;  %v6388_v14 = vmul.f32 1.442695, %v6329_v1  ;;  %v6443_v42 = vadd.f32 %v14569_v18, %v6442_v38 }
 0xdc0   : > { %9654 = vpow2.f32 %v6384_v47 }
 0xdc1   : > { %v14583_v7 = vpop.eup %9644  ;;  %9656 = vpow2.f32 %v6386_v13  ;;  %6444 = vadd.xlane.f32.xlu1 %v6443_v42 }
 0xdc2   : > { %v14585_v24 = vpop.eup %9646  ;;  %9658 = vpow2.f32 %v6388_v14  ;;  %v6285_v33 = vpop.xlane.xlu0 %6284 }
 0xdc3   : > { %v14587_v56 = vpop.eup %9648  ;;  %v6330_v31 = vsub.f32 %v14329_v54, %v6285_v33  ;;  %v6331_v25 = vsub.f32 %v14325_v17, %v6285_v33  ;;  %v6446_v6 = vsel %vm16659_vm7, %v14585_v24, 0.0  ;;  %vm16669_vm7 = vmmov %vm16622_vm1 }
 0xdc4   : > { %v14593_v41 = vpop.eup %9650  ;;  %v6289_v51 = vpop.xlane.xlu1 %6288  ;;  %v6447_v48 = vadd.f32 %v14583_v7, %v6446_v6 }
 0xdc5   : > { %v6390_v27 = vmul.f32 1.442695, %v6330_v31  ;;  %v6392_v63 = vmul.f32 1.442695, %v6331_v25  ;;  %v6332_v5 = vsub.f32 %v14340_v37, %v6289_v51  ;;  %v6333_v22 = vsub.f32 %v14335_v9, %v6289_v51 }
 0xdc6   : > { %6448 = vadd.xlane.f32.xlu0 %v6447_v48  ;;  %v6450_v54 = vsel %vm16660_vm8, %v14593_v41, 0.0  ;;  %vm16672_vm8 = vmmov %vm16622_vm1 }
 0xdc7   : > { %9660 = vpow2.f32 %v6390_v27  ;;  %v6394_v17 = vmul.f32 1.442695, %v6332_v5  ;;  %v6396_v47 = vmul.f32 1.442695, %v6333_v22  ;;  %v6451_v43 = vadd.f32 %v14587_v56, %v6450_v54 }
 0xdc8   : > { %9662 = vpow2.f32 %v6392_v63 }
 0xdc9   : > { %v14601_v1 = vpop.eup %9652  ;;  %9664 = vpow2.f32 %v6394_v17  ;;  %6452 = vadd.xlane.f32.xlu1 %v6451_v43 }
 0xdca   : > { %v14603_v38 = vpop.eup %9654  ;;  %9666 = vpow2.f32 %v6396_v47  ;;  %v6293_v37 = vpop.xlane.xlu0 %6292 }
 0xdcb   : > { %v14605_v13 = vpop.eup %9656  ;;  %v6334_v9 = vsub.f32 %v14351_v60, %v6293_v37  ;;  %v6335_v14 = vsub.f32 %v14347_v59, %v6293_v37  ;;  %v6454_v42 = vsel %vm16661_vm9, %v14603_v38, 0.0  ;;  %vm16674_vm9 = vmmov %vm16622_vm1 }
 0xdcc   : > { %v14611_v33 = vpop.eup %9658  ;;  %v6297_v31 = vpop.xlane.xlu1 %6296  ;;  %v6455_v25 = vadd.f32 %v14601_v1, %v6454_v42 }
 0xdcd   : > { %v6398_v6 = vmul.f32 1.442695, %v6334_v9  ;;  %v6400_v51 = vmul.f32 1.442695, %v6335_v14  ;;  %v6336_v48 = vsub.f32 %v14362_v16, %v6297_v31  ;;  %v6337_v27 = vsub.f32 %v14357_v12, %v6297_v31 }
 0xdce   : > { %6456 = vadd.xlane.f32.xlu0 %v6455_v25  ;;  %v6458_v60 = vsel %vm16662_vm15, %v14611_v33, 0.0  ;;  %vm16677_vm15 = vnez %v16570_v46 }
 0xdcf   : > { %9668 = vpow2.f32 %v6398_v6  ;;  %v6402_v59 = vmul.f32 1.442695, %v6336_v48  ;;  %v6404_v63 = vmul.f32 1.442695, %v6337_v27  ;;  %v6459_v5 = vadd.f32 %v14605_v13, %v6458_v60 }
 0xdd0   : > { %9670 = vpow2.f32 %v6400_v51 }
 0xdd1   : > { %v14619_v22 = vpop.eup %9660  ;;  %9672 = vpow2.f32 %v6402_v59  ;;  %6460 = vadd.xlane.f32.xlu1 %v6459_v5 }
 0xdd2   : > { %v14621_v54 = vpop.eup %9662  ;;  %9674 = vpow2.f32 %v6404_v63  ;;  %v6301_v16 = vpop.xlane.xlu0 %6300 }
 0xdd3   : > { %v14623_v17 = vpop.eup %9664  ;;  %v6338_v12 = vsub.f32 %v14373_v34, %v6301_v16  ;;  %v6339_v47 = vsub.f32 %v14369_v53, %v6301_v16  ;;  %v6462_v43 = vsel %vm16663_vm14, %v14621_v54, 0.0  ;;  %vm16681_vm14 = vmmov %vm16622_vm1 }
 0xdd4   : > { %v14629_v37 = vpop.eup %9666  ;;  %v6305_v9 = vpop.xlane.xlu1 %6304  ;;  %v6463_v14 = vadd.f32 %v14619_v22, %v6462_v43 }
 0xdd5   : > { %v6406_v42 = vmul.f32 1.442695, %v6338_v12  ;;  %v6408_v31 = vmul.f32 1.442695, %v6339_v47  ;;  %v6340_v25 = vsub.f32 %v14384_v19, %v6305_v9  ;;  %v6341_v6 = vsub.f32 %v14379_v20, %v6305_v9 }
 0xdd6   : > { %6464 = vadd.xlane.f32.xlu0 %v6463_v14  ;;  %v6466_v34 = vsel %vm16664_vm10, %v14629_v37, 0.0 }
 0xdd7   : > { %9676 = vpow2.f32 %v6406_v42  ;;  %v6410_v53 = vmul.f32 1.442695, %v6340_v25  ;;  %v6412_v51 = vmul.f32 1.442695, %v6341_v6  ;;  %v6467_v48 = vadd.f32 %v14623_v17, %v6466_v34 }
 0xdd8   : > { %9678 = vpow2.f32 %v6408_v31 }
 0xdd9   : > { %v14637_v27 = vpop.eup %9668  ;;  %9680 = vpow2.f32 %v6410_v53  ;;  %6468 = vadd.xlane.f32.xlu1 %v6467_v48 }
 0xdda   : > { %v14639_v60 = vpop.eup %9670  ;;  %9682 = vpow2.f32 %v6412_v51  ;;  %v6915_v19 = vpop.xlane.xlu0 %6914 }
 0xddb   : > { %v14641_v59 = vpop.eup %9672  ;;  %v6984_v20 = vsub.f32 %v14395_v40, %v6915_v19  ;;  %v6985_v63 = vsub.f32 %v14391_v55, %v6915_v19  ;;  %v6470_v5 = vsel %vm16622_vm1, %v14639_v60, 0.0 }
 0xddc   : > { %v14647_v16 = vpop.eup %9674  ;;  %v6919_v12 = vpop.xlane.xlu1 %6918  ;;  %v6471_v47 = vadd.f32 %v14637_v27, %v6470_v5 }
 0xddd   : > { %v7020_v43 = vmul.f32 1.442695, %v6984_v20  ;;  %v7022_v9 = vmul.f32 1.442695, %v6985_v63  ;;  %v6986_v14 = vsub.f32 %v14406_v28, %v6919_v12  ;;  %v6987_v42 = vsub.f32 %v14401_v10, %v6919_v12 }
 0xdde   : > { %6472 = vadd.xlane.f32.xlu0 %v6471_v47  ;;  %v6474_v40 = vsel %vm16665_vm2, %v14647_v16, 0.0  ;;  %vm16688_vm2 = vmmov %vm16622_vm1 }
 0xddf   : > { %9684 = vpow2.f32 %v7020_v43  ;;  %v7024_v55 = vmul.f32 1.442695, %v6986_v14  ;;  %v7026_v31 = vmul.f32 1.442695, %v6987_v42  ;;  %v6475_v25 = vadd.f32 %v14641_v59, %v6474_v40 }
 0xde0   : > { %9686 = vpow2.f32 %v7022_v9 }
 0xde1   : > { %v14655_v6 = vpop.eup %9676  ;;  %9688 = vpow2.f32 %v7024_v55  ;;  %6476 = vadd.xlane.f32.xlu1 %v6475_v25 }
 0xde2   : > { %v14657_v34 = vpop.eup %9678  ;;  %9690 = vpow2.f32 %v7026_v31  ;;  %v6923_v28 = vpop.xlane.xlu0 %6922 }
 0xde3   : > { %v14659_v53 = vpop.eup %9680  ;;  %v6988_v10 = vsub.f32 %v14417_v36, %v6923_v28  ;;  %v6989_v51 = vsub.f32 %v14413_v32, %v6923_v28  ;;  %v6478_v48 = vsel %vm16666_vm4, %v14657_v34, 0.0 }
 0xde4   : > { %v14665_v19 = vpop.eup %9682  ;;  %v6927_v20 = vpop.xlane.xlu1 %6926  ;;  %v6479_v63 = vadd.f32 %v14655_v6, %v6478_v48 }
 0xde5   : > { %v7028_v5 = vmul.f32 1.442695, %v6988_v10  ;;  %v7030_v12 = vmul.f32 1.442695, %v6989_v51  ;;  %v6990_v47 = vsub.f32 %v14428_v58, %v6927_v20  ;;  %v6991_v43 = vsub.f32 %v14423_v39, %v6927_v20 }
 0xde6   : > { %6480 = vadd.xlane.f32.xlu0 %v6479_v63  ;;  %v6482_v36 = vsel %vm16667_vm5, %v14665_v19, 0.0 }
 0xde7   : > { %9692 = vpow2.f32 %v7028_v5  ;;  %v7032_v32 = vmul.f32 1.442695, %v6990_v47  ;;  %v7034_v9 = vmul.f32 1.442695, %v6991_v43  ;;  %v6483_v14 = vadd.f32 %v14659_v53, %v6482_v36 }
 0xde8   : > { %9694 = vpow2.f32 %v7030_v12 }
 0xde9   : > { %v14673_v42 = vpop.eup %9684  ;;  %9696 = vpow2.f32 %v7032_v32  ;;  %6484 = vadd.xlane.f32.xlu1 %v6483_v14 }
 0xdea   : > { %v14675_v40 = vpop.eup %9686  ;;  %9698 = vpow2.f32 %v7034_v9  ;;  %v6931_v58 = vpop.xlane.xlu0 %6930 }
 0xdeb   : > { %v14677_v55 = vpop.eup %9688  ;;  %v6992_v39 = vsub.f32 %v14439_v49, %v6931_v58  ;;  %v6993_v31 = vsub.f32 %v14435_v2, %v6931_v58  ;;  %v7092_v25 = vsel %vm16668_vm6, %v14675_v40, 0.0  ;;  %v6853_v58 = vmul.f32 0.1118034, %v14457_v21  ;;  %vm16695_vm6 = vmmov %vm16622_vm1 }
 0xdec   : > { %v14683_v28 = vpop.eup %9690  ;;  %v6935_v10 = vpop.xlane.xlu1 %6934  ;;  %v7093_v51 = vadd.f32 %v14673_v42, %v7092_v25 }
 0xded   : > { %v7036_v48 = vmul.f32 1.442695, %v6992_v39  ;;  %v7038_v20 = vmul.f32 1.442695, %v6993_v31  ;;  %v6994_v63 = vsub.f32 %v14450_v50, %v6935_v10  ;;  %v6995_v5 = vsub.f32 %v14445_v35, %v6935_v10 }
 0xdee   : > { %7094 = vadd.xlane.f32.xlu0 %v7093_v51  ;;  %v7096_v49 = vsel %vm16669_vm7, %v14683_v28, 0.0  ;;  %v6855_v31 = vmul.f32 0.1118034, %v14461_v23  ;;  %v14713_v51 = vsel %vm16677_vm15, %v6853_v58, -1e+30  ;;  %v16683_v23 = vld [vmem:[#allocation77_spill] sm:$0xff] }
 0xdef   : > { %9700 = vpow2.f32 %v7036_v48  ;;  %v7040_v2 = vmul.f32 1.442695, %v6994_v63  ;;  %v7042_v12 = vmul.f32 1.442695, %v6995_v5  ;;  %v7097_v47 = vadd.f32 %v14677_v55, %v7096_v49  ;;  %v16678_v48 = vld [vmem:[#allocation21_spill] sm:$0xff]  ;;  %v16680_v5 = vld [vmem:[#allocation19_spill] sm:$0xff] }
 0xdf0   : > { %9702 = vpow2.f32 %v7038_v20  ;;  %v6857_v20 = vmul.f32 0.1118034, %v16678_v48  ;;  %v6852_v21 = vmul.f32 0.1118034, %v16680_v5  ;;  %vm16684_vm10 = vnez %v16683_v23  ;;  %v16689_v48 = vld [vmem:[#allocation79_spill] sm:$0xff] }
 0xdf1   : > { %v14691_v43 = vpop.eup %9692  ;;  %9704 = vpow2.f32 %v7040_v2  ;;  %7098 = vadd.xlane.f32.xlu1 %v7097_v47  ;;  %v16686_v47 = vld [vmem:[#allocation24_spill] sm:$0xff]  ;;  %vm16690_vm4 = vnez %v16689_v48 }
 0xdf2   : > { %v14693_v36 = vpop.eup %9694  ;;  %9706 = vpow2.f32 %v7042_v12  ;;  %v14725_v12 = vsel %vm16684_vm10, %v6855_v31, -1e+30  ;;  %v14736_v5 = vsel %vm16690_vm4, %v6857_v20, -1e+30  ;;  %v16700_v20 = vld [vmem:[#allocation28_spill] sm:$0xff]  ;;  %vm16713_vm10 = vmmov %vm16622_vm1 }
 0xdf3   : > { %16670 = vst [vmem:[#allocation38_spill] sm:$0xff] %v14693_v36  ;;  %v14695_v50 = vpop.eup %9696  ;;  %v7100_v35 = vsel %vm16672_vm8, %v14693_v36, 0.0  ;;  %16685 = vst [vmem:[#allocation128_spill] sm:$0xff] %v14725_v12  ;;  %v16697_v36 = vld [vmem:[#allocation81_spill] sm:$0xff]  ;;  %v6863_v48 = vmul.f32 0.1118034, %v16700_v20 }
 0xdf4   : > { %16671 = vst [vmem:[#allocation116_spill] sm:$0xff] %v14695_v50  ;;  %v14699_v32 = vpop.eup %9698  ;;  %v7101_v9 = vadd.f32 %v14691_v43, %v7100_v35  ;;  %v6859_v35 = vmul.f32 0.1118034, %v16686_v47  ;;  %16691 = vst [vmem:[#allocation130_spill] sm:$0xff] %v14736_v5  ;;  %v16693_v47 = vld [vmem:[#allocation76_spill] sm:$0xff]  ;;  %vm16698_vm7 = vnez %v16697_v36  ;;  %v16709_v36 = vld [vmem:[#allocation29_spill] sm:$0xff] }
 0xdf5   : > { %16673 = vst [vmem:[#allocation115_spill] sm:$0xff] %v14699_v32  ;;  %v7104_v14 = vsel %vm16674_vm9, %v14699_v32, 0.0  ;;  %vm16694_vm5 = vnez %v16693_v47  ;;  %vm16704_vm9 = vmmov %vm16622_vm1  ;;  %v16705_v47 = vld [vmem:[#allocation23_spill] sm:$0xff]  ;;  %v16710_v20 = vld [vmem:[#allocation80_spill] sm:$0xff] }
 0xdf6   : > { %7102 = vadd.xlane.f32.xlu0 %v7101_v9  ;;  %v7105_v39 = vadd.f32 %v14695_v50, %v7104_v14  ;;  %v6936_v9 = vsel %vm16622_vm1, %v14713_v51, -inf  ;;  %v16687_v14 = vld [vmem:[#allocation20_spill] sm:$0xff]  ;;  %v16715_v50 = vld [vmem:[#allocation85_spill] sm:$0xff]  ;;  %vm16722_vm4 = vmmov %vm16695_vm6 }
 0xdf7   : > { %v6854_v58 = vmul.f32 0.1118034, %v16687_v14  ;;  %v16696_v14 = vld [vmem:[#allocation18_spill] sm:$0xff]  ;;  %vm16716_vm1 = vnez %v16715_v50  ;;  %v16727_v50 = vld [vmem:[#allocation33_spill] sm:$0xff] }
 0xdf8   : > { %7106 = vadd.xlane.f32.xlu1 %v7105_v39  ;;  %v6856_v32 = vmul.f32 0.1118034, %v16696_v14 }
 0xdf9   : > { %v14707_v25 = vpop.eup %9700 }
 0xdfa   : > { %16675 = vst [vmem:[#allocation3_spill] sm:$0xff] %v14707_v25  ;;  %v14709_v10 = vpop.eup %9702 }
 0xdfb   : > { %16676 = vst [vmem:[#allocation4_spill] sm:$0xff] %v14709_v10  ;;  %v14716_v63 = vpop.eup %9704  ;;  %v7108_v49 = vsel %vm16681_vm14, %v14709_v10, 0.0  ;;  %v16692_v10 = vld [vmem:[#allocation25_spill] sm:$0xff]  ;;  %vm16711_vm14 = vnez %v16710_v20  ;;  %v16723_v20 = vld [vmem:[#allocation27_spill] sm:$0xff] }
 0xdfc   : > { %16679 = vst [vmem:[#allocation41_spill] sm:$0xff] %v14716_v63  ;;  %v14721_v2 = vpop.eup %9706  ;;  %v7109_v46 = vadd.f32 %v14707_v25, %v7108_v49  ;;  %v6861_v23 = vmul.f32 0.1118034, %v16692_v10  ;;  %v14742_v49 = vsel %vm16694_vm5, %v6852_v21, -1e+30  ;;  %v6940_v25 = vsel %vm16695_vm6, %v14725_v12, -inf }
 0xdfd   : > { %16682 = vst [vmem:[#allocation42_spill] sm:$0xff] %v14721_v2  ;;  %v7112_v39 = vsel %vm16688_vm2, %v14721_v2, 0.0  ;;  %v14749_v2 = vsel %vm16698_vm7, %v6859_v35, -1e+30  ;;  %v6937_v10 = vmax.f32 %v14742_v49, %v6936_v9  ;;  %v6944_v21 = vsel %vm16704_vm9, %v14736_v5, -inf  ;;  %v16706_v12 = vld [vmem:[#allocation83_spill] sm:$0xff]  ;;  %vm16731_vm7 = vmmov %vm16722_vm4 }
 0xdfe   : > { %7110 = vadd.xlane.f32.xlu0 %v7109_v46  ;;  %v7113_v31 = vadd.f32 %v14716_v63, %v7112_v39  ;;  %16699 = vst [vmem:[#allocation97_spill] sm:$0xff] %v14749_v2  ;;  %v16701_v46 = vld [vmem:[#allocation78_spill] sm:$0xff]  ;;  %v6858_v63 = vmul.f32 0.1118034, %v16705_v47  ;;  %vm16707_vm15 = vnez %v16706_v12  ;;  %v6865_v35 = vmul.f32 0.1118034, %v16709_v36  ;;  %vm16739_vm9 = vmmov %vm16722_vm4 }
 0xdff   : > { %vm16702_vm8 = vnez %v16701_v46  ;;  %v14762_v14 = vsel %vm16707_vm15, %v6861_v23, -1e+30  ;;  %v14768_v9 = vsel %vm16711_vm14, %v6856_v32, -1e+30  ;;  %v16714_v46 = vld [vmem:[#allocation22_spill] sm:$0xff]  ;;  %v16718_v12 = vld [vmem:[#allocation32_spill] sm:$0xff]  ;;  %vm16746_vm15 = vmmov %vm16722_vm4 }
 0xe00   : > { %7114 = vadd.xlane.f32.xlu1 %v7113_v31  ;;  %v14755_v39 = vsel %vm16702_vm8, %v6854_v58, -1e+30  ;;  %16708 = vst [vmem:[#allocation129_spill] sm:$0xff] %v14762_v14  ;;  %16712 = vst [vmem:[#allocation132_spill] sm:$0xff] %v14768_v9  ;;  %v6948_v58 = vsel %vm16713_vm10, %v14749_v2, -inf  ;;  %v16719_v36 = vld [vmem:[#allocation82_spill] sm:$0xff] }
 0xe01   : > { %16703 = vst [vmem:[#allocation102_spill] sm:$0xff] %v14755_v39  ;;  %v6941_v31 = vmax.f32 %v14755_v39, %v6940_v25  ;;  %v6860_v5 = vmul.f32 0.1118034, %v16714_v46  ;;  %v14775_v47 = vsel %vm16716_vm1, %v6863_v48, -1e+30  ;;  %vm16720_vm2 = vnez %v16719_v36  ;;  %v16724_v39 = vld [vmem:[#allocation91_spill] sm:$0xff]  ;;  %vm16753_vm10 = vmmov %vm16722_vm4 }
 0xe02   : > { %6938 = vmax.xlane.f32.xlu0 %v6937_v10  ;;  %16717 = vst [vmem:[#allocation104_spill] sm:$0xff] %v14775_v47  ;;  %v6867_v23 = vmul.f32 0.1118034, %v16718_v12  ;;  %v6945_v10 = vmax.f32 %v14768_v9, %v6944_v21  ;;  %v14781_v25 = vsel %vm16720_vm2, %v6858_v63, -1e+30  ;;  %v6952_v32 = vsel %vm16722_vm4, %v14762_v14, -inf }
 0xe03   : > { %16721 = vst [vmem:[#allocation112_spill] sm:$0xff] %v14781_v25  ;;  %v6862_v2 = vmul.f32 0.1118034, %v16723_v20  ;;  %vm16725_vm5 = vnez %v16724_v39  ;;  %v6869_v48 = vmul.f32 0.1118034, %v16727_v50  ;;  %v16728_v12 = vld [vmem:[#allocation84_spill] sm:$0xff] }
 0xe04   : > { %6942 = vmax.xlane.f32.xlu1 %v6941_v31  ;;  %v14788_v46 = vsel %vm16725_vm5, %v6865_v35, -1e+30  ;;  %v6949_v31 = vmax.f32 %v14781_v25, %v6948_v58  ;;  %vm16729_vm6 = vnez %v16728_v12  ;;  %v6956_v63 = vsel %vm16731_vm7, %v14775_v47, -inf  ;;  %v16732_v36 = vld [vmem:[#allocation26_spill] sm:$0xff]  ;;  %v16735_v39 = vld [vmem:[#allocation35_spill] sm:$0xff]  ;;  %v16743_v9 = vld [vmem:[#allocation37_spill] sm:$0xff] }
 0xe05   : > { %16726 = vst [vmem:[#allocation106_spill] sm:$0xff] %v14788_v46  ;;  %v14794_v21 = vsel %vm16729_vm6, %v6860_v5, -1e+30  ;;  %v6864_v14 = vmul.f32 0.1118034, %v16732_v36  ;;  %v16736_v50 = vld [vmem:[#allocation87_spill] sm:$0xff]  ;;  %vm16764_vm6 = vmmov %vm16722_vm4 }
 0xe06   : > { %6946 = vmax.xlane.f32.xlu0 %v6945_v10  ;;  %16730 = vst [vmem:[#allocation44_spill] sm:$0xff] %v14794_v21  ;;  %v14801_v20 = vsel %vm16602_vm13, %v6867_v23, -1e+30  ;;  %v6871_v35 = vmul.f32 0.1118034, %v16735_v39  ;;  %v6953_v10 = vmax.f32 %v14794_v21, %v6952_v32  ;;  %vm16737_vm8 = vnez %v16736_v50  ;;  %v16740_v12 = vld [vmem:[#allocation31_spill] sm:$0xff] }
 0xe07   : > { %16734 = vst [vmem:[#allocation43_spill] sm:$0xff] %v14801_v20  ;;  %v14807_v58 = vsel %vm16737_vm8, %v6862_v2, -1e+30  ;;  %v6960_v5 = vsel %vm16739_vm9, %v14788_v46, -inf  ;;  %v6866_v47 = vmul.f32 0.1118034, %v16740_v12 }
 0xe08   : > { %6950 = vmax.xlane.f32.xlu1 %v6949_v31  ;;  %16738 = vst [vmem:[#allocation46_spill] sm:$0xff] %v14807_v58  ;;  %v14814_v36 = vsel %vm16607_vm3, %v6869_v48, -1e+30  ;;  %v6873_v23 = vmul.f32 0.1118034, %v16743_v9  ;;  %v6957_v31 = vmax.f32 %v14807_v58, %v6956_v63  ;;  %v16744_v39 = vld [vmem:[#allocation92_spill] sm:$0xff] }
 0xe09   : > { %16742 = vst [vmem:[#allocation45_spill] sm:$0xff] %v14814_v36  ;;  %vm16745_vm13 = vnez %v16744_v39  ;;  %v6964_v2 = vsel %vm16746_vm15, %v14801_v20, -inf  ;;  %v16747_v50 = vld [vmem:[#allocation30_spill] sm:$0xff]  ;;  %v16748_v21 = vld [vmem:[#allocation101_spill] sm:$0xff]  ;;  %v16750_v25 = vld [vmem:[#allocation39_spill] sm:$0xff] }
 0xe0a   : > { %6954 = vmax.xlane.f32.xlu0 %v6953_v10  ;;  %v14820_v32 = vsel %vm16745_vm13, %v6864_v14, -1e+30  ;;  %v6868_v46 = vmul.f32 0.1118034, %v16747_v50  ;;  %vm16749_vm14 = vnez %v16748_v21  ;;  %v6875_v48 = vmul.f32 0.1118034, %v16750_v25 }
 0xe0b   : > { %v14827_v12 = vsel %vm16749_vm14, %v6871_v35, -1e+30  ;;  %v6961_v10 = vmax.f32 %v14820_v32, %v6960_v5  ;;  %v16751_v9 = vld [vmem:[#allocation95_spill] sm:$0xff]  ;;  %v6968_v14 = vsel %vm16753_vm10, %v14814_v36, -inf  ;;  %v16754_v39 = vld [vmem:[#allocation36_spill] sm:$0xff]  ;;  %v16759_v5 = vld [vmem:[#allocation34_spill] sm:$0xff] }
 0xe0c   : > { %6958 = vmax.xlane.f32.xlu1 %v6957_v31  ;;  %vm16752_vm3 = vnez %v16751_v9  ;;  %v6870_v20 = vmul.f32 0.1118034, %v16754_v39  ;;  %v16755_v58 = vld [vmem:[#allocation107_spill] sm:$0xff]  ;;  %v16757_v35 = vld [vmem:[#allocation100_spill] sm:$0xff]  ;;  %v6872_v25 = vmul.f32 0.1118034, %v16759_v5 }
 0xe0d   : > { %v14833_v63 = vsel %vm16752_vm3, %v6866_v47, -1e+30  ;;  %vm16756_vm1 = vnez %v16755_v58  ;;  %vm16758_vm2 = vnez %v16757_v35  ;;  %v6972_v47 = vsel %vm16722_vm4, %v14827_v12, -inf }
 0xe0e   : > { %v14840_v50 = vsel %vm16756_vm1, %v6873_v23, -1e+30  ;;  %6962 = vmax.xlane.f32.xlu0 %v6961_v10  ;;  %v6965_v21 = vmax.f32 %v14833_v63, %v6964_v2  ;;  %v14845_v31 = vsel %vm16758_vm2, %v6868_v46, -1e+30  ;;  %v14852_v36 = vsel %vm16618_vm12, %v6875_v48, -1e+30  ;;  %vm16767_vm12 = vmmov %vm16722_vm4 }
 0xe0f   : > { %16761 = vst [vmem:[#allocation48_spill] sm:$0xff] %v14852_v36  ;;  %v6969_v58 = vmax.f32 %v14845_v31, %v6968_v14  ;;  %v16762_v23 = vld [vmem:[#allocation103_spill] sm:$0xff]  ;;  %v6976_v46 = vsel %vm16764_vm6, %v14840_v50, -inf  ;;  %v16765_v2 = vld [vmem:[#allocation40_spill] sm:$0xff]  ;;  %v14865_v9 = vsel %vm16616_vm0, %v6872_v25, -1e+30  ;;  %vm16778_vm0 = vmmov %vm16722_vm4 }
 0xe10   : > { %6966 = vmax.xlane.f32.xlu1 %v6965_v21  ;;  %vm16763_vm5 = vnez %v16762_v23  ;;  %v6874_v39 = vmul.f32 0.1118034, %v16765_v2  ;;  %v6980_v48 = vsel %vm16767_vm12, %v14852_v36, -inf  ;;  %v6977_v14 = vmax.f32 %v14865_v9, %v6976_v46  ;;  %vm16785_vm7 = vmmov %vm16778_vm0 }
 0xe11   : > { %v14857_v10 = vsel %vm16763_vm5, %v6870_v20, -1e+30  ;;  %vm16792_vm8 = vmmov %vm16778_vm0 }
 0xe12   : > { %6970 = vmax.xlane.f32.xlu0 %v6969_v58  ;;  %v6973_v35 = vmax.f32 %v14857_v10, %v6972_v47  ;;  %v14872_v21 = vsel %vm16620_vm11, %v6874_v39, -1e+30  ;;  %vm16770_vm11 = vmmov %vm16722_vm4 }
 0xe13   : > { %16769 = vst [vmem:[#allocation47_spill] sm:$0xff] %v14872_v21  ;;  %v6981_v23 = vmax.f32 %v14872_v21, %v6980_v48  ;;  %vm16799_vm9 = vmmov %vm16778_vm0 }
 0xe14   : > { %6974 = vmax.xlane.f32.xlu1 %v6973_v35  ;;  %vm16803_vm13 = vmmov %vm16778_vm0 }
 0xe15   : > { %vm16804_vm15 = vmmov %vm16778_vm0 }
 0xe16   : > { %6978 = vmax.xlane.f32.xlu0 %v6977_v14  ;;  %vm16805_vm14 = vmmov %vm16778_vm0 }
 0xe17   : > { %vm16806_vm3 = vmmov %vm16778_vm0 }
 0xe18   : > { %6982 = vmax.xlane.f32.xlu1 %v6981_v23  ;;  %vm16807_vm10 = vmmov %vm16778_vm0 }
 0xe19   : > { %vm16815_vm1 = vmmov %vm16778_vm0 }
 0xe1a   : > { %vm16827_vm2 = vmmov %vm16778_vm0 }
 0xe1b   : > { %vm16830_vm4 = vmmov %vm16778_vm0 }
 0xe1c   : > { %vm16831_vm5 = vmmov %vm16778_vm0 }
 0xe1d   : > { %vm16832_vm6 = vmmov %vm16778_vm0 }
 0xe1e   : > { %vm16835_vm12 = vmmov %vm16778_vm0 }
 0xe33   : > { %v6417_v58 = vpop.xlane.xlu0 %6416 }
 0xe34   : > { %9708 = vrcp.f32 %v6417_v58 }
 0xe36   : > { %v6421_v47 = vpop.xlane.xlu1 %6420 }
 0xe37   : > { %9710 = vrcp.f32 %v6421_v47 }
 0xe3b   : > { %v6425_v25 = vpop.xlane.xlu0 %6424 }
 0xe3c   : > { %9712 = vrcp.f32 %v6425_v25  ;;  %v16771_v25 = vld [vmem:[#allocation105_spill] sm:$0xff] }
 0xe3e   : > { %v6429_v2 = vpop.xlane.xlu1 %6428  ;;  %v9709_v5 = vpop.eup %9708 }
 0xe3f   : > { %9714 = vrcp.f32 %v6429_v2  ;;  %v6504_v46 = vmul.f32 %v9709_v5, %v14511_v45  ;;  %v6505_v39 = vmul.f32 %v9709_v5, %v14513_v15  ;;  %v16772_v2 = vld [vmem:[#allocation131_spill] sm:$0xff] }
 0xe40   : > { %v16773_v21 = vpack.c.bf16 %v16771_v25, %v16772_v2 }
 0xe41   : > { %v9711_v35 = vpop.eup %9710 }
 0xe42   : > { %v6506_v20 = vmul.f32 %v9711_v35, %v14515_v61  ;;  %v6507_v14 = vmul.f32 %v9711_v35, %v14521_v62  ;;  %v16774_v61 = vmov 0  }
 0xe43   : > { %v6433_v48 = vpop.xlane.xlu0 %6432 }
 0xe44   : > { %v6540_v23 = vpack.c.bf16 %v6506_v20, %v6504_v46  ;;  %v6541_v36 = vpack.c.bf16 %v6507_v14, %v6505_v39  ;;  %9716 = vrcp.f32 %v6433_v48  ;;  %v16775_v20 = vld [vmem:[#allocation113_spill] sm:$0xff]  ;;  %v16776_v39 = vld [vmem:[#allocation114_spill] sm:$0xff] }
 0xe45   : > { %v16777_v14 = vpack.c.bf16 %v16775_v20, %v16776_v39 }
 0xe46   : > { %8620 = vmatprep.mubr.msk.bf16.mxu0 %vm16770_vm11, %v6541_v36  ;;  %v6437_v58 = vpop.xlane.xlu1 %6436  ;;  %v9713_v47 = vpop.eup %9712  ;;  %vm16836_vm11 = vmmov %vm16778_vm0 }
 0xe47   : > { %9718 = vrcp.f32 %v6437_v58  ;;  %6618 = vmatmul.mubr.bf16.vlgmr.msra.gmra.mrb[32].mxu0 %v6540_v23  ;;  %v6508_v15 = vmul.f32 %v9713_v47, %v14529_v30  ;;  %v6509_v5 = vmul.f32 %v9713_v47, %v14531_v29  ;;  %v16780_v29 = vld [vmem:[#allocation110_spill] sm:$0xff] }
 0xe48   : > { %7264 = vmatpush1.bf16.msra.mxu0 %v16773_v21 }
 0xe49   : > { %v9715_v45 = vpop.eup %9714  ;;  %7265 = vmatprep.subr.bf16.mxu0 %v16774_v61 }
 0xe4a   : > { %v6510_v62 = vmul.f32 %v9715_v45, %v14533_v0  ;;  %v6511_v35 = vmul.f32 %v9715_v45, %v14539_v3  ;;  %v16779_v0 = vld [vmem:[#allocation5_spill] sm:$0xff] }
 0xe4b   : > { %v6441_v36 = vpop.xlane.xlu0 %6440  ;;  %v16781_v23 = vpack.c.bf16 %v16779_v0, %v16780_v29  ;;  %v16789_v29 = vld [vmem:[#allocation12_spill] sm:$0xff] }
 0xe4c   : > { %v6542_v46 = vpack.c.bf16 %v6510_v62, %v6508_v15  ;;  %7266 = vmatpush1.bf16.msra.mxu0 %v16777_v14  ;;  %v6543_v48 = vpack.c.bf16 %v6511_v35, %v6509_v5  ;;  %9720 = vrcp.f32 %v6441_v36  ;;  %v16782_v62 = vld [vmem:[#allocation8_spill] sm:$0xff]  ;;  %v16783_v5 = vld [vmem:[#allocation7_spill] sm:$0xff] }
 0xe4d   : > { %7267 = vmatprep.subr.bf16.mxu0 %v16774_v61  ;;  %v16784_v35 = vpack.c.bf16 %v16782_v62, %v16783_v5 }
 0xe4e   : > { %8621 = vmatprep.mubr.msk.bf16.mxu0 %vm16778_vm0, %v6543_v48  ;;  %v6445_v21 = vpop.xlane.xlu1 %6444  ;;  %v9717_v30 = vpop.eup %9716 }
 0xe4f   : > { %9722 = vrcp.f32 %v6445_v21  ;;  %6626 = vmatmul.mubr.bf16.gmra.mrb[36].mxu0 %v6542_v46  ;;  %v6512_v58 = vmul.f32 %v9717_v30, %v14547_v11  ;;  %v6513_v25 = vmul.f32 %v9717_v30, %v14549_v8  ;;  %v16787_v8 = vld [vmem:[#allocation6_spill] sm:$0xff] }
 0xe50   : > { %7268 = vmatpush1.bf16.msra.mxu0 %v16781_v23  ;;  %v16790_v23 = vld [vmem:[#allocation11_spill] sm:$0xff] }
 0xe51   : > { %v9719_v3 = vpop.eup %9718  ;;  %7269 = vmatprep.subr.bf16.mxu0 %v16774_v61 }
 0xe52   : > { %v6514_v47 = vmul.f32 %v9719_v3, %v14551_v26  ;;  %v6515_v2 = vmul.f32 %v9719_v3, %v14557_v52  ;;  %v16786_v26 = vld [vmem:[#allocation9_spill] sm:$0xff]  ;;  %v16791_v3 = vpack.c.bf16 %v16789_v29, %v16790_v23 }
 0xe53   : > { %v6449_v45 = vpop.xlane.xlu0 %6448  ;;  %v16788_v20 = vpack.c.bf16 %v16786_v26, %v16787_v8 }
 0xe54   : > { %v6544_v15 = vpack.c.bf16 %v6514_v47, %v6512_v58  ;;  %7270 = vmatpush1.bf16.msra.mxu0 %v16784_v35  ;;  %v6545_v36 = vpack.c.bf16 %v6515_v2, %v6513_v25  ;;  %9724 = vrcp.f32 %v6449_v45 }
 0xe55   : > { %7271 = vmatprep.subr.bf16.mxu0 %v16774_v61 }
 0xe56   : > { %8622 = vmatprep.mubr.msk.bf16.mxu0 %vm16785_vm7, %v6545_v36  ;;  %v6453_v46 = vpop.xlane.xlu1 %6452  ;;  %v9721_v11 = vpop.eup %9720  ;;  %v16796_v36 = vld [vmem:[#allocation16_spill] sm:$0xff]  ;;  %vm16837_vm7 = vmmov %vm16778_vm0 }
 0xe57   : > { %9726 = vrcp.f32 %v6453_v46  ;;  %6634 = vmatmul.mubr.bf16.gmra.mrb[40].mxu0 %v6544_v15  ;;  %v6516_v39 = vmul.f32 %v9721_v11, %v14565_v4  ;;  %v6517_v48 = vmul.f32 %v9721_v11, %v14567_v44  ;;  %v16794_v44 = vld [vmem:[#allocation10_spill] sm:$0xff]  ;;  %v16797_v46 = vld [vmem:[#allocation15_spill] sm:$0xff] }
 0xe58   : > { %7272 = vmatpush1.bf16.msra.mxu0 %v16788_v20  ;;  %v16798_v11 = vpack.c.bf16 %v16796_v36, %v16797_v46 }
 0xe59   : > { %v9723_v52 = vpop.eup %9722  ;;  %7273 = vmatprep.subr.bf16.mxu0 %v16774_v61 }
 0xe5a   : > { %v6518_v14 = vmul.f32 %v9723_v52, %v14569_v18  ;;  %v6519_v21 = vmul.f32 %v9723_v52, %v14575_v57  ;;  %v16793_v18 = vld [vmem:[#allocation13_spill] sm:$0xff] }
 0xe5b   : > { %v6457_v30 = vpop.xlane.xlu0 %6456  ;;  %v16795_v25 = vpack.c.bf16 %v16793_v18, %v16794_v44 }
 0xe5c   : > { %v6546_v0 = vpack.c.bf16 %v6518_v14, %v6516_v39  ;;  %7274 = vmatpush1.bf16.msra.mxu0 %v16791_v3  ;;  %v6547_v58 = vpack.c.bf16 %v6519_v21, %v6517_v48  ;;  %9728 = vrcp.f32 %v6457_v30 }
 0xe5d   : > { %7275 = vmatprep.subr.bf16.mxu0 %v16774_v61 }
 0xe5e   : > { %8623 = vmatprep.mubr.msk.bf16.mxu0 %vm16792_vm8, %v6547_v58  ;;  %v6461_v47 = vpop.xlane.xlu1 %6460  ;;  %v9725_v4 = vpop.eup %9724  ;;  %vm16838_vm8 = vmmov %vm16778_vm0 }
 0xe5f   : > { %9730 = vrcp.f32 %v6461_v47  ;;  %6642 = vmatmul.mubr.bf16.gmra.mrb[44].mxu0 %v6546_v0  ;;  %v6520_v2 = vmul.f32 %v9725_v4, %v14583_v7  ;;  %v6521_v15 = vmul.f32 %v9725_v4, %v14585_v24  ;;  %v16801_v24 = vld [vmem:[#allocation14_spill] sm:$0xff] }
 0xe60   : > { %7276 = vmatpush1.bf16.msra.mxu0 %v16795_v25 }
 0xe61   : > { %v9727_v57 = vpop.eup %9726  ;;  %7277 = vmatprep.subr.bf16.mxu0 %v16774_v61 }
 0xe62   : > { %v6522_v45 = vmul.f32 %v9727_v57, %v14587_v56  ;;  %v6523_v62 = vmul.f32 %v9727_v57, %v14593_v41  ;;  %v16800_v56 = vld [vmem:[#allocation17_spill] sm:$0xff] }
 0xe63   : > { %v6465_v5 = vpop.xlane.xlu0 %6464  ;;  %v16802_v20 = vpack.c.bf16 %v16800_v56, %v16801_v24 }
 0xe64   : > { %v6548_v35 = vpack.c.bf16 %v6522_v45, %v6520_v2  ;;  %7278 = vmatpush1.bf16.msra.mxu0 %v16798_v11  ;;  %v6549_v26 = vpack.c.bf16 %v6523_v62, %v6521_v15  ;;  %9732 = vrcp.f32 %v6465_v5 }
 0xe65   : > { %7279 = vmatprep.subr.bf16.mxu0 %v16774_v61 }
 0xe66   : > { %8624 = vmatprep.mubr.msk.bf16.mxu0 %vm16799_vm9, %v6549_v26  ;;  %v6469_v8 = vpop.xlane.xlu1 %6468  ;;  %v9729_v7 = vpop.eup %9728  ;;  %vm16839_vm9 = vmmov %vm16778_vm0 }
 0xe67   : > { %9734 = vrcp.f32 %v6469_v8  ;;  %6650 = vmatmul.mubr.bf16.gmra.mrb[48].mxu0 %v6548_v35  ;;  %v6524_v52 = vmul.f32 %v9729_v7, %v14601_v1  ;;  %v6525_v14 = vmul.f32 %v9729_v7, %v14603_v38 }
 0xe68   : > { %7280 = vmatpush1.bf16.msra.mxu0 %v16802_v20 }
 0xe69   : > { %v9731_v41 = vpop.eup %9730 }
 0xe6a   : > { %v6526_v39 = vmul.f32 %v9731_v41, %v14605_v13  ;;  %v6527_v48 = vmul.f32 %v9731_v41, %v14611_v33 }
 0xe6b   : > { %v6473_v21 = vpop.xlane.xlu0 %6472 }
 0xe6c   : > { %v6550_v30 = vpack.c.bf16 %v6526_v39, %v6524_v52  ;;  %v6551_v0 = vpack.c.bf16 %v6527_v48, %v6525_v14  ;;  %9736 = vrcp.f32 %v6473_v21  ;;  %v16808_v14 = vld [vmem:[#allocation116_spill] sm:$0xff]  ;;  %v16809_v21 = vld [vmem:[#allocation38_spill] sm:$0xff] }
 0xe6e   : > { %8625 = vmatprep.mubr.msk.bf16.mxu0 %vm16803_vm13, %v6551_v0  ;;  %v6477_v29 = vpop.xlane.xlu1 %6476  ;;  %v9733_v23 = vpop.eup %9732  ;;  %v16810_v0 = vld [vmem:[#allocation115_spill] sm:$0xff]  ;;  %vm16840_vm13 = vmmov %vm16778_vm0 }
 0xe6f   : > { %9738 = vrcp.f32 %v6477_v29  ;;  %6658 = vmatmul.mubr.bf16.gmra.mrb[52].mxu0 %v6550_v30  ;;  %v6528_v58 = vmul.f32 %v9733_v23, %v14619_v22  ;;  %v6529_v13 = vmul.f32 %v9733_v23, %v14621_v54 }
 0xe71   : > { %v9735_v3 = vpop.eup %9734 }
 0xe72   : > { %v6530_v1 = vmul.f32 %v9735_v3, %v14623_v17  ;;  %v6531_v38 = vmul.f32 %v9735_v3, %v14629_v37 }
 0xe73   : > { %v6481_v33 = vpop.xlane.xlu0 %6480 }
 0xe74   : > { %v6552_v47 = vpack.c.bf16 %v6530_v1, %v6528_v58  ;;  %v6553_v4 = vpack.c.bf16 %v6531_v38, %v6529_v13  ;;  %9740 = vrcp.f32 %v6481_v33  ;;  %v16811_v58 = vld [vmem:[#allocation102_spill] sm:$0xff]  ;;  %v16812_v13 = vld [vmem:[#allocation128_spill] sm:$0xff] }
 0xe76   : > { %8626 = vmatprep.mubr.msk.bf16.mxu0 %vm16804_vm15, %v6553_v4  ;;  %v6485_v18 = vpop.xlane.xlu1 %6484  ;;  %v9737_v44 = vpop.eup %9736  ;;  %vm16841_vm15 = vmmov %vm16778_vm0 }
 0xe77   : > { %9742 = vrcp.f32 %v6485_v18  ;;  %6666 = vmatmul.mubr.bf16.gmra.mrb[56].mxu0 %v6552_v47  ;;  %v6532_v57 = vmul.f32 %v9737_v44, %v14637_v27  ;;  %v6533_v17 = vmul.f32 %v9737_v44, %v14639_v60  ;;  %v16814_v44 = vld [vmem:[#allocation130_spill] sm:$0xff] }
 0xe79   : > { %v9739_v25 = vpop.eup %9738 }
 0xe7a   : > { %v6534_v22 = vmul.f32 %v9739_v25, %v14641_v59  ;;  %v6535_v54 = vmul.f32 %v9739_v25, %v14647_v16 }
 0xe7b   : > { %v7095_v37 = vpop.xlane.xlu0 %7094 }
 0xe7c   : > { %v6554_v2 = vpack.c.bf16 %v6534_v22, %v6532_v57  ;;  %v6555_v45 = vpack.c.bf16 %v6535_v54, %v6533_v17  ;;  %9744 = vrcp.f32 %v7095_v37  ;;  %v16816_v54 = vld [vmem:[#allocation112_spill] sm:$0xff] }
 0xe7e   : > { %8627 = vmatprep.mubr.msk.bf16.mxu0 %vm16805_vm14, %v6555_v45  ;;  %v7099_v15 = vpop.xlane.xlu1 %7098  ;;  %v9741_v62 = vpop.eup %9740  ;;  %vm16842_vm14 = vmmov %vm16778_vm0 }
 0xe7f   : > { %9746 = vrcp.f32 %v7099_v15  ;;  %6674 = vmatmul.mubr.bf16.gmra.mrb[60].mxu0 %v6554_v2  ;;  %v6536_v35 = vmul.f32 %v9741_v62, %v14655_v6  ;;  %v6537_v59 = vmul.f32 %v9741_v62, %v14657_v34  ;;  %v16817_v2 = vld [vmem:[#allocation97_spill] sm:$0xff]  ;;  %v16818_v15 = vld [vmem:[#allocation3_spill] sm:$0xff] }
 0xe81   : > { %v9743_v5 = vpop.eup %9742 }
 0xe82   : > { %v6538_v27 = vmul.f32 %v9743_v5, %v14659_v53  ;;  %v6539_v60 = vmul.f32 %v9743_v5, %v14665_v19 }
 0xe83   : > { %v7103_v16 = vpop.xlane.xlu0 %7102 }
 0xe84   : > { %v6556_v36 = vpack.c.bf16 %v6538_v27, %v6536_v35  ;;  %9748 = vrcp.f32 %v7103_v16  ;;  %v6557_v46 = vpack.c.bf16 %v6539_v60, %v6537_v59  ;;  %v16819_v27 = vld [vmem:[#allocation4_spill] sm:$0xff] }
 0xe85   : > { %v7107_v11 = vpop.xlane.xlu1 %7106 }
 0xe86   : > { %8628 = vmatprep.mubr.msk.bf16.mxu0 %vm16806_vm3, %v6557_v46  ;;  %9750 = vrcp.f32 %v7107_v11  ;;  %v9745_v26 = vpop.eup %9744  ;;  %v16820_v46 = vld [vmem:[#allocation44_spill] sm:$0xff]  ;;  %vm16843_vm3 = vmmov %vm16778_vm0 }
 0xe87   : > { %6682 = vmatmul.mubr.bf16.gmra.mrb[64].mxu0 %v6556_v36  ;;  %v7182_v7 = vmul.f32 %v9745_v26, %v14673_v42  ;;  %v7183_v53 = vmul.f32 %v9745_v26, %v14675_v40  ;;  %v16821_v26 = vld [vmem:[#allocation41_spill] sm:$0xff] }
 0xe89   : > { %v9747_v8 = vpop.eup %9746 }
 0xe8a   : > { %v7184_v6 = vmul.f32 %v9747_v8, %v14677_v55  ;;  %v7185_v34 = vmul.f32 %v9747_v8, %v14683_v28 }
 0xe8b   : > { %v7111_v19 = vpop.xlane.xlu0 %7110 }
 0xe8c   : > { %v7218_v56 = vpack.c.bf16 %v7184_v6, %v7182_v7  ;;  %9752 = vrcp.f32 %v7111_v19  ;;  %v7219_v24 = vpack.c.bf16 %v7185_v34, %v7183_v53  ;;  %v16822_v7 = vld [vmem:[#allocation129_spill] sm:$0xff]  ;;  %v16823_v34 = vld [vmem:[#allocation42_spill] sm:$0xff] }
 0xe8d   : > { %v7115_v20 = vpop.xlane.xlu1 %7114 }
 0xe8e   : > { %v9749_v41 = vpop.eup %9748  ;;  %8629 = vmatprep.mubr.msk.bf16.mxu0 %vm16807_vm10, %v7219_v24  ;;  %9754 = vrcp.f32 %v7115_v20  ;;  %v16824_v24 = vld [vmem:[#allocation46_spill] sm:$0xff]  ;;  %vm16844_vm10 = vmmov %vm16778_vm0 }
 0xe8f   : > { %7296 = vmatmul.mubr.bf16.vlgmr.msra.gmra.mrb[68].mxu0 %v7218_v56  ;;  %v6939_v52 = vpop.xlane.xlu0 %6938  ;;  %v7186_v40 = vmul.f32 %v9749_v41, %v14691_v43  ;;  %v7187_v30 = vmul.f32 %v9749_v41, %v16809_v21  ;;  %v16813_v43 = vld [vmem:[#allocation132_spill] sm:$0xff]  ;;  %v16826_v21 = vld [vmem:[#allocation106_spill] sm:$0xff] }
 0xe90   : > { %v9751_v39 = vpop.eup %9750  ;;  %v6996_v42 = vsub.f32 %v14742_v49, %v6939_v52  ;;  %v6997_v55 = vsub.f32 %v14713_v51, %v6939_v52  ;;  %v16825_v41 = vld [vmem:[#allocation104_spill] sm:$0xff] }
 0xe91   : > { %v7188_v28 = vmul.f32 %v9751_v39, %v16808_v14  ;;  %v6943_v48 = vpop.xlane.xlu1 %6942  ;;  %v7189_v29 = vmul.f32 %v9751_v39, %v16810_v0 }
 0xe92   : > { %v7044_v23 = vmul.f32 1.442695, %v6996_v42  ;;  %v7046_v3 = vmul.f32 1.442695, %v6997_v55  ;;  %v6998_v1 = vsub.f32 %v16811_v58, %v6943_v48  ;;  %v6999_v38 = vsub.f32 %v16812_v13, %v6943_v48  ;;  %v16828_v58 = vld [vmem:[#allocation43_spill] sm:$0xff] }
 0xe93   : > { %v7220_v33 = vpack.c.bf16 %v7188_v28, %v7186_v40  ;;  %v6947_v47 = vpop.xlane.xlu0 %6946  ;;  %v7221_v49 = vpack.c.bf16 %v7189_v29, %v7187_v30 }
 0xe94   : > { %9756 = vpow2.f32 %v7044_v23  ;;  %v7048_v51 = vmul.f32 1.442695, %v6998_v1  ;;  %v7050_v4 = vmul.f32 1.442695, %v6999_v38  ;;  %v7000_v18 = vsub.f32 %v16813_v43, %v6947_v47  ;;  %v16829_v43 = vld [vmem:[#allocation45_spill] sm:$0xff] }
 0xe95   : > { %9758 = vpow2.f32 %v7046_v3  ;;  %v7001_v25 = vsub.f32 %v16814_v44, %v6947_v47  ;;  %8630 = vmatprep.mubr.msk.bf16.mxu0 %vm16815_vm1, %v7221_v49  ;;  %v6951_v57 = vpop.xlane.xlu1 %6950  ;;  %vm16845_vm1 = vmmov %vm16778_vm0 }
 0xe96   : > { %v9753_v22 = vpop.eup %9752  ;;  %9760 = vpow2.f32 %v7048_v51  ;;  %v7052_v17 = vmul.f32 1.442695, %v7000_v18  ;;  %v7002_v37 = vsub.f32 %v16816_v54, %v6951_v57  ;;  %v7003_v45 = vsub.f32 %v16817_v2, %v6951_v57 }
 0xe97   : > { %v7190_v62 = vmul.f32 %v9753_v22, %v16818_v15  ;;  %9762 = vpow2.f32 %v7050_v4  ;;  %v7054_v5 = vmul.f32 1.442695, %v7001_v25  ;;  %7304 = vmatmul.mubr.bf16.gmra.mrb[72].mxu0 %v7220_v33  ;;  %v6955_v35 = vpop.xlane.xlu0 %6954  ;;  %v7191_v59 = vmul.f32 %v9753_v22, %v16819_v27 }
 0xe98   : > { %v9755_v60 = vpop.eup %9754  ;;  %9764 = vpow2.f32 %v7052_v17  ;;  %v7056_v16 = vmul.f32 1.442695, %v7002_v37  ;;  %v7058_v36 = vmul.f32 1.442695, %v7003_v45  ;;  %v7004_v11 = vsub.f32 %v16820_v46, %v6955_v35 }
 0xe99   : > { %v7192_v8 = vmul.f32 %v9755_v60, %v16821_v26  ;;  %9766 = vpow2.f32 %v7054_v5  ;;  %v7005_v6 = vsub.f32 %v16822_v7, %v6955_v35  ;;  %v6959_v53 = vpop.xlane.xlu1 %6958  ;;  %v7193_v19 = vmul.f32 %v9755_v60, %v16823_v34  ;;  %v16834_v26 = vld [vmem:[#allocation48_spill] sm:$0xff] }
 0xe9a   : > { %9768 = vpow2.f32 %v7056_v16  ;;  %v7060_v56 = vmul.f32 1.442695, %v7004_v11  ;;  %v7006_v20 = vsub.f32 %v16824_v24, %v6959_v53  ;;  %v7007_v52 = vsub.f32 %v16825_v41, %v6959_v53  ;;  %v9056_v16 = vld [vmem:[%s15578_s8] ss:$8 sps:$4 sm:$0xff]   ;;  %v9061_v7 = vld [vmem:[%s15578_s8 + $0x14] ss:$8 sps:$4 sm:$0xff]  }
 0xe9b   : > { %v7222_v39 = vpack.c.bf16 %v7192_v8, %v7190_v62  ;;  %9770 = vpow2.f32 %v7058_v36  ;;  %v7062_v42 = vmul.f32 1.442695, %v7005_v6  ;;  %v6963_v55 = vpop.xlane.xlu0 %6962  ;;  %v7223_v40 = vpack.c.bf16 %v7193_v19, %v7191_v59  ;;  %v16833_v11 = vld [vmem:[#allocation47_spill] sm:$0xff] }
 0xe9c   : > { %9772 = vpow2.f32 %v7060_v56  ;;  %v7064_v14 = vmul.f32 1.442695, %v7006_v20  ;;  %v7066_v28 = vmul.f32 1.442695, %v7007_v52  ;;  %v7008_v48 = vsub.f32 %v14820_v32, %v6963_v55  ;;  %v9059_v52 = vld [vmem:[%s15578_s8 + $0x10] ss:$8 sps:$4 sm:$0xff]  }
 0xe9d   : > { %9774 = vpow2.f32 %v7062_v42  ;;  %v7009_v30 = vsub.f32 %v16826_v21, %v6963_v55  ;;  %8631 = vmatprep.mubr.msk.bf16.mxu0 %vm16827_vm2, %v7223_v40  ;;  %v6967_v0 = vpop.xlane.xlu1 %6966  ;;  %vm16846_vm2 = vmmov %vm16778_vm0 }
 0xe9e   : > { %v14984_v29 = vpop.eup %9756  ;;  %9776 = vpow2.f32 %v7064_v14  ;;  %v7068_v23 = vmul.f32 1.442695, %v7008_v48  ;;  %v7010_v3 = vsub.f32 %v14833_v63, %v6967_v0  ;;  %v7011_v1 = vsub.f32 %v16828_v58, %v6967_v0  ;;  %v9064_v58 = vld [vmem:[%s15578_s8 + $0x24] ss:$8 sps:$4 sm:$0xff]  }
 0xe9f   : > { %v14988_v13 = vpop.eup %9758  ;;  %9778 = vpow2.f32 %v7066_v28  ;;  %v7070_v38 = vmul.f32 1.442695, %v7009_v30  ;;  %7312 = vmatmul.mubr.bf16.gmra.mrb[76].mxu0 %v7222_v39  ;;  %v6971_v32 = vpop.xlane.xlu0 %6970 }
 0xea0   : > { %v14990_v33 = vpop.eup %9760  ;;  %9780 = vpow2.f32 %v7068_v23  ;;  %v7072_v47 = vmul.f32 1.442695, %v7010_v3  ;;  %v7074_v49 = vmul.f32 1.442695, %v7011_v1  ;;  %v7012_v51 = vsub.f32 %v14845_v31, %v6971_v32  ;;  %v9062_v3 = vld [vmem:[%s15578_s8 + $0x20] ss:$8 sps:$4 sm:$0xff]  }
 0xea1   : > { %v14993_v4 = vpop.eup %9762  ;;  %9782 = vpow2.f32 %v7070_v38  ;;  %v7013_v63 = vsub.f32 %v16829_v43, %v6971_v32  ;;  %v6975_v18 = vpop.xlane.xlu1 %6974  ;;  %v7116_v44 = vsel %vm16830_vm4, %v14988_v13, 0.0  ;;  %vm16847_vm4 = vmmov %vm16778_vm0 }
 0xea2   : > { %v14998_v25 = vpop.eup %9764  ;;  %9784 = vpow2.f32 %v7072_v47  ;;  %v7076_v57 = vmul.f32 1.442695, %v7012_v51  ;;  %v7014_v22 = vsub.f32 %v14857_v10, %v6975_v18  ;;  %v7015_v17 = vsub.f32 %v14827_v12, %v6975_v18 }
 0xea3   : > { %v15002_v54 = vpop.eup %9766  ;;  %9786 = vpow2.f32 %v7074_v49  ;;  %v7078_v31 = vmul.f32 1.442695, %v7013_v63  ;;  %v7117_v37 = vadd.f32 %v14984_v29, %v7116_v44  ;;  %v6979_v2 = vpop.xlane.xlu0 %6978  ;;  %v7120_v45 = vsel %vm16831_vm5, %v14993_v4, 0.0  ;;  %vm16848_vm5 = vmmov %vm16778_vm0 }
 0xea4   : > { %v15007_v15 = vpop.eup %9768  ;;  %9788 = vpow2.f32 %v7076_v57  ;;  %v7080_v62 = vmul.f32 1.442695, %v7014_v22  ;;  %v7082_v5 = vmul.f32 1.442695, %v7015_v17  ;;  %v7016_v35 = vsub.f32 %v14865_v9, %v6979_v2  ;;  %v9058_v9 = vld [vmem:[%s15578_s8 + $0x4] ss:$8 sps:$4 sm:$0xff]  }
 0xea5   : > { %v15010_v10 = vpop.eup %9770  ;;  %9790 = vpow2.f32 %v7078_v31  ;;  %7118 = vadd.xlane.f32.xlu0 %v7117_v37  ;;  %v7017_v12 = vsub.f32 %v14840_v50, %v6979_v2  ;;  %v7121_v27 = vadd.f32 %v14990_v33, %v7120_v45  ;;  %v6983_v59 = vpop.xlane.xlu1 %6982  ;;  %v7124_v60 = vsel %vm16832_vm6, %v15002_v54, 0.0  ;;  %7546 = vmatprep.subr.bf16.mxu1 %v9058_v9  ;;  %v9067_v37 = vld [vmem:[%s15578_s8 + $0x34] ss:$8 sps:$4 sm:$0xff]   ;;  %v9074_v9 = vld [vmem:[%s15578_s8 + $0x60] ss:$8 sps:$4 sm:$0xff]  }
 0xea6   : > { %v15022_v36 = vpop.eup %9772  ;;  %9792 = vpow2.f32 %v7080_v62  ;;  %v7084_v46 = vmul.f32 1.442695, %v7016_v35  ;;  %v7018_v50 = vsub.f32 %v16833_v11, %v6983_v59  ;;  %v7019_v8 = vsub.f32 %v16834_v26, %v6983_v59  ;;  %7547 = vmatpush1.bf16.msra.mxu1 %v9056_v16  ;;  %v9065_v62 = vld [vmem:[%s15578_s8 + $0x30] ss:$8 sps:$4 sm:$0xff]   ;;  %v9073_v59 = vld [vmem:[%s15578_s8 + $0x54] ss:$8 sps:$4 sm:$0xff]  }
 0xea7   : > { %v15029_v6 = vpop.eup %9774  ;;  %9794 = vpow2.f32 %v7082_v5  ;;  %v7086_v53 = vmul.f32 1.442695, %v7017_v12  ;;  %7122 = vadd.xlane.f32.xlu1 %v7121_v27  ;;  %v7125_v34 = vadd.f32 %v14998_v25, %v7124_v60  ;;  %v7128_v19 = vsel %vm16835_vm12, %v15010_v10, 0.0  ;;  %7548 = vmatprep.subr.bf16.mxu1 %v9061_v7  ;;  %v9070_v12 = vld [vmem:[%s15578_s8 + $0x44] ss:$8 sps:$4 sm:$0xff]  }
 0xea8   : > { %v15034_v56 = vpop.eup %9776  ;;  %9796 = vpow2.f32 %v7084_v46  ;;  %v7088_v24 = vmul.f32 1.442695, %v7018_v50  ;;  %v7090_v20 = vmul.f32 1.442695, %v7019_v8  ;;  %v7129_v41 = vadd.f32 %v15007_v15, %v7128_v19  ;;  %v9068_v27 = vld [vmem:[%s15578_s8 + $0x40] ss:$8 sps:$4 sm:$0xff]  }
 0xea9   : > { %v15040_v39 = vpop.eup %9778  ;;  %9798 = vpow2.f32 %v7086_v53  ;;  %7126 = vadd.xlane.f32.xlu0 %v7125_v34  ;;  %v7132_v42 = vsel %vm16836_vm11, %v15029_v6, 0.0  ;;  %v9071_v60 = vld [vmem:[%s15578_s8 + $0x50] ss:$8 sps:$4 sm:$0xff]   ;;  %v9076_v16 = vld [vmem:[%s15578_s8 + $0x64] ss:$8 sps:$4 sm:$0xff]   ;;  %vm16855_vm6 = vcmask 261120  }
 0xeaa   : > { %v15044_v55 = vpop.eup %9780  ;;  %9800 = vpow2.f32 %v7088_v24  ;;  %v7133_v40 = vadd.f32 %v15022_v36, %v7132_v42  ;;  %v7136_v14 = vsel %vm16778_vm0, %v15040_v39, 0.0  ;;  %7549 = vmatpush1.bf16.msra.mxu1 %v9059_v52  ;;  %v9079_v46 = vld [vmem:[%s15578_s8 + $0x74] ss:$8 sps:$4 sm:$0xff]   ;;  %v9077_v11 = vld [vmem:[%s15578_s8 + $0x70] ss:$8 sps:$4 sm:$0xff]   ;;  %vm16860_vm12 = vmmov %vm16855_vm6 }
 0xeab   : > { %v15049_v28 = vpop.eup %9782  ;;  %9802 = vpow2.f32 %v7090_v20  ;;  %7130 = vadd.xlane.f32.xlu1 %v7129_v41  ;;  %v7137_v48 = vadd.f32 %v15034_v56, %v7136_v14  ;;  %7550 = vmatprep.subr.bf16.mxu1 %v9064_v58  ;;  %v9082_v50 = vld [vmem:[%s15578_s8 + $0x84] ss:$8 sps:$4 sm:$0xff]   ;;  %v9080_v26 = vld [vmem:[%s15578_s8 + $0x80] ss:$8 sps:$4 sm:$0xff]   ;;  %v9085_v8 = vld [vmem:[%s15578_s8 + $0x94] ss:$8 sps:$4 sm:$0xff]  }
 0xeac   : > { %v15052_v21 = vpop.eup %9784  ;;  %v7140_v30 = vsel %vm16837_vm7, %v15049_v28, 0.0  ;;  %v9083_v7 = vld [vmem:[%s15578_s8 + $0x90] ss:$8 sps:$4 sm:$0xff]   ;;  %v9088_v53 = vld [vmem:[%s15578_s8 + $0xa4] ss:$8 sps:$4 sm:$0xff]   ;;  %vm16864_vm11 = vmmov %vm16855_vm6 }
 0xead   : > { %v15056_v0 = vpop.eup %9786  ;;  %7134 = vadd.xlane.f32.xlu0 %v7133_v40  ;;  %v7141_v23 = vadd.f32 %v15044_v55, %v7140_v30  ;;  %v9086_v34 = vld [vmem:[%s15578_s8 + $0xa0] ss:$8 sps:$4 sm:$0xff]   ;;  %v9091_v19 = vld [vmem:[%s15578_s8 + $0xb4] ss:$8 sps:$4 sm:$0xff]   ;;  %v9089_v24 = vld [vmem:[%s15578_s8 + $0xb0] ss:$8 sps:$4 sm:$0xff]  }
 0xeae   : > { %v15065_v1 = vpop.eup %9788  ;;  %v7144_v38 = vsel %vm16838_vm8, %v15056_v0, 0.0  ;;  %7551 = vmatpush1.bf16.msra.mxu1 %v9062_v3  ;;  %v9094_v20 = vld [vmem:[%s15578_s8 + $0xc4] ss:$8 sps:$4 sm:$0xff]   ;;  %v9092_v41 = vld [vmem:[%s15578_s8 + $0xc0] ss:$8 sps:$4 sm:$0xff]   ;;  %vm16871_vm0 = vmmov %vm16855_vm6 }
 0xeaf   : > { %v15069_v32 = vpop.eup %9790  ;;  %7138 = vadd.xlane.f32.xlu1 %v7137_v48  ;;  %v7145_v47 = vadd.f32 %v15052_v21, %v7144_v38  ;;  %7552 = vmatprep.subr.bf16.mxu1 %v9067_v37  ;;  %v9097_v52 = vld [vmem:[%s15578_s8 + $0xd4] ss:$8 sps:$4 sm:$0xff]   ;;  %v9095_v42 = vld [vmem:[%s15578_s8 + $0xd0] ss:$8 sps:$4 sm:$0xff]   ;;  %v9100_v40 = vld [vmem:[%s15578_s8 + $0xe4] ss:$8 sps:$4 sm:$0xff]  }
 0xeb0   : > { %v15072_v49 = vpop.eup %9792  ;;  %v7148_v51 = vsel %vm16839_vm9, %v15069_v32, 0.0  ;;  %v9098_v14 = vld [vmem:[%s15578_s8 + $0xe0] ss:$8 sps:$4 sm:$0xff]   ;;  %v9103_v48 = vld [vmem:[%s15578_s8 + $0xf4] ss:$8 sps:$4 sm:$0xff]   ;;  %vm16876_vm7 = vmmov %vm16871_vm0 }
 0xeb1   : > { %v15076_v43 = vpop.eup %9794  ;;  %7142 = vadd.xlane.f32.xlu0 %v7141_v23  ;;  %v7149_v63 = vadd.f32 %v15065_v1, %v7148_v51  ;;  %v9101_v30 = vld [vmem:[%s15578_s8 + $0xf0] ss:$8 sps:$4 sm:$0xff]   ;;  %v9104_v23 = vld [vmem:[%s15579_s9] ss:$8 sps:$4 sm:$0xff]   ;;  %v9106_v3 = vld [vmem:[%s15579_s9 + $0x4] ss:$8 sps:$4 sm:$0xff]  }
 0xeb2   : > { %v15079_v18 = vpop.eup %9796  ;;  %v7152_v44 = vsel %vm16840_vm13, %v15076_v43, 0.0  ;;  %7553 = vmatpush1.bf16.msra.mxu1 %v9065_v62  ;;  %v9109_v58 = vld [vmem:[%s15579_s9 + $0x14] ss:$8 sps:$4 sm:$0xff]   ;;  %7902 = vmatprep.subr.bf16.mxu0 %v9106_v3  ;;  %v9107_v38 = vld [vmem:[%s15579_s9 + $0x10] ss:$8 sps:$4 sm:$0xff]   ;;  %vm16881_vm8 = vmmov %vm16871_vm0 }
 0xeb3   : > { %v15083_v57 = vpop.eup %9798  ;;  %7146 = vadd.xlane.f32.xlu1 %v7145_v47  ;;  %v7153_v22 = vadd.f32 %v15072_v49, %v7152_v44  ;;  %7554 = vmatprep.subr.bf16.mxu1 %v9070_v12  ;;  %v9112_v47 = vld [vmem:[%s15579_s9 + $0x24] ss:$8 sps:$4 sm:$0xff]   ;;  %v9110_v51 = vld [vmem:[%s15579_s9 + $0x20] ss:$8 sps:$4 sm:$0xff]   ;;  %vm16886_vm9 = vmmov %vm16871_vm0 }
 0xeb4   : > { %v15086_v17 = vpop.eup %9800  ;;  %v7156_v31 = vsel %vm16841_vm15, %v15083_v57, 0.0  ;;  %7903 = vmatpush1.bf16.msra.mxu0 %v9104_v23  ;;  %vm16892_vm13 = vmmov %vm16871_vm0 }
 0xeb5   : > { %v15093_v2 = vpop.eup %9802  ;;  %7150 = vadd.xlane.f32.xlu0 %v7149_v63  ;;  %v7157_v45 = vadd.f32 %v15079_v18, %v7156_v31  ;;  %7904 = vmatprep.subr.bf16.mxu0 %v9109_v58  ;;  %vm16895_vm15 = vmmov %vm16871_vm0 }
 0xeb6   : > { %v7160_v5 = vsel %vm16842_vm14, %v15093_v2, 0.0  ;;  %7555 = vmatpush1.bf16.msra.mxu1 %v9068_v27  ;;  %vm16896_vm14 = vmmov %vm16871_vm0 }
 0xeb7   : > { %7154 = vadd.xlane.f32.xlu1 %v7153_v22  ;;  %v7161_v35 = vadd.f32 %v15086_v17, %v7160_v5  ;;  %7556 = vmatprep.subr.bf16.mxu1 %v9073_v59 }
 0xeb8   : > { %7905 = vmatpush1.bf16.msra.mxu0 %v9107_v38 }
 0xeb9   : > { %7158 = vadd.xlane.f32.xlu0 %v7157_v45  ;;  %7906 = vmatprep.subr.bf16.mxu0 %v9112_v47 }
 0xeba   : > { %7557 = vmatpush1.bf16.msra.mxu1 %v9071_v60 }
 0xebb   : > { %7162 = vadd.xlane.f32.xlu1 %v7161_v35  ;;  %7558 = vmatprep.subr.bf16.mxu1 %v9076_v16 }
 0xebc   : > { %7907 = vmatpush1.bf16.msra.mxu0 %v9110_v51 }
 0xebe   : > { %7559 = vmatpush1.bf16.msra.mxu1 %v9074_v9 }
 0xebf   : > { %7560 = vmatprep.subr.bf16.mxu1 %v9079_v46 }
 0xec2   : > { %7561 = vmatpush1.bf16.msra.mxu1 %v9077_v11 }
 0xec3   : > { %7562 = vmatprep.subr.bf16.mxu1 %v9082_v50 }
 0xec6   : > { %7563 = vmatpush1.bf16.msra.mxu1 %v9080_v26 }
 0xec7   : > { %7564 = vmatprep.subr.bf16.mxu1 %v9085_v8 }
 0xeca   : > { %7565 = vmatpush1.bf16.msra.mxu1 %v9083_v7 }
 0xecb   : > { %7566 = vmatprep.subr.bf16.mxu1 %v9088_v53 }
 0xece   : > { %7567 = vmatpush1.bf16.msra.mxu1 %v9086_v34 }
 0xecf   : > { %7568 = vmatprep.subr.bf16.mxu1 %v9091_v19 }
 0xed2   : > { %7569 = vmatpush1.bf16.msra.mxu1 %v9089_v24 }
 0xed3   : > { %7570 = vmatprep.subr.bf16.mxu1 %v9094_v20 }
 0xed6   : > { %7571 = vmatpush1.bf16.msra.mxu1 %v9092_v41 }
 0xed7   : > { %7572 = vmatprep.subr.bf16.mxu1 %v9097_v52 }
 0xeda   : > { %7573 = vmatpush1.bf16.msra.mxu1 %v9095_v42 }
 0xedb   : > { %7574 = vmatprep.subr.bf16.mxu1 %v9100_v40 }
 0xede   : > { %7575 = vmatpush1.bf16.msra.mxu1 %v9098_v14 }
 0xedf   : > { %7576 = vmatprep.subr.bf16.mxu1 %v9103_v48 }
 0xee2   : > { %7577 = vmatpush1.bf16.msra.mxu1 %v9101_v30 }
 0xee3   : > { %8172 = vmatprep.subr.bf16.mxu1 %v16774_v61 }
 0xf1a   : > { %v15193_v63 = vpop.f32.mrb[32].mxu0 }
 0xf1b   : > { %v6621_v44 = vpop.f32.mrb[33].mxu0 }
 0xf1c   : > { %v15195_v22 = vpop.f32.mrb[34].mxu0 }
 0xf1d   : > { %v7368_v31 = vpack.c.bf16 %v15195_v22, %v15193_v63  ;;  %v6624_v37 = vpop.f32.mrb[35].mxu0  ;;  %v9115_v22 = vld [vmem:[%s15579_s9 + $0x34] ss:$8 sps:$4 sm:$0xff]  }
 0xf1e   : > { %7908 = vmatprep.subr.bf16.mxu0 %v9115_v22 }
 0xf22   : > { %v15199_v45 = vpop.f32.mrb[36].mxu0 }
 0xf23   : > { %v6629_v62 = vpop.f32.mrb[37].mxu0 }
 0xf24   : > { %v15201_v5 = vpop.f32.mrb[38].mxu0 }
 0xf25   : > { %v7370_v35 = vpack.c.bf16 %v15201_v5, %v15199_v45  ;;  %v6632_v12 = vpop.f32.mrb[39].mxu0  ;;  %v9118_v45 = vld [vmem:[%s15579_s9 + $0x44] ss:$8 sps:$4 sm:$0xff]   ;;  %v9119_v5 = vld [vmem:[%s15579_s9 + $0x50] ss:$8 sps:$4 sm:$0xff]  }
 0xf2a   : > { %v15205_v27 = vpop.f32.mrb[40].mxu0 }
 0xf2b   : > { %v6637_v59 = vpop.f32.mrb[41].mxu0 }
 0xf2c   : > { %v15207_v60 = vpop.f32.mrb[42].mxu0 }
 0xf2d   : > { %v7372_v16 = vpack.c.bf16 %v15207_v60, %v15205_v27  ;;  %v6640_v9 = vpop.f32.mrb[43].mxu0  ;;  %v9122_v27 = vld [vmem:[%s15579_s9 + $0x60] ss:$8 sps:$4 sm:$0xff]   ;;  %v9124_v60 = vld [vmem:[%s15579_s9 + $0x64] ss:$8 sps:$4 sm:$0xff]  }
 0xf32   : > { %v7119_v46 = vpop.xlane.xlu0 %7118  ;;  %v15211_v11 = vpop.f32.mrb[44].mxu0 }
 0xf33   : > { %9804 = vrcp.f32 %v7119_v46  ;;  %v6645_v50 = vpop.f32.mrb[45].mxu0 }
 0xf34   : > { %v7123_v26 = vpop.xlane.xlu1 %7122  ;;  %v15213_v8 = vpop.f32.mrb[46].mxu0 }
 0xf35   : > { %9806 = vrcp.f32 %v7123_v26  ;;  %v7374_v7 = vpack.c.bf16 %v15213_v8, %v15211_v11  ;;  %v6648_v53 = vpop.f32.mrb[47].mxu0 }
 0xf36   : > { %v7127_v34 = vpop.xlane.xlu0 %7126 }
 0xf37   : > { %9808 = vrcp.f32 %v7127_v34 }
 0xf38   : > { %v7131_v19 = vpop.xlane.xlu1 %7130 }
 0xf39   : > { %9810 = vrcp.f32 %v7131_v19 }
 0xf3a   : > { %v7135_v24 = vpop.xlane.xlu0 %7134  ;;  %v15217_v20 = vpop.f32.mrb[48].mxu0 }
 0xf3b   : > { %v6653_v41 = vpop.f32.mrb[49].mxu0  ;;  %9812 = vrcp.f32 %v7135_v24 }
 0xf3c   : > { %v7139_v52 = vpop.xlane.xlu1 %7138  ;;  %v15219_v42 = vpop.f32.mrb[50].mxu0 }
 0xf3d   : > { %v9805_v40 = vpop.eup %9804  ;;  %9814 = vrcp.f32 %v7139_v52  ;;  %v7376_v14 = vpack.c.bf16 %v15219_v42, %v15217_v20  ;;  %v6656_v48 = vpop.f32.mrb[51].mxu0 }
 0xf3e   : > { %v7194_v23 = vmul.f32 %v9805_v40, %v14984_v29  ;;  %v7195_v38 = vmul.f32 %v9805_v40, %v14988_v13  ;;  %v7143_v37 = vpop.xlane.xlu0 %7142 }
 0xf3f   : > { %v9807_v30 = vpop.eup %9806 }
 0xf40   : > { %v7196_v3 = vmul.f32 %v9807_v30, %v14990_v33  ;;  %v7147_v58 = vpop.xlane.xlu1 %7146  ;;  %v7197_v47 = vmul.f32 %v9807_v30, %v14993_v4 }
 0xf41   : > { %v9809_v51 = vpop.eup %9808  ;;  %9816 = vrcp.f32 %v7147_v58 }
 0xf42   : > { %v7224_v44 = vpack.c.bf16 %v7196_v3, %v7194_v23  ;;  %v15227_v62 = vpop.f32.mrb[52].mxu0  ;;  %v7225_v12 = vpack.c.bf16 %v7197_v47, %v7195_v38  ;;  %v7199_v29 = vmul.f32 %v9809_v51, %v15002_v54  ;;  %9818 = vrcp.f32 %v7143_v37  ;;  %v7151_v41 = vpop.xlane.xlu0 %7150 }
 0xf43   : > { %v9811_v59 = vpop.eup %9810  ;;  %v6661_v9 = vpop.f32.mrb[53].mxu0  ;;  %v7198_v54 = vmul.f32 %v9809_v51, %v14998_v25 }
 0xf44   : > { %8632 = vmatprep.mubr.msk.bf16.mxu0 %vm16843_vm3, %v7225_v12  ;;  %v15230_v46 = vpop.f32.mrb[54].mxu0  ;;  %v7201_v33 = vmul.f32 %v9811_v59, %v15010_v10  ;;  %v7200_v34 = vmul.f32 %v9811_v59, %v15007_v15  ;;  %v7155_v19 = vpop.xlane.xlu1 %7154  ;;  %vm16897_vm3 = vmmov %vm16871_vm0 }
 0xf45   : > { %7320 = vmatmul.mubr.bf16.gmra.mrb[80].mxu0 %v7224_v44  ;;  %v7378_v13 = vpack.c.bf16 %v15230_v46, %v15227_v62  ;;  %v6664_v4 = vpop.f32.mrb[55].mxu0  ;;  %v9813_v50 = vpop.eup %9812  ;;  %9820 = vrcp.f32 %v7155_v19  ;;  %v16849_v62 = vld [vmem:[#allocation117_spill] sm:$0xff] }
 0xf46   : > { %v7227_v26 = vpack.c.bf16 %v7201_v33, %v7199_v29  ;;  %v7203_v52 = vmul.f32 %v9813_v50, %v15029_v6  ;;  %v7226_v40 = vpack.c.bf16 %v7200_v34, %v7198_v54  ;;  %9822 = vrcp.f32 %v7151_v41  ;;  %v7159_v51 = vpop.xlane.xlu0 %7158 }
 0xf47   : > { %v9815_v53 = vpop.eup %9814  ;;  %v7202_v47 = vmul.f32 %v9813_v50, %v15022_v36 }
 0xf48   : > { %8633 = vmatprep.mubr.msk.bf16.mxu0 %vm16844_vm10, %v7227_v26  ;;  %v7205_v24 = vmul.f32 %v9815_v53, %v15040_v39  ;;  %v7204_v58 = vmul.f32 %v9815_v53, %v15034_v56  ;;  %v7163_v38 = vpop.xlane.xlu1 %7162  ;;  %vm16898_vm10 = vmmov %vm16871_vm0 }
 0xf49   : > { %9824 = vrcp.f32 %v7163_v38 }
 0xf4a   : > { %v15240_v10 = vpop.f32.mrb[56].mxu0  ;;  %v7229_v23 = vpack.c.bf16 %v7205_v24, %v7203_v52  ;;  %v7228_v12 = vpack.c.bf16 %v7204_v58, %v7202_v47  ;;  %9826 = vrcp.f32 %v7159_v51 }
 0xf4b   : > { %v6669_v48 = vpop.f32.mrb[57].mxu0  ;;  %v9817_v3 = vpop.eup %9816 }
 0xf4c   : > { %v15243_v30 = vpop.f32.mrb[58].mxu0  ;;  %v9819_v25 = vpop.eup %9818  ;;  %v7209_v6 = vmul.f32 %v9817_v3, %v15056_v0  ;;  %v7208_v4 = vmul.f32 %v9817_v3, %v15052_v21 }
 0xf4d   : > { %7328 = vmatmul.mubr.bf16.gmra.mrb[84].mxu0 %v7226_v40  ;;  %v7380_v15 = vpack.c.bf16 %v15243_v30, %v15240_v10  ;;  %v6672_v39 = vpop.f32.mrb[59].mxu0  ;;  %v7207_v37 = vmul.f32 %v9819_v25, %v15049_v28  ;;  %v7206_v50 = vmul.f32 %v9819_v25, %v15044_v55  ;;  %v16851_v30 = vld [vmem:[#allocation119_spill] sm:$0xff] }
 0xf4e   : > { %8634 = vmatprep.mubr.msk.bf16.mxu0 %vm16845_vm1, %v7229_v23 }
 0xf4f   : > { %v7231_v29 = vpack.c.bf16 %v7209_v6, %v7207_v37  ;;  %v9821_v33 = vpop.eup %9820  ;;  %v7230_v34 = vpack.c.bf16 %v7208_v4, %v7206_v50  ;;  %v9128_v4 = vld [vmem:[%s15579_s9 + $0x80] ss:$8 sps:$4 sm:$0xff]   ;;  %v9131_v50 = vld [vmem:[%s15579_s9 + $0x90] ss:$8 sps:$4 sm:$0xff]  }
 0xf50   : > { %v9823_v36 = vpop.eup %9822  ;;  %v7213_v28 = vmul.f32 %v9821_v33, %v15076_v43  ;;  %v7212_v55 = vmul.f32 %v9821_v33, %v15072_v49 }
 0xf51   : > { %v7211_v53 = vmul.f32 %v9823_v36, %v15069_v32  ;;  %v7210_v32 = vmul.f32 %v9823_v36, %v15065_v1  ;;  %v9130_v36 = vld [vmem:[%s15579_s9 + $0x84] ss:$8 sps:$4 sm:$0xff]  }
 0xf52   : > { %v15251_v44 = vpop.f32.mrb[60].mxu0 }
 0xf53   : > { %v6677_v59 = vpop.f32.mrb[61].mxu0  ;;  %v7233_v54 = vpack.c.bf16 %v7213_v28, %v7211_v53  ;;  %v9825_v41 = vpop.eup %9824  ;;  %v7232_v3 = vpack.c.bf16 %v7212_v55, %v7210_v32  ;;  %v9133_v28 = vld [vmem:[%s15579_s9 + $0x94] ss:$8 sps:$4 sm:$0xff]  }
 0xf54   : > { %v15254_v9 = vpop.f32.mrb[62].mxu0  ;;  %v9827_v21 = vpop.eup %9826  ;;  %v7217_v43 = vmul.f32 %v9825_v41, %v15093_v2  ;;  %v7216_v47 = vmul.f32 %v9825_v41, %v15086_v17 }
 0xf55   : > { %7336 = vmatmul.mubr.bf16.gmra.mrb[88].mxu0 %v7228_v12  ;;  %v7382_v56 = vpack.c.bf16 %v15254_v9, %v15251_v44  ;;  %v6680_v0 = vpop.f32.mrb[63].mxu0  ;;  %v7215_v23 = vmul.f32 %v9827_v21, %v15083_v57  ;;  %v7214_v1 = vmul.f32 %v9827_v21, %v15079_v18  ;;  %v9113_v18 = vld [vmem:[%s15579_s9 + $0x30] ss:$8 sps:$4 sm:$0xff]  }
 0xf56   : > { %8635 = vmatprep.mubr.msk.bf16.mxu0 %vm16846_vm2, %v7231_v29  ;;  %7909 = vmatpush1.bf16.msra.mxu0 %v9113_v18  ;;  %v9127_v0 = vld [vmem:[%s15579_s9 + $0x74] ss:$8 sps:$4 sm:$0xff]  }
 0xf57   : > { %v7235_v58 = vpack.c.bf16 %v7217_v43, %v7215_v23  ;;  %v7234_v57 = vpack.c.bf16 %v7216_v47, %v7214_v1  ;;  %7910 = vmatprep.subr.bf16.mxu0 %v9118_v45 }
 0xf5a   : > { %v15262_v26 = vpop.f32.mrb[64].mxu0 }
 0xf5b   : > { %v6685_v19 = vpop.f32.mrb[65].mxu0 }
 0xf5c   : > { %v15265_v24 = vpop.f32.mrb[66].mxu0 }
 0xf5d   : > { %7344 = vmatmul.mubr.bf16.gmra.mrb[92].mxu0 %v7230_v34  ;;  %v7384_v52 = vpack.c.bf16 %v15265_v24, %v15262_v26  ;;  %v6688_v40 = vpop.f32.mrb[67].mxu0 }
 0xf5e   : > { %8636 = vmatprep.mubr.msk.bf16.mxu0 %vm16847_vm4, %v7233_v54 }
 0xf62   : > { %v7297_v48 = vpop.f32.mrb[68].mxu0 }
 0xf63   : > { %v7299_v39 = vpop.f32.mrb[69].mxu0 }
 0xf64   : > { %v7300_v25 = vpop.f32.mrb[70].mxu0 }
 0xf65   : > { %7352 = vmatmul.mubr.bf16.gmra.mrb[96].mxu0 %v7232_v3  ;;  %v7369_v38 = vpack.c.bf16 %v7300_v25, %v7297_v48  ;;  %v7302_v6 = vpop.f32.mrb[71].mxu0 }
 0xf66   : > { %8637 = vmatprep.mubr.msk.bf16.mxu0 %vm16848_vm5, %v7235_v58 }
 0xf67   : > { %7578 = vmatprep.mubr.bf16.mxu1 %v7369_v38 }
 0xf68   : > { %7579 = vmatmul.mubr.bf16.vlgmr.msra.gmra.mrb[40].mxu1 %v7368_v31  ;;  %v9116_v31 = vld [vmem:[%s15579_s9 + $0x40] ss:$8 sps:$4 sm:$0xff]  }
 0xf69   : > { %7911 = vmatpush1.bf16.msra.mxu0 %v9116_v31 }
 0xf6a   : > { %v7305_v49 = vpop.f32.mrb[72].mxu0 }
 0xf6b   : > { %v7307_v2 = vpop.f32.mrb[73].mxu0 }
 0xf6c   : > { %v7308_v51 = vpop.f32.mrb[74].mxu0 }
 0xf6d   : > { %7360 = vmatmul.mubr.bf16.gmra.mrb[100].mxu0 %v7234_v57  ;;  %v7371_v37 = vpack.c.bf16 %v7308_v51, %v7305_v49  ;;  %v7310_v12 = vpop.f32.mrb[75].mxu0  ;;  %v16850_v57 = vld [vmem:[#allocation49_spill] sm:$0xff]  ;;  %v15354_v51 = vld [vmem:[%s15583_s13] sm:$0xff] }
 0xf6e   : > { %v16852_v12 = vld [vmem:[#allocation118_spill] sm:$0xff] }
 0xf6f   : > { %7588 = vmatprep.mubr.bf16.mxu1 %v7371_v37  ;;  %v15358_v37 = vrot.slane %v15354_v51, %v16850_v57 }
 0xf70   : > { %7589 = vmatmul.mubr.bf16.gmra.mrb[44].mxu1 %v7370_v35  ;;  %v9121_v35 = vld [vmem:[%s15579_s9 + $0x54] ss:$8 sps:$4 sm:$0xff]  }
 0xf71   : > { %7912 = vmatprep.subr.bf16.mxu0 %v9121_v35 }
 0xf72   : > { %v7313_v17 = vpop.f32.mrb[76].mxu0  ;;  %7913 = vmatpush1.bf16.msra.mxu0 %v9119_v5 }
 0xf73   : > { %v7315_v59 = vpop.f32.mrb[77].mxu0  ;;  %7914 = vmatprep.subr.bf16.mxu0 %v9124_v60 }
 0xf74   : > { %v7316_v29 = vpop.f32.mrb[78].mxu0 }
 0xf75   : > { %v7373_v33 = vpack.c.bf16 %v7316_v29, %v7313_v17  ;;  %v7318_v63 = vpop.f32.mrb[79].mxu0  ;;  %v16853_v29 = vld [vmem:[#allocation120_spill] sm:$0xff] }
 0xf76   : > { %7915 = vmatpush1.bf16.msra.mxu0 %v9122_v27 }
 0xf77   : > { %7598 = vmatprep.mubr.bf16.mxu1 %v7373_v33  ;;  %7916 = vmatprep.subr.bf16.mxu0 %v9127_v0  ;;  %v16854_v0 = vld [vmem:[#allocation121_spill] sm:$0xff] }
 0xf78   : > { %7599 = vmatmul.mubr.bf16.gmra.mrb[48].mxu1 %v7372_v16  ;;  %v9125_v16 = vld [vmem:[%s15579_s9 + $0x70] ss:$8 sps:$4 sm:$0xff]  }
 0xf7a   : > { %7917 = vmatpush1.bf16.msra.mxu0 %v9125_v16 }
 0xf7b   : > { %7918 = vmatprep.subr.bf16.mxu0 %v9130_v36 }
 0xf7e   : > { %7919 = vmatpush1.bf16.msra.mxu0 %v9128_v4 }
 0xf7f   : > { %7920 = vmatprep.subr.bf16.mxu0 %v9133_v28  ;;  %v16856_v28 = vld [vmem:[#allocation123_spill] sm:$0xff] }
 0xf82   : > { %7921 = vmatpush1.bf16.msra.mxu0 %v9131_v50 }
0x1018   : > { %v7321_v53 = vpop.f32.mrb[80].mxu0 }
0x1019   : > { %v7323_v34 = vpop.f32.mrb[81].mxu0 }
0x101a   : > { %v7324_v19 = vpop.f32.mrb[82].mxu0 }
0x101b   : > { %v7375_v54 = vpack.c.bf16 %v7324_v19, %v7321_v53  ;;  %v7326_v41 = vpop.f32.mrb[83].mxu0  ;;  %v16857_v53 = vld [vmem:[#allocation122_spill] sm:$0xff] }
0x101d   : > { %7608 = vmatprep.mubr.bf16.mxu1 %v7375_v54  ;;  %v16858_v54 = vld [vmem:[#allocation124_spill] sm:$0xff] }
0x101e   : > { %7609 = vmatmul.mubr.bf16.gmra.mrb[52].mxu1 %v7374_v7 }
0x1020   : > { %v7329_v40 = vpop.f32.mrb[84].mxu0 }
0x1021   : > { %v7331_v21 = vpop.f32.mrb[85].mxu0 }
0x1022   : > { %v7332_v55 = vpop.f32.mrb[86].mxu0 }
0x1023   : > { %v7377_v43 = vpack.c.bf16 %v7332_v55, %v7329_v40  ;;  %v7334_v32 = vpop.f32.mrb[87].mxu0 }
0x1025   : > { %7618 = vmatprep.mubr.bf16.mxu1 %v7377_v43 }
0x1026   : > { %7619 = vmatmul.mubr.bf16.gmra.mrb[56].mxu1 %v7376_v14 }
0x1028   : > { %v7337_v48 = vpop.f32.mrb[88].mxu0 }
0x1029   : > { %v7339_v23 = vpop.f32.mrb[89].mxu0 }
0x102a   : > { %v7340_v3 = vpop.f32.mrb[90].mxu0 }
0x102b   : > { %v7379_v39 = vpack.c.bf16 %v7340_v3, %v7337_v48  ;;  %v7342_v25 = vpop.f32.mrb[91].mxu0  ;;  %v16859_v48 = vld [vmem:[#allocation125_spill] sm:$0xff] }
0x102d   : > { %7628 = vmatprep.mubr.bf16.mxu1 %v7379_v39  ;;  %v16861_v39 = vld [vmem:[#allocation51_spill] sm:$0xff] }
0x102e   : > { %7629 = vmatmul.mubr.bf16.gmra.mrb[60].mxu1 %v7378_v13  ;;  %v15344_v13 = vld [vmem:[%s15583_s13 + $0x8] sm:$0xff] }
0x102f   : > { %v15348_v2 = vrot.slane %v15344_v13, %v16850_v57  ;;  %v9137_v57 = vld [vmem:[%s15582_s12 + $0x18] sm:$0xff]  }
0x1030   : > { %v7345_v11 = vpop.f32.mrb[92].mxu0 }
0x1031   : > { %v7347_v8 = vpop.f32.mrb[93].mxu0 }
0x1032   : > { %v7348_v7 = vpop.f32.mrb[94].mxu0 }
0x1033   : > { %v7381_v58 = vpack.c.bf16 %v7348_v7, %v7345_v11  ;;  %v7350_v38 = vpop.f32.mrb[95].mxu0  ;;  %v16862_v11 = vld [vmem:[#allocation126_spill] sm:$0xff] }
0x1035   : > { %7638 = vmatprep.mubr.bf16.mxu1 %v7381_v58  ;;  %v16863_v58 = vld [vmem:[#allocation52_spill] sm:$0xff] }
0x1036   : > { %7639 = vmatmul.mubr.bf16.gmra.mrb[64].mxu1 %v7380_v15 }
0x1038   : > { %v7353_v20 = vpop.f32.mrb[96].mxu0 }
0x1039   : > { %v7355_v42 = vpop.f32.mrb[97].mxu0 }
0x103a   : > { %v7356_v14 = vpop.f32.mrb[98].mxu0 }
0x103b   : > { %v7383_v6 = vpack.c.bf16 %v7356_v14, %v7353_v20  ;;  %v7358_v47 = vpop.f32.mrb[99].mxu0  ;;  %v7580_v1 = vpop.f32.mrb[40].mxu1 }
0x103c   : > { %v7582_v49 = vpop.f32.mrb[41].mxu1  ;;  %v7669_v15 = vadd.f32 %v7580_v1, %v16851_v30  ;;  %v9139_v30 = vld [vmem:[%s15582_s12 + $0x28] sm:$0xff]  }
0x103d   : > { %7648 = vmatprep.mubr.bf16.mxu1 %v7383_v6  ;;  %v7670_v46 = vadd.f32 %v7582_v49, %v16849_v62  ;;  %v7584_v10 = vpop.f32.mrb[42].mxu1  ;;  %v9134_v49 = vld [vmem:[%s15582_s12] sm:$0xff]   ;;  %v9135_v62 = vld [vmem:[%s15582_s12 + $0x8] sm:$0xff]  }
0x103e   : > { %7649 = vmatmul.mubr.bf16.gmra.mrb[68].mxu1 %v7382_v56  ;;  %v7671_v17 = vadd.f32 %v7584_v10, %v16852_v12  ;;  %v7586_v59 = vpop.f32.mrb[43].mxu1  ;;  %v15375_v5 = vadd.f32 %v15358_v37, %v7669_v15  ;;  %v9138_v10 = vld [vmem:[%s15582_s12 + $0x20] sm:$0xff]   ;;  %v9140_v15 = vld [vmem:[%s15582_s12 + $0x30] sm:$0xff]   ;;  %v9141_v12 = vld [vmem:[%s15582_s12 + $0x38] sm:$0xff]  }
0x103f   : > { %v7672_v33 = vadd.f32 %v7586_v59, %v16853_v29  ;;  %v15369_v22 = vadd.f32 %v15348_v2, %v7670_v46  ;;  %8173 = vmatpush1.bf16.msra.mxu1 %v9134_v49  ;;  %v9136_v46 = vld [vmem:[%s15582_s12 + $0x10] sm:$0xff]   ;;  %v9143_v59 = vld [vmem:[%s15582_s12 + $0x48] sm:$0xff]  }
0x1040   : > { %v15366_v63 = vadd.f32 %v15358_v37, %v7671_v17  ;;  %v7361_v18 = vpop.f32.mrb[100].mxu0  ;;  %8174 = vmatprep.subr.bf16.mxu1 %v16774_v61  ;;  %v9142_v17 = vld [vmem:[%s15582_s12 + $0x40] sm:$0xff]  }
0x1041   : > { %v15372_v31 = vadd.f32 %v15348_v2, %v7672_v33  ;;  %v7363_v45 = vpop.f32.mrb[101].mxu0  ;;  %v16865_v33 = vld [vmem:[#allocation55_spill] sm:$0xff] }
0x1042   : > { %v7364_v44 = vpop.f32.mrb[102].mxu0  ;;  %v7749_v60 = vpack.c.bf16 %v15366_v63, %v15375_v5 }
0x1043   : > { %v7750_v9 = vpack.c.bf16 %v15372_v31, %v15369_v22  ;;  %v7385_v56 = vpack.c.bf16 %v7364_v44, %v7361_v18  ;;  %v7366_v35 = vpop.f32.mrb[103].mxu0  ;;  %v7590_v27 = vpop.f32.mrb[44].mxu1  ;;  %8175 = vmatpush1.bf16.msra.mxu1 %v9135_v62  ;;  %v16866_v44 = vld [vmem:[#allocation53_spill] sm:$0xff] }
0x1044   : > { %v7592_v16 = vpop.f32.mrb[45].mxu1  ;;  %v7673_v50 = vadd.f32 %v7590_v27, %v16856_v28  ;;  %8176 = vmatprep.subr.bf16.mxu1 %v16774_v61  ;;  %v16867_v35 = vld [vmem:[#allocation54_spill] sm:$0xff] }
0x1045   : > { %7658 = vmatprep.mubr.bf16.mxu1 %v7385_v56  ;;  %v7674_v36 = vadd.f32 %v7592_v16, %v16854_v0  ;;  %v7594_v4 = vpop.f32.mrb[46].mxu1  ;;  %8690 = vmatprep.mubr.msk.bf16.mxu0 %vm16855_vm6, %v7750_v9  ;;  %v16868_v16 = vld [vmem:[#allocation56_spill] sm:$0xff] }
0x1046   : > { %7659 = vmatmul.mubr.bf16.gmra.mrb[72].mxu1 %v7384_v52  ;;  %v7675_v34 = vadd.f32 %v7594_v4, %v16857_v53  ;;  %v7596_v19 = vpop.f32.mrb[47].mxu1  ;;  %7935 = vmatmul.mubr.bf16.vlgmr.msra.gmra.mrb[104].mxu0 %v7749_v60  ;;  %v15399_v43 = vadd.f32 %v15358_v37, %v7673_v50 }
0x1047   : > { %v7676_v41 = vadd.f32 %v7596_v19, %v16858_v54  ;;  %v15393_v21 = vadd.f32 %v15348_v2, %v7674_v36  ;;  %8177 = vmatpush1.bf16.msra.mxu1 %v9136_v46  ;;  %v16869_v19 = vld [vmem:[#allocation59_spill] sm:$0xff] }
0x1048   : > { %v15390_v40 = vadd.f32 %v15358_v37, %v7675_v34  ;;  %8178 = vmatprep.subr.bf16.mxu1 %v16774_v61  ;;  %v16875_v46 = vld [vmem:[#allocation63_spill] sm:$0xff] }
0x1049   : > { %v15396_v55 = vadd.f32 %v15348_v2, %v7676_v41 }
0x104a   : > { %v7751_v52 = vpack.c.bf16 %v15390_v40, %v15399_v43 }
0x104b   : > { %v7752_v26 = vpack.c.bf16 %v15396_v55, %v15393_v21  ;;  %v7600_v24 = vpop.f32.mrb[48].mxu1  ;;  %8179 = vmatpush1.bf16.msra.mxu1 %v9137_v57 }
0x104c   : > { %v7602_v32 = vpop.f32.mrb[49].mxu1  ;;  %v7677_v25 = vadd.f32 %v7600_v24, %v16861_v39  ;;  %8180 = vmatprep.subr.bf16.mxu1 %v16774_v61 }
0x104d   : > { %v7678_v23 = vadd.f32 %v7602_v32, %v16859_v48  ;;  %v7604_v3 = vpop.f32.mrb[50].mxu1  ;;  %8691 = vmatprep.mubr.msk.bf16.mxu0 %vm16860_vm12, %v7752_v26  ;;  %v16870_v26 = vld [vmem:[#allocation57_spill] sm:$0xff]  ;;  %v16872_v32 = vld [vmem:[#allocation58_spill] sm:$0xff] }
0x104e   : > { %v7679_v8 = vadd.f32 %v7604_v3, %v16862_v11  ;;  %v7606_v7 = vpop.f32.mrb[51].mxu1  ;;  %7945 = vmatmul.mubr.bf16.gmra.mrb[108].mxu0 %v7751_v52  ;;  %v15420_v6 = vadd.f32 %v15358_v37, %v7677_v25  ;;  %v16873_v3 = vld [vmem:[#allocation60_spill] sm:$0xff] }
0x104f   : > { %v7680_v38 = vadd.f32 %v7606_v7, %v16863_v58  ;;  %v15414_v42 = vadd.f32 %v15348_v2, %v7678_v23  ;;  %8181 = vmatpush1.bf16.msra.mxu1 %v9138_v10 }
0x1050   : > { %v15411_v20 = vadd.f32 %v15358_v37, %v7679_v8  ;;  %8182 = vmatprep.subr.bf16.mxu1 %v16774_v61 }
0x1051   : > { %v15417_v14 = vadd.f32 %v15348_v2, %v7680_v38 }
0x1052   : > { %v7753_v1 = vpack.c.bf16 %v15411_v20, %v15420_v6 }
0x1053   : > { %v7754_v47 = vpack.c.bf16 %v15417_v14, %v15414_v42  ;;  %8183 = vmatpush1.bf16.msra.mxu1 %v9139_v30  ;;  %v16877_v30 = vld [vmem:[#allocation64_spill] sm:$0xff] }
0x1054   : > { %8184 = vmatprep.subr.bf16.mxu1 %v16774_v61 }
0x1055   : > { %8692 = vmatprep.mubr.msk.bf16.mxu0 %vm16864_vm11, %v7754_v47 }
0x1056   : > { %7955 = vmatmul.mubr.bf16.gmra.mrb[112].mxu0 %v7753_v1  ;;  %v16874_v1 = vld [vmem:[#allocation61_spill] sm:$0xff] }
0x1057   : > { %8185 = vmatpush1.bf16.msra.mxu1 %v9140_v15 }
0x1058   : > { %8186 = vmatprep.subr.bf16.mxu1 %v16774_v61 }
0x105b   : > { %8187 = vmatpush1.bf16.msra.mxu1 %v9141_v12 }
0x105c   : > { %8188 = vmatprep.subr.bf16.mxu1 %v16774_v61 }
0x105f   : > { %8189 = vmatpush1.bf16.msra.mxu1 %v9142_v17  ;;  %v16878_v17 = vld [vmem:[#allocation62_spill] sm:$0xff] }
0x1060   : > { %8190 = vmatprep.subr.bf16.mxu1 %v16774_v61 }
0x1063   : > { %8191 = vmatpush1.bf16.msra.mxu1 %v9143_v59 }
0x10f1   : > { %v7610_v29 = vpop.f32.mrb[52].mxu1 }
0x10f2   : > { %v7681_v18 = vadd.f32 %v7610_v29, %v16865_v33  ;;  %v7612_v45 = vpop.f32.mrb[53].mxu1 }
0x10f3   : > { %v7682_v9 = vadd.f32 %v7612_v45, %v16866_v44  ;;  %v7614_v56 = vpop.f32.mrb[54].mxu1 }
0x10f4   : > { %v7683_v27 = vadd.f32 %v7614_v56, %v16867_v35  ;;  %v7616_v60 = vpop.f32.mrb[55].mxu1  ;;  %v7725_v36 = vadd.f32 %v15358_v37, %v7681_v18  ;;  %v16879_v35 = vld [vmem:[#allocation67_spill] sm:$0xff] }
0x10f5   : > { %v7684_v0 = vadd.f32 %v7616_v60, %v16868_v16  ;;  %v7726_v4 = vadd.f32 %v15348_v2, %v7682_v9  ;;  %v16880_v16 = vld [vmem:[#allocation66_spill] sm:$0xff] }
0x10f6   : > { %v7727_v61 = vadd.f32 %v15358_v37, %v7683_v27 }
0x10f7   : > { %v7728_v28 = vadd.f32 %v15348_v2, %v7684_v0 }
0x10f8   : > { %v7755_v50 = vpack.c.bf16 %v7727_v61, %v7725_v36  ;;  %v16882_v61 = vld [vmem:[#allocation68_spill] sm:$0xff] }
0x10f9   : > { %v7756_v53 = vpack.c.bf16 %v7728_v28, %v7726_v4  ;;  %v7620_v34 = vpop.f32.mrb[56].mxu1 }
0x10fa   : > { %v7685_v54 = vadd.f32 %v7620_v34, %v16869_v19  ;;  %v7622_v41 = vpop.f32.mrb[57].mxu1 }
0x10fb   : > { %v7686_v24 = vadd.f32 %v7622_v41, %v16870_v26  ;;  %v7624_v52 = vpop.f32.mrb[58].mxu1  ;;  %8693 = vmatprep.mubr.msk.bf16.mxu0 %vm16871_vm0, %v7756_v53 }
0x10fc   : > { %v7687_v48 = vadd.f32 %v7624_v52, %v16872_v32  ;;  %v7626_v23 = vpop.f32.mrb[59].mxu1  ;;  %7965 = vmatmul.mubr.bf16.gmra.mrb[116].mxu0 %v7755_v50  ;;  %v7729_v25 = vadd.f32 %v15358_v37, %v7685_v54  ;;  %v16883_v50 = vld [vmem:[#allocation65_spill] sm:$0xff]  ;;  %v16884_v32 = vld [vmem:[#allocation90_spill] sm:$0xff] }
0x10fd   : > { %v7688_v39 = vadd.f32 %v7626_v23, %v16873_v3  ;;  %v7730_v8 = vadd.f32 %v15348_v2, %v7686_v24  ;;  %v16885_v3 = vld [vmem:[#allocation86_spill] sm:$0xff] }
0x10fe   : > { %v7731_v11 = vadd.f32 %v15358_v37, %v7687_v48 }
0x10ff   : > { %v7732_v7 = vadd.f32 %v15348_v2, %v7688_v39 }
0x1100   : > { %v7757_v58 = vpack.c.bf16 %v7731_v11, %v7729_v25  ;;  %v16887_v11 = vld [vmem:[#allocation88_spill] sm:$0xff] }
0x1101   : > { %v7758_v38 = vpack.c.bf16 %v7732_v7, %v7730_v8  ;;  %v7630_v47 = vpop.f32.mrb[60].mxu1 }
0x1102   : > { %v7689_v49 = vadd.f32 %v7630_v47, %v16874_v1  ;;  %v7632_v62 = vpop.f32.mrb[61].mxu1 }
0x1103   : > { %v7690_v57 = vadd.f32 %v7632_v62, %v16875_v46  ;;  %v7634_v10 = vpop.f32.mrb[62].mxu1  ;;  %8694 = vmatprep.mubr.msk.bf16.mxu0 %vm16876_vm7, %v7758_v38 }
0x1104   : > { %v7691_v15 = vadd.f32 %v7634_v10, %v16877_v30  ;;  %v7636_v12 = vpop.f32.mrb[63].mxu1  ;;  %7971 = vmatmul.mubr.bf16.gmra.mrb[120].mxu0 %v7757_v58  ;;  %v7733_v29 = vadd.f32 %v15358_v37, %v7689_v49  ;;  %v16888_v58 = vld [vmem:[#allocation89_spill] sm:$0xff]  ;;  %v16889_v49 = vld [vmem:[#allocation50_spill] sm:$0xff] }
0x1105   : > { %v7692_v59 = vadd.f32 %v7636_v12, %v16878_v17  ;;  %v7734_v18 = vadd.f32 %v15348_v2, %v7690_v57  ;;  %v15510_v62 = vrot.slane %v15354_v51, %v16889_v49  ;;  %v15516_v10 = vrot.slane %v15344_v13, %v16889_v49  ;;  %v16893_v13 = vld [vmem:[#allocation94_spill] sm:$0xff] }
0x1106   : > { %v7735_v33 = vadd.f32 %v15358_v37, %v7691_v15 }
0x1107   : > { %v7736_v45 = vadd.f32 %v15348_v2, %v7692_v59  ;;  %v16890_v59 = vld [vmem:[#allocation98_spill] sm:$0xff] }
0x1108   : > { %v7759_v44 = vpack.c.bf16 %v7735_v33, %v7733_v29 }
0x1109   : > { %v7760_v9 = vpack.c.bf16 %v7736_v45, %v7734_v18  ;;  %v7640_v56 = vpop.f32.mrb[64].mxu1 }
0x110a   : > { %v7693_v27 = vadd.f32 %v7640_v56, %v16879_v35  ;;  %v7642_v60 = vpop.f32.mrb[65].mxu1 }
0x110b   : > { %v7694_v0 = vadd.f32 %v7642_v60, %v16880_v16  ;;  %v7644_v36 = vpop.f32.mrb[66].mxu1  ;;  %8695 = vmatprep.mubr.msk.bf16.mxu0 %vm16881_vm8, %v7760_v9 }
0x110c   : > { %v7695_v4 = vadd.f32 %v7644_v36, %v16882_v61  ;;  %v7646_v28 = vpop.f32.mrb[67].mxu1  ;;  %7977 = vmatmul.mubr.bf16.gmra.mrb[124].mxu0 %v7759_v44  ;;  %v7737_v34 = vadd.f32 %v15358_v37, %v7693_v27  ;;  %v16891_v44 = vld [vmem:[#allocation96_spill] sm:$0xff] }
0x110d   : > { %v7696_v53 = vadd.f32 %v7646_v28, %v16883_v50  ;;  %v7738_v54 = vadd.f32 %v15348_v2, %v7694_v0 }
0x110e   : > { %v7739_v19 = vadd.f32 %v15358_v37, %v7695_v4  ;;  %v16894_v4 = vld [vmem:[#allocation127_spill] sm:$0xff] }
0x110f   : > { %v7740_v41 = vadd.f32 %v15348_v2, %v7696_v53 }
0x1110   : > { %v7761_v26 = vpack.c.bf16 %v7739_v19, %v7737_v34 }
0x1111   : > { %v7762_v24 = vpack.c.bf16 %v7740_v41, %v7738_v54  ;;  %v7650_v52 = vpop.f32.mrb[68].mxu1 }
0x1112   : > { %v7697_v48 = vadd.f32 %v7650_v52, %v16884_v32  ;;  %v7652_v23 = vpop.f32.mrb[69].mxu1 }
0x1113   : > { %v7698_v39 = vadd.f32 %v7652_v23, %v16885_v3  ;;  %v7654_v25 = vpop.f32.mrb[70].mxu1  ;;  %8696 = vmatprep.mubr.msk.bf16.mxu0 %vm16886_vm9, %v7762_v24 }
0x1114   : > { %v7699_v8 = vadd.f32 %v7654_v25, %v16887_v11  ;;  %v7656_v7 = vpop.f32.mrb[71].mxu1  ;;  %7983 = vmatmul.mubr.bf16.gmra.mrb[128].mxu0 %v7761_v26  ;;  %v7741_v47 = vadd.f32 %v15358_v37, %v7697_v48 }
0x1115   : > { %v7700_v38 = vadd.f32 %v7656_v7, %v16888_v58  ;;  %v7742_v46 = vadd.f32 %v15348_v2, %v7698_v39 }
0x1116   : > { %v7743_v1 = vadd.f32 %v15358_v37, %v7699_v8 }
0x1117   : > { %v7744_v57 = vadd.f32 %v15348_v2, %v7700_v38 }
0x1118   : > { %v7763_v30 = vpack.c.bf16 %v7743_v1, %v7741_v47 }
0x1119   : > { %v7764_v15 = vpack.c.bf16 %v7744_v57, %v7742_v46  ;;  %v7660_v12 = vpop.f32.mrb[72].mxu1  ;;  %v7936_v17 = vpop.f32.mrb[104].mxu0 }
0x111a   : > { %v7701_v29 = vadd.f32 %v7660_v12, %v16890_v59  ;;  %v7662_v33 = vpop.f32.mrb[73].mxu1  ;;  %v7937_v18 = vadd.f32 %v7936_v17, %v15510_v62  ;;  %v7938_v45 = vpop.f32.mrb[105].mxu0 }
0x111b   : > { %v7702_v9 = vadd.f32 %v7662_v33, %v16891_v44  ;;  %v7664_v56 = vpop.f32.mrb[74].mxu1  ;;  %8697 = vmatprep.mubr.msk.bf16.mxu0 %vm16892_vm13, %v7764_v15  ;;  %v7939_v35 = vadd.f32 %v7938_v45, %v15516_v10  ;;  %v7940_v27 = vpop.f32.mrb[106].mxu0 }
0x111c   : > { %v7703_v60 = vadd.f32 %v7664_v56, %v16893_v13  ;;  %v8013_v16 = vmul.f32 0.70710677, %v7937_v18  ;;  %v7666_v0 = vpop.f32.mrb[75].mxu1  ;;  %7989 = vmatmul.mubr.bf16.gmra.mrb[132].mxu0 %v7763_v30  ;;  %v7942_v36 = vpop.f32.mrb[107].mxu0  ;;  %v7745_v61 = vadd.f32 %v15358_v37, %v7701_v29  ;;  %v7941_v34 = vadd.f32 %v7940_v27, %v15510_v62 }
0x111d   : > { %v7704_v28 = vadd.f32 %v7666_v0, %v16894_v4  ;;  %v8014_v50 = vmul.f32 0.70710677, %v7939_v35  ;;  %v7943_v19 = vadd.f32 %v7942_v36, %v15516_v10  ;;  %v7746_v54 = vadd.f32 %v15348_v2, %v7702_v9 }
0x111e   : > { %v7747_v53 = vadd.f32 %v15358_v37, %v7703_v60  ;;  %9828 = verf.f32 %v8013_v16  ;;  %v8015_v24 = vmul.f32 0.70710677, %v7941_v34  ;;  %v8001_v12 = vmul.f32 0.5, %v7937_v18 }
0x111f   : > { %v7748_v41 = vadd.f32 %v15348_v2, %v7704_v28  ;;  %9830 = verf.f32 %v8014_v50  ;;  %v8016_v32 = vmul.f32 0.70710677, %v7943_v19  ;;  %v8002_v33 = vmul.f32 0.5, %v7939_v35 }
0x1120   : > { %v7765_v26 = vpack.c.bf16 %v7747_v53, %v7745_v61  ;;  %9832 = verf.f32 %v8015_v24  ;;  %v8003_v13 = vmul.f32 0.5, %v7941_v34  ;;  %v8004_v36 = vmul.f32 0.5, %v7943_v19 }
0x1121   : > { %v7766_v52 = vpack.c.bf16 %v7748_v41, %v7746_v54  ;;  %v7946_v48 = vpop.f32.mrb[108].mxu0  ;;  %9834 = verf.f32 %v8016_v32 }
0x1122   : > { %v7947_v23 = vadd.f32 %v7946_v48, %v15510_v62  ;;  %v7948_v3 = vpop.f32.mrb[109].mxu0 }
0x1123   : > { %8698 = vmatprep.mubr.msk.bf16.mxu0 %vm16895_vm15, %v7766_v52  ;;  %v7949_v37 = vadd.f32 %v7948_v3, %v15516_v10  ;;  %v7950_v39 = vpop.f32.mrb[110].mxu0 }
0x1124   : > { %v8017_v25 = vmul.f32 0.70710677, %v7947_v23  ;;  %7995 = vmatmul.mubr.bf16.gmra.mrb[136].mxu0 %v7765_v26  ;;  %v7951_v2 = vadd.f32 %v7950_v39, %v15510_v62  ;;  %v7952_v11 = vpop.f32.mrb[111].mxu0  ;;  %v8005_v53 = vmul.f32 0.5, %v7947_v23 }
0x1125   : > { %v8018_v8 = vmul.f32 0.70710677, %v7949_v37  ;;  %v7953_v7 = vadd.f32 %v7952_v11, %v15516_v10 }
0x1126   : > { %9836 = verf.f32 %v8017_v25  ;;  %v8019_v58 = vmul.f32 0.70710677, %v7951_v2  ;;  %v8007_v54 = vmul.f32 0.5, %v7951_v2 }
0x1127   : > { %9838 = verf.f32 %v8018_v8  ;;  %v8020_v38 = vmul.f32 0.70710677, %v7953_v7 }
0x1128   : > { %v9829_v47 = vpop.eup %9828  ;;  %9840 = verf.f32 %v8019_v58 }
0x1129   : > { %v9831_v1 = vpop.eup %9830  ;;  %v8037_v49 = vadd.f32 1.0, %v9829_v47  ;;  %9842 = verf.f32 %v8020_v38  ;;  %v7956_v46 = vpop.f32.mrb[112].mxu0 }
0x112a   : > { %v8038_v57 = vadd.f32 1.0, %v9831_v1  ;;  %v7957_v30 = vadd.f32 %v7956_v46, %v15510_v62  ;;  %v7958_v15 = vpop.f32.mrb[113].mxu0  ;;  %v9833_v29 = vpop.eup %9832 }
0x112b   : > { %v15538_v17 = vadd.f32 %v7958_v15, %v15516_v10  ;;  %v7960_v59 = vpop.f32.mrb[114].mxu0  ;;  %v9835_v56 = vpop.eup %9834  ;;  %v8049_v27 = vmul.f32 %v8037_v49, %v8001_v12  ;;  %v8039_v60 = vadd.f32 1.0, %v9833_v29 }
0x112c   : > { %v8021_v45 = vmul.f32 0.70710677, %v7957_v30  ;;  %v7961_v44 = vadd.f32 %v7960_v59, %v15510_v62  ;;  %v7962_v9 = vpop.f32.mrb[115].mxu0  ;;  %v8050_v0 = vmul.f32 %v8038_v57, %v8002_v33  ;;  %v8040_v61 = vadd.f32 1.0, %v9835_v56 }
0x112d   : > { %v8022_v16 = vmul.f32 0.70710677, %v15538_v17  ;;  %v8051_v18 = vmul.f32 %v8039_v60, %v8003_v13  ;;  %v7963_v28 = vadd.f32 %v7962_v9, %v15516_v10  ;;  %v8006_v62 = vmul.f32 0.5, %v7949_v37 }
0x112e   : > { %9844 = verf.f32 %v8021_v45  ;;  %v8023_v4 = vmul.f32 0.70710677, %v7961_v44  ;;  %v8052_v50 = vmul.f32 %v8040_v61, %v8004_v36  ;;  %v8061_v34 = vadd.f32 %v8049_v27, %v15375_v5 }
0x112f   : > { %9846 = verf.f32 %v8022_v16  ;;  %v8063_v26 = vadd.f32 %v8051_v18, %v15366_v63  ;;  %v8062_v52 = vadd.f32 %v8050_v0, %v15369_v22  ;;  %v8024_v3 = vmul.f32 0.70710677, %v7963_v28 }
0x1130   : > { %v9837_v35 = vpop.eup %9836  ;;  %9848 = verf.f32 %v8023_v4  ;;  %v8064_v32 = vadd.f32 %v8052_v50, %v15372_v31  ;;  %v8008_v37 = vmul.f32 0.5, %v7953_v7  ;;  %v8009_v46 = vmul.f32 0.5, %v7957_v30 }
0x1131   : > { %v9839_v41 = vpop.eup %9838  ;;  %v8041_v24 = vadd.f32 1.0, %v9837_v35  ;;  %v8073_v39 = vpack.c.bf16 %v8063_v26, %v8061_v34  ;;  %9850 = verf.f32 %v8024_v3  ;;  %v8011_v29 = vmul.f32 0.5, %v7961_v44  ;;  %v16899_v3 = vld [vmem:[#allocation2_spill] sm:$0xff] }
0x1132   : > { %v9841_v19 = vpop.eup %9840  ;;  %v8042_v48 = vadd.f32 1.0, %v9839_v41  ;;  %v8074_v5 = vpack.c.bf16 %v8064_v32, %v8062_v52 }
0x1133   : > { %v9843_v10 = vpop.eup %9842  ;;  %v8053_v25 = vmul.f32 %v8041_v24, %v8005_v53  ;;  %v8043_v23 = vadd.f32 1.0, %v9841_v19 }
0x1134   : > { %v8054_v2 = vmul.f32 %v8042_v48, %v8006_v62  ;;  %v8044_v11 = vadd.f32 1.0, %v9843_v10  ;;  %8709 = vmatprep.mubr.msk.bf16.mxu1 %vm16896_vm14, %v8074_v5  ;;  %v8101_v10 = vsub.s32 7, %v16899_v3 }
0x1135   : > { %v8055_v8 = vmul.f32 %v8043_v23, %v8007_v54  ;;  %v8065_v58 = vadd.f32 %v8053_v25, %v15399_v43  ;;  %8205 = vmatmul.mubr.bf16.vlgmr.msra.gmra.mrb[76].mxu1 %v8073_v39 }
0x1136   : > { %v8056_v63 = vmul.f32 %v8044_v11, %v8008_v37  ;;  %v8066_v38 = vadd.f32 %v8054_v2, %v15393_v21  ;;  %v8012_v21 = vmul.f32 0.5, %v7963_v28  ;;  %v8102_v39 = vrot.slane %v15354_v51, %v8101_v10 }
0x1137   : > { %v8067_v22 = vadd.f32 %v8055_v8, %v15390_v40  ;;  %v8010_v40 = vmul.f32 0.5, %v15538_v17 }
0x1138   : > { %v9845_v31 = vpop.eup %9844  ;;  %v8068_v47 = vadd.f32 %v8056_v63, %v15396_v55 }
0x1139   : > { %v9847_v1 = vpop.eup %9846  ;;  %v8075_v7 = vpack.c.bf16 %v8067_v22, %v8065_v58  ;;  %v8045_v49 = vadd.f32 1.0, %v9845_v31 }
0x113a   : > { %v8076_v57 = vpack.c.bf16 %v8068_v47, %v8066_v38  ;;  %v9849_v15 = vpop.eup %9848  ;;  %v8046_v12 = vadd.f32 1.0, %v9847_v1 }
0x113b   : > { %v8057_v59 = vmul.f32 %v8045_v49, %v8009_v46  ;;  %v8047_v33 = vadd.f32 1.0, %v9849_v15  ;;  %v9851_v43 = vpop.eup %9850 }
0x113c   : > { %8710 = vmatprep.mubr.msk.bf16.mxu1 %vm16897_vm3, %v8076_v57  ;;  %v8058_v9 = vmul.f32 %v8046_v12, %v8010_v40  ;;  %v8048_v56 = vadd.f32 1.0, %v9851_v43 }
0x113d   : > { %v8059_v45 = vmul.f32 %v8047_v33, %v8011_v29  ;;  %8213 = vmatmul.mubr.bf16.gmra.mrb[80].mxu1 %v8075_v7  ;;  %v8069_v55 = vadd.f32 %v8057_v59, %v15420_v6 }
0x113e   : > { %v8060_v27 = vmul.f32 %v8048_v56, %v8012_v21  ;;  %v8070_v60 = vadd.f32 %v8058_v9, %v15414_v42 }
0x113f   : > { %v8071_v30 = vadd.f32 %v8059_v45, %v15411_v20 }
0x1140   : > { %v8072_v44 = vadd.f32 %v8060_v27, %v15417_v14 }
0x1141   : > { %v8077_v13 = vpack.c.bf16 %v8071_v30, %v8069_v55 }
0x1142   : > { %v8078_v16 = vpack.c.bf16 %v8072_v44, %v8070_v60 }
0x1144   : > { %8711 = vmatprep.mubr.msk.bf16.mxu1 %vm16898_vm10, %v8078_v16 }
0x1145   : > { %8221 = vmatmul.mubr.bf16.gmra.mrb[84].mxu1 %v8077_v13 }
0x11cf   : > { %v7966_v17 = vpop.f32.mrb[116].mxu0 }
0x11d0   : > { %v7967_v0 = vpop.f32.mrb[117].mxu0 }
0x11d1   : > { %v7968_v36 = vpop.f32.mrb[118].mxu0 }
0x11d2   : > { %v7969_v61 = vpop.f32.mrb[119].mxu0 }
0x11d7   : > { %v7972_v18 = vpop.f32.mrb[120].mxu0 }
0x11d8   : > { %v7973_v4 = vpop.f32.mrb[121].mxu0 }
0x11d9   : > { %v7974_v28 = vpop.f32.mrb[122].mxu0 }
0x11da   : > { %v7975_v6 = vpop.f32.mrb[123].mxu0 }
0x11df   : > { %v7978_v35 = vpop.f32.mrb[124].mxu0 }
0x11e0   : > { %v7979_v20 = vpop.f32.mrb[125].mxu0 }
0x11e1   : > { %v7980_v50 = vpop.f32.mrb[126].mxu0 }
0x11e2   : > { %v7981_v53 = vpop.f32.mrb[127].mxu0 }
0x11e7   : > { %v7984_v62 = vpop.f32.mrb[128].mxu0 }
0x11e8   : > { %v7985_v42 = vpop.f32.mrb[129].mxu0 }
0x11e9   : > { %v7986_v54 = vpop.f32.mrb[130].mxu0 }
0x11ea   : > { %v7987_v14 = vpop.f32.mrb[131].mxu0 }
0x11ef   : > { %v7990_v41 = vpop.f32.mrb[132].mxu0 }
0x11f0   : > { %v7991_v34 = vpop.f32.mrb[133].mxu0 }
0x11f1   : > { %v7992_v26 = vpop.f32.mrb[134].mxu0 }
0x11f2   : > { %v7993_v24 = vpop.f32.mrb[135].mxu0 }
0x11f7   : > { %v7996_v19 = vpop.f32.mrb[136].mxu0 }
0x11f8   : > { %v7997_v52 = vpop.f32.mrb[137].mxu0 }
0x11f9   : > { %v7998_v32 = vpop.f32.mrb[138].mxu0 }
0x11fa   : > { %v7999_v48 = vpop.f32.mrb[139].mxu0 }
0x1208   : > { %v8206_v25 = vpop.f32.mrb[76].mxu1 }
0x1209   : > { %v8207_v23 = vadd.f32 %v8206_v25, %v8102_v39  ;;  %v8208_v37 = vpop.f32.mrb[77].mxu1 }
0x120a   : > { %v8209_v2 = vpop.f32.mrb[78].mxu1 }
0x120b   : > { %8229 = vst [vmem:[%s14008_s16] sm:$0xff] %v8207_v23  ;;  %v8210_v11 = vadd.f32 %v8209_v2, %v8102_v39  ;;  %v8211_v5 = vpop.f32.mrb[79].mxu1 }
0x120d   : > { %8230 = vst [vmem:[%s14008_s16 + $0x8] sm:$0xff] %v8210_v11 }
0x1210   : > { %v8214_v8 = vpop.f32.mrb[80].mxu1 }
0x1211   : > { %v8215_v63 = vadd.f32 %v8214_v8, %v8102_v39  ;;  %v8216_v58 = vpop.f32.mrb[81].mxu1 }
0x1212   : > { %v8217_v22 = vpop.f32.mrb[82].mxu1 }
0x1213   : > { %8231 = vst [vmem:[%s14008_s16 + $0x10] sm:$0xff] %v8215_v63  ;;  %v8218_v31 = vadd.f32 %v8217_v22, %v8102_v39  ;;  %v8219_v38 = vpop.f32.mrb[83].mxu1 }
0x1215   : > { %8232 = vst [vmem:[%s14008_s16 + $0x18] sm:$0xff] %v8218_v31 }
0x1218   : > { %v8222_v51 = vpop.f32.mrb[84].mxu1 }
0x1219   : > { %v8223_v47 = vadd.f32 %v8222_v51, %v8102_v39  ;;  %v8224_v1 = vpop.f32.mrb[85].mxu1 }
0x121a   : > { %v8225_v7 = vpop.f32.mrb[86].mxu1 }
0x121b   : > { %8233 = vst [vmem:[%s14008_s16 + $0x20] sm:$0xff] %v8223_v47  ;;  %v8226_v49 = vadd.f32 %v8225_v7, %v8102_v39  ;;  %v8227_v46 = vpop.f32.mrb[87].mxu1 }
0x121d   : > { %8234 = vst [vmem:[%s14008_s16 + $0x28] sm:$0xff] %v8226_v49 }
0x121e PF: > { %s24_s29 = sadd.s32 1, %s9864_s29  }
0x121f   : > { %p21_p5 = scmp.ge.s32.totalorder %s24_s29, 10  }
0x1221   :  { %23 = sbr.rel (!%p21_p5) target bundleno = 1 (0x1), region = 106 }

</bundles_post_ra>
